<compile_context>
chip_gen: v6e
topology: v6e:2x2x1
jax: 0.10.0
libtpu: 0.0.40
codegen_flags: <defaults>
</compile_context>

<pallas_src>
import functools
import numpy as np

import jax
import jax.numpy as jnp
from jax.experimental import pallas as pl
from jax.experimental.pallas import tpu as pltpu


_CPARAMS = pltpu.CompilerParams(
    dimension_semantics=("parallel",),          # batch grid axis -> both TCs on v7x
    vmem_limit_bytes=32 * 1024 * 1024,          # explicit, safe on v5e/v6e/v7x
)


# ------------------------------ fused kernel --------------------------------

def _net_kernel(x_ref, t1_ref, b1_ref, se1_ref, so1_ref, ce1_ref, co1_ref,
                t2_ref, b2_ref, se2_ref, so2_ref, ce2_ref, co2_ref,
                w1_ref, fb1_ref, w2_ref, fb2_ref, w3_ref, fb3_ref,
                o_ref, *, bb):
    """Whole Net forward for one batch block of `bb` images.

    x_ref : (32*bb, 96)   conv1 input, rows = h*bb + b, lanes = (width, chan)
    t1/t2 : (5, WC, OW*C) Toeplitz conv weights per kernel-row offset
    se/so : (PH*bb, OH*bb) 0/1 batched row-pool selectors
    ce/co : (OW*C, PW*C)   0/1 lane-pool selectors
    w1    : (5, 80, 128)   fc1 with NCHW-flatten folded in, per conv2 height
    o_ref : (bb, 128)      padded logits (lane-dense)
    """
    f32 = jnp.float32
    cdt = x_ref.dtype                              # matmul operand dtype (bf16)

    # ---- conv1 (32x32x3 -> 28x28x6): 5 row-shifted matmuls, M = 28*bb ----
    acc = jnp.dot(x_ref[0:28 * bb, :], t1_ref[0], preferred_element_type=f32)
    for di in range(1, 5):
        acc = acc + jnp.dot(x_ref[di * bb:(di + 28) * bb, :], t1_ref[di],
                            preferred_element_type=f32)
    h = jnp.maximum(acc + b1_ref[...], 0.0).astype(cdt)             # (28*bb, 168)
    # 2x2 max-pool: rows via batched selectors, cols via lane selectors
    r = jnp.maximum(jnp.dot(se1_ref[...], h, preferred_element_type=f32),
                    jnp.dot(so1_ref[...], h, preferred_element_type=f32)).astype(cdt)
    p = jnp.maximum(jnp.dot(r, ce1_ref[...], preferred_element_type=f32),
                    jnp.dot(r, co1_ref[...], preferred_element_type=f32)).astype(cdt)
    # p: (14*bb, 84)  — already height-major, ready for conv2

    # ---- conv2 (14x14x6 -> 10x10x16): M = 10*bb ----
    acc = jnp.dot(p[0:10 * bb, :], t2_ref[0], preferred_element_type=f32)
    for di in range(1, 5):
        acc = acc + jnp.dot(p[di * bb:(di + 10) * bb, :], t2_ref[di],
                            preferred_element_type=f32)
    h = jnp.maximum(acc + b2_ref[...], 0.0).astype(cdt)             # (10*bb, 160)
    r = jnp.maximum(jnp.dot(se2_ref[...], h, preferred_element_type=f32),
                    jnp.dot(so2_ref[...], h, preferred_element_type=f32)).astype(cdt)
    p = jnp.maximum(jnp.dot(r, ce2_ref[...], preferred_element_type=f32),
                    jnp.dot(r, co2_ref[...], preferred_element_type=f32)).astype(cdt)
    # p: (5*bb, 80)

    # ---- fc1 (flatten folded into per-height weight slabs) -> relu ----
    f = jnp.dot(p[0:bb, :], w1_ref[0], preferred_element_type=f32)
    for i in range(1, 5):
        f = f + jnp.dot(p[i * bb:(i + 1) * bb, :], w1_ref[i],
                        preferred_element_type=f32)
    f = jnp.maximum(f + fb1_ref[...], 0.0).astype(cdt)              # (bb, 128)
    # ---- fc2 -> relu -> fc3 ----
    f = jnp.maximum(jnp.dot(f, w2_ref[...], preferred_element_type=f32)
                    + fb2_ref[...], 0.0).astype(cdt)
    f = jnp.dot(f, w3_ref[...], preferred_element_type=f32) + fb3_ref[...]
    o_ref[...] = f.astype(o_ref.dtype)


# ----------------------- parameters & preprocessing -------------------------

def init_params(key):
    """PyTorch-layout params, uniform(+-1/sqrt(fan_in)) like nn default init."""
    def uni(k, shape, fan_in):
        bound = 1.0 / np.sqrt(fan_in)
        return jax.random.uniform(k, shape, jnp.float32, -bound, bound)

    ks = jax.random.split(key, 10)
    return {
        "conv1_w": uni(ks[0], (6, 3, 5, 5), 3 * 25),
        "conv1_b": uni(ks[1], (6,), 3 * 25),
        "conv2_w": uni(ks[2], (16, 6, 5, 5), 6 * 25),
        "conv2_b": uni(ks[3], (16,), 6 * 25),
        "fc1_w": uni(ks[4], (120, 400), 400),   # (out, in) like torch
        "fc1_b": uni(ks[5], (120,), 400),
        "fc2_w": uni(ks[6], (84, 120), 120),
        "fc2_b": uni(ks[7], (84,), 120),
        "fc3_w": uni(ks[8], (10, 84), 84),
        "fc3_b": uni(ks[9], (10,), 84),
    }


def _build_toeplitz(w, in_w):
    """PyTorch conv weight (Cout,Cin,KH,KW) -> (KH, W*Cin, OW*Cout) banded mats."""
    cout, cin, kh, kw = w.shape
    ow = in_w - kw + 1
    t = np.zeros((kh, in_w * cin, ow * cout), np.float32)
    for di in range(kh):
        for dj in range(kw):
            blk = w[:, :, di, dj].T                     # (Cin, Cout)
            for j in range(ow):
                t[di, (j + dj) * cin:(j + dj) * cin + cin,
                  j * cout:j * cout + cout] = blk
    return t


def _row_pool_select(oh, bb):
    """Batched 0/1 row selectors for rows ordered (height, batch)."""
    ph = oh // 2
    se = np.zeros((ph * bb, oh * bb), np.float32)
    so = np.zeros((ph * bb, oh * bb), np.float32)
    for p in range(ph):
        for b in range(bb):
            se[p * bb + b, (2 * p) * bb + b] = 1.0
            so[p * bb + b, (2 * p + 1) * bb + b] = 1.0
    return se, so


def _col_pool_select(ow, cout):
    pw = ow // 2
    ce = np.zeros((ow * cout, pw * cout), np.float32)
    co = np.zeros((ow * cout, pw * cout), np.float32)
    for pj in range(pw):
        for o in range(cout):
            ce[(2 * pj) * cout + o, pj * cout + o] = 1.0
            co[(2 * pj + 1) * cout + o, pj * cout + o] = 1.0
    return ce, co


def prepare_params(params, *, block_b=16, dtype=jnp.bfloat16):
    """One-time host-side repack for the fused kernel.

    block_b must be a multiple of 16 so every in-kernel row slice stays
    aligned to the bf16 (16,128) tiling.
    """
    assert block_b >= 16 and block_b % 16 == 0
    bb = block_b
    f32 = np.float32
    kp = {}
    # conv1: 32x32x3 -> 28x28x6 -> pool -> 14x14x6
    kp["t1"] = jnp.asarray(_build_toeplitz(np.asarray(params["conv1_w"], f32), 32), dtype)
    kp["b1"] = jnp.asarray(np.tile(np.asarray(params["conv1_b"], f32), 28)[None, :])
    se, so = _row_pool_select(28, bb)
    kp["se1"], kp["so1"] = jnp.asarray(se, dtype), jnp.asarray(so, dtype)
    ce, co = _col_pool_select(28, 6)
    kp["ce1"], kp["co1"] = jnp.asarray(ce, dtype), jnp.asarray(co, dtype)
    # conv2: 14x14x6 -> 10x10x16 -> pool -> 5x5x16
    kp["t2"] = jnp.asarray(_build_toeplitz(np.asarray(params["conv2_w"], f32), 14), dtype)
    kp["b2"] = jnp.asarray(np.tile(np.asarray(params["conv2_b"], f32), 10)[None, :])
    se, so = _row_pool_select(10, bb)
    kp["se2"], kp["so2"] = jnp.asarray(se, dtype), jnp.asarray(so, dtype)
    ce, co = _col_pool_select(10, 16)
    kp["ce2"], kp["co2"] = jnp.asarray(ce, dtype), jnp.asarray(co, dtype)
    # fc1: fold torch's NCHW flatten (c*25 + i*5 + j) into 5 per-height slabs
    # indexed by our lane order (j*16 + c); pad output lanes 120 -> 128.
    w1fc = np.asarray(params["fc1_w"], f32)                      # (120, 400)
    w1k = np.zeros((5, 80, 128), f32)
    for i in range(5):
        for j in range(5):
            for c in range(16):
                w1k[i, j * 16 + c, :120] = w1fc[:, c * 25 + i * 5 + j]
    kp["w1"] = jnp.asarray(w1k, dtype)
    kp["fb1"] = jnp.asarray(np.pad(np.asarray(params["fc1_b"], f32), (0, 8))[None, :])
    w2fc = np.zeros((128, 128), f32)
    w2fc[:120, :84] = np.asarray(params["fc2_w"], f32).T
    kp["w2"] = jnp.asarray(w2fc, dtype)
    kp["fb2"] = jnp.asarray(np.pad(np.asarray(params["fc2_b"], f32), (0, 44))[None, :])
    w3fc = np.zeros((128, 128), f32)
    w3fc[:84, :10] = np.asarray(params["fc3_w"], f32).T
    kp["w3"] = jnp.asarray(w3fc, dtype)
    kp["fb3"] = jnp.asarray(np.pad(np.asarray(params["fc3_b"], f32), (0, 118))[None, :])
    return kp


# -------------------------------- forward -----------------------------------

def net_forward(kp, x):
    """x: (B, 3, 32, 32) float32 NCHW -> logits (B, 10) float32."""
    B = x.shape[0]
    bb = kp["se1"].shape[0] // 14          # batch block (static, from selectors)
    cdt = kp["t1"].dtype                   # matmul operand dtype (bf16)

    # NCHW -> NHWC once, fold (W, C) onto lanes: (B, 32, 96).
    xh = jnp.transpose(x, (0, 2, 3, 1)).reshape(B, 32, 32 * 3).astype(cdt)
    # Pad the batch to an even number (>=2) of bb-image grid steps so v7x's
    # two TensorCores both get work; padded images are zeros and discarded.
    g = max(2, -(-B // bb))
    g += g % 2
    bpad = g * bb
    if bpad != B:
        xh = jnp.pad(xh, ((0, bpad - B), (0, 0), (0, 0)))
    # Height-major per block: row index = h*bb + b_local  ->  (g*32*bb, 96).
    xh = xh.reshape(g, bb, 32, 96).transpose(0, 2, 1, 3).reshape(g * 32 * bb, 96)

    def cspec(a):  # VMEM-resident constants: same block every grid step
        if a.ndim == 3:
            return pl.BlockSpec(a.shape, lambda i: (0, 0, 0))
        return pl.BlockSpec(a.shape, lambda i: (0, 0))

    order = ["t1", "b1", "se1", "so1", "ce1", "co1",
             "t2", "b2", "se2", "so2", "ce2", "co2",
             "w1", "fb1", "w2", "fb2", "w3", "fb3"]
    logits = pl.pallas_call(
        functools.partial(_net_kernel, bb=bb),
        out_shape=jax.ShapeDtypeStruct((bpad, 128), jnp.float32),
        grid=(g,),
        in_specs=[pl.BlockSpec((32 * bb, 96), lambda i: (i, 0))]
                 + [cspec(kp[k]) for k in order],
        out_specs=pl.BlockSpec((bb, 128), lambda i: (i, 0)),
        compiler_params=_CPARAMS,
    )(xh, *[kp[k] for k in order])
    return logits[:B, :10]                 # drop batch padding + lane padding


if __name__ == "__main__":
    key = jax.random.PRNGKey(0)
    pkey, xkey = jax.random.split(key)
    params = init_params(pkey)
    kparams = prepare_params(params, block_b=16)
    # The fixed 16*5*5 flatten implies 32x32 spatial input (CIFAR-10 style).
    x = jax.random.normal(xkey, (2, 3, 32, 32), dtype=jnp.float32)
    logits = jax.jit(net_forward)(kparams, x)
    jax.block_until_ready(logits)
    assert logits.shape == (2, 10) and logits.dtype == jnp.float32
    print("KERNEL_OK")
</pallas_src>

<mosaic_0001>
module attributes {stable_mosaic.version = 11 : i64} {
  func.func @_net_kernel(%arg0: i32, %arg1: memref<512x96xbf16, #tpu.memory_space<vmem>>, %arg2: memref<5x96x168xbf16, #tpu.memory_space<vmem>>, %arg3: memref<1x168xf32, #tpu.memory_space<vmem>>, %arg4: memref<224x448xbf16, #tpu.memory_space<vmem>>, %arg5: memref<224x448xbf16, #tpu.memory_space<vmem>>, %arg6: memref<168x84xbf16, #tpu.memory_space<vmem>>, %arg7: memref<168x84xbf16, #tpu.memory_space<vmem>>, %arg8: memref<5x84x160xbf16, #tpu.memory_space<vmem>>, %arg9: memref<1x160xf32, #tpu.memory_space<vmem>>, %arg10: memref<80x160xbf16, #tpu.memory_space<vmem>>, %arg11: memref<80x160xbf16, #tpu.memory_space<vmem>>, %arg12: memref<160x80xbf16, #tpu.memory_space<vmem>>, %arg13: memref<160x80xbf16, #tpu.memory_space<vmem>>, %arg14: memref<5x80x128xbf16, #tpu.memory_space<vmem>>, %arg15: memref<1x128xf32, #tpu.memory_space<vmem>>, %arg16: memref<128x128xbf16, #tpu.memory_space<vmem>>, %arg17: memref<1x128xf32, #tpu.memory_space<vmem>>, %arg18: memref<128x128xbf16, #tpu.memory_space<vmem>>, %arg19: memref<1x128xf32, #tpu.memory_space<vmem>>, %arg20: memref<16x128xf32, #tpu.memory_space<vmem>>) attributes {dimension_semantics = [#tpu.dimension_semantics<parallel>], iteration_bounds = array<i64: 2>, scalar_prefetch = 0 : i64, scratch_operands = 0 : i64, tpu.core_type = #tpu.core_type<tc>, window_params = [{transform_indices = @transform_0, window_bounds = array<i64: 512, 96>}, {pipeline_mode = #tpu.pipeline_mode<synchronous>, transform_indices = @transform_1, window_bounds = array<i64: 5, 96, 168>}, {pipeline_mode = #tpu.pipeline_mode<synchronous>, transform_indices = @transform_2, window_bounds = array<i64: 1, 168>}, {pipeline_mode = #tpu.pipeline_mode<synchronous>, transform_indices = @transform_3, window_bounds = array<i64: 224, 448>}, {pipeline_mode = #tpu.pipeline_mode<synchronous>, transform_indices = @transform_4, window_bounds = array<i64: 224, 448>}, {pipeline_mode = #tpu.pipeline_mode<synchronous>, transform_indices = @transform_5, window_bounds = array<i64: 168, 84>}, {pipeline_mode = #tpu.pipeline_mode<synchronous>, transform_indices = @transform_6, window_bounds = array<i64: 168, 84>}, {pipeline_mode = #tpu.pipeline_mode<synchronous>, transform_indices = @transform_7, window_bounds = array<i64: 5, 84, 160>}, {pipeline_mode = #tpu.pipeline_mode<synchronous>, transform_indices = @transform_8, window_bounds = array<i64: 1, 160>}, {pipeline_mode = #tpu.pipeline_mode<synchronous>, transform_indices = @transform_9, window_bounds = array<i64: 80, 160>}, {pipeline_mode = #tpu.pipeline_mode<synchronous>, transform_indices = @transform_10, window_bounds = array<i64: 80, 160>}, {pipeline_mode = #tpu.pipeline_mode<synchronous>, transform_indices = @transform_11, window_bounds = array<i64: 160, 80>}, {pipeline_mode = #tpu.pipeline_mode<synchronous>, transform_indices = @transform_12, window_bounds = array<i64: 160, 80>}, {pipeline_mode = #tpu.pipeline_mode<synchronous>, transform_indices = @transform_13, window_bounds = array<i64: 5, 80, 128>}, {pipeline_mode = #tpu.pipeline_mode<synchronous>, transform_indices = @transform_14, window_bounds = array<i64: 1, 128>}, {pipeline_mode = #tpu.pipeline_mode<synchronous>, transform_indices = @transform_15, window_bounds = array<i64: 128, 128>}, {pipeline_mode = #tpu.pipeline_mode<synchronous>, transform_indices = @transform_16, window_bounds = array<i64: 1, 128>}, {pipeline_mode = #tpu.pipeline_mode<synchronous>, transform_indices = @transform_17, window_bounds = array<i64: 128, 128>}, {pipeline_mode = #tpu.pipeline_mode<synchronous>, transform_indices = @transform_18, window_bounds = array<i64: 1, 128>}, {transform_indices = @transform_19, window_bounds = array<i64: 16, 128>}]} {
    %c0 = arith.constant 0 : index
    %c0_0 = arith.constant 0 : index
    %0 = vector.load %arg1[%c0, %c0_0] : memref<512x96xbf16, #tpu.memory_space<vmem>>, vector<448x96xbf16>
    %c0_1 = arith.constant 0 : index
    %c0_2 = arith.constant 0 : index
    %c0_3 = arith.constant 0 : index
    %1 = vector.load %arg2[%c0_1, %c0_2, %c0_3] : memref<5x96x168xbf16, #tpu.memory_space<vmem>>, vector<1x96x168xbf16>
    %2 = vector.shape_cast %1 : vector<1x96x168xbf16> to vector<96x168xbf16>
    %cst = arith.constant dense<0.000000e+00> : vector<448x168xf32>
    %3 = tpu.matmul %0, %2, %cst {dimension_numbers = #tpu.dot_dimension_numbers<[1], [0], [0], [1], [0, 0, 1, 1], [], []>} : vector<448x96xbf16>, vector<96x168xbf16>, vector<448x168xf32> -> vector<448x168xf32>
    %c16 = arith.constant 16 : index
    %c0_4 = arith.constant 0 : index
    %4 = vector.load %arg1[%c16, %c0_4] : memref<512x96xbf16, #tpu.memory_space<vmem>>, vector<448x96xbf16>
    %c1 = arith.constant 1 : index
    %c0_5 = arith.constant 0 : index
    %c0_6 = arith.constant 0 : index
    %5 = vector.load %arg2[%c1, %c0_5, %c0_6] : memref<5x96x168xbf16, #tpu.memory_space<vmem>>, vector<1x96x168xbf16>
    %6 = vector.shape_cast %5 : vector<1x96x168xbf16> to vector<96x168xbf16>
    %cst_7 = arith.constant dense<0.000000e+00> : vector<448x168xf32>
    %7 = tpu.matmul %4, %6, %cst_7 {dimension_numbers = #tpu.dot_dimension_numbers<[1], [0], [0], [1], [0, 0, 1, 1], [], []>} : vector<448x96xbf16>, vector<96x168xbf16>, vector<448x168xf32> -> vector<448x168xf32>
    %8 = arith.addf %3, %7 : vector<448x168xf32>
    %c32 = arith.constant 32 : index
    %c0_8 = arith.constant 0 : index
    %9 = vector.load %arg1[%c32, %c0_8] : memref<512x96xbf16, #tpu.memory_space<vmem>>, vector<448x96xbf16>
    %c2 = arith.constant 2 : index
    %c0_9 = arith.constant 0 : index
    %c0_10 = arith.constant 0 : index
    %10 = vector.load %arg2[%c2, %c0_9, %c0_10] : memref<5x96x168xbf16, #tpu.memory_space<vmem>>, vector<1x96x168xbf16>
    %11 = vector.shape_cast %10 : vector<1x96x168xbf16> to vector<96x168xbf16>
    %cst_11 = arith.constant dense<0.000000e+00> : vector<448x168xf32>
    %12 = tpu.matmul %9, %11, %cst_11 {dimension_numbers = #tpu.dot_dimension_numbers<[1], [0], [0], [1], [0, 0, 1, 1], [], []>} : vector<448x96xbf16>, vector<96x168xbf16>, vector<448x168xf32> -> vector<448x168xf32>
    %13 = arith.addf %8, %12 : vector<448x168xf32>
    %c48 = arith.constant 48 : index
    %c0_12 = arith.constant 0 : index
    %14 = vector.load %arg1[%c48, %c0_12] : memref<512x96xbf16, #tpu.memory_space<vmem>>, vector<448x96xbf16>
    %c3 = arith.constant 3 : index
    %c0_13 = arith.constant 0 : index
    %c0_14 = arith.constant 0 : index
    %15 = vector.load %arg2[%c3, %c0_13, %c0_14] : memref<5x96x168xbf16, #tpu.memory_space<vmem>>, vector<1x96x168xbf16>
    %16 = vector.shape_cast %15 : vector<1x96x168xbf16> to vector<96x168xbf16>
    %cst_15 = arith.constant dense<0.000000e+00> : vector<448x168xf32>
    %17 = tpu.matmul %14, %16, %cst_15 {dimension_numbers = #tpu.dot_dimension_numbers<[1], [0], [0], [1], [0, 0, 1, 1], [], []>} : vector<448x96xbf16>, vector<96x168xbf16>, vector<448x168xf32> -> vector<448x168xf32>
    %18 = arith.addf %13, %17 : vector<448x168xf32>
    %c64 = arith.constant 64 : index
    %c0_16 = arith.constant 0 : index
    %19 = vector.load %arg1[%c64, %c0_16] : memref<512x96xbf16, #tpu.memory_space<vmem>>, vector<448x96xbf16>
    %c4 = arith.constant 4 : index
    %c0_17 = arith.constant 0 : index
    %c0_18 = arith.constant 0 : index
    %20 = vector.load %arg2[%c4, %c0_17, %c0_18] : memref<5x96x168xbf16, #tpu.memory_space<vmem>>, vector<1x96x168xbf16>
    %21 = vector.shape_cast %20 : vector<1x96x168xbf16> to vector<96x168xbf16>
    %cst_19 = arith.constant dense<0.000000e+00> : vector<448x168xf32>
    %22 = tpu.matmul %19, %21, %cst_19 {dimension_numbers = #tpu.dot_dimension_numbers<[1], [0], [0], [1], [0, 0, 1, 1], [], []>} : vector<448x96xbf16>, vector<96x168xbf16>, vector<448x168xf32> -> vector<448x168xf32>
    %23 = arith.addf %18, %22 : vector<448x168xf32>
    %c0_20 = arith.constant 0 : index
    %c0_21 = arith.constant 0 : index
    %24 = vector.load %arg3[%c0_20, %c0_21] : memref<1x168xf32, #tpu.memory_space<vmem>>, vector<1x168xf32>
    %25 = vector.broadcast %24 : vector<1x168xf32> to vector<448x168xf32>
    %26 = arith.addf %23, %25 : vector<448x168xf32>
    %cst_22 = arith.constant 0.000000e+00 : f32
    %27 = vector.broadcast %cst_22 : f32 to vector<448x168xf32>
    %28 = arith.maximumf %26, %27 : vector<448x168xf32>
    %29 = arith.truncf %28 : vector<448x168xf32> to vector<448x168xbf16>
    %c0_23 = arith.constant 0 : index
    %c0_24 = arith.constant 0 : index
    %30 = vector.load %arg4[%c0_23, %c0_24] : memref<224x448xbf16, #tpu.memory_space<vmem>>, vector<224x448xbf16>
    %cst_25 = arith.constant dense<0.000000e+00> : vector<224x168xf32>
    %31 = tpu.matmul %30, %29, %cst_25 {dimension_numbers = #tpu.dot_dimension_numbers<[1], [0], [0], [1], [0, 0, 1, 1], [], []>} : vector<224x448xbf16>, vector<448x168xbf16>, vector<224x168xf32> -> vector<224x168xf32>
    %c0_26 = arith.constant 0 : index
    %c0_27 = arith.constant 0 : index
    %32 = vector.load %arg5[%c0_26, %c0_27] : memref<224x448xbf16, #tpu.memory_space<vmem>>, vector<224x448xbf16>
    %cst_28 = arith.constant dense<0.000000e+00> : vector<224x168xf32>
    %33 = tpu.matmul %32, %29, %cst_28 {dimension_numbers = #tpu.dot_dimension_numbers<[1], [0], [0], [1], [0, 0, 1, 1], [], []>} : vector<224x448xbf16>, vector<448x168xbf16>, vector<224x168xf32> -> vector<224x168xf32>
    %34 = arith.maximumf %31, %33 : vector<224x168xf32>
    %35 = arith.truncf %34 : vector<224x168xf32> to vector<224x168xbf16>
    %c0_29 = arith.constant 0 : index
    %c0_30 = arith.constant 0 : index
    %36 = vector.load %arg6[%c0_29, %c0_30] : memref<168x84xbf16, #tpu.memory_space<vmem>>, vector<168x84xbf16>
    %cst_31 = arith.constant dense<0.000000e+00> : vector<224x84xf32>
    %37 = tpu.matmul %35, %36, %cst_31 {dimension_numbers = #tpu.dot_dimension_numbers<[1], [0], [0], [1], [0, 0, 1, 1], [], []>} : vector<224x168xbf16>, vector<168x84xbf16>, vector<224x84xf32> -> vector<224x84xf32>
    %c0_32 = arith.constant 0 : index
    %c0_33 = arith.constant 0 : index
    %38 = vector.load %arg7[%c0_32, %c0_33] : memref<168x84xbf16, #tpu.memory_space<vmem>>, vector<168x84xbf16>
    %cst_34 = arith.constant dense<0.000000e+00> : vector<224x84xf32>
    %39 = tpu.matmul %35, %38, %cst_34 {dimension_numbers = #tpu.dot_dimension_numbers<[1], [0], [0], [1], [0, 0, 1, 1], [], []>} : vector<224x168xbf16>, vector<168x84xbf16>, vector<224x84xf32> -> vector<224x84xf32>
    %40 = arith.maximumf %37, %39 : vector<224x84xf32>
    %41 = arith.truncf %40 : vector<224x84xf32> to vector<224x84xbf16>
    %42 = vector.extract_strided_slice %41 {offsets = [0, 0], sizes = [160, 84], strides = [1, 1]} : vector<224x84xbf16> to vector<160x84xbf16>
    %c0_35 = arith.constant 0 : index
    %c0_36 = arith.constant 0 : index
    %c0_37 = arith.constant 0 : index
    %43 = vector.load %arg8[%c0_35, %c0_36, %c0_37] : memref<5x84x160xbf16, #tpu.memory_space<vmem>>, vector<1x84x160xbf16>
    %44 = vector.shape_cast %43 : vector<1x84x160xbf16> to vector<84x160xbf16>
    %cst_38 = arith.constant dense<0.000000e+00> : vector<160x160xf32>
    %45 = tpu.matmul %42, %44, %cst_38 {dimension_numbers = #tpu.dot_dimension_numbers<[1], [0], [0], [1], [0, 0, 1, 1], [], []>} : vector<160x84xbf16>, vector<84x160xbf16>, vector<160x160xf32> -> vector<160x160xf32>
    %46 = vector.extract_strided_slice %41 {offsets = [16, 0], sizes = [160, 84], strides = [1, 1]} : vector<224x84xbf16> to vector<160x84xbf16>
    %c1_39 = arith.constant 1 : index
    %c0_40 = arith.constant 0 : index
    %c0_41 = arith.constant 0 : index
    %47 = vector.load %arg8[%c1_39, %c0_40, %c0_41] : memref<5x84x160xbf16, #tpu.memory_space<vmem>>, vector<1x84x160xbf16>
    %48 = vector.shape_cast %47 : vector<1x84x160xbf16> to vector<84x160xbf16>
    %cst_42 = arith.constant dense<0.000000e+00> : vector<160x160xf32>
    %49 = tpu.matmul %46, %48, %cst_42 {dimension_numbers = #tpu.dot_dimension_numbers<[1], [0], [0], [1], [0, 0, 1, 1], [], []>} : vector<160x84xbf16>, vector<84x160xbf16>, vector<160x160xf32> -> vector<160x160xf32>
    %50 = arith.addf %45, %49 : vector<160x160xf32>
    %51 = vector.extract_strided_slice %41 {offsets = [32, 0], sizes = [160, 84], strides = [1, 1]} : vector<224x84xbf16> to vector<160x84xbf16>
    %c2_43 = arith.constant 2 : index
    %c0_44 = arith.constant 0 : index
    %c0_45 = arith.constant 0 : index
    %52 = vector.load %arg8[%c2_43, %c0_44, %c0_45] : memref<5x84x160xbf16, #tpu.memory_space<vmem>>, vector<1x84x160xbf16>
    %53 = vector.shape_cast %52 : vector<1x84x160xbf16> to vector<84x160xbf16>
    %cst_46 = arith.constant dense<0.000000e+00> : vector<160x160xf32>
    %54 = tpu.matmul %51, %53, %cst_46 {dimension_numbers = #tpu.dot_dimension_numbers<[1], [0], [0], [1], [0, 0, 1, 1], [], []>} : vector<160x84xbf16>, vector<84x160xbf16>, vector<160x160xf32> -> vector<160x160xf32>
    %55 = arith.addf %50, %54 : vector<160x160xf32>
    %56 = vector.extract_strided_slice %41 {offsets = [48, 0], sizes = [160, 84], strides = [1, 1]} : vector<224x84xbf16> to vector<160x84xbf16>
    %c3_47 = arith.constant 3 : index
    %c0_48 = arith.constant 0 : index
    %c0_49 = arith.constant 0 : index
    %57 = vector.load %arg8[%c3_47, %c0_48, %c0_49] : memref<5x84x160xbf16, #tpu.memory_space<vmem>>, vector<1x84x160xbf16>
    %58 = vector.shape_cast %57 : vector<1x84x160xbf16> to vector<84x160xbf16>
    %cst_50 = arith.constant dense<0.000000e+00> : vector<160x160xf32>
    %59 = tpu.matmul %56, %58, %cst_50 {dimension_numbers = #tpu.dot_dimension_numbers<[1], [0], [0], [1], [0, 0, 1, 1], [], []>} : vector<160x84xbf16>, vector<84x160xbf16>, vector<160x160xf32> -> vector<160x160xf32>
    %60 = arith.addf %55, %59 : vector<160x160xf32>
    %61 = vector.extract_strided_slice %41 {offsets = [64, 0], sizes = [160, 84], strides = [1, 1]} : vector<224x84xbf16> to vector<160x84xbf16>
    %c4_51 = arith.constant 4 : index
    %c0_52 = arith.constant 0 : index
    %c0_53 = arith.constant 0 : index
    %62 = vector.load %arg8[%c4_51, %c0_52, %c0_53] : memref<5x84x160xbf16, #tpu.memory_space<vmem>>, vector<1x84x160xbf16>
    %63 = vector.shape_cast %62 : vector<1x84x160xbf16> to vector<84x160xbf16>
    %cst_54 = arith.constant dense<0.000000e+00> : vector<160x160xf32>
    %64 = tpu.matmul %61, %63, %cst_54 {dimension_numbers = #tpu.dot_dimension_numbers<[1], [0], [0], [1], [0, 0, 1, 1], [], []>} : vector<160x84xbf16>, vector<84x160xbf16>, vector<160x160xf32> -> vector<160x160xf32>
    %65 = arith.addf %60, %64 : vector<160x160xf32>
    %c0_55 = arith.constant 0 : index
    %c0_56 = arith.constant 0 : index
    %66 = vector.load %arg9[%c0_55, %c0_56] : memref<1x160xf32, #tpu.memory_space<vmem>>, vector<1x160xf32>
    %67 = vector.broadcast %66 : vector<1x160xf32> to vector<160x160xf32>
    %68 = arith.addf %65, %67 : vector<160x160xf32>
    %cst_57 = arith.constant 0.000000e+00 : f32
    %69 = vector.broadcast %cst_57 : f32 to vector<160x160xf32>
    %70 = arith.maximumf %68, %69 : vector<160x160xf32>
    %71 = arith.truncf %70 : vector<160x160xf32> to vector<160x160xbf16>
    %c0_58 = arith.constant 0 : index
    %c0_59 = arith.constant 0 : index
    %72 = vector.load %arg10[%c0_58, %c0_59] : memref<80x160xbf16, #tpu.memory_space<vmem>>, vector<80x160xbf16>
    %cst_60 = arith.constant dense<0.000000e+00> : vector<80x160xf32>
    %73 = tpu.matmul %72, %71, %cst_60 {dimension_numbers = #tpu.dot_dimension_numbers<[1], [0], [0], [1], [0, 0, 1, 1], [], []>} : vector<80x160xbf16>, vector<160x160xbf16>, vector<80x160xf32> -> vector<80x160xf32>
    %c0_61 = arith.constant 0 : index
    %c0_62 = arith.constant 0 : index
    %74 = vector.load %arg11[%c0_61, %c0_62] : memref<80x160xbf16, #tpu.memory_space<vmem>>, vector<80x160xbf16>
    %cst_63 = arith.constant dense<0.000000e+00> : vector<80x160xf32>
    %75 = tpu.matmul %74, %71, %cst_63 {dimension_numbers = #tpu.dot_dimension_numbers<[1], [0], [0], [1], [0, 0, 1, 1], [], []>} : vector<80x160xbf16>, vector<160x160xbf16>, vector<80x160xf32> -> vector<80x160xf32>
    %76 = arith.maximumf %73, %75 : vector<80x160xf32>
    %77 = arith.truncf %76 : vector<80x160xf32> to vector<80x160xbf16>
    %c0_64 = arith.constant 0 : index
    %c0_65 = arith.constant 0 : index
    %78 = vector.load %arg12[%c0_64, %c0_65] : memref<160x80xbf16, #tpu.memory_space<vmem>>, vector<160x80xbf16>
    %cst_66 = arith.constant dense<0.000000e+00> : vector<80x80xf32>
    %79 = tpu.matmul %77, %78, %cst_66 {dimension_numbers = #tpu.dot_dimension_numbers<[1], [0], [0], [1], [0, 0, 1, 1], [], []>} : vector<80x160xbf16>, vector<160x80xbf16>, vector<80x80xf32> -> vector<80x80xf32>
    %c0_67 = arith.constant 0 : index
    %c0_68 = arith.constant 0 : index
    %80 = vector.load %arg13[%c0_67, %c0_68] : memref<160x80xbf16, #tpu.memory_space<vmem>>, vector<160x80xbf16>
    %cst_69 = arith.constant dense<0.000000e+00> : vector<80x80xf32>
    %81 = tpu.matmul %77, %80, %cst_69 {dimension_numbers = #tpu.dot_dimension_numbers<[1], [0], [0], [1], [0, 0, 1, 1], [], []>} : vector<80x160xbf16>, vector<160x80xbf16>, vector<80x80xf32> -> vector<80x80xf32>
    %82 = arith.maximumf %79, %81 : vector<80x80xf32>
    %83 = arith.truncf %82 : vector<80x80xf32> to vector<80x80xbf16>
    %84 = vector.extract_strided_slice %83 {offsets = [0, 0], sizes = [16, 80], strides = [1, 1]} : vector<80x80xbf16> to vector<16x80xbf16>
    %c0_70 = arith.constant 0 : index
    %c0_71 = arith.constant 0 : index
    %c0_72 = arith.constant 0 : index
    %85 = vector.load %arg14[%c0_70, %c0_71, %c0_72] : memref<5x80x128xbf16, #tpu.memory_space<vmem>>, vector<1x80x128xbf16>
    %86 = vector.shape_cast %85 : vector<1x80x128xbf16> to vector<80x128xbf16>
    %cst_73 = arith.constant dense<0.000000e+00> : vector<16x128xf32>
    %87 = tpu.matmul %84, %86, %cst_73 {dimension_numbers = #tpu.dot_dimension_numbers<[1], [0], [0], [1], [0, 0, 1, 1], [], []>} : vector<16x80xbf16>, vector<80x128xbf16>, vector<16x128xf32> -> vector<16x128xf32>
    %88 = vector.extract_strided_slice %83 {offsets = [16, 0], sizes = [16, 80], strides = [1, 1]} : vector<80x80xbf16> to vector<16x80xbf16>
    %c1_74 = arith.constant 1 : index
    %c0_75 = arith.constant 0 : index
    %c0_76 = arith.constant 0 : index
    %89 = vector.load %arg14[%c1_74, %c0_75, %c0_76] : memref<5x80x128xbf16, #tpu.memory_space<vmem>>, vector<1x80x128xbf16>
    %90 = vector.shape_cast %89 : vector<1x80x128xbf16> to vector<80x128xbf16>
    %cst_77 = arith.constant dense<0.000000e+00> : vector<16x128xf32>
    %91 = tpu.matmul %88, %90, %cst_77 {dimension_numbers = #tpu.dot_dimension_numbers<[1], [0], [0], [1], [0, 0, 1, 1], [], []>} : vector<16x80xbf16>, vector<80x128xbf16>, vector<16x128xf32> -> vector<16x128xf32>
    %92 = arith.addf %87, %91 : vector<16x128xf32>
    %93 = vector.extract_strided_slice %83 {offsets = [32, 0], sizes = [16, 80], strides = [1, 1]} : vector<80x80xbf16> to vector<16x80xbf16>
    %c2_78 = arith.constant 2 : index
    %c0_79 = arith.constant 0 : index
    %c0_80 = arith.constant 0 : index
    %94 = vector.load %arg14[%c2_78, %c0_79, %c0_80] : memref<5x80x128xbf16, #tpu.memory_space<vmem>>, vector<1x80x128xbf16>
    %95 = vector.shape_cast %94 : vector<1x80x128xbf16> to vector<80x128xbf16>
    %cst_81 = arith.constant dense<0.000000e+00> : vector<16x128xf32>
    %96 = tpu.matmul %93, %95, %cst_81 {dimension_numbers = #tpu.dot_dimension_numbers<[1], [0], [0], [1], [0, 0, 1, 1], [], []>} : vector<16x80xbf16>, vector<80x128xbf16>, vector<16x128xf32> -> vector<16x128xf32>
    %97 = arith.addf %92, %96 : vector<16x128xf32>
    %98 = vector.extract_strided_slice %83 {offsets = [48, 0], sizes = [16, 80], strides = [1, 1]} : vector<80x80xbf16> to vector<16x80xbf16>
    %c3_82 = arith.constant 3 : index
    %c0_83 = arith.constant 0 : index
    %c0_84 = arith.constant 0 : index
    %99 = vector.load %arg14[%c3_82, %c0_83, %c0_84] : memref<5x80x128xbf16, #tpu.memory_space<vmem>>, vector<1x80x128xbf16>
    %100 = vector.shape_cast %99 : vector<1x80x128xbf16> to vector<80x128xbf16>
    %cst_85 = arith.constant dense<0.000000e+00> : vector<16x128xf32>
    %101 = tpu.matmul %98, %100, %cst_85 {dimension_numbers = #tpu.dot_dimension_numbers<[1], [0], [0], [1], [0, 0, 1, 1], [], []>} : vector<16x80xbf16>, vector<80x128xbf16>, vector<16x128xf32> -> vector<16x128xf32>
    %102 = arith.addf %97, %101 : vector<16x128xf32>
    %103 = vector.extract_strided_slice %83 {offsets = [64, 0], sizes = [16, 80], strides = [1, 1]} : vector<80x80xbf16> to vector<16x80xbf16>
    %c4_86 = arith.constant 4 : index
    %c0_87 = arith.constant 0 : index
    %c0_88 = arith.constant 0 : index
    %104 = vector.load %arg14[%c4_86, %c0_87, %c0_88] : memref<5x80x128xbf16, #tpu.memory_space<vmem>>, vector<1x80x128xbf16>
    %105 = vector.shape_cast %104 : vector<1x80x128xbf16> to vector<80x128xbf16>
    %cst_89 = arith.constant dense<0.000000e+00> : vector<16x128xf32>
    %106 = tpu.matmul %103, %105, %cst_89 {dimension_numbers = #tpu.dot_dimension_numbers<[1], [0], [0], [1], [0, 0, 1, 1], [], []>} : vector<16x80xbf16>, vector<80x128xbf16>, vector<16x128xf32> -> vector<16x128xf32>
    %107 = arith.addf %102, %106 : vector<16x128xf32>
    %c0_90 = arith.constant 0 : index
    %c0_91 = arith.constant 0 : index
    %108 = vector.load %arg15[%c0_90, %c0_91] : memref<1x128xf32, #tpu.memory_space<vmem>>, vector<1x128xf32>
    %109 = vector.broadcast %108 : vector<1x128xf32> to vector<16x128xf32>
    %110 = arith.addf %107, %109 : vector<16x128xf32>
    %cst_92 = arith.constant 0.000000e+00 : f32
    %111 = vector.broadcast %cst_92 : f32 to vector<16x128xf32>
    %112 = arith.maximumf %110, %111 : vector<16x128xf32>
    %113 = arith.truncf %112 : vector<16x128xf32> to vector<16x128xbf16>
    %c0_93 = arith.constant 0 : index
    %c0_94 = arith.constant 0 : index
    %114 = vector.load %arg16[%c0_93, %c0_94] : memref<128x128xbf16, #tpu.memory_space<vmem>>, vector<128x128xbf16>
    %cst_95 = arith.constant dense<0.000000e+00> : vector<16x128xf32>
    %115 = tpu.matmul %113, %114, %cst_95 {dimension_numbers = #tpu.dot_dimension_numbers<[1], [0], [0], [1], [0, 0, 1, 1], [], []>} : vector<16x128xbf16>, vector<128x128xbf16>, vector<16x128xf32> -> vector<16x128xf32>
    %c0_96 = arith.constant 0 : index
    %c0_97 = arith.constant 0 : index
    %116 = vector.load %arg17[%c0_96, %c0_97] : memref<1x128xf32, #tpu.memory_space<vmem>>, vector<1x128xf32>
    %117 = vector.broadcast %116 : vector<1x128xf32> to vector<16x128xf32>
    %118 = arith.addf %115, %117 : vector<16x128xf32>
    %cst_98 = arith.constant 0.000000e+00 : f32
    %119 = vector.broadcast %cst_98 : f32 to vector<16x128xf32>
    %120 = arith.maximumf %118, %119 : vector<16x128xf32>
    %121 = arith.truncf %120 : vector<16x128xf32> to vector<16x128xbf16>
    %c0_99 = arith.constant 0 : index
    %c0_100 = arith.constant 0 : index
    %122 = vector.load %arg18[%c0_99, %c0_100] : memref<128x128xbf16, #tpu.memory_space<vmem>>, vector<128x128xbf16>
    %cst_101 = arith.constant dense<0.000000e+00> : vector<16x128xf32>
    %123 = tpu.matmul %121, %122, %cst_101 {dimension_numbers = #tpu.dot_dimension_numbers<[1], [0], [0], [1], [0, 0, 1, 1], [], []>} : vector<16x128xbf16>, vector<128x128xbf16>, vector<16x128xf32> -> vector<16x128xf32>
    %c0_102 = arith.constant 0 : index
    %c0_103 = arith.constant 0 : index
    %124 = vector.load %arg19[%c0_102, %c0_103] : memref<1x128xf32, #tpu.memory_space<vmem>>, vector<1x128xf32>
    %125 = vector.broadcast %124 : vector<1x128xf32> to vector<16x128xf32>
    %126 = arith.addf %123, %125 : vector<16x128xf32>
    %c0_104 = arith.constant 0 : index
    %c0_105 = arith.constant 0 : index
    %127 = vector.load %arg20[%c0_104, %c0_105] : memref<16x128xf32, #tpu.memory_space<vmem>>, vector<16x128xf32>
    tpu.vector_store %arg20[%c0_104, %c0_105], %126 {strides = array<i32>} : memref<16x128xf32, #tpu.memory_space<vmem>>, vector<16x128xf32>,
    return
  }
  func.func @transform_0(%arg0: i32) -> (i32, i32) {
    %c0_i32 = arith.constant 0 : i32
    %c0_i32_0 = arith.constant 0 : i32
    return %arg0, %c0_i32 : i32, i32
  }
  func.func @transform_1(%arg0: i32) -> (i32, i32, i32) {
    %c0_i32 = arith.constant 0 : i32
    %c0_i32_0 = arith.constant 0 : i32
    %c0_i32_1 = arith.constant 0 : i32
    %c0_i32_2 = arith.constant 0 : i32
    return %c0_i32, %c0_i32_0, %c0_i32_1 : i32, i32, i32
  }
  func.func @transform_2(%arg0: i32) -> (i32, i32) {
    %c0_i32 = arith.constant 0 : i32
    %c0_i32_0 = arith.constant 0 : i32
    %c0_i32_1 = arith.constant 0 : i32
    return %c0_i32, %c0_i32_0 : i32, i32
  }
  func.func @transform_3(%arg0: i32) -> (i32, i32) {
    %c0_i32 = arith.constant 0 : i32
    %c0_i32_0 = arith.constant 0 : i32
    %c0_i32_1 = arith.constant 0 : i32
    return %c0_i32, %c0_i32_0 : i32, i32
  }
  func.func @transform_4(%arg0: i32) -> (i32, i32) {
    %c0_i32 = arith.constant 0 : i32
    %c0_i32_0 = arith.constant 0 : i32
    %c0_i32_1 = arith.constant 0 : i32
    return %c0_i32, %c0_i32_0 : i32, i32
  }
  func.func @transform_5(%arg0: i32) -> (i32, i32) {
    %c0_i32 = arith.constant 0 : i32
    %c0_i32_0 = arith.constant 0 : i32
    %c0_i32_1 = arith.constant 0 : i32
    return %c0_i32, %c0_i32_0 : i32, i32
  }
  func.func @transform_6(%arg0: i32) -> (i32, i32) {
    %c0_i32 = arith.constant 0 : i32
    %c0_i32_0 = arith.constant 0 : i32
    %c0_i32_1 = arith.constant 0 : i32
    return %c0_i32, %c0_i32_0 : i32, i32
  }
  func.func @transform_7(%arg0: i32) -> (i32, i32, i32) {
    %c0_i32 = arith.constant 0 : i32
    %c0_i32_0 = arith.constant 0 : i32
    %c0_i32_1 = arith.constant 0 : i32
    %c0_i32_2 = arith.constant 0 : i32
    return %c0_i32, %c0_i32_0, %c0_i32_1 : i32, i32, i32
  }
  func.func @transform_8(%arg0: i32) -> (i32, i32) {
    %c0_i32 = arith.constant 0 : i32
    %c0_i32_0 = arith.constant 0 : i32
    %c0_i32_1 = arith.constant 0 : i32
    return %c0_i32, %c0_i32_0 : i32, i32
  }
  func.func @transform_9(%arg0: i32) -> (i32, i32) {
    %c0_i32 = arith.constant 0 : i32
    %c0_i32_0 = arith.constant 0 : i32
    %c0_i32_1 = arith.constant 0 : i32
    return %c0_i32, %c0_i32_0 : i32, i32
  }
  func.func @transform_10(%arg0: i32) -> (i32, i32) {
    %c0_i32 = arith.constant 0 : i32
    %c0_i32_0 = arith.constant 0 : i32
    %c0_i32_1 = arith.constant 0 : i32
    return %c0_i32, %c0_i32_0 : i32, i32
  }
  func.func @transform_11(%arg0: i32) -> (i32, i32) {
    %c0_i32 = arith.constant 0 : i32
    %c0_i32_0 = arith.constant 0 : i32
    %c0_i32_1 = arith.constant 0 : i32
    return %c0_i32, %c0_i32_0 : i32, i32
  }
  func.func @transform_12(%arg0: i32) -> (i32, i32) {
    %c0_i32 = arith.constant 0 : i32
    %c0_i32_0 = arith.constant 0 : i32
    %c0_i32_1 = arith.constant 0 : i32
    return %c0_i32, %c0_i32_0 : i32, i32
  }
  func.func @transform_13(%arg0: i32) -> (i32, i32, i32) {
    %c0_i32 = arith.constant 0 : i32
    %c0_i32_0 = arith.constant 0 : i32
    %c0_i32_1 = arith.constant 0 : i32
    %c0_i32_2 = arith.constant 0 : i32
    return %c0_i32, %c0_i32_0, %c0_i32_1 : i32, i32, i32
  }
  func.func @transform_14(%arg0: i32) -> (i32, i32) {
    %c0_i32 = arith.constant 0 : i32
    %c0_i32_0 = arith.constant 0 : i32
    %c0_i32_1 = arith.constant 0 : i32
    return %c0_i32, %c0_i32_0 : i32, i32
  }
  func.func @transform_15(%arg0: i32) -> (i32, i32) {
    %c0_i32 = arith.constant 0 : i32
    %c0_i32_0 = arith.constant 0 : i32
    %c0_i32_1 = arith.constant 0 : i32
    return %c0_i32, %c0_i32_0 : i32, i32
  }
  func.func @transform_16(%arg0: i32) -> (i32, i32) {
    %c0_i32 = arith.constant 0 : i32
    %c0_i32_0 = arith.constant 0 : i32
    %c0_i32_1 = arith.constant 0 : i32
    return %c0_i32, %c0_i32_0 : i32, i32
  }
  func.func @transform_17(%arg0: i32) -> (i32, i32) {
    %c0_i32 = arith.constant 0 : i32
    %c0_i32_0 = arith.constant 0 : i32
    %c0_i32_1 = arith.constant 0 : i32
    return %c0_i32, %c0_i32_0 : i32, i32
  }
  func.func @transform_18(%arg0: i32) -> (i32, i32) {
    %c0_i32 = arith.constant 0 : i32
    %c0_i32_0 = arith.constant 0 : i32
    %c0_i32_1 = arith.constant 0 : i32
    return %c0_i32, %c0_i32_0 : i32, i32
  }
  func.func @transform_19(%arg0: i32) -> (i32, i32) {
    %c0_i32 = arith.constant 0 : i32
    %c0_i32_0 = arith.constant 0 : i32
    return %arg0, %c0_i32 : i32, i32
  }
}

</mosaic_0001>

<bundles_post_ra>
// kernel: net_forward.1
= control target key start
LH: loop header
LB: loop body
LE: loop exit
PB: predicated region body
PF: predicated region fallthrough
CT: control target
= control target key end

     0   :  { %s14772_s0 = inlined_call_operand.vmem [shape: bf16[1024,96], index: 0, kind: input, shape index: {}]   ;;  %s14773_s1 = inlined_call_operand.vmem [shape: bf16[5,96,168], index: 1, kind: input, shape index: {}]   ;;  %s14774_s2 = inlined_call_operand.vmem [shape: f32[1,168], index: 2, kind: input, shape index: {}]   ;;  %s14775_s3 = inlined_call_operand.vmem [shape: bf16[224,448], index: 3, kind: input, shape index: {}]   ;;  %s14776_s4 = inlined_call_operand.vmem [shape: bf16[224,448], index: 4, kind: input, shape index: {}]   ;;  %s14777_s5 = inlined_call_operand.vmem [shape: bf16[168,84], index: 5, kind: input, shape index: {}]   ;;  %s14778_s6 = inlined_call_operand.vmem [shape: bf16[168,84], index: 6, kind: input, shape index: {}]   ;;  %s14779_s7 = inlined_call_operand.vmem [shape: bf16[5,84,160], index: 7, kind: input, shape index: {}]   ;;  %s14780_s8 = inlined_call_operand.vmem [shape: f32[1,160], index: 8, kind: input, shape index: {}]   ;;  %s14781_s9 = inlined_call_operand.vmem [shape: bf16[80,160], index: 9, kind: input, shape index: {}]   ;;  %s14782_s10 = inlined_call_operand.vmem [shape: bf16[80,160], index: 10, kind: input, shape index: {}]   ;;  %s14783_s11 = inlined_call_operand.vmem [shape: bf16[160,80], index: 11, kind: input, shape index: {}]   ;;  %s14784_s12 = inlined_call_operand.vmem [shape: bf16[160,80], index: 12, kind: input, shape index: {}]   ;;  %s14785_s13 = inlined_call_operand.vmem [shape: bf16[5,80,128], index: 13, kind: input, shape index: {}]   ;;  %s14786_s14 = inlined_call_operand.vmem [shape: f32[1,128], index: 14, kind: input, shape index: {}]   ;;  %s14787_s15 = inlined_call_operand.vmem [shape: bf16[128,128], index: 15, kind: input, shape index: {}]   ;;  %s14788_s16 = inlined_call_operand.vmem [shape: f32[1,128], index: 16, kind: input, shape index: {}]   ;;  %s14789_s17 = inlined_call_operand.vmem [shape: bf16[128,128], index: 17, kind: input, shape index: {}]   ;;  %s14790_s18 = inlined_call_operand.vmem [shape: f32[1,128], index: 18, kind: input, shape index: {}]   ;;  %s14791_s19 = inlined_call_operand.vmem [shape: f32[32,128], index: 19, kind: output, shape index: {}]  }
   0x1   :  { %14803 = sst [smem:[#allocation121_spill]] %s14772_s0  ;;  %s10775_s0 = smov 0  }
   0x2   :  { %14804 = sst [smem:[#allocation122_spill]] %s14773_s1 }
   0x3   :  { %14805 = sst [smem:[#allocation123_spill]] %s14774_s2 }
   0x4   :  { %14806 = sst [smem:[#allocation124_spill]] %s14775_s3 }
   0x5 LB: > { %s14794_s30 = sadd.s32 4294967295, %s10670_s0   ;;  %p9060_p0 = scmp.ge.s32.totalorder %s10670_s0, 1  ;;  %s10670_s0 = sphi %s10775_s0, %s29_s0  }
   0x6   : > { %p538_p1 = scmp.lt.s32.totalorder %s10670_s0, 3 }
   0x8   : > { %p539_p2 = pnand %p9060_p0, %p538_p1 }
   0xa   : > { %542 = sbr.rel (%p539_p2) target bundleno = 3056 (0xbf0), region = 96 }
   0xf   : > { %s14807_s1 = sld [smem:[#allocation122_spill]]  ;;  %v14795_v2 = vmov 0   ;;  %s9061_s23 = sshll.u32 %s14794_s30, 6  ;;  %vm890_vm0 = vcmask 785408   ;;  %vm4617_vm1 = vcmask 523264   ;;  %vm5927_vm2 = vcmask 1043456  }
  0x10   : > { %1007 = vmatprep.mubr.bf16.mxu0 %v14795_v2  ;;  %1388 = vmatprep.mubr.bf16.mxu1 %v14795_v2  ;;  %p595_p3 = scmp.lt.s32.totalorder %s9061_s23, 127  ;;  %s14808_s30 = sld [smem:[#allocation121_spill]]  ;;  %vm6459_vm3 = vcmask 1041408   ;;  %vm5884_vm4 = vcmask 326656   ;;  %vm6428_vm5 = vcmask 687104   ;;  %vm7710_vm6 = vcmask 261120  }
  0x11   : > { %s15054_s27 = sld [smem:[#allocation123_spill]]  ;;  %vm10674_vm7 = vmmov 0   ;;  %vm8379_vm8 = vcmask 654336   ;;  %s15408_s25 = sadd.s32 4294967295, %s10670_s0  }
  0x12   : > { %s15410_s23 = smov (!%p595_p3, %s9061_s23), 127 }
  0x13   : > { %s9062_s21 = sshll.u32 %s15410_s23, 2  ;;  %s15065_s23 = sld [smem:[#allocation124_spill]] }
  0x15   : > { %v10095_v0 = vld [vmem:[%s14807_s1 + $0xb4] ss:$8 sps:$4 sm:$0xff]   ;;  %v10099_v3 = vld [vmem:[%s14807_s1 + $0xb0] ss:$8 sps:$4 sm:$0xff]   ;;  %v10101_v5 = vld [vmem:[%s14807_s1 + $0xa4] ss:$8 sps:$4 sm:$0xff]  }
  0x16   : > { %v10097_v1 = vld [vmem:[%s14807_s1 + $0x54] ss:$8 sps:$4 sm:$0xff]   ;;  %979 = vmatprep.subr.bf16.mxu0 %v10095_v0  ;;  %v10100_v4 = vld [vmem:[%s14807_s1 + $0x50] ss:$8 sps:$4 sm:$0xff]   ;;  %v10103_v6 = vld [vmem:[%s14807_s1 + $0x44] ss:$8 sps:$4 sm:$0xff]   ;;  %s10850_s29 = scalar_lea.vmem %s14808_s30, %s9062_s21 }
  0x17   : > { %1360 = vmatprep.subr.bf16.mxu1 %v10097_v1  ;;  %980 = vmatpush1.bf16.msra.mxu0 %v10099_v3  ;;  %v10105_v7 = vld [vmem:[%s14807_s1 + $0xa0] ss:$8 sps:$4 sm:$0xff]   ;;  %v10107_v9 = vld [vmem:[%s14807_s1 + $0x94] ss:$8 sps:$4 sm:$0xff]   ;;  %v10111_v11 = vld [vmem:[%s14807_s1 + $0x90] ss:$8 sps:$4 sm:$0xff]  }
  0x18   : > { %1361 = vmatpush1.bf16.msra.mxu1 %v10100_v4  ;;  %981 = vmatprep.subr.bf16.mxu0 %v10101_v5  ;;  %v10106_v8 = vld [vmem:[%s14807_s1 + $0x40] ss:$8 sps:$4 sm:$0xff]   ;;  %v10109_v10 = vld [vmem:[%s14807_s1 + $0x34] ss:$8 sps:$4 sm:$0xff]   ;;  %v10112_v12 = vld [vmem:[%s14807_s1 + $0x30] ss:$8 sps:$4 sm:$0xff]  }
  0x19   : > { %1362 = vmatprep.subr.bf16.mxu1 %v10103_v6  ;;  %v10113_v13 = vld [vmem:[%s14807_s1 + $0x84] ss:$8 sps:$4 sm:$0xff]   ;;  %v10117_v15 = vld [vmem:[%s14807_s1 + $0x80] ss:$8 sps:$4 sm:$0xff]   ;;  %v10119_v17 = vld [vmem:[%s14807_s1 + $0x74] ss:$8 sps:$4 sm:$0xff]  }
  0x1a   : > { %v10115_v14 = vld [vmem:[%s14807_s1 + $0x24] ss:$8 sps:$4 sm:$0xff]   ;;  %v10118_v16 = vld [vmem:[%s14807_s1 + $0x20] ss:$8 sps:$4 sm:$0xff]   ;;  %v10121_v18 = vld [vmem:[%s14807_s1 + $0x14] ss:$8 sps:$4 sm:$0xff]  }
  0x1b   : > { %982 = vmatpush1.bf16.msra.mxu0 %v10105_v7  ;;  %v10123_v19 = vld [vmem:[%s14807_s1 + $0x70] ss:$8 sps:$4 sm:$0xff]   ;;  %v10125_v21 = vld [vmem:[%s14807_s1 + $0x64] ss:$8 sps:$4 sm:$0xff]   ;;  %v10129_v23 = vld [vmem:[%s14807_s1 + $0x60] ss:$8 sps:$4 sm:$0xff]  }
  0x1c   : > { %1363 = vmatpush1.bf16.msra.mxu1 %v10106_v8  ;;  %983 = vmatprep.subr.bf16.mxu0 %v10107_v9  ;;  %v10124_v20 = vld [vmem:[%s14807_s1 + $0x10] ss:$8 sps:$4 sm:$0xff]   ;;  %v10127_v22 = vld [vmem:[%s14807_s1 + $0x4] ss:$8 sps:$4 sm:$0xff]   ;;  %v10130_v24 = vld [vmem:[%s14807_s1] ss:$8 sps:$4 sm:$0xff]  }
  0x1d   : > { %1364 = vmatprep.subr.bf16.mxu1 %v10109_v10  ;;  %v10131_v25 = vld [vmem:[%s10850_s29 + $0x8] sm:$0xff]   ;;  %v10132_v26 = vld [vmem:[%s10850_s29] sm:$0xff]   ;;  %v10133_v27 = vld [vmem:[%s10850_s29 + $0x10] sm:$0xff]   ;;  %s9063_s30 = sshll.u32 %s15408_s25, 1 }
  0x1e   : > { %v10149_v28 = vld [vmem:[%s14807_s1 + $0x110] ss:$8 sps:$4 sm:$0xff]   ;;  %v10151_v29 = vld [vmem:[%s14807_s1 + $0x114] ss:$8 sps:$4 sm:$0xff]   ;;  %v10135_v31 = vld [vmem:[%s10850_s29 + $0x20] sm:$0xff]   ;;  %p601_p4 = scmp.lt.s32.totalorder %s9063_s30, 3 }
  0x1f   : > { %984 = vmatpush1.bf16.msra.mxu0 %v10111_v11  ;;  %v10134_v30 = vld [vmem:[%s10850_s29 + $0x18] sm:$0xff]   ;;  %v10136_v32 = vld [vmem:[%s10850_s29 + $0x28] sm:$0xff]   ;;  %v10137_v35 = vld [vmem:[%s10850_s29 + $0x30] sm:$0xff]  }
  0x20   : > { %1365 = vmatpush1.bf16.msra.mxu1 %v10112_v12  ;;  %985 = vmatprep.subr.bf16.mxu0 %v10113_v13  ;;  %v10156_v33 = vld [vmem:[%s14807_s1 + $0x100] ss:$8 sps:$4 sm:$0xff]   ;;  %v10158_v34 = vld [vmem:[%s14807_s1 + $0x104] ss:$8 sps:$4 sm:$0xff]   ;;  %v10138_v36 = vld [vmem:[%s10850_s29 + $0x38] sm:$0xff]   ;;  %s15412_s30 = smov (!%p601_p4, %s9063_s30), 3 }
  0x21   : > { %1366 = vmatprep.subr.bf16.mxu1 %v10115_v14  ;;  %v10139_v37 = vld [vmem:[%s10850_s29 + $0x40] sm:$0xff]   ;;  %v10140_v38 = vld [vmem:[%s10850_s29 + $0x48] sm:$0xff]   ;;  %v10141_v39 = vld [vmem:[%s10850_s29 + $0x50] sm:$0xff]   ;;  %s9064_s21 = sshll.u32 %s15412_s30, 3 }
  0x22   : > { %v10166_v40 = vld [vmem:[%s14807_s1 + $0x174] ss:$8 sps:$4 sm:$0xff]   ;;  %v10164_v41 = vld [vmem:[%s14807_s1 + $0x170] ss:$8 sps:$4 sm:$0xff]   ;;  %v10172_v45 = vld [vmem:[%s14807_s1 + $0x164] ss:$8 sps:$4 sm:$0xff]   ;;  %s604_s28 = scalar_lea.vmem %s14791_s19, %s9064_s21 }
  0x23   : > { %986 = vmatpush1.bf16.msra.mxu0 %v10117_v15  ;;  %v10142_v42 = vld [vmem:[%s10850_s29 + $0x58] sm:$0xff]   ;;  %v10170_v46 = vld [vmem:[%s14807_s1 + $0x160] ss:$8 sps:$4 sm:$0xff]   ;;  %v10179_v50 = vld [vmem:[%s14807_s1 + $0xe4] ss:$8 sps:$4 sm:$0xff]  }
  0x24   : > { %1367 = vmatpush1.bf16.msra.mxu1 %v10118_v16  ;;  %987 = vmatprep.subr.bf16.mxu0 %v10119_v17  ;;  %v10167_v43 = vld [vmem:[%s14807_s1 + $0xf0] ss:$8 sps:$4 sm:$0xff]   ;;  %v10169_v44 = vld [vmem:[%s14807_s1 + $0xf4] ss:$8 sps:$4 sm:$0xff]   ;;  %v10143_v49 = vld [vmem:[%s10850_s29 + $0x60] sm:$0xff]  }
  0x25   : > { %1368 = vmatprep.subr.bf16.mxu1 %v10121_v18  ;;  %v10176_v47 = vld [vmem:[%s14807_s1 + $0x154] ss:$8 sps:$4 sm:$0xff]   ;;  %v10174_v48 = vld [vmem:[%s14807_s1 + $0x150] ss:$8 sps:$4 sm:$0xff]   ;;  %v10177_v51 = vld [vmem:[%s14807_s1 + $0xe0] ss:$8 sps:$4 sm:$0xff]  }
  0x26   : > { %v10182_v52 = vld [vmem:[%s14807_s1 + $0x144] ss:$8 sps:$4 sm:$0xff]   ;;  %v10180_v53 = vld [vmem:[%s14807_s1 + $0x140] ss:$8 sps:$4 sm:$0xff]   ;;  %v10186_v54 = vld [vmem:[%s14807_s1 + $0xd4] ss:$8 sps:$4 sm:$0xff]  }
  0x27   : > { %988 = vmatpush1.bf16.msra.mxu0 %v10123_v19  ;;  %v10184_v55 = vld [vmem:[%s14807_s1 + $0xd0] ss:$8 sps:$4 sm:$0xff]   ;;  %v10189_v56 = vld [vmem:[%s14807_s1 + $0x134] ss:$8 sps:$4 sm:$0xff]   ;;  %v10144_v58 = vld [vmem:[%s10850_s29 + $0x68] sm:$0xff]  }
  0x28   : > { %1369 = vmatpush1.bf16.msra.mxu1 %v10124_v20  ;;  %989 = vmatprep.subr.bf16.mxu0 %v10125_v21  ;;  %v10187_v57 = vld [vmem:[%s14807_s1 + $0x130] ss:$8 sps:$4 sm:$0xff]   ;;  %v10192_v59 = vld [vmem:[%s14807_s1 + $0xc4] ss:$8 sps:$4 sm:$0xff]   ;;  %v10190_v60 = vld [vmem:[%s14807_s1 + $0xc0] ss:$8 sps:$4 sm:$0xff]  }
  0x29   : > { %1370 = vmatprep.subr.bf16.mxu1 %v10127_v22  ;;  %v10195_v61 = vld [vmem:[%s14807_s1 + $0x124] ss:$8 sps:$4 sm:$0xff]   ;;  %v10193_v62 = vld [vmem:[%s14807_s1 + $0x120] ss:$8 sps:$4 sm:$0xff]   ;;  %v10145_v63 = vld [vmem:[%s10850_s29 + $0x70] sm:$0xff]  }
  0x2a   : > { %v10146_v0 = vld [vmem:[%s10850_s29 + $0x78] sm:$0xff]   ;;  %v10147_v1 = vld [vmem:[%s10850_s29 + $0x80] sm:$0xff]   ;;  %v10148_v3 = vld [vmem:[%s10850_s29 + $0x88] sm:$0xff]  }
  0x2b   : > { %990 = vmatpush1.bf16.msra.mxu0 %v10129_v23  ;;  %v10152_v4 = vld [vmem:[%s10850_s29 + $0x90] sm:$0xff]   ;;  %v10153_v5 = vld [vmem:[%s10850_s29 + $0x98] sm:$0xff]   ;;  %v10154_v6 = vld [vmem:[%s10850_s29 + $0xa0] sm:$0xff]  }
  0x2c   : > { %1371 = vmatpush1.bf16.msra.mxu1 %v10130_v24  ;;  %2026 = vmatprep.subr.bf16.mxu0 %v10151_v29  ;;  %v10155_v7 = vld [vmem:[%s10850_s29 + $0xa8] sm:$0xff]   ;;  %v10159_v8 = vld [vmem:[%s10850_s29 + $0xb0] sm:$0xff]   ;;  %v10160_v9 = vld [vmem:[%s10850_s29 + $0xb8] sm:$0xff]  }
  0x2d   : > { %2804 = vmatprep.subr.bf16.mxu1 %v10166_v40  ;;  %v10161_v10 = vld [vmem:[%s10850_s29 + $0xc0] sm:$0xff]   ;;  %v10162_v11 = vld [vmem:[%s10850_s29 + $0xc8] sm:$0xff]   ;;  %v10163_v17 = vld [vmem:[%s10850_s29 + $0xd0] sm:$0xff]  }
  0x2e   : > { %9117 = vmatmul.mubr.msk.bf16.vlgmr.msra.gmra.mxu0 %vm890_vm0, %v10131_v25 }
  0x2f   : > { %9158 = vmatmul.mubr.msk.bf16.vlgmr.msra.gmra.mxu1 %vm890_vm0, %v10132_v26  ;;  %1017 = vmatprep.mubr.bf16.mxu0 %v14795_v2 }
  0x30   : > { %1398 = vmatprep.mubr.bf16.mxu1 %v14795_v2  ;;  %2027 = vmatpush1.bf16.msra.mxu0 %v10149_v28 }
  0x31   : > { %2028 = vmatprep.subr.bf16.mxu0 %v10158_v34  ;;  %2805 = vmatpush1.bf16.msra.mxu1 %v10164_v41 }
  0x32   : > { %2806 = vmatprep.subr.bf16.mxu1 %v10172_v45 }
  0x34   : > { %2029 = vmatpush1.bf16.msra.mxu0 %v10156_v33 }
  0x35   : > { %2030 = vmatprep.subr.bf16.mxu0 %v10169_v44  ;;  %2807 = vmatpush1.bf16.msra.mxu1 %v10170_v46 }
  0x36   : > { %9118 = vmatmul.mubr.msk.bf16.gmra.mxu0 %vm890_vm0, %v10133_v27  ;;  %2808 = vmatprep.subr.bf16.mxu1 %v10176_v47 }
  0x37   : > { %9159 = vmatmul.mubr.msk.bf16.gmra.mxu1 %vm890_vm0, %v10131_v25  ;;  %1027 = vmatprep.mubr.bf16.mxu0 %v14795_v2 }
  0x38   : > { %1408 = vmatprep.mubr.bf16.mxu1 %v14795_v2  ;;  %2031 = vmatpush1.bf16.msra.mxu0 %v10167_v43  ;;  %v10183_v43 = vld [vmem:[%s10850_s29 + $0xe0] sm:$0xff]  }
  0x39   : > { %2809 = vmatpush1.bf16.msra.mxu1 %v10174_v48  ;;  %2032 = vmatprep.subr.bf16.mxu0 %v10179_v50 }
  0x3a   : > { %2810 = vmatprep.subr.bf16.mxu1 %v10182_v52 }
  0x3c   : > { %2033 = vmatpush1.bf16.msra.mxu0 %v10177_v51 }
  0x3d   : > { %2811 = vmatpush1.bf16.msra.mxu1 %v10180_v53  ;;  %2034 = vmatprep.subr.bf16.mxu0 %v10186_v54 }
  0x3e   : > { %9119 = vmatmul.mubr.msk.bf16.gmra.mxu0 %vm890_vm0, %v10134_v30  ;;  %2812 = vmatprep.subr.bf16.mxu1 %v10189_v56 }
  0x3f   : > { %9160 = vmatmul.mubr.msk.bf16.gmra.mxu1 %vm890_vm0, %v10133_v27  ;;  %1037 = vmatprep.mubr.bf16.mxu0 %v14795_v2 }
  0x40   : > { %1418 = vmatprep.mubr.bf16.mxu1 %v14795_v2  ;;  %2035 = vmatpush1.bf16.msra.mxu0 %v10184_v55 }
  0x41   : > { %2813 = vmatpush1.bf16.msra.mxu1 %v10187_v57  ;;  %2036 = vmatprep.subr.bf16.mxu0 %v10192_v59  ;;  %v10196_v59 = vld [vmem:[%s10850_s29 + $0x10] sm:$0xff]  }
  0x42   : > { %2814 = vmatprep.subr.bf16.mxu1 %v10195_v61 }
  0x44   : > { %2037 = vmatpush1.bf16.msra.mxu0 %v10190_v60  ;;  %v10197_v60 = vld [vmem:[%s10850_s29 + $0x18] sm:$0xff]  }
  0x45   : > { %2815 = vmatpush1.bf16.msra.mxu1 %v10193_v62 }
  0x46   : > { %9120 = vmatmul.mubr.msk.bf16.gmra.mxu0 %vm890_vm0, %v10135_v31 }
  0x47   : > { %9161 = vmatmul.mubr.msk.bf16.gmra.mxu1 %vm890_vm0, %v10134_v30  ;;  %1047 = vmatprep.mubr.bf16.mxu0 %v14795_v2  ;;  %v10173_v30 = vld [vmem:[%s10850_s29 + $0xd8] sm:$0xff]  }
  0x48   : > { %1428 = vmatprep.mubr.bf16.mxu1 %v14795_v2 }
  0x4e   : > { %9121 = vmatmul.mubr.msk.bf16.gmra.mxu0 %vm890_vm0, %v10136_v32 }
  0x4f   : > { %9162 = vmatmul.mubr.msk.bf16.gmra.mxu1 %vm890_vm0, %v10135_v31  ;;  %1057 = vmatprep.mubr.bf16.mxu0 %v14795_v2 }
  0x50   : > { %1438 = vmatprep.mubr.bf16.mxu1 %v14795_v2 }
  0x56   : > { %9122 = vmatmul.mubr.msk.bf16.gmra.mxu0 %vm890_vm0, %v10137_v35 }
  0x57   : > { %9163 = vmatmul.mubr.msk.bf16.gmra.mxu1 %vm890_vm0, %v10136_v32  ;;  %1067 = vmatprep.mubr.bf16.mxu0 %v14795_v2 }
  0x58   : > { %1448 = vmatprep.mubr.bf16.mxu1 %v14795_v2 }
  0x5e   : > { %9123 = vmatmul.mubr.msk.bf16.gmra.mxu0 %vm890_vm0, %v10138_v36 }
  0x5f   : > { %9164 = vmatmul.mubr.msk.bf16.gmra.mxu1 %vm890_vm0, %v10137_v35  ;;  %1077 = vmatprep.mubr.bf16.mxu0 %v14795_v2 }
  0x60   : > { %1458 = vmatprep.mubr.bf16.mxu1 %v14795_v2 }
  0x66   : > { %9124 = vmatmul.mubr.msk.bf16.gmra.mxu0 %vm890_vm0, %v10139_v37 }
  0x67   : > { %9165 = vmatmul.mubr.msk.bf16.gmra.mxu1 %vm890_vm0, %v10138_v36  ;;  %1087 = vmatprep.mubr.bf16.mxu0 %v14795_v2 }
  0x68   : > { %1468 = vmatprep.mubr.bf16.mxu1 %v14795_v2 }
  0x6e   : > { %9125 = vmatmul.mubr.msk.bf16.gmra.mxu0 %vm890_vm0, %v10140_v38 }
  0x6f   : > { %9166 = vmatmul.mubr.msk.bf16.gmra.mxu1 %vm890_vm0, %v10139_v37  ;;  %1097 = vmatprep.mubr.bf16.mxu0 %v14795_v2 }
  0x70   : > { %1478 = vmatprep.mubr.bf16.mxu1 %v14795_v2 }
  0x76   : > { %9126 = vmatmul.mubr.msk.bf16.gmra.mxu0 %vm890_vm0, %v10141_v39 }
  0x77   : > { %9167 = vmatmul.mubr.msk.bf16.gmra.mxu1 %vm890_vm0, %v10140_v38  ;;  %1107 = vmatprep.mubr.bf16.mxu0 %v14795_v2 }
  0x78   : > { %1488 = vmatprep.mubr.bf16.mxu1 %v14795_v2 }
  0x7e   : > { %9127 = vmatmul.mubr.msk.bf16.gmra.mxu0 %vm890_vm0, %v10142_v42 }
  0x7f   : > { %9168 = vmatmul.mubr.msk.bf16.gmra.mxu1 %vm890_vm0, %v10141_v39  ;;  %1117 = vmatprep.mubr.bf16.mxu0 %v14795_v2 }
  0x80   : > { %1498 = vmatprep.mubr.bf16.mxu1 %v14795_v2 }
  0x86   : > { %9128 = vmatmul.mubr.msk.bf16.gmra.mxu0 %vm890_vm0, %v10143_v49 }
  0x87   : > { %9169 = vmatmul.mubr.msk.bf16.gmra.mxu1 %vm890_vm0, %v10142_v42  ;;  %1127 = vmatprep.mubr.bf16.mxu0 %v14795_v2 }
  0x88   : > { %1508 = vmatprep.mubr.bf16.mxu1 %v14795_v2 }
  0x8e   : > { %9129 = vmatmul.mubr.msk.bf16.gmra.mxu0 %vm890_vm0, %v10144_v58 }
  0x8f   : > { %9170 = vmatmul.mubr.msk.bf16.gmra.mxu1 %vm890_vm0, %v10143_v49  ;;  %1137 = vmatprep.mubr.bf16.mxu0 %v14795_v2 }
  0x90   : > { %1518 = vmatprep.mubr.bf16.mxu1 %v14795_v2 }
  0x96   : > { %9130 = vmatmul.mubr.msk.bf16.gmra.mxu0 %vm890_vm0, %v10145_v63 }
  0x97   : > { %9171 = vmatmul.mubr.msk.bf16.gmra.mxu1 %vm890_vm0, %v10144_v58  ;;  %1147 = vmatprep.mubr.bf16.mxu0 %v14795_v2 }
  0x98   : > { %1528 = vmatprep.mubr.bf16.mxu1 %v14795_v2 }
  0x9e   : > { %9131 = vmatmul.mubr.msk.bf16.gmra.mxu0 %vm890_vm0, %v10146_v0 }
  0x9f   : > { %9172 = vmatmul.mubr.msk.bf16.gmra.mxu1 %vm890_vm0, %v10145_v63  ;;  %1157 = vmatprep.mubr.bf16.mxu0 %v14795_v2 }
  0xa0   : > { %1538 = vmatprep.mubr.bf16.mxu1 %v14795_v2 }
  0xa6   : > { %9132 = vmatmul.mubr.msk.bf16.gmra.mxu0 %vm890_vm0, %v10147_v1 }
  0xa7   : > { %9173 = vmatmul.mubr.msk.bf16.gmra.mxu1 %vm890_vm0, %v10146_v0  ;;  %1167 = vmatprep.mubr.bf16.mxu0 %v14795_v2 }
  0xa8   : > { %1548 = vmatprep.mubr.bf16.mxu1 %v14795_v2 }
  0xae   : > { %9133 = vmatmul.mubr.msk.bf16.gmra.mxu0 %vm890_vm0, %v10148_v3 }
  0xaf   : > { %9174 = vmatmul.mubr.msk.bf16.gmra.mxu1 %vm890_vm0, %v10147_v1  ;;  %1177 = vmatprep.mubr.bf16.mxu0 %v14795_v2 }
  0xb0   : > { %1558 = vmatprep.mubr.bf16.mxu1 %v14795_v2 }
  0xb6   : > { %9134 = vmatmul.mubr.msk.bf16.gmra.mxu0 %vm890_vm0, %v10152_v4 }
  0xb7   : > { %9175 = vmatmul.mubr.msk.bf16.gmra.mxu1 %vm890_vm0, %v10148_v3  ;;  %1187 = vmatprep.mubr.bf16.mxu0 %v14795_v2 }
  0xb8   : > { %1568 = vmatprep.mubr.bf16.mxu1 %v14795_v2 }
  0xbe   : > { %9135 = vmatmul.mubr.msk.bf16.gmra.mxu0 %vm890_vm0, %v10153_v5 }
  0xbf   : > { %9176 = vmatmul.mubr.msk.bf16.gmra.mxu1 %vm890_vm0, %v10152_v4  ;;  %1197 = vmatprep.mubr.bf16.mxu0 %v14795_v2 }
  0xc0   : > { %1578 = vmatprep.mubr.bf16.mxu1 %v14795_v2 }
  0xc6   : > { %9136 = vmatmul.mubr.msk.bf16.gmra.mxu0 %vm890_vm0, %v10154_v6 }
  0xc7   : > { %9177 = vmatmul.mubr.msk.bf16.gmra.mxu1 %vm890_vm0, %v10153_v5  ;;  %1207 = vmatprep.mubr.bf16.mxu0 %v14795_v2  ;;  %v10229_v5 = vld [vmem:[%s14807_s1 + $0x1d0] ss:$8 sps:$4 sm:$0xff]  }
  0xc8   : > { %1588 = vmatprep.mubr.bf16.mxu1 %v14795_v2 }
  0xce   : > { %9137 = vmatmul.mubr.msk.bf16.gmra.mxu0 %vm890_vm0, %v10155_v7 }
  0xcf   : > { %9178 = vmatmul.mubr.msk.bf16.gmra.mxu1 %vm890_vm0, %v10154_v6  ;;  %1217 = vmatprep.mubr.bf16.mxu0 %v14795_v2  ;;  %v10231_v6 = vld [vmem:[%s14807_s1 + $0x1d4] ss:$8 sps:$4 sm:$0xff]  }
  0xd0   : > { %1598 = vmatprep.mubr.bf16.mxu1 %v14795_v2  ;;  %3582 = vmatprep.subr.bf16.mxu0 %v10231_v6 }
  0xd6   : > { %9138 = vmatmul.mubr.msk.bf16.gmra.mxu0 %vm890_vm0, %v10159_v8 }
  0xd7   : > { %9179 = vmatmul.mubr.msk.bf16.gmra.mxu1 %vm890_vm0, %v10155_v7  ;;  %1227 = vmatprep.mubr.bf16.mxu0 %v14795_v2 }
  0xd8   : > { %1608 = vmatprep.mubr.bf16.mxu1 %v14795_v2 }
  0xde   : > { %9139 = vmatmul.mubr.msk.bf16.gmra.mxu0 %vm890_vm0, %v10160_v9 }
  0xdf   : > { %9180 = vmatmul.mubr.msk.bf16.gmra.mxu1 %vm890_vm0, %v10159_v8  ;;  %1237 = vmatprep.mubr.bf16.mxu0 %v14795_v2 }
  0xe0   : > { %1618 = vmatprep.mubr.bf16.mxu1 %v14795_v2 }
  0xe6   : > { %9140 = vmatmul.mubr.msk.bf16.gmra.mxu0 %vm890_vm0, %v10161_v10 }
  0xe7   : > { %9181 = vmatmul.mubr.msk.bf16.gmra.mxu1 %vm890_vm0, %v10160_v9  ;;  %1247 = vmatprep.mubr.bf16.mxu0 %v14795_v2 }
  0xe8   : > { %1628 = vmatprep.mubr.bf16.mxu1 %v14795_v2 }
  0xee   : > { %v1009_v12 = vpop.f32.mrf.mxu0  ;;  %9141 = vmatmul.mubr.msk.bf16.gmra.mxu0 %vm890_vm0, %v10162_v11 }
  0xef   : > { %v1390_v13 = vpop.f32.mrf.mxu1  ;;  %9182 = vmatmul.mubr.msk.bf16.gmra.mxu1 %vm890_vm0, %v10161_v10  ;;  %1257 = vmatprep.mubr.bf16.mxu0 %v14795_v2 }
  0xf0   : > { %v11060_v14 = vadd.f32 %v1390_v13, %v1009_v12  ;;  %1638 = vmatprep.mubr.bf16.mxu1 %v14795_v2  ;;  %v1011_v15 = vpop.f32.mrf.mxu0  ;;  %v10198_v12 = vld [vmem:[%s10850_s29 + $0x18] sm:$0xff]   ;;  %v10199_v13 = vld [vmem:[%s10850_s29 + $0x20] sm:$0xff]  }
  0xf1   : > { %v1392_v16 = vpop.f32.mrf.mxu1 }
  0xf2   : > { %v11065_v18 = vadd.f32 %v1392_v16, %v1011_v15  ;;  %v1013_v19 = vpop.f32.mrf.mxu0 }
  0xf3   : > { %v1394_v20 = vpop.f32.mrf.mxu1 }
  0xf4   : > { %v11067_v21 = vadd.f32 %v1394_v20, %v1013_v19  ;;  %v1015_v22 = vpop.f32.mrf.mxu0 }
  0xf5   : > { %v1396_v23 = vpop.f32.mrf.mxu1 }
  0xf6   : > { %v11069_v24 = vadd.f32 %v1396_v23, %v1015_v22  ;;  %v1019_v25 = vpop.f32.mrf.mxu0  ;;  %9142 = vmatmul.mubr.msk.bf16.gmra.mxu0 %vm890_vm0, %v10163_v17 }
  0xf7   : > { %v1400_v26 = vpop.f32.mrf.mxu1  ;;  %9183 = vmatmul.mubr.msk.bf16.gmra.mxu1 %vm890_vm0, %v10162_v11  ;;  %1267 = vmatprep.mubr.bf16.mxu0 %v14795_v2 }
  0xf8   : > { %v11073_v27 = vadd.f32 %v1400_v26, %v1019_v25  ;;  %1648 = vmatprep.mubr.bf16.mxu1 %v14795_v2  ;;  %v1021_v28 = vpop.f32.mrf.mxu0 }
  0xf9   : > { %v1402_v29 = vpop.f32.mrf.mxu1 }
  0xfa   : > { %v11078_v31 = vadd.f32 %v1402_v29, %v1021_v28  ;;  %v1023_v32 = vpop.f32.mrf.mxu0 }
  0xfb   : > { %v1404_v33 = vpop.f32.mrf.mxu1 }
  0xfc   : > { %v11080_v34 = vadd.f32 %v1404_v33, %v1023_v32  ;;  %v1025_v35 = vpop.f32.mrf.mxu0  ;;  %v10200_v32 = vld [vmem:[%s10850_s29 + $0x20] sm:$0xff]   ;;  %v10201_v33 = vld [vmem:[%s10850_s29 + $0x28] sm:$0xff]  }
  0xfd   : > { %v1406_v36 = vpop.f32.mrf.mxu1 }
  0xfe   : > { %v11082_v37 = vadd.f32 %v1406_v36, %v1025_v35  ;;  %v1029_v38 = vpop.f32.mrf.mxu0  ;;  %9143 = vmatmul.mubr.msk.bf16.gmra.mxu0 %vm890_vm0, %v10173_v30 }
  0xff   : > { %v1410_v39 = vpop.f32.mrf.mxu1  ;;  %9184 = vmatmul.mubr.msk.bf16.gmra.mxu1 %vm890_vm0, %v10163_v17  ;;  %1277 = vmatprep.mubr.bf16.mxu0 %v14795_v2 }
 0x100   : > { %v11086_v40 = vadd.f32 %v1410_v39, %v1029_v38  ;;  %1658 = vmatprep.mubr.bf16.mxu1 %v14795_v2  ;;  %v1031_v41 = vpop.f32.mrf.mxu0 }
 0x101   : > { %v1412_v42 = vpop.f32.mrf.mxu1 }
 0x102   : > { %v11091_v44 = vadd.f32 %v1412_v42, %v1031_v41  ;;  %v1033_v45 = vpop.f32.mrf.mxu0 }
 0x103   : > { %v1414_v46 = vpop.f32.mrf.mxu1 }
 0x104   : > { %v11093_v47 = vadd.f32 %v1414_v46, %v1033_v45  ;;  %v1035_v48 = vpop.f32.mrf.mxu0 }
 0x105   : > { %v1416_v49 = vpop.f32.mrf.mxu1 }
 0x106   : > { %v11095_v50 = vadd.f32 %v1416_v49, %v1035_v48  ;;  %v1039_v51 = vpop.f32.mrf.mxu0  ;;  %9144 = vmatmul.mubr.msk.bf16.gmra.mxu0 %vm890_vm0, %v10183_v43 }
 0x107   : > { %v1420_v52 = vpop.f32.mrf.mxu1  ;;  %9185 = vmatmul.mubr.msk.bf16.gmra.mxu1 %vm890_vm0, %v10173_v30  ;;  %2054 = vmatprep.mubr.bf16.mxu0 %v14795_v2 }
 0x108   : > { %v11099_v53 = vadd.f32 %v1420_v52, %v1039_v51  ;;  %2832 = vmatprep.mubr.bf16.mxu1 %v14795_v2  ;;  %v1041_v54 = vpop.f32.mrf.mxu0  ;;  %v10202_v52 = vld [vmem:[%s10850_s29 + $0x28] sm:$0xff]  }
 0x109   : > { %v1422_v55 = vpop.f32.mrf.mxu1 }
 0x10a   : > { %v11103_v56 = vadd.f32 %v1422_v55, %v1041_v54  ;;  %v1043_v57 = vpop.f32.mrf.mxu0  ;;  %v10203_v54 = vld [vmem:[%s10850_s29 + $0x30] sm:$0xff]  }
 0x10b   : > { %v1424_v58 = vpop.f32.mrf.mxu1 }
 0x10c   : > { %v11107_v61 = vadd.f32 %v1424_v58, %v1043_v57  ;;  %v1045_v62 = vpop.f32.mrf.mxu0 }
 0x10d   : > { %v1426_v63 = vpop.f32.mrf.mxu1 }
 0x10e   : > { %v11109_v0 = vadd.f32 %v1426_v63, %v1045_v62  ;;  %v1049_v1 = vpop.f32.mrf.mxu0  ;;  %9238 = vmatmul.mubr.msk.bf16.vlgmr.msra.gmra.mxu0 %vm890_vm0, %v10196_v59 }
 0x10f   : > { %v1430_v3 = vpop.f32.mrf.mxu1  ;;  %9318 = vmatmul.mubr.msk.bf16.vlgmr.msra.gmra.mxu1 %vm890_vm0, %v10197_v60  ;;  %2064 = vmatprep.mubr.bf16.mxu0 %v14795_v2 }
 0x110   : > { %v11113_v4 = vadd.f32 %v1430_v3, %v1049_v1  ;;  %2842 = vmatprep.mubr.bf16.mxu1 %v14795_v2  ;;  %v1051_v7 = vpop.f32.mrf.mxu0  ;;  %3583 = vmatpush1.bf16.msra.mxu0 %v10229_v5 }
 0x111   : > { %v1432_v8 = vpop.f32.mrf.mxu1 }
 0x112   : > { %v11123_v9 = vadd.f32 %v1432_v8, %v1051_v7  ;;  %v1053_v10 = vpop.f32.mrf.mxu0  ;;  %v10204_v8 = vld [vmem:[%s10850_s29 + $0x30] sm:$0xff]  }
 0x113   : > { %v1434_v11 = vpop.f32.mrf.mxu1 }
 0x114   : > { %v11127_v15 = vadd.f32 %v1434_v11, %v1053_v10  ;;  %v1055_v16 = vpop.f32.mrf.mxu0  ;;  %v10205_v10 = vld [vmem:[%s10850_s29 + $0x38] sm:$0xff]  }
 0x115   : > { %v1436_v17 = vpop.f32.mrf.mxu1 }
 0x116   : > { %v11129_v19 = vadd.f32 %v1436_v17, %v1055_v16  ;;  %v1059_v20 = vpop.f32.mrf.mxu0  ;;  %9239 = vmatmul.mubr.msk.bf16.gmra.mxu0 %vm890_vm0, %v10198_v12 }
 0x117   : > { %v1440_v22 = vpop.f32.mrf.mxu1  ;;  %9319 = vmatmul.mubr.msk.bf16.gmra.mxu1 %vm890_vm0, %v10199_v13  ;;  %2074 = vmatprep.mubr.bf16.mxu0 %v14795_v2 }
 0x118   : > { %v11133_v23 = vadd.f32 %v1440_v22, %v1059_v20  ;;  %2852 = vmatprep.mubr.bf16.mxu1 %v14795_v2  ;;  %v1061_v25 = vpop.f32.mrf.mxu0 }
 0x119   : > { %v1442_v26 = vpop.f32.mrf.mxu1 }
 0x11a   : > { %v11137_v28 = vadd.f32 %v1442_v26, %v1061_v25  ;;  %v1063_v29 = vpop.f32.mrf.mxu0 }
 0x11b   : > { %v1444_v30 = vpop.f32.mrf.mxu1 }
 0x11c   : > { %v11141_v35 = vadd.f32 %v1444_v30, %v1063_v29  ;;  %v1065_v36 = vpop.f32.mrf.mxu0 }
 0x11d   : > { %v1446_v38 = vpop.f32.mrf.mxu1 }
 0x11e   : > { %v11143_v39 = vadd.f32 %v1446_v38, %v1065_v36  ;;  %v1069_v41 = vpop.f32.mrf.mxu0  ;;  %9240 = vmatmul.mubr.msk.bf16.gmra.mxu0 %vm890_vm0, %v10200_v32  ;;  %v10207_v36 = vld [vmem:[%s10850_s29 + $0x40] sm:$0xff]  }
 0x11f   : > { %v1450_v42 = vpop.f32.mrf.mxu1  ;;  %9320 = vmatmul.mubr.msk.bf16.gmra.mxu1 %vm890_vm0, %v10201_v33  ;;  %2084 = vmatprep.mubr.bf16.mxu0 %v14795_v2  ;;  %v10206_v33 = vld [vmem:[%s10850_s29 + $0x38] sm:$0xff]  }
 0x120   : > { %v11147_v43 = vadd.f32 %v1450_v42, %v1069_v41  ;;  %2862 = vmatprep.mubr.bf16.mxu1 %v14795_v2  ;;  %v1071_v45 = vpop.f32.mrf.mxu0 }
 0x121   : > { %v1452_v46 = vpop.f32.mrf.mxu1 }
 0x122   : > { %v11151_v48 = vadd.f32 %v1452_v46, %v1071_v45  ;;  %v1073_v49 = vpop.f32.mrf.mxu0  ;;  %v10241_v46 = vld [vmem:[%s14807_s1 + $0x1c0] ss:$8 sps:$4 sm:$0xff]  }
 0x123   : > { %v1454_v51 = vpop.f32.mrf.mxu1 }
 0x124   : > { %v11155_v55 = vadd.f32 %v1454_v51, %v1073_v49  ;;  %v1075_v57 = vpop.f32.mrf.mxu0  ;;  %v10243_v49 = vld [vmem:[%s14807_s1 + $0x1c4] ss:$8 sps:$4 sm:$0xff]  }
 0x125   : > { %v1456_v58 = vpop.f32.mrf.mxu1  ;;  %3584 = vmatprep.subr.bf16.mxu0 %v10243_v49 }
 0x126   : > { %v11157_v59 = vadd.f32 %v1456_v58, %v1075_v57  ;;  %v1079_v60 = vpop.f32.mrf.mxu0  ;;  %9241 = vmatmul.mubr.msk.bf16.gmra.mxu0 %vm890_vm0, %v10202_v52 }
 0x127   : > { %v1460_v62 = vpop.f32.mrf.mxu1  ;;  %9321 = vmatmul.mubr.msk.bf16.gmra.mxu1 %vm890_vm0, %v10203_v54  ;;  %2094 = vmatprep.mubr.bf16.mxu0 %v14795_v2 }
 0x128   : > { %v11161_v63 = vadd.f32 %v1460_v62, %v1079_v60  ;;  %2872 = vmatprep.mubr.bf16.mxu1 %v14795_v2  ;;  %v1081_v1 = vpop.f32.mrf.mxu0  ;;  %3585 = vmatpush1.bf16.msra.mxu0 %v10241_v46 }
 0x129   : > { %v1462_v3 = vpop.f32.mrf.mxu1 }
 0x12a   : > { %v11165_v5 = vadd.f32 %v1462_v3, %v1081_v1  ;;  %v1083_v6 = vpop.f32.mrf.mxu0  ;;  %v10208_v3 = vld [vmem:[%s10850_s29 + $0x40] sm:$0xff]  }
 0x12b   : > { %v1464_v7 = vpop.f32.mrf.mxu1 }
 0x12c   : > { %v11169_v11 = vadd.f32 %v1464_v7, %v1083_v6  ;;  %v1085_v12 = vpop.f32.mrf.mxu0  ;;  %v10209_v6 = vld [vmem:[%s10850_s29 + $0x48] sm:$0xff]  }
 0x12d   : > { %v1466_v13 = vpop.f32.mrf.mxu1 }
 0x12e   : > { %v11171_v16 = vadd.f32 %v1466_v13, %v1085_v12  ;;  %v1089_v17 = vpop.f32.mrf.mxu0  ;;  %9242 = vmatmul.mubr.msk.bf16.gmra.mxu0 %vm890_vm0, %v10204_v8 }
 0x12f   : > { %v1470_v20 = vpop.f32.mrf.mxu1  ;;  %9322 = vmatmul.mubr.msk.bf16.gmra.mxu1 %vm890_vm0, %v10205_v10  ;;  %2104 = vmatprep.mubr.bf16.mxu0 %v14795_v2 }
 0x130   : > { %v11175_v22 = vadd.f32 %v1470_v20, %v1089_v17  ;;  %2882 = vmatprep.mubr.bf16.mxu1 %v14795_v2  ;;  %v1091_v25 = vpop.f32.mrf.mxu0 }
 0x131   : > { %v1472_v26 = vpop.f32.mrf.mxu1 }
 0x132   : > { %v11179_v29 = vadd.f32 %v1472_v26, %v1091_v25  ;;  %v1093_v30 = vpop.f32.mrf.mxu0 }
 0x133   : > { %v1474_v32 = vpop.f32.mrf.mxu1 }
 0x134   : > { %v11183_v38 = vadd.f32 %v1474_v32, %v1093_v30  ;;  %v1095_v41 = vpop.f32.mrf.mxu0 }
 0x135   : > { %v1476_v42 = vpop.f32.mrf.mxu1 }
 0x136   : > { %v11185_v45 = vadd.f32 %v1476_v42, %v1095_v41  ;;  %v1099_v51 = vpop.f32.mrf.mxu0  ;;  %9243 = vmatmul.mubr.msk.bf16.gmra.mxu0 %vm890_vm0, %v10206_v33  ;;  %v10211_v41 = vld [vmem:[%s10850_s29 + $0x50] sm:$0xff]  }
 0x137   : > { %v1480_v52 = vpop.f32.mrf.mxu1  ;;  %9323 = vmatmul.mubr.msk.bf16.gmra.mxu1 %vm890_vm0, %v10207_v36  ;;  %2114 = vmatprep.mubr.bf16.mxu0 %v14795_v2  ;;  %v10210_v36 = vld [vmem:[%s10850_s29 + $0x48] sm:$0xff]  }
 0x138   : > { %v11195_v54 = vadd.f32 %v1480_v52, %v1099_v51  ;;  %2892 = vmatprep.mubr.bf16.mxu1 %v14795_v2  ;;  %v1101_v57 = vpop.f32.mrf.mxu0 }
 0x139   : > { %v1482_v58 = vpop.f32.mrf.mxu1 }
 0x13a   : > { %v11199_v60 = vadd.f32 %v1482_v58, %v1101_v57  ;;  %v1103_v62 = vpop.f32.mrf.mxu0 }
 0x13b   : > { %v1484_v1 = vpop.f32.mrf.mxu1 }
 0x13c   : > { %v11203_v7 = vadd.f32 %v1484_v1, %v1103_v62  ;;  %v1105_v8 = vpop.f32.mrf.mxu0 }
 0x13d   : > { %v1486_v10 = vpop.f32.mrf.mxu1 }
 0x13e   : > { %v11205_v12 = vadd.f32 %v1486_v10, %v1105_v8  ;;  %v1109_v13 = vpop.f32.mrf.mxu0  ;;  %9244 = vmatmul.mubr.msk.bf16.gmra.mxu0 %vm890_vm0, %v10208_v3  ;;  %v10212_v10 = vld [vmem:[%s10850_s29 + $0x50] sm:$0xff]  }
 0x13f   : > { %v1490_v17 = vpop.f32.mrf.mxu1  ;;  %9324 = vmatmul.mubr.msk.bf16.gmra.mxu1 %vm890_vm0, %v10209_v6  ;;  %2124 = vmatprep.mubr.bf16.mxu0 %v14795_v2 }
 0x140   : > { %v11209_v20 = vadd.f32 %v1490_v17, %v1109_v13  ;;  %2902 = vmatprep.mubr.bf16.mxu1 %v14795_v2  ;;  %v1111_v25 = vpop.f32.mrf.mxu0  ;;  %v10213_v13 = vld [vmem:[%s10850_s29 + $0x58] sm:$0xff]  }
 0x141   : > { %v1492_v26 = vpop.f32.mrf.mxu1 }
 0x142   : > { %v11213_v30 = vadd.f32 %v1492_v26, %v1111_v25  ;;  %v1113_v32 = vpop.f32.mrf.mxu0 }
 0x143   : > { %v1494_v33 = vpop.f32.mrf.mxu1 }
 0x144   : > { %v11217_v42 = vadd.f32 %v1494_v33, %v1113_v32  ;;  %v1115_v46 = vpop.f32.mrf.mxu0 }
 0x145   : > { %v1496_v49 = vpop.f32.mrf.mxu1 }
 0x146   : > { %v11219_v51 = vadd.f32 %v1496_v49, %v1115_v46  ;;  %v1119_v52 = vpop.f32.mrf.mxu0  ;;  %9245 = vmatmul.mubr.msk.bf16.gmra.mxu0 %vm890_vm0, %v10210_v36 }
 0x147   : > { %v1500_v57 = vpop.f32.mrf.mxu1  ;;  %9325 = vmatmul.mubr.msk.bf16.gmra.mxu1 %vm890_vm0, %v10211_v41  ;;  %2134 = vmatprep.mubr.bf16.mxu0 %v14795_v2 }
 0x148   : > { %v11223_v58 = vadd.f32 %v1500_v57, %v1119_v52  ;;  %2912 = vmatprep.mubr.bf16.mxu1 %v14795_v2  ;;  %v1121_v62 = vpop.f32.mrf.mxu0 }
 0x149   : > { %v1502_v1 = vpop.f32.mrf.mxu1 }
 0x14a   : > { %v11227_v3 = vadd.f32 %v1502_v1, %v1121_v62  ;;  %v1123_v6 = vpop.f32.mrf.mxu0  ;;  %v10214_v1 = vld [vmem:[%s10850_s29 + $0x58] sm:$0xff]  }
 0x14b   : > { %v1504_v8 = vpop.f32.mrf.mxu1 }
 0x14c   : > { %v11231_v17 = vadd.f32 %v1504_v8, %v1123_v6  ;;  %v1125_v25 = vpop.f32.mrf.mxu0  ;;  %v10215_v6 = vld [vmem:[%s10850_s29 + $0x60] sm:$0xff]  }
 0x14d   : > { %v1506_v26 = vpop.f32.mrf.mxu1 }
 0x14e   : > { %v11233_v32 = vadd.f32 %v1506_v26, %v1125_v25  ;;  %v1129_v33 = vpop.f32.mrf.mxu0  ;;  %9246 = vmatmul.mubr.msk.bf16.gmra.mxu0 %vm890_vm0, %v10212_v10 }
 0x14f   : > { %v1510_v36 = vpop.f32.mrf.mxu1  ;;  %9326 = vmatmul.mubr.msk.bf16.gmra.mxu1 %vm890_vm0, %v10213_v13  ;;  %2144 = vmatprep.mubr.bf16.mxu0 %v14795_v2 }
 0x150   : > { %v11237_v41 = vadd.f32 %v1510_v36, %v1129_v33  ;;  %2922 = vmatprep.mubr.bf16.mxu1 %v14795_v2  ;;  %v1131_v46 = vpop.f32.mrf.mxu0 }
 0x151   : > { %v1512_v49 = vpop.f32.mrf.mxu1 }
 0x152   : > { %14809 = vst [vmem:[#allocation2_spill] sm:$0xff] %v11237_v41  ;;  %v11241_v52 = vadd.f32 %v1512_v49, %v1131_v46  ;;  %v1133_v57 = vpop.f32.mrf.mxu0 }
 0x153   : > { %v1514_v62 = vpop.f32.mrf.mxu1 }
 0x154   : > { %14810 = vst [vmem:[#allocation3_spill] sm:$0xff] %v11241_v52  ;;  %v11245_v8 = vadd.f32 %v1514_v62, %v1133_v57  ;;  %v1135_v25 = vpop.f32.mrf.mxu0  ;;  %v10254_v62 = vld [vmem:[%s14807_s1 + $0x1b0] ss:$8 sps:$4 sm:$0xff]  }
 0x155   : > { %v1516_v10 = vpop.f32.mrf.mxu1 }
 0x156   : > { %14811 = vst [vmem:[#allocation4_spill] sm:$0xff] %v11245_v8  ;;  %v11247_v13 = vadd.f32 %v1516_v10, %v1135_v25  ;;  %v1139_v26 = vpop.f32.mrf.mxu0  ;;  %9247 = vmatmul.mubr.msk.bf16.gmra.mxu0 %vm890_vm0, %v10214_v1  ;;  %v10256_v1 = vld [vmem:[%s14807_s1 + $0x1b4] ss:$8 sps:$4 sm:$0xff]   ;;  %v10216_v10 = vld [vmem:[%s10850_s29 + $0x60] sm:$0xff]   ;;  %v14818_v8 = vmov 0  }
 0x157   : > { %v1520_v33 = vpop.f32.mrf.mxu1  ;;  %9327 = vmatmul.mubr.msk.bf16.gmra.mxu1 %vm890_vm0, %v10215_v6  ;;  %2154 = vmatprep.mubr.bf16.mxu0 %v14795_v2 }
 0x158   : > { %14812 = vst [vmem:[#allocation5_spill] sm:$0xff] %v11247_v13  ;;  %v11251_v36 = vadd.f32 %v1520_v33, %v1139_v26  ;;  %2932 = vmatprep.mubr.bf16.mxu1 %v14795_v2  ;;  %v1141_v46 = vpop.f32.mrf.mxu0  ;;  %v10217_v26 = vld [vmem:[%s10850_s29 + $0x68] sm:$0xff]   ;;  %3586 = vmatprep.subr.bf16.mxu0 %v10256_v1 }
 0x159   : > { %v1522_v49 = vpop.f32.mrf.mxu1  ;;  %3587 = vmatpush1.bf16.msra.mxu0 %v10254_v62  ;;  %v10259_v62 = vld [vmem:[%s14807_s1 + $0x1a0] ss:$8 sps:$4 sm:$0xff]  }
 0x15a   : > { %14813 = vst [vmem:[#allocation6_spill] sm:$0xff] %v11251_v36  ;;  %v11255_v57 = vadd.f32 %v1522_v49, %v1141_v46  ;;  %v1143_v25 = vpop.f32.mrf.mxu0 }
 0x15b   : > { %v1524_v6 = vpop.f32.mrf.mxu1 }
 0x15c   : > { %14814 = vst [vmem:[#allocation7_spill] sm:$0xff] %v11255_v57  ;;  %v11265_v33 = vadd.f32 %v1524_v6, %v1143_v25  ;;  %v1145_v2 = vpop.f32.mrf.mxu0 }
 0x15d   : > { %v1526_v36 = vpop.f32.mrf.mxu1 }
 0x15e   : > { %14815 = vst [vmem:[#allocation8_spill] sm:$0xff] %v11265_v33  ;;  %v11267_v46 = vadd.f32 %v1526_v36, %v1145_v2  ;;  %v1149_v49 = vpop.f32.mrf.mxu0  ;;  %9248 = vmatmul.mubr.msk.bf16.gmra.mxu0 %vm890_vm0, %v10216_v10  ;;  %v10261_v2 = vld [vmem:[%s14807_s1 + $0x1a4] ss:$8 sps:$4 sm:$0xff]   ;;  %v10265_v33 = vld [vmem:[%s14807_s1 + $0x194] ss:$8 sps:$4 sm:$0xff]  }
 0x15f   : > { %v1530_v57 = vpop.f32.mrf.mxu1  ;;  %9328 = vmatmul.mubr.msk.bf16.gmra.mxu1 %vm890_vm0, %v10217_v26  ;;  %2164 = vmatprep.mubr.bf16.mxu0 %v14818_v8  ;;  %v10219_v26 = vld [vmem:[%s10850_s29 + $0x70] sm:$0xff]  }
 0x160   : > { %14816 = vst [vmem:[#allocation9_spill] sm:$0xff] %v11267_v46  ;;  %v11271_v13 = vadd.f32 %v1530_v57, %v1149_v49  ;;  %2942 = vmatprep.mubr.bf16.mxu1 %v14818_v8  ;;  %v1151_v1 = vpop.f32.mrf.mxu0  ;;  %v10218_v57 = vld [vmem:[%s10850_s29 + $0x68] sm:$0xff]   ;;  %3588 = vmatprep.subr.bf16.mxu0 %v10261_v2 }
 0x161   : > { %v1532_v25 = vpop.f32.mrf.mxu1  ;;  %3589 = vmatpush1.bf16.msra.mxu0 %v10259_v62  ;;  %v10269_v62 = vld [vmem:[%s14807_s1 + $0x184] ss:$8 sps:$4 sm:$0xff]  }
 0x162   : > { %14817 = vst [vmem:[#allocation10_spill] sm:$0xff] %v11271_v13  ;;  %v11278_v36 = vadd.f32 %v1532_v25, %v1151_v1  ;;  %v1153_v6 = vpop.f32.mrf.mxu0  ;;  %v10263_v25 = vld [vmem:[%s14807_s1 + $0x190] ss:$8 sps:$4 sm:$0xff]   ;;  %3590 = vmatprep.subr.bf16.mxu0 %v10265_v33 }
 0x163   : > { %v1534_v10 = vpop.f32.mrf.mxu1 }
 0x164   : > { %14819 = vst [vmem:[#allocation11_spill] sm:$0xff] %v11278_v36  ;;  %v11285_v49 = vadd.f32 %v1534_v10, %v1153_v6  ;;  %v1155_v13 = vpop.f32.mrf.mxu0  ;;  %v10267_v10 = vld [vmem:[%s14807_s1 + $0x180] ss:$8 sps:$4 sm:$0xff]  }
 0x165   : > { %v1536_v46 = vpop.f32.mrf.mxu1  ;;  %3591 = vmatpush1.bf16.msra.mxu0 %v10263_v25 }
 0x166   : > { %14820 = vst [vmem:[#allocation12_spill] sm:$0xff] %v11285_v49  ;;  %v11290_v1 = vadd.f32 %v1536_v46, %v1155_v13  ;;  %v1159_v36 = vpop.f32.mrf.mxu0  ;;  %9249 = vmatmul.mubr.msk.bf16.gmra.mxu0 %vm890_vm0, %v10218_v57  ;;  %v10220_v57 = vld [vmem:[%s10850_s29 + $0x70] sm:$0xff]   ;;  %3592 = vmatprep.subr.bf16.mxu0 %v10269_v62 }
 0x167   : > { %v1540_v52 = vpop.f32.mrf.mxu1  ;;  %9329 = vmatmul.mubr.msk.bf16.gmra.mxu1 %vm890_vm0, %v10219_v26  ;;  %2174 = vmatprep.mubr.bf16.mxu0 %v14818_v8  ;;  %v10221_v26 = vld [vmem:[%s10850_s29 + $0x78] sm:$0xff]  }
 0x168   : > { %14821 = vst [vmem:[#allocation13_spill] sm:$0xff] %v11290_v1  ;;  %v11297_v2 = vadd.f32 %v1540_v52, %v1159_v36  ;;  %2952 = vmatprep.mubr.bf16.mxu1 %v14818_v8  ;;  %v1161_v13 = vpop.f32.mrf.mxu0 }
 0x169   : > { %v1542_v46 = vpop.f32.mrf.mxu1  ;;  %3593 = vmatpush1.bf16.msra.mxu0 %v10267_v10  ;;  %v10223_v10 = vld [vmem:[%s10850_s29 + $0x80] sm:$0xff]  }
 0x16a   : > { %14822 = vst [vmem:[#allocation14_spill] sm:$0xff] %v11297_v2  ;;  %v11304_v6 = vadd.f32 %v1542_v46, %v1161_v13  ;;  %v1163_v52 = vpop.f32.mrf.mxu0 }
 0x16b   : > { %v1544_v36 = vpop.f32.mrf.mxu1 }
 0x16c   : > { %14823 = vst [vmem:[#allocation15_spill] sm:$0xff] %v11304_v6  ;;  %v11311_v2 = vadd.f32 %v1544_v36, %v1163_v52  ;;  %v1165_v1 = vpop.f32.mrf.mxu0 }
 0x16d   : > { %v1546_v33 = vpop.f32.mrf.mxu1 }
 0x16e   : > { %14824 = vst [vmem:[#allocation16_spill] sm:$0xff] %v11311_v2  ;;  %v11313_v49 = vadd.f32 %v1546_v33, %v1165_v1  ;;  %v1169_v13 = vpop.f32.mrf.mxu0  ;;  %9250 = vmatmul.mubr.msk.bf16.gmra.mxu0 %vm890_vm0, %v10220_v57  ;;  %v10222_v33 = vld [vmem:[%s10850_s29 + $0x78] sm:$0xff]  }
 0x16f   : > { %v1550_v25 = vpop.f32.mrf.mxu1  ;;  %9330 = vmatmul.mubr.msk.bf16.gmra.mxu1 %vm890_vm0, %v10221_v26  ;;  %2184 = vmatprep.mubr.bf16.mxu0 %v14818_v8 }
 0x170   : > { %14825 = vst [vmem:[#allocation17_spill] sm:$0xff] %v11313_v49  ;;  %v11317_v46 = vadd.f32 %v1550_v25, %v1169_v13  ;;  %2962 = vmatprep.mubr.bf16.mxu1 %v14818_v8  ;;  %v1171_v62 = vpop.f32.mrf.mxu0 }
 0x171   : > { %v1552_v52 = vpop.f32.mrf.mxu1 }
 0x172   : > { %14826 = vst [vmem:[#allocation18_spill] sm:$0xff] %v11317_v46  ;;  %v11321_v36 = vadd.f32 %v1552_v52, %v1171_v62  ;;  %v1173_v2 = vpop.f32.mrf.mxu0 }
 0x173   : > { %v1554_v1 = vpop.f32.mrf.mxu1 }
 0x174   : > { %14827 = vst [vmem:[#allocation19_spill] sm:$0xff] %v11321_v36  ;;  %v11325_v49 = vadd.f32 %v1554_v1, %v1173_v2  ;;  %v1175_v57 = vpop.f32.mrf.mxu0 }
 0x175   : > { %v1556_v26 = vpop.f32.mrf.mxu1 }
 0x176   : > { %14828 = vst [vmem:[#allocation20_spill] sm:$0xff] %v11325_v49  ;;  %v11327_v13 = vadd.f32 %v1556_v26, %v1175_v57  ;;  %v1179_v25 = vpop.f32.mrf.mxu0  ;;  %9251 = vmatmul.mubr.msk.bf16.gmra.mxu0 %vm890_vm0, %v10222_v33  ;;  %v10224_v57 = vld [vmem:[%s10850_s29 + $0x80] sm:$0xff]   ;;  %v10225_v26 = vld [vmem:[%s10850_s29 + $0x88] sm:$0xff]  }
 0x177   : > { %v1560_v46 = vpop.f32.mrf.mxu1  ;;  %9331 = vmatmul.mubr.msk.bf16.gmra.mxu1 %vm890_vm0, %v10223_v10  ;;  %2194 = vmatprep.mubr.bf16.mxu0 %v14818_v8 }
 0x178   : > { %14829 = vst [vmem:[#allocation21_spill] sm:$0xff] %v11327_v13  ;;  %v11331_v62 = vadd.f32 %v1560_v46, %v1179_v25  ;;  %2972 = vmatprep.mubr.bf16.mxu1 %v14818_v8  ;;  %v1181_v2 = vpop.f32.mrf.mxu0 }
 0x179   : > { %v1562_v52 = vpop.f32.mrf.mxu1 }
 0x17a   : > { %14830 = vst [vmem:[#allocation22_spill] sm:$0xff] %v11331_v62  ;;  %v11335_v1 = vadd.f32 %v1562_v52, %v1181_v2  ;;  %v1183_v49 = vpop.f32.mrf.mxu0 }
 0x17b   : > { %v1564_v36 = vpop.f32.mrf.mxu1 }
 0x17c   : > { %14831 = vst [vmem:[#allocation23_spill] sm:$0xff] %v11335_v1  ;;  %v11339_v13 = vadd.f32 %v1564_v36, %v1183_v49  ;;  %v1185_v33 = vpop.f32.mrf.mxu0 }
 0x17d   : > { %v1566_v10 = vpop.f32.mrf.mxu1 }
 0x17e   : > { %14832 = vst [vmem:[#allocation24_spill] sm:$0xff] %v11339_v13  ;;  %v11341_v46 = vadd.f32 %v1566_v10, %v1185_v33  ;;  %v1189_v25 = vpop.f32.mrf.mxu0  ;;  %9252 = vmatmul.mubr.msk.bf16.gmra.mxu0 %vm890_vm0, %v10224_v57  ;;  %v10226_v33 = vld [vmem:[%s10850_s29 + $0x88] sm:$0xff]   ;;  %v10227_v10 = vld [vmem:[%s10850_s29 + $0x90] sm:$0xff]  }
 0x17f   : > { %v1570_v62 = vpop.f32.mrf.mxu1  ;;  %9332 = vmatmul.mubr.msk.bf16.gmra.mxu1 %vm890_vm0, %v10225_v26  ;;  %2204 = vmatprep.mubr.bf16.mxu0 %v14818_v8 }
 0x180   : > { %14833 = vst [vmem:[#allocation25_spill] sm:$0xff] %v11341_v46  ;;  %v11345_v2 = vadd.f32 %v1570_v62, %v1189_v25  ;;  %2982 = vmatprep.mubr.bf16.mxu1 %v14818_v8  ;;  %v1191_v49 = vpop.f32.mrf.mxu0 }
 0x181   : > { %v1572_v36 = vpop.f32.mrf.mxu1 }
 0x182   : > { %14834 = vst [vmem:[#allocation26_spill] sm:$0xff] %v11345_v2  ;;  %v11349_v52 = vadd.f32 %v1572_v36, %v1191_v49  ;;  %v1193_v13 = vpop.f32.mrf.mxu0 }
 0x183   : > { %v1574_v1 = vpop.f32.mrf.mxu1 }
 0x184   : > { %14835 = vst [vmem:[#allocation27_spill] sm:$0xff] %v11349_v52  ;;  %v11353_v46 = vadd.f32 %v1574_v1, %v1193_v13  ;;  %v1195_v57 = vpop.f32.mrf.mxu0 }
 0x185   : > { %v1576_v26 = vpop.f32.mrf.mxu1 }
 0x186   : > { %14836 = vst [vmem:[#allocation28_spill] sm:$0xff] %v11353_v46  ;;  %v11355_v62 = vadd.f32 %v1576_v26, %v1195_v57  ;;  %v1199_v25 = vpop.f32.mrf.mxu0  ;;  %9253 = vmatmul.mubr.msk.bf16.gmra.mxu0 %vm890_vm0, %v10226_v33  ;;  %v10228_v57 = vld [vmem:[%s10850_s29 + $0x90] sm:$0xff]   ;;  %v10232_v26 = vld [vmem:[%s10850_s29 + $0x98] sm:$0xff]  }
 0x187   : > { %v1580_v2 = vpop.f32.mrf.mxu1  ;;  %9333 = vmatmul.mubr.msk.bf16.gmra.mxu1 %vm890_vm0, %v10227_v10  ;;  %2214 = vmatprep.mubr.bf16.mxu0 %v14818_v8 }
 0x188   : > { %14837 = vst [vmem:[#allocation29_spill] sm:$0xff] %v11355_v62  ;;  %v11359_v49 = vadd.f32 %v1580_v2, %v1199_v25  ;;  %2992 = vmatprep.mubr.bf16.mxu1 %v14818_v8  ;;  %v1201_v13 = vpop.f32.mrf.mxu0 }
 0x189   : > { %v1582_v1 = vpop.f32.mrf.mxu1 }
 0x18a   : > { %14838 = vst [vmem:[#allocation30_spill] sm:$0xff] %v11359_v49  ;;  %v11363_v36 = vadd.f32 %v1582_v1, %v1201_v13  ;;  %v1203_v46 = vpop.f32.mrf.mxu0 }
 0x18b   : > { %v1584_v52 = vpop.f32.mrf.mxu1 }
 0x18c   : > { %14839 = vst [vmem:[#allocation31_spill] sm:$0xff] %v11363_v36  ;;  %v11367_v62 = vadd.f32 %v1584_v52, %v1203_v46  ;;  %v1205_v33 = vpop.f32.mrf.mxu0 }
 0x18d   : > { %v1586_v10 = vpop.f32.mrf.mxu1 }
 0x18e   : > { %14840 = vst [vmem:[#allocation32_spill] sm:$0xff] %v11367_v62  ;;  %v11369_v2 = vadd.f32 %v1586_v10, %v1205_v33  ;;  %v1209_v25 = vpop.f32.mrf.mxu0  ;;  %9254 = vmatmul.mubr.msk.bf16.gmra.mxu0 %vm890_vm0, %v10228_v57  ;;  %v10233_v33 = vld [vmem:[%s10850_s29 + $0x98] sm:$0xff]   ;;  %v10234_v10 = vld [vmem:[%s10850_s29 + $0xa0] sm:$0xff]  }
 0x18f   : > { %v1590_v49 = vpop.f32.mrf.mxu1  ;;  %9334 = vmatmul.mubr.msk.bf16.gmra.mxu1 %vm890_vm0, %v10232_v26  ;;  %2224 = vmatprep.mubr.bf16.mxu0 %v14818_v8 }
 0x190   : > { %14841 = vst [vmem:[#allocation33_spill] sm:$0xff] %v11369_v2  ;;  %v11373_v13 = vadd.f32 %v1590_v49, %v1209_v25  ;;  %3002 = vmatprep.mubr.bf16.mxu1 %v14818_v8  ;;  %v1211_v46 = vpop.f32.mrf.mxu0 }
 0x191   : > { %v1592_v52 = vpop.f32.mrf.mxu1 }
 0x192   : > { %14842 = vst [vmem:[#allocation34_spill] sm:$0xff] %v11373_v13  ;;  %v11377_v1 = vadd.f32 %v1592_v52, %v1211_v46  ;;  %v1213_v62 = vpop.f32.mrf.mxu0 }
 0x193   : > { %v1594_v36 = vpop.f32.mrf.mxu1 }
 0x194   : > { %14843 = vst [vmem:[#allocation35_spill] sm:$0xff] %v11377_v1  ;;  %v11381_v2 = vadd.f32 %v1594_v36, %v1213_v62  ;;  %v1215_v57 = vpop.f32.mrf.mxu0 }
 0x195   : > { %v1596_v26 = vpop.f32.mrf.mxu1 }
 0x196   : > { %14844 = vst [vmem:[#allocation36_spill] sm:$0xff] %v11381_v2  ;;  %v11383_v49 = vadd.f32 %v1596_v26, %v1215_v57  ;;  %v1219_v25 = vpop.f32.mrf.mxu0  ;;  %9255 = vmatmul.mubr.msk.bf16.gmra.mxu0 %vm890_vm0, %v10233_v33  ;;  %v10235_v57 = vld [vmem:[%s10850_s29 + $0xa0] sm:$0xff]   ;;  %v10236_v26 = vld [vmem:[%s10850_s29 + $0xa8] sm:$0xff]  }
 0x197   : > { %v1600_v13 = vpop.f32.mrf.mxu1  ;;  %9335 = vmatmul.mubr.msk.bf16.gmra.mxu1 %vm890_vm0, %v10234_v10  ;;  %2234 = vmatprep.mubr.bf16.mxu0 %v14818_v8 }
 0x198   : > { %14845 = vst [vmem:[#allocation37_spill] sm:$0xff] %v11383_v49  ;;  %v11387_v46 = vadd.f32 %v1600_v13, %v1219_v25  ;;  %3012 = vmatprep.mubr.bf16.mxu1 %v14818_v8  ;;  %v1221_v62 = vpop.f32.mrf.mxu0 }
 0x199   : > { %v1602_v36 = vpop.f32.mrf.mxu1 }
 0x19a   : > { %14846 = vst [vmem:[#allocation38_spill] sm:$0xff] %v11387_v46  ;;  %v11391_v52 = vadd.f32 %v1602_v36, %v1221_v62  ;;  %v1223_v2 = vpop.f32.mrf.mxu0 }
 0x19b   : > { %v1604_v1 = vpop.f32.mrf.mxu1 }
 0x19c   : > { %14847 = vst [vmem:[#allocation39_spill] sm:$0xff] %v11391_v52  ;;  %v11395_v49 = vadd.f32 %v1604_v1, %v1223_v2  ;;  %v1225_v33 = vpop.f32.mrf.mxu0 }
 0x19d   : > { %v1606_v10 = vpop.f32.mrf.mxu1 }
 0x19e   : > { %14848 = vst [vmem:[#allocation40_spill] sm:$0xff] %v11395_v49  ;;  %v11397_v13 = vadd.f32 %v1606_v10, %v1225_v33  ;;  %v1229_v25 = vpop.f32.mrf.mxu0  ;;  %9256 = vmatmul.mubr.msk.bf16.gmra.mxu0 %vm890_vm0, %v10235_v57  ;;  %v10237_v33 = vld [vmem:[%s10850_s29 + $0xa8] sm:$0xff]   ;;  %v10238_v10 = vld [vmem:[%s10850_s29 + $0xb0] sm:$0xff]  }
 0x19f   : > { %v1610_v46 = vpop.f32.mrf.mxu1  ;;  %9336 = vmatmul.mubr.msk.bf16.gmra.mxu1 %vm890_vm0, %v10236_v26  ;;  %2244 = vmatprep.mubr.bf16.mxu0 %v14818_v8 }
 0x1a0   : > { %14849 = vst [vmem:[#allocation41_spill] sm:$0xff] %v11397_v13  ;;  %v11401_v62 = vadd.f32 %v1610_v46, %v1229_v25  ;;  %3022 = vmatprep.mubr.bf16.mxu1 %v14818_v8  ;;  %v1231_v2 = vpop.f32.mrf.mxu0 }
 0x1a1   : > { %v1612_v1 = vpop.f32.mrf.mxu1 }
 0x1a2   : > { %14850 = vst [vmem:[#allocation42_spill] sm:$0xff] %v11401_v62  ;;  %v11405_v36 = vadd.f32 %v1612_v1, %v1231_v2  ;;  %v1233_v49 = vpop.f32.mrf.mxu0 }
 0x1a3   : > { %v1614_v52 = vpop.f32.mrf.mxu1 }
 0x1a4   : > { %14851 = vst [vmem:[#allocation43_spill] sm:$0xff] %v11405_v36  ;;  %v11409_v13 = vadd.f32 %v1614_v52, %v1233_v49  ;;  %v1235_v57 = vpop.f32.mrf.mxu0 }
 0x1a5   : > { %v1616_v26 = vpop.f32.mrf.mxu1 }
 0x1a6   : > { %14852 = vst [vmem:[#allocation44_spill] sm:$0xff] %v11409_v13  ;;  %v11411_v46 = vadd.f32 %v1616_v26, %v1235_v57  ;;  %v1239_v25 = vpop.f32.mrf.mxu0  ;;  %9257 = vmatmul.mubr.msk.bf16.gmra.mxu0 %vm890_vm0, %v10237_v33  ;;  %v10239_v57 = vld [vmem:[%s10850_s29 + $0xb0] sm:$0xff]   ;;  %v10240_v26 = vld [vmem:[%s10850_s29 + $0xb8] sm:$0xff]  }
 0x1a7   : > { %v1620_v62 = vpop.f32.mrf.mxu1  ;;  %9337 = vmatmul.mubr.msk.bf16.gmra.mxu1 %vm890_vm0, %v10238_v10  ;;  %2254 = vmatprep.mubr.bf16.mxu0 %v14818_v8 }
 0x1a8   : > { %14853 = vst [vmem:[#allocation45_spill] sm:$0xff] %v11411_v46  ;;  %v11415_v2 = vadd.f32 %v1620_v62, %v1239_v25  ;;  %3032 = vmatprep.mubr.bf16.mxu1 %v14818_v8  ;;  %v1241_v49 = vpop.f32.mrf.mxu0 }
 0x1a9   : > { %v1622_v52 = vpop.f32.mrf.mxu1 }
 0x1aa   : > { %14854 = vst [vmem:[#allocation46_spill] sm:$0xff] %v11415_v2  ;;  %v11419_v1 = vadd.f32 %v1622_v52, %v1241_v49  ;;  %v1243_v13 = vpop.f32.mrf.mxu0 }
 0x1ab   : > { %v1624_v36 = vpop.f32.mrf.mxu1 }
 0x1ac   : > { %14855 = vst [vmem:[#allocation47_spill] sm:$0xff] %v11419_v1  ;;  %v11423_v46 = vadd.f32 %v1624_v36, %v1243_v13  ;;  %v1245_v33 = vpop.f32.mrf.mxu0 }
 0x1ad   : > { %v1626_v10 = vpop.f32.mrf.mxu1 }
 0x1ae   : > { %14856 = vst [vmem:[#allocation48_spill] sm:$0xff] %v11423_v46  ;;  %v11425_v62 = vadd.f32 %v1626_v10, %v1245_v33  ;;  %v1249_v25 = vpop.f32.mrf.mxu0  ;;  %9258 = vmatmul.mubr.msk.bf16.gmra.mxu0 %vm890_vm0, %v10239_v57  ;;  %v10244_v33 = vld [vmem:[%s10850_s29 + $0xb8] sm:$0xff]   ;;  %v10245_v10 = vld [vmem:[%s10850_s29 + $0xc0] sm:$0xff]  }
 0x1af   : > { %v1630_v2 = vpop.f32.mrf.mxu1  ;;  %9338 = vmatmul.mubr.msk.bf16.gmra.mxu1 %vm890_vm0, %v10240_v26  ;;  %2264 = vmatprep.mubr.bf16.mxu0 %v14818_v8 }
 0x1b0   : > { %14857 = vst [vmem:[#allocation49_spill] sm:$0xff] %v11425_v62  ;;  %v11429_v49 = vadd.f32 %v1630_v2, %v1249_v25  ;;  %3042 = vmatprep.mubr.bf16.mxu1 %v14818_v8  ;;  %v1251_v13 = vpop.f32.mrf.mxu0 }
 0x1b1   : > { %v1632_v36 = vpop.f32.mrf.mxu1 }
 0x1b2   : > { %14858 = vst [vmem:[#allocation50_spill] sm:$0xff] %v11429_v49  ;;  %v11433_v52 = vadd.f32 %v1632_v36, %v1251_v13  ;;  %v1253_v46 = vpop.f32.mrf.mxu0 }
 0x1b3   : > { %v1634_v1 = vpop.f32.mrf.mxu1 }
 0x1b4   : > { %14859 = vst [vmem:[#allocation51_spill] sm:$0xff] %v11433_v52  ;;  %v11437_v62 = vadd.f32 %v1634_v1, %v1253_v46  ;;  %v1255_v57 = vpop.f32.mrf.mxu0 }
 0x1b5   : > { %v1636_v26 = vpop.f32.mrf.mxu1 }
 0x1b6   : > { %14860 = vst [vmem:[#allocation52_spill] sm:$0xff] %v11437_v62  ;;  %v11439_v2 = vadd.f32 %v1636_v26, %v1255_v57  ;;  %v1259_v25 = vpop.f32.mrf.mxu0  ;;  %9259 = vmatmul.mubr.msk.bf16.gmra.mxu0 %vm890_vm0, %v10244_v33  ;;  %v10246_v57 = vld [vmem:[%s10850_s29 + $0xc0] sm:$0xff]   ;;  %v10247_v26 = vld [vmem:[%s10850_s29 + $0xc8] sm:$0xff]  }
 0x1b7   : > { %v1640_v49 = vpop.f32.mrf.mxu1  ;;  %9339 = vmatmul.mubr.msk.bf16.gmra.mxu1 %vm890_vm0, %v10245_v10  ;;  %2274 = vmatprep.mubr.bf16.mxu0 %v14818_v8 }
 0x1b8   : > { %14861 = vst [vmem:[#allocation53_spill] sm:$0xff] %v11439_v2  ;;  %v11443_v13 = vadd.f32 %v1640_v49, %v1259_v25  ;;  %3052 = vmatprep.mubr.bf16.mxu1 %v14818_v8  ;;  %v1261_v46 = vpop.f32.mrf.mxu0 }
 0x1b9   : > { %v1642_v1 = vpop.f32.mrf.mxu1 }
 0x1ba   : > { %14862 = vst [vmem:[#allocation54_spill] sm:$0xff] %v11443_v13  ;;  %v11447_v36 = vadd.f32 %v1642_v1, %v1261_v46  ;;  %v1263_v62 = vpop.f32.mrf.mxu0 }
 0x1bb   : > { %v1644_v52 = vpop.f32.mrf.mxu1 }
 0x1bc   : > { %14863 = vst [vmem:[#allocation55_spill] sm:$0xff] %v11447_v36  ;;  %v11451_v2 = vadd.f32 %v1644_v52, %v1263_v62  ;;  %v1265_v33 = vpop.f32.mrf.mxu0 }
 0x1bd   : > { %v1646_v10 = vpop.f32.mrf.mxu1 }
 0x1be   : > { %14864 = vst [vmem:[#allocation56_spill] sm:$0xff] %v11451_v2  ;;  %v11453_v49 = vadd.f32 %v1646_v10, %v1265_v33  ;;  %v1269_v25 = vpop.f32.mrf.mxu0  ;;  %9260 = vmatmul.mubr.msk.bf16.gmra.mxu0 %vm890_vm0, %v10246_v57  ;;  %v10248_v33 = vld [vmem:[%s10850_s29 + $0xc8] sm:$0xff]   ;;  %v10249_v10 = vld [vmem:[%s10850_s29 + $0xd0] sm:$0xff]  }
 0x1bf   : > { %v1650_v13 = vpop.f32.mrf.mxu1  ;;  %9340 = vmatmul.mubr.msk.bf16.gmra.mxu1 %vm890_vm0, %v10247_v26  ;;  %2284 = vmatprep.mubr.bf16.mxu0 %v14818_v8 }
 0x1c0   : > { %14865 = vst [vmem:[#allocation57_spill] sm:$0xff] %v11453_v49  ;;  %v11457_v46 = vadd.f32 %v1650_v13, %v1269_v25  ;;  %3062 = vmatprep.mubr.bf16.mxu1 %v14818_v8  ;;  %v1271_v62 = vpop.f32.mrf.mxu0 }
 0x1c1   : > { %v1652_v52 = vpop.f32.mrf.mxu1 }
 0x1c2   : > { %14866 = vst [vmem:[#allocation58_spill] sm:$0xff] %v11457_v46  ;;  %v11461_v1 = vadd.f32 %v1652_v52, %v1271_v62  ;;  %v1273_v2 = vpop.f32.mrf.mxu0 }
 0x1c3   : > { %v1654_v36 = vpop.f32.mrf.mxu1 }
 0x1c4   : > { %14867 = vst [vmem:[#allocation59_spill] sm:$0xff] %v11461_v1  ;;  %v11465_v49 = vadd.f32 %v1654_v36, %v1273_v2  ;;  %v1275_v57 = vpop.f32.mrf.mxu0 }
 0x1c5   : > { %v1656_v26 = vpop.f32.mrf.mxu1 }
 0x1c6   : > { %14868 = vst [vmem:[#allocation60_spill] sm:$0xff] %v11465_v49  ;;  %v11467_v13 = vadd.f32 %v1656_v26, %v1275_v57  ;;  %v1279_v25 = vpop.f32.mrf.mxu0  ;;  %9261 = vmatmul.mubr.msk.bf16.gmra.mxu0 %vm890_vm0, %v10248_v33  ;;  %v10250_v57 = vld [vmem:[%s10850_s29 + $0xd0] sm:$0xff]   ;;  %v10251_v26 = vld [vmem:[%s10850_s29 + $0xd8] sm:$0xff]  }
 0x1c7   : > { %v1660_v46 = vpop.f32.mrf.mxu1  ;;  %9341 = vmatmul.mubr.msk.bf16.gmra.mxu1 %vm890_vm0, %v10249_v10  ;;  %2294 = vmatprep.mubr.bf16.mxu0 %v14818_v8 }
 0x1c8   : > { %14869 = vst [vmem:[#allocation61_spill] sm:$0xff] %v11467_v13  ;;  %v11471_v62 = vadd.f32 %v1660_v46, %v1279_v25  ;;  %3072 = vmatprep.mubr.bf16.mxu1 %v14818_v8  ;;  %v1281_v2 = vpop.f32.mrf.mxu0 }
 0x1c9   : > { %v1662_v36 = vpop.f32.mrf.mxu1 }
 0x1ca   : > { %14870 = vst [vmem:[#allocation62_spill] sm:$0xff] %v11471_v62  ;;  %v11475_v52 = vadd.f32 %v1662_v36, %v1281_v2  ;;  %v1283_v49 = vpop.f32.mrf.mxu0 }
 0x1cb   : > { %v1664_v1 = vpop.f32.mrf.mxu1 }
 0x1cc   : > { %14871 = vst [vmem:[#allocation63_spill] sm:$0xff] %v11475_v52  ;;  %v11479_v13 = vadd.f32 %v1664_v1, %v1283_v49  ;;  %v1285_v6 = vpop.f32.mrf.mxu0  ;;  %v10253_v52 = vld [vmem:[%s10850_s29 + $0xe0] sm:$0xff]  }
 0x1cd   : > { %v1666_v33 = vpop.f32.mrf.mxu1 }
 0x1ce   : > { %14872 = vst [vmem:[#allocation64_spill] sm:$0xff] %v11479_v13  ;;  %v11481_v46 = vadd.f32 %v1666_v33, %v1285_v6  ;;  %v2056_v10 = vpop.f32.mrf.mxu0  ;;  %9262 = vmatmul.mubr.msk.bf16.gmra.mxu0 %vm890_vm0, %v10250_v57 }
 0x1cf   : > { %v2834_v25 = vpop.f32.mrf.mxu1  ;;  %9342 = vmatmul.mubr.msk.bf16.gmra.mxu1 %vm890_vm0, %v10251_v26  ;;  %v2335_v2 = vadd.f32 %v2056_v10, %v11060_v14  ;;  %2304 = vmatprep.mubr.bf16.mxu0 %v14818_v8 }
 0x1d0   : > { %14873 = vst [vmem:[#allocation65_spill] sm:$0xff] %v11481_v46  ;;  %3082 = vmatprep.mubr.bf16.mxu1 %v14818_v8  ;;  %v2058_v49 = vpop.f32.mrf.mxu0  ;;  %v10252_v46 = vld [vmem:[%s10850_s29 + $0xd8] sm:$0xff]  }
 0x1d1   : > { %v2836_v1 = vpop.f32.mrf.mxu1  ;;  %v2336_v36 = vadd.f32 %v2058_v49, %v11065_v18  ;;  %v11489_v13 = vadd.f32 %v2834_v25, %v2335_v2 }
 0x1d2   : > { %v2060_v6 = vpop.f32.mrf.mxu0 }
 0x1d3   : > { %v2838_v33 = vpop.f32.mrf.mxu1  ;;  %v2337_v57 = vadd.f32 %v2060_v6, %v11067_v21  ;;  %v11494_v62 = vadd.f32 %v2836_v1, %v2336_v36 }
 0x1d4   : > { %v2062_v26 = vpop.f32.mrf.mxu0 }
 0x1d5   : > { %v11496_v14 = vpop.f32.mrf.mxu1  ;;  %v11499_v10 = vadd.f32 %v2062_v26, %v11069_v24  ;;  %v11501_v41 = vadd.f32 %v2838_v33, %v2337_v57  ;;  %v10257_v33 = vld [vmem:[%s10850_s29 + $0xe0] sm:$0xff]   ;;  %v10258_v57 = vld [vmem:[%s10850_s29 + $0xe8] sm:$0xff]  }
 0x1d6   : > { %v2066_v18 = vpop.f32.mrf.mxu0  ;;  %9263 = vmatmul.mubr.msk.bf16.gmra.mxu0 %vm890_vm0, %v10252_v46 }
 0x1d7   : > { %14874 = vst [vmem:[#allocation66_spill] sm:$0xff] %v11501_v41  ;;  %v2844_v25 = vpop.f32.mrf.mxu1  ;;  %9343 = vmatmul.mubr.msk.bf16.gmra.mxu1 %vm890_vm0, %v10253_v52  ;;  %v2339_v21 = vadd.f32 %v2066_v18, %v11073_v27  ;;  %2314 = vmatprep.mubr.bf16.mxu0 %v14818_v8 }
 0x1d8   : > { %3092 = vmatprep.mubr.bf16.mxu1 %v14818_v8  ;;  %v2068_v2 = vpop.f32.mrf.mxu0 }
 0x1d9   : > { %v2846_v49 = vpop.f32.mrf.mxu1  ;;  %v2340_v24 = vadd.f32 %v2068_v2, %v11078_v31  ;;  %v11509_v1 = vadd.f32 %v2844_v25, %v2339_v21 }
 0x1da   : > { %v2070_v36 = vpop.f32.mrf.mxu0 }
 0x1db   : > { %v2848_v6 = vpop.f32.mrf.mxu1  ;;  %v2341_v46 = vadd.f32 %v2070_v36, %v11080_v34  ;;  %v11514_v26 = vadd.f32 %v2846_v49, %v2340_v24 }
 0x1dc   : > { %v2072_v52 = vpop.f32.mrf.mxu0 }
 0x1dd   : > { %v11516_v27 = vpop.f32.mrf.mxu1  ;;  %v11519_v18 = vadd.f32 %v2072_v52, %v11082_v37  ;;  %v11521_v41 = vadd.f32 %v2848_v6, %v2341_v46  ;;  %v10262_v6 = vld [vmem:[%s10850_s29 + $0xe8] sm:$0xff]  }
 0x1de   : > { %v2076_v31 = vpop.f32.mrf.mxu0  ;;  %9264 = vmatmul.mubr.msk.bf16.gmra.mxu0 %vm890_vm0, %v10257_v33  ;;  %v10266_v33 = vld [vmem:[%s10850_s29 + $0xf0] sm:$0xff]  }
 0x1df   : > { %v2854_v25 = vpop.f32.mrf.mxu1  ;;  %9344 = vmatmul.mubr.msk.bf16.gmra.mxu1 %vm890_vm0, %v10258_v57  ;;  %v2343_v34 = vadd.f32 %v2076_v31, %v11086_v40  ;;  %2324 = vmatprep.mubr.bf16.mxu0 %v14818_v8 }
 0x1e0   : > { %3102 = vmatprep.mubr.bf16.mxu1 %v14818_v8  ;;  %v2078_v21 = vpop.f32.mrf.mxu0 }
 0x1e1   : > { %v11528_v2 = vpop.f32.mrf.mxu1  ;;  %v11531_v37 = vadd.f32 %v2078_v21, %v11091_v44  ;;  %v11533_v49 = vadd.f32 %v2854_v25, %v2343_v34 }
 0x1e2   : > { %v2080_v24 = vpop.f32.mrf.mxu0 }
 0x1e3   : > { %v11535_v36 = vpop.f32.mrf.mxu1  ;;  %v11540_v40 = vadd.f32 %v2080_v24, %v11093_v47 }
 0x1e4   : > { %v2082_v57 = vpop.f32.mrf.mxu0 }
 0x1e5   : > { %v11542_v46 = vpop.f32.mrf.mxu1  ;;  %v11545_v52 = vadd.f32 %v2082_v57, %v11095_v50 }
 0x1e6   : > { %v2086_v31 = vpop.f32.mrf.mxu0  ;;  %9265 = vmatmul.mubr.msk.bf16.gmra.mxu0 %vm890_vm0, %v10262_v6  ;;  %v10270_v6 = vld [vmem:[%s10850_s29 + $0x20] sm:$0xff]  }
 0x1e7   : > { %v11548_v44 = vpop.f32.mrf.mxu1  ;;  %9345 = vmatmul.mubr.msk.bf16.gmra.mxu1 %vm890_vm0, %v10266_v33  ;;  %v11552_v25 = vadd.f32 %v2086_v31, %v11099_v53  ;;  %3610 = vmatprep.mubr.bf16.mxu0 %v14818_v8 }
 0x1e8   : > { %14875 = vst [vmem:[#allocation67_spill] sm:$0xff] %v11548_v44  ;;  %v2088_v47 = vpop.f32.mrf.mxu0 }
 0x1e9   : > { %v11555_v34 = vpop.f32.mrf.mxu1  ;;  %v11558_v21 = vadd.f32 %v2088_v47, %v11103_v56 }
 0x1ea   : > { %14876 = vst [vmem:[#allocation68_spill] sm:$0xff] %v11555_v34  ;;  %v2090_v50 = vpop.f32.mrf.mxu0 }
 0x1eb   : > { %v11560_v24 = vpop.f32.mrf.mxu1  ;;  %v11564_v57 = vadd.f32 %v2090_v50, %v11107_v61 }
 0x1ec   : > { %14877 = vst [vmem:[#allocation69_spill] sm:$0xff] %v11560_v24  ;;  %v2092_v33 = vpop.f32.mrf.mxu0 }
 0x1ed   : > { %v11566_v44 = vpop.f32.mrf.mxu1  ;;  %v11569_v53 = vadd.f32 %v2092_v33, %v11109_v0  ;;  %v10271_v0 = vld [vmem:[%s10850_s29 + $0x28] sm:$0xff]  }
 0x1ee   : > { %14878 = vst [vmem:[#allocation70_spill] sm:$0xff] %v11566_v44  ;;  %v2096_v31 = vpop.f32.mrf.mxu0  ;;  %9398 = vmatmul.mubr.msk.bf16.vlgmr.msra.gmra.mxu0 %vm890_vm0, %v10270_v6 }
 0x1ef   : > { %v11572_v34 = vpop.f32.mrf.mxu1  ;;  %v11575_v56 = vadd.f32 %v2096_v31, %v11113_v4  ;;  %3620 = vmatprep.mubr.bf16.mxu0 %v14818_v8 }
 0x1f0   : > { %14879 = vst [vmem:[#allocation71_spill] sm:$0xff] %v11572_v34  ;;  %v2098_v47 = vpop.f32.mrf.mxu0 }
 0x1f1   : > { %v11578_v24 = vpop.f32.mrf.mxu1  ;;  %v11581_v61 = vadd.f32 %v2098_v47, %v11123_v9 }
 0x1f2   : > { %14880 = vst [vmem:[#allocation72_spill] sm:$0xff] %v11578_v24  ;;  %v2100_v50 = vpop.f32.mrf.mxu0 }
 0x1f3   : > { %v11583_v44 = vpop.f32.mrf.mxu1  ;;  %v11587_v6 = vadd.f32 %v2100_v50, %v11127_v15 }
 0x1f4   : > { %14881 = vst [vmem:[#allocation73_spill] sm:$0xff] %v11583_v44  ;;  %v2102_v33 = vpop.f32.mrf.mxu0 }
 0x1f5   : > { %v11589_v34 = vpop.f32.mrf.mxu1  ;;  %v11592_v4 = vadd.f32 %v2102_v33, %v11129_v19  ;;  %v10272_v19 = vld [vmem:[%s10850_s29 + $0x30] sm:$0xff]  }
 0x1f6   : > { %14882 = vst [vmem:[#allocation74_spill] sm:$0xff] %v11589_v34  ;;  %v2106_v31 = vpop.f32.mrf.mxu0  ;;  %9399 = vmatmul.mubr.msk.bf16.gmra.mxu0 %vm890_vm0, %v10271_v0 }
 0x1f7   : > { %v11595_v24 = vpop.f32.mrf.mxu1  ;;  %v11598_v9 = vadd.f32 %v2106_v31, %v11133_v23  ;;  %3630 = vmatprep.mubr.bf16.mxu0 %v14818_v8 }
 0x1f8   : > { %14883 = vst [vmem:[#allocation75_spill] sm:$0xff] %v11595_v24  ;;  %v2108_v47 = vpop.f32.mrf.mxu0 }
 0x1f9   : > { %v11601_v44 = vpop.f32.mrf.mxu1  ;;  %v11604_v15 = vadd.f32 %v2108_v47, %v11137_v28 }
 0x1fa   : > { %14884 = vst [vmem:[#allocation76_spill] sm:$0xff] %v11601_v44  ;;  %v2110_v50 = vpop.f32.mrf.mxu0 }
 0x1fb   : > { %v11606_v34 = vpop.f32.mrf.mxu1  ;;  %v11610_v0 = vadd.f32 %v2110_v50, %v11141_v35 }
 0x1fc   : > { %14885 = vst [vmem:[#allocation77_spill] sm:$0xff] %v11606_v34  ;;  %v2112_v33 = vpop.f32.mrf.mxu0 }
 0x1fd   : > { %v11612_v24 = vpop.f32.mrf.mxu1  ;;  %v11615_v23 = vadd.f32 %v2112_v33, %v11143_v39  ;;  %v10273_v39 = vld [vmem:[%s10850_s29 + $0x38] sm:$0xff]  }
 0x1fe   : > { %14886 = vst [vmem:[#allocation78_spill] sm:$0xff] %v11612_v24  ;;  %v2116_v31 = vpop.f32.mrf.mxu0  ;;  %9400 = vmatmul.mubr.msk.bf16.gmra.mxu0 %vm890_vm0, %v10272_v19 }
 0x1ff   : > { %v11618_v44 = vpop.f32.mrf.mxu1  ;;  %v11621_v28 = vadd.f32 %v2116_v31, %v11147_v43  ;;  %3640 = vmatprep.mubr.bf16.mxu0 %v14818_v8 }
 0x200   : > { %14887 = vst [vmem:[#allocation79_spill] sm:$0xff] %v11618_v44  ;;  %v2118_v47 = vpop.f32.mrf.mxu0 }
 0x201   : > { %v11624_v34 = vpop.f32.mrf.mxu1  ;;  %v11627_v35 = vadd.f32 %v2118_v47, %v11151_v48 }
 0x202   : > { %14888 = vst [vmem:[#allocation80_spill] sm:$0xff] %v11624_v34  ;;  %v2120_v50 = vpop.f32.mrf.mxu0 }
 0x203   : > { %v11629_v24 = vpop.f32.mrf.mxu1  ;;  %v11633_v19 = vadd.f32 %v2120_v50, %v11155_v55 }
 0x204   : > { %14889 = vst [vmem:[#allocation81_spill] sm:$0xff] %v11629_v24  ;;  %v2122_v33 = vpop.f32.mrf.mxu0 }
 0x205   : > { %v11635_v44 = vpop.f32.mrf.mxu1  ;;  %v11638_v43 = vadd.f32 %v2122_v33, %v11157_v59  ;;  %v10274_v59 = vld [vmem:[%s10850_s29 + $0x40] sm:$0xff]  }
 0x206   : > { %14890 = vst [vmem:[#allocation82_spill] sm:$0xff] %v11635_v44  ;;  %v2126_v31 = vpop.f32.mrf.mxu0  ;;  %9401 = vmatmul.mubr.msk.bf16.gmra.mxu0 %vm890_vm0, %v10273_v39 }
 0x207   : > { %v11641_v34 = vpop.f32.mrf.mxu1  ;;  %v11644_v48 = vadd.f32 %v2126_v31, %v11161_v63  ;;  %3650 = vmatprep.mubr.bf16.mxu0 %v14818_v8 }
 0x208   : > { %14891 = vst [vmem:[#allocation83_spill] sm:$0xff] %v11641_v34  ;;  %v2128_v47 = vpop.f32.mrf.mxu0 }
 0x209   : > { %14892 = vst [vmem:[#allocation84_spill] sm:$0xff] %v11644_v48  ;;  %v11647_v24 = vpop.f32.mrf.mxu1  ;;  %v11650_v55 = vadd.f32 %v2128_v47, %v11165_v5 }
 0x20a   : > { %14893 = vst [vmem:[#allocation85_spill] sm:$0xff] %v11647_v24  ;;  %v2130_v50 = vpop.f32.mrf.mxu0 }
 0x20b   : > { %14894 = vst [vmem:[#allocation86_spill] sm:$0xff] %v11650_v55  ;;  %v11652_v44 = vpop.f32.mrf.mxu1  ;;  %v11656_v39 = vadd.f32 %v2130_v50, %v11169_v11 }
 0x20c   : > { %14895 = vst [vmem:[#allocation87_spill] sm:$0xff] %v11652_v44  ;;  %v2132_v33 = vpop.f32.mrf.mxu0 }
 0x20d   : > { %14896 = vst [vmem:[#allocation88_spill] sm:$0xff] %v11656_v39  ;;  %v11658_v34 = vpop.f32.mrf.mxu1  ;;  %v11661_v63 = vadd.f32 %v2132_v33, %v11171_v16 }
 0x20e   : > { %14897 = vst [vmem:[#allocation89_spill] sm:$0xff] %v11658_v34  ;;  %v2136_v31 = vpop.f32.mrf.mxu0  ;;  %9402 = vmatmul.mubr.msk.bf16.gmra.mxu0 %vm890_vm0, %v10274_v59  ;;  %v10275_v34 = vld [vmem:[%s10850_s29 + $0x48] sm:$0xff]  }
 0x20f   : > { %14898 = vst [vmem:[#allocation90_spill] sm:$0xff] %v11661_v63  ;;  %v2914_v24 = vpop.f32.mrf.mxu1  ;;  %v2367_v5 = vadd.f32 %v2136_v31, %v11175_v22  ;;  %3660 = vmatprep.mubr.bf16.mxu0 %v14818_v8 }
 0x210   : > { %v2138_v47 = vpop.f32.mrf.mxu0 }
 0x211   : > { %v2916_v44 = vpop.f32.mrf.mxu1  ;;  %v2368_v55 = vadd.f32 %v2138_v47, %v11179_v29  ;;  %v11667_v11 = vadd.f32 %v2914_v24, %v2367_v5 }
 0x212   : > { %v2140_v50 = vpop.f32.mrf.mxu0 }
 0x213   : > { %v2918_v39 = vpop.f32.mrf.mxu1  ;;  %v2369_v16 = vadd.f32 %v2140_v50, %v11183_v38  ;;  %v11671_v33 = vadd.f32 %v2916_v44, %v2368_v55 }
 0x214   : > { %v2142_v59 = vpop.f32.mrf.mxu0 }
 0x215   : > { %v11673_v63 = vpop.f32.mrf.mxu1  ;;  %v11676_v22 = vadd.f32 %v2142_v59, %v11185_v45  ;;  %v11678_v31 = vadd.f32 %v2918_v39, %v2369_v16  ;;  %v10276_v45 = vld [vmem:[%s10850_s29 + $0x50] sm:$0xff]  }
 0x216   : > { %v2146_v48 = vpop.f32.mrf.mxu0  ;;  %9403 = vmatmul.mubr.msk.bf16.gmra.mxu0 %vm890_vm0, %v10275_v34 }
 0x217   : > { %14899 = vst [vmem:[#allocation91_spill] sm:$0xff] %v11678_v31  ;;  %v2924_v29 = vpop.f32.mrf.mxu1  ;;  %v2371_v24 = vadd.f32 %v2146_v48, %v11195_v54  ;;  %3670 = vmatprep.mubr.bf16.mxu0 %v14818_v8 }
 0x218   : > { %v2148_v38 = vpop.f32.mrf.mxu0 }
 0x219   : > { %v2926_v44 = vpop.f32.mrf.mxu1  ;;  %v2372_v55 = vadd.f32 %v2148_v38, %v11199_v60  ;;  %v11684_v5 = vadd.f32 %v2924_v29, %v2371_v24 }
 0x21a   : > { %v2150_v47 = vpop.f32.mrf.mxu0 }
 0x21b   : > { %v2928_v50 = vpop.f32.mrf.mxu1  ;;  %v2373_v39 = vadd.f32 %v2150_v47, %v11203_v7  ;;  %v11688_v16 = vadd.f32 %v2926_v44, %v2372_v55  ;;  %v10277_v47 = vld [vmem:[%s10850_s29 + $0x58] sm:$0xff]  }
 0x21c   : > { %v2152_v34 = vpop.f32.mrf.mxu0 }
 0x21d   : > { %v11690_v59 = vpop.f32.mrf.mxu1  ;;  %v11693_v54 = vadd.f32 %v2152_v34, %v11205_v12  ;;  %v11695_v48 = vadd.f32 %v2928_v50, %v2373_v39 }
 0x21e   : > { %v2156_v31 = vpop.f32.mrf.mxu0  ;;  %9404 = vmatmul.mubr.msk.bf16.gmra.mxu0 %vm890_vm0, %v10276_v45 }
 0x21f   : > { %v2934_v60 = vpop.f32.mrf.mxu1  ;;  %v2375_v29 = vadd.f32 %v2156_v31, %v11209_v20  ;;  %3680 = vmatprep.mubr.bf16.mxu0 %v14818_v8 }
 0x220   : > { %v2158_v7 = vpop.f32.mrf.mxu0 }
 0x221   : > { %v11700_v24 = vpop.f32.mrf.mxu1  ;;  %v11703_v38 = vadd.f32 %v2158_v7, %v11213_v30  ;;  %v11705_v44 = vadd.f32 %v2934_v60, %v2375_v29 }
 0x222   : > { %v2160_v12 = vpop.f32.mrf.mxu0 }
 0x223   : > { %v11707_v55 = vpop.f32.mrf.mxu1  ;;  %v11711_v50 = vadd.f32 %v2160_v12, %v11217_v42 }
 0x224   : > { %14900 = vst [vmem:[#allocation92_spill] sm:$0xff] %v11707_v55  ;;  %v2162_v45 = vpop.f32.mrf.mxu0 }
 0x225   : > { %14901 = vst [vmem:[#allocation93_spill] sm:$0xff] %v11711_v50  ;;  %v11713_v20 = vpop.f32.mrf.mxu1  ;;  %v11716_v31 = vadd.f32 %v2162_v45, %v11219_v51  ;;  %v10278_v51 = vld [vmem:[%s10850_s29 + $0x60] sm:$0xff]  }
 0x226   : > { %14902 = vst [vmem:[#allocation94_spill] sm:$0xff] %v11713_v20  ;;  %v2166_v39 = vpop.f32.mrf.mxu0  ;;  %9405 = vmatmul.mubr.msk.bf16.gmra.mxu0 %vm890_vm0, %v10277_v47 }
 0x227   : > { %14903 = vst [vmem:[#allocation95_spill] sm:$0xff] %v11716_v31  ;;  %v11719_v30 = vpop.f32.mrf.mxu1  ;;  %v11722_v34 = vadd.f32 %v2166_v39, %v11223_v58  ;;  %3690 = vmatprep.mubr.bf16.mxu0 %v14818_v8  ;;  %v14963_v31 = vld [vmem:[#allocation20_spill] sm:$0xff] }
 0x228   : > { %14904 = vst [vmem:[#allocation96_spill] sm:$0xff] %v11719_v30  ;;  %v2168_v60 = vpop.f32.mrf.mxu0 }
 0x229   : > { %14905 = vst [vmem:[#allocation97_spill] sm:$0xff] %v11722_v34  ;;  %v11725_v29 = vpop.f32.mrf.mxu1  ;;  %v11728_v42 = vadd.f32 %v2168_v60, %v11227_v3  ;;  %v14913_v3 = vld [vmem:[#allocation2_spill] sm:$0xff]  ;;  %v14961_v34 = vld [vmem:[#allocation19_spill] sm:$0xff] }
 0x22a   : > { %14906 = vst [vmem:[#allocation98_spill] sm:$0xff] %v11725_v29  ;;  %v2170_v7 = vpop.f32.mrf.mxu0 }
 0x22b   : > { %14907 = vst [vmem:[#allocation99_spill] sm:$0xff] %v11728_v42  ;;  %v11730_v12 = vpop.f32.mrf.mxu1  ;;  %v11734_v47 = vadd.f32 %v2170_v7, %v11231_v17  ;;  %v14916_v17 = vld [vmem:[#allocation3_spill] sm:$0xff] }
 0x22c   : > { %14908 = vst [vmem:[#allocation100_spill] sm:$0xff] %v11730_v12  ;;  %v2172_v45 = vpop.f32.mrf.mxu0 }
 0x22d   : > { %14909 = vst [vmem:[#allocation101_spill] sm:$0xff] %v11734_v47  ;;  %v11736_v30 = vpop.f32.mrf.mxu1  ;;  %v11739_v58 = vadd.f32 %v2172_v45, %v11233_v32  ;;  %v10279_v32 = vld [vmem:[%s10850_s29 + $0x68] sm:$0xff]   ;;  %v14919_v45 = vld [vmem:[#allocation4_spill] sm:$0xff] }
 0x22e   : > { %14910 = vst [vmem:[#allocation102_spill] sm:$0xff] %v11736_v30  ;;  %v2176_v39 = vpop.f32.mrf.mxu0  ;;  %9406 = vmatmul.mubr.msk.bf16.gmra.mxu0 %vm890_vm0, %v10278_v51 }
 0x22f   : > { %14911 = vst [vmem:[#allocation103_spill] sm:$0xff] %v11739_v58  ;;  %v11742_v29 = vpop.f32.mrf.mxu1  ;;  %v11745_v60 = vadd.f32 %v2176_v39, %v14913_v3  ;;  %3700 = vmatprep.mubr.bf16.mxu0 %v14818_v8  ;;  %v14922_v39 = vld [vmem:[#allocation5_spill] sm:$0xff] }
 0x230   : > { %14912 = vst [vmem:[#allocation104_spill] sm:$0xff] %v11742_v29  ;;  %v2178_v12 = vpop.f32.mrf.mxu0 }
 0x231   : > { %14914 = vst [vmem:[#allocation2_spill] sm:$0xff] %v11745_v60  ;;  %v11748_v42 = vpop.f32.mrf.mxu1  ;;  %v11751_v7 = vadd.f32 %v2178_v12, %v14916_v17  ;;  %v14925_v12 = vld [vmem:[#allocation6_spill] sm:$0xff] }
 0x232   : > { %14915 = vst [vmem:[#allocation105_spill] sm:$0xff] %v11748_v42  ;;  %v2180_v30 = vpop.f32.mrf.mxu0 }
 0x233   : > { %14917 = vst [vmem:[#allocation3_spill] sm:$0xff] %v11751_v7  ;;  %v11753_v47 = vpop.f32.mrf.mxu1  ;;  %v11757_v51 = vadd.f32 %v2180_v30, %v14919_v45  ;;  %v14928_v30 = vld [vmem:[#allocation7_spill] sm:$0xff] }
 0x234   : > { %14918 = vst [vmem:[#allocation106_spill] sm:$0xff] %v11753_v47  ;;  %v2182_v29 = vpop.f32.mrf.mxu0 }
 0x235   : > { %14920 = vst [vmem:[#allocation4_spill] sm:$0xff] %v11757_v51  ;;  %v11759_v58 = vpop.f32.mrf.mxu1  ;;  %v11762_v3 = vadd.f32 %v2182_v29, %v14922_v39  ;;  %v10280_v29 = vld [vmem:[%s10850_s29 + $0x70] sm:$0xff]  }
 0x236   : > { %14921 = vst [vmem:[#allocation107_spill] sm:$0xff] %v11759_v58  ;;  %v2186_v60 = vpop.f32.mrf.mxu0  ;;  %9407 = vmatmul.mubr.msk.bf16.gmra.mxu0 %vm890_vm0, %v10279_v32  ;;  %v14931_v39 = vld [vmem:[#allocation8_spill] sm:$0xff] }
 0x237   : > { %14923 = vst [vmem:[#allocation5_spill] sm:$0xff] %v11762_v3  ;;  %v11765_v42 = vpop.f32.mrf.mxu1  ;;  %v11768_v17 = vadd.f32 %v2186_v60, %v14925_v12  ;;  %3710 = vmatprep.mubr.bf16.mxu0 %v14818_v8  ;;  %v14934_v60 = vld [vmem:[#allocation9_spill] sm:$0xff] }
 0x238   : > { %14924 = vst [vmem:[#allocation108_spill] sm:$0xff] %v11765_v42  ;;  %v2188_v47 = vpop.f32.mrf.mxu0 }
 0x239   : > { %14926 = vst [vmem:[#allocation6_spill] sm:$0xff] %v11768_v17  ;;  %v11771_v7 = vpop.f32.mrf.mxu1  ;;  %v11774_v45 = vadd.f32 %v2188_v47, %v14928_v30  ;;  %v14937_v47 = vld [vmem:[#allocation10_spill] sm:$0xff] }
 0x23a   : > { %14927 = vst [vmem:[#allocation109_spill] sm:$0xff] %v11771_v7  ;;  %v2190_v58 = vpop.f32.mrf.mxu0 }
 0x23b   : > { %14929 = vst [vmem:[#allocation7_spill] sm:$0xff] %v11774_v45  ;;  %v11776_v51 = vpop.f32.mrf.mxu1  ;;  %v11780_v32 = vadd.f32 %v2190_v58, %v14931_v39  ;;  %v14940_v58 = vld [vmem:[#allocation11_spill] sm:$0xff] }
 0x23c   : > { %14930 = vst [vmem:[#allocation110_spill] sm:$0xff] %v11776_v51  ;;  %v2192_v42 = vpop.f32.mrf.mxu0 }
 0x23d   : > { %14932 = vst [vmem:[#allocation8_spill] sm:$0xff] %v11780_v32  ;;  %v11782_v3 = vpop.f32.mrf.mxu1  ;;  %v11785_v12 = vadd.f32 %v2192_v42, %v14934_v60  ;;  %v10281_v42 = vld [vmem:[%s10850_s29 + $0x78] sm:$0xff]   ;;  %v14943_v60 = vld [vmem:[#allocation12_spill] sm:$0xff] }
 0x23e   : > { %14933 = vst [vmem:[#allocation111_spill] sm:$0xff] %v11782_v3  ;;  %v2196_v17 = vpop.f32.mrf.mxu0  ;;  %9408 = vmatmul.mubr.msk.bf16.gmra.mxu0 %vm890_vm0, %v10280_v29 }
 0x23f   : > { %14935 = vst [vmem:[#allocation9_spill] sm:$0xff] %v11785_v12  ;;  %v11788_v7 = vpop.f32.mrf.mxu1  ;;  %v11791_v30 = vadd.f32 %v2196_v17, %v14937_v47  ;;  %3720 = vmatprep.mubr.bf16.mxu0 %v14818_v8  ;;  %v14946_v17 = vld [vmem:[#allocation13_spill] sm:$0xff] }
 0x240   : > { %14936 = vst [vmem:[#allocation112_spill] sm:$0xff] %v11788_v7  ;;  %v2198_v51 = vpop.f32.mrf.mxu0 }
 0x241   : > { %14938 = vst [vmem:[#allocation10_spill] sm:$0xff] %v11791_v30  ;;  %v11794_v45 = vpop.f32.mrf.mxu1  ;;  %v11797_v39 = vadd.f32 %v2198_v51, %v14940_v58  ;;  %v14949_v51 = vld [vmem:[#allocation14_spill] sm:$0xff] }
 0x242   : > { %14939 = vst [vmem:[#allocation113_spill] sm:$0xff] %v11794_v45  ;;  %v2200_v3 = vpop.f32.mrf.mxu0 }
 0x243   : > { %14941 = vst [vmem:[#allocation11_spill] sm:$0xff] %v11797_v39  ;;  %v11799_v32 = vpop.f32.mrf.mxu1  ;;  %v11803_v29 = vadd.f32 %v2200_v3, %v14943_v60  ;;  %v14952_v3 = vld [vmem:[#allocation15_spill] sm:$0xff] }
 0x244   : > { %14942 = vst [vmem:[#allocation114_spill] sm:$0xff] %v11799_v32  ;;  %v2202_v7 = vpop.f32.mrf.mxu0 }
 0x245   : > { %14944 = vst [vmem:[#allocation12_spill] sm:$0xff] %v11803_v29  ;;  %v11805_v12 = vpop.f32.mrf.mxu1  ;;  %v11808_v47 = vadd.f32 %v2202_v7, %v14946_v17  ;;  %v10282_v7 = vld [vmem:[%s10850_s29 + $0x80] sm:$0xff]   ;;  %v14955_v17 = vld [vmem:[#allocation16_spill] sm:$0xff] }
 0x246   : > { %14945 = vst [vmem:[#allocation115_spill] sm:$0xff] %v11805_v12  ;;  %v2206_v30 = vpop.f32.mrf.mxu0  ;;  %9409 = vmatmul.mubr.msk.bf16.gmra.mxu0 %vm890_vm0, %v10281_v42 }
 0x247   : > { %14947 = vst [vmem:[#allocation13_spill] sm:$0xff] %v11808_v47  ;;  %v11811_v45 = vpop.f32.mrf.mxu1  ;;  %v11814_v58 = vadd.f32 %v2206_v30, %v14949_v51  ;;  %3730 = vmatprep.mubr.bf16.mxu0 %v14818_v8  ;;  %v14958_v30 = vld [vmem:[#allocation17_spill] sm:$0xff] }
 0x248   : > { %14948 = vst [vmem:[#allocation116_spill] sm:$0xff] %v11811_v45  ;;  %v2208_v32 = vpop.f32.mrf.mxu0 }
 0x249   : > { %14950 = vst [vmem:[#allocation14_spill] sm:$0xff] %v11814_v58  ;;  %v11817_v39 = vpop.f32.mrf.mxu1  ;;  %v11820_v60 = vadd.f32 %v2208_v32, %v14952_v3  ;;  %v14960_v32 = vld [vmem:[#allocation18_spill] sm:$0xff] }
 0x24a   : > { %14951 = vst [vmem:[#allocation117_spill] sm:$0xff] %v11817_v39  ;;  %v2210_v12 = vpop.f32.mrf.mxu0 }
 0x24b   : > { %14953 = vst [vmem:[#allocation15_spill] sm:$0xff] %v11820_v60  ;;  %v11822_v29 = vpop.f32.mrf.mxu1  ;;  %v11826_v42 = vadd.f32 %v2210_v12, %v14955_v17 }
 0x24c   : > { %14954 = vst [vmem:[#allocation118_spill] sm:$0xff] %v11822_v29  ;;  %v2212_v45 = vpop.f32.mrf.mxu0 }
 0x24d   : > { %14956 = vst [vmem:[#allocation16_spill] sm:$0xff] %v11826_v42  ;;  %v11828_v47 = vpop.f32.mrf.mxu1  ;;  %v11831_v51 = vadd.f32 %v2212_v45, %v14958_v30 }
 0x24e   : > { %14957 = vst [vmem:[#allocation119_spill] sm:$0xff] %v11828_v47  ;;  %v2216_v58 = vpop.f32.mrf.mxu0  ;;  %9410 = vmatmul.mubr.msk.bf16.gmra.mxu0 %vm890_vm0, %v10282_v7  ;;  %v10283_v47 = vld [vmem:[%s10850_s29 + $0x88] sm:$0xff]  }
 0x24f   : > { %14959 = vst [vmem:[#allocation17_spill] sm:$0xff] %v11831_v51  ;;  %v2994_v39 = vpop.f32.mrf.mxu1  ;;  %v2399_v3 = vadd.f32 %v2216_v58, %v14960_v32  ;;  %3740 = vmatprep.mubr.bf16.mxu0 %v14818_v8  ;;  %v14966_v58 = vld [vmem:[#allocation21_spill] sm:$0xff] }
 0x250   : > { %v2218_v29 = vpop.f32.mrf.mxu0 }
 0x251   : > { %v2996_v60 = vpop.f32.mrf.mxu1  ;;  %v2400_v20 = vadd.f32 %v2218_v29, %v14961_v34  ;;  %v11837_v12 = vadd.f32 %v2994_v39, %v2399_v3  ;;  %v14969_v39 = vld [vmem:[#allocation22_spill] sm:$0xff] }
 0x252   : > { %v2220_v17 = vpop.f32.mrf.mxu0 }
 0x253   : > { %14962 = vst [vmem:[#allocation18_spill] sm:$0xff] %v11837_v12  ;;  %v2998_v42 = vpop.f32.mrf.mxu1  ;;  %v2401_v45 = vadd.f32 %v2220_v17, %v14963_v31  ;;  %v11841_v30 = vadd.f32 %v2996_v60, %v2400_v20  ;;  %v14970_v60 = vld [vmem:[#allocation23_spill] sm:$0xff] }
 0x254   : > { %v2222_v7 = vpop.f32.mrf.mxu0 }
 0x255   : > { %14964 = vst [vmem:[#allocation19_spill] sm:$0xff] %v11841_v30  ;;  %v11843_v51 = vpop.f32.mrf.mxu1  ;;  %v11846_v32 = vadd.f32 %v2222_v7, %v14966_v58  ;;  %v11848_v55 = vadd.f32 %v2998_v42, %v2401_v45  ;;  %v10284_v7 = vld [vmem:[%s10850_s29 + $0x90] sm:$0xff]  }
 0x256   : > { %14965 = vst [vmem:[#allocation20_spill] sm:$0xff] %v11843_v51  ;;  %v2226_v50 = vpop.f32.mrf.mxu0  ;;  %9411 = vmatmul.mubr.msk.bf16.gmra.mxu0 %vm890_vm0, %v10283_v47  ;;  %v14971_v58 = vld [vmem:[#allocation24_spill] sm:$0xff] }
 0x257   : > { %14967 = vst [vmem:[#allocation21_spill] sm:$0xff] %v11846_v32  ;;  %14968 = vst [vmem:[#allocation120_spill] sm:$0xff] %v11848_v55  ;;  %v3004_v34 = vpop.f32.mrf.mxu1  ;;  %v2403_v29 = vadd.f32 %v2226_v50, %v14969_v39  ;;  %3750 = vmatprep.mubr.bf16.mxu0 %v14818_v8  ;;  %v14973_v50 = vld [vmem:[#allocation25_spill] sm:$0xff] }
 0x258   : > { %v2228_v31 = vpop.f32.mrf.mxu0 }
 0x259   : > { %v3006_v20 = vpop.f32.mrf.mxu1  ;;  %v2404_v3 = vadd.f32 %v2228_v31, %v14970_v60  ;;  %v11854_v17 = vadd.f32 %v3004_v34, %v2403_v29  ;;  %v14975_v29 = vld [vmem:[#allocation26_spill] sm:$0xff] }
 0x25a   : > { %v2230_v51 = vpop.f32.mrf.mxu0 }
 0x25b   : > { %v3008_v30 = vpop.f32.mrf.mxu1  ;;  %v2405_v42 = vadd.f32 %v2230_v51, %v14971_v58  ;;  %v11858_v45 = vadd.f32 %v3006_v20, %v2404_v3  ;;  %v14976_v20 = vld [vmem:[#allocation27_spill] sm:$0xff] }
 0x25c   : > { %v2232_v47 = vpop.f32.mrf.mxu0 }
 0x25d   : > { %v11860_v55 = vpop.f32.mrf.mxu1  ;;  %v11863_v39 = vadd.f32 %v2232_v47, %v14973_v50  ;;  %v11865_v32 = vadd.f32 %v3008_v30, %v2405_v42  ;;  %v10285_v47 = vld [vmem:[%s10850_s29 + $0x98] sm:$0xff]   ;;  %v14979_v50 = vld [vmem:[#allocation28_spill] sm:$0xff] }
 0x25e   : > { %14972 = vst [vmem:[#allocation22_spill] sm:$0xff] %v11860_v55  ;;  %v2236_v12 = vpop.f32.mrf.mxu0  ;;  %9412 = vmatmul.mubr.msk.bf16.gmra.mxu0 %vm890_vm0, %v10284_v7 }
 0x25f   : > { %14974 = vst [vmem:[#allocation23_spill] sm:$0xff] %v11865_v32  ;;  %v3014_v34 = vpop.f32.mrf.mxu1  ;;  %v2407_v31 = vadd.f32 %v2236_v12, %v14975_v29  ;;  %3760 = vmatprep.mubr.bf16.mxu0 %v14818_v8  ;;  %v14981_v32 = vld [vmem:[#allocation29_spill] sm:$0xff]  ;;  %v14983_v12 = vld [vmem:[#allocation30_spill] sm:$0xff] }
 0x260   : > { %v2238_v51 = vpop.f32.mrf.mxu0 }
 0x261   : > { %v11871_v60 = vadd.f32 %v2238_v51, %v14976_v20  ;;  %v11873_v3 = vadd.f32 %v3014_v34, %v2407_v31  ;;  %v14985_v31 = vld [vmem:[#allocation31_spill] sm:$0xff] }
 0x262   : > { %v2240_v58 = vpop.f32.mrf.mxu0 }
 0x263   : > { %14977 = vst [vmem:[#allocation24_spill] sm:$0xff] %v11871_v60  ;;  %14978 = vst [vmem:[#allocation25_spill] sm:$0xff] %v11873_v3  ;;  %v11877_v30 = vadd.f32 %v2240_v58, %v14979_v50  ;;  %v10286_v58 = vld [vmem:[%s10850_s29 + $0xa0] sm:$0xff]   ;;  %v14987_v50 = vld [vmem:[#allocation32_spill] sm:$0xff] }
 0x264   : > { %v2242_v42 = vpop.f32.mrf.mxu0 }
 0x265   : > { %14980 = vst [vmem:[#allocation26_spill] sm:$0xff] %v11877_v30  ;;  %v11880_v7 = vadd.f32 %v2242_v42, %v14981_v32  ;;  %v14989_v42 = vld [vmem:[#allocation33_spill] sm:$0xff] }
 0x266   : > { %v2246_v55 = vpop.f32.mrf.mxu0  ;;  %9413 = vmatmul.mubr.msk.bf16.gmra.mxu0 %vm890_vm0, %v10285_v47 }
 0x267   : > { %14982 = vst [vmem:[#allocation27_spill] sm:$0xff] %v11880_v7  ;;  %v11884_v29 = vadd.f32 %v2246_v55, %v14983_v12  ;;  %3770 = vmatprep.mubr.bf16.mxu0 %v14818_v8  ;;  %v14991_v55 = vld [vmem:[#allocation34_spill] sm:$0xff] }
 0x268   : > { %v2248_v34 = vpop.f32.mrf.mxu0 }
 0x269   : > { %14984 = vst [vmem:[#allocation28_spill] sm:$0xff] %v11884_v29  ;;  %v11888_v51 = vadd.f32 %v2248_v34, %v14985_v31  ;;  %v14993_v31 = vld [vmem:[#allocation35_spill] sm:$0xff] }
 0x26a   : > { %v2250_v20 = vpop.f32.mrf.mxu0 }
 0x26b   : > { %14986 = vst [vmem:[#allocation29_spill] sm:$0xff] %v11888_v51  ;;  %v11892_v30 = vadd.f32 %v2250_v20, %v14987_v50  ;;  %v10287_v20 = vld [vmem:[%s10850_s29 + $0xa8] sm:$0xff]   ;;  %v14995_v50 = vld [vmem:[#allocation36_spill] sm:$0xff] }
 0x26c   : > { %v2252_v32 = vpop.f32.mrf.mxu0 }
 0x26d   : > { %14988 = vst [vmem:[#allocation30_spill] sm:$0xff] %v11892_v30  ;;  %v11895_v7 = vadd.f32 %v2252_v32, %v14989_v42  ;;  %v14997_v42 = vld [vmem:[#allocation37_spill] sm:$0xff] }
 0x26e   : > { %v2256_v47 = vpop.f32.mrf.mxu0  ;;  %9414 = vmatmul.mubr.msk.bf16.gmra.mxu0 %vm890_vm0, %v10286_v58 }
 0x26f   : > { %14990 = vst [vmem:[#allocation31_spill] sm:$0xff] %v11895_v7  ;;  %v11899_v12 = vadd.f32 %v2256_v47, %v14991_v55  ;;  %3780 = vmatprep.mubr.bf16.mxu0 %v14818_v8  ;;  %v14999_v47 = vld [vmem:[#allocation38_spill] sm:$0xff] }
 0x270   : > { %v2258_v34 = vpop.f32.mrf.mxu0 }
 0x271   : > { %14992 = vst [vmem:[#allocation32_spill] sm:$0xff] %v11899_v12  ;;  %v11903_v51 = vadd.f32 %v2258_v34, %v14993_v31  ;;  %v15001_v31 = vld [vmem:[#allocation39_spill] sm:$0xff] }
 0x272   : > { %v2260_v29 = vpop.f32.mrf.mxu0 }
 0x273   : > { %14994 = vst [vmem:[#allocation33_spill] sm:$0xff] %v11903_v51  ;;  %v11907_v30 = vadd.f32 %v2260_v29, %v14995_v50  ;;  %v10288_v29 = vld [vmem:[%s10850_s29 + $0xb0] sm:$0xff]  }
 0x274   : > { %v2262_v32 = vpop.f32.mrf.mxu0  ;;  %v15003_v50 = vld [vmem:[#allocation40_spill] sm:$0xff] }
 0x275   : > { %14996 = vst [vmem:[#allocation34_spill] sm:$0xff] %v11907_v30  ;;  %v11910_v7 = vadd.f32 %v2262_v32, %v14997_v42  ;;  %v15005_v42 = vld [vmem:[#allocation41_spill] sm:$0xff] }
 0x276   : > { %v2266_v58 = vpop.f32.mrf.mxu0  ;;  %9415 = vmatmul.mubr.msk.bf16.gmra.mxu0 %vm890_vm0, %v10287_v20 }
 0x277   : > { %14998 = vst [vmem:[#allocation35_spill] sm:$0xff] %v11910_v7  ;;  %v11914_v55 = vadd.f32 %v2266_v58, %v14999_v47  ;;  %3790 = vmatprep.mubr.bf16.mxu0 %v14818_v8  ;;  %v15007_v58 = vld [vmem:[#allocation42_spill] sm:$0xff] }
 0x278   : > { %v2268_v34 = vpop.f32.mrf.mxu0 }
 0x279   : > { %15000 = vst [vmem:[#allocation36_spill] sm:$0xff] %v11914_v55  ;;  %v11918_v51 = vadd.f32 %v2268_v34, %v15001_v31  ;;  %v15009_v31 = vld [vmem:[#allocation43_spill] sm:$0xff] }
 0x27a   : > { %v2270_v12 = vpop.f32.mrf.mxu0 }
 0x27b   : > { %15002 = vst [vmem:[#allocation37_spill] sm:$0xff] %v11918_v51  ;;  %v11922_v30 = vadd.f32 %v2270_v12, %v15003_v50  ;;  %v10289_v12 = vld [vmem:[%s10850_s29 + $0xb8] sm:$0xff]   ;;  %v15011_v50 = vld [vmem:[#allocation44_spill] sm:$0xff] }
 0x27c   : > { %v2272_v32 = vpop.f32.mrf.mxu0 }
 0x27d   : > { %15004 = vst [vmem:[#allocation38_spill] sm:$0xff] %v11922_v30  ;;  %v11925_v7 = vadd.f32 %v2272_v32, %v15005_v42  ;;  %v15013_v42 = vld [vmem:[#allocation45_spill] sm:$0xff] }
 0x27e   : > { %v2276_v20 = vpop.f32.mrf.mxu0  ;;  %9416 = vmatmul.mubr.msk.bf16.gmra.mxu0 %vm890_vm0, %v10288_v29 }
 0x27f   : > { %15006 = vst [vmem:[#allocation39_spill] sm:$0xff] %v11925_v7  ;;  %v11929_v47 = vadd.f32 %v2276_v20, %v15007_v58  ;;  %3800 = vmatprep.mubr.bf16.mxu0 %v14818_v8  ;;  %v15015_v20 = vld [vmem:[#allocation46_spill] sm:$0xff] }
 0x280   : > { %v2278_v34 = vpop.f32.mrf.mxu0 }
 0x281   : > { %15008 = vst [vmem:[#allocation40_spill] sm:$0xff] %v11929_v47  ;;  %v11933_v51 = vadd.f32 %v2278_v34, %v15009_v31  ;;  %v15017_v31 = vld [vmem:[#allocation47_spill] sm:$0xff] }
 0x282   : > { %v2280_v55 = vpop.f32.mrf.mxu0 }
 0x283   : > { %15010 = vst [vmem:[#allocation41_spill] sm:$0xff] %v11933_v51  ;;  %v11937_v30 = vadd.f32 %v2280_v55, %v15011_v50  ;;  %v10290_v55 = vld [vmem:[%s10850_s29 + $0xc0] sm:$0xff]   ;;  %v15019_v50 = vld [vmem:[#allocation48_spill] sm:$0xff] }
 0x284   : > { %v2282_v32 = vpop.f32.mrf.mxu0 }
 0x285   : > { %15012 = vst [vmem:[#allocation42_spill] sm:$0xff] %v11937_v30  ;;  %v11940_v7 = vadd.f32 %v2282_v32, %v15013_v42  ;;  %v15021_v42 = vld [vmem:[#allocation49_spill] sm:$0xff] }
 0x286   : > { %v2286_v29 = vpop.f32.mrf.mxu0  ;;  %9417 = vmatmul.mubr.msk.bf16.gmra.mxu0 %vm890_vm0, %v10289_v12 }
 0x287   : > { %15014 = vst [vmem:[#allocation43_spill] sm:$0xff] %v11940_v7  ;;  %v11944_v58 = vadd.f32 %v2286_v29, %v15015_v20  ;;  %3810 = vmatprep.mubr.bf16.mxu0 %v14818_v8  ;;  %v15023_v29 = vld [vmem:[#allocation50_spill] sm:$0xff] }
 0x288   : > { %v2288_v34 = vpop.f32.mrf.mxu0 }
 0x289   : > { %15016 = vst [vmem:[#allocation44_spill] sm:$0xff] %v11944_v58  ;;  %v11948_v51 = vadd.f32 %v2288_v34, %v15017_v31  ;;  %v15025_v31 = vld [vmem:[#allocation51_spill] sm:$0xff] }
 0x28a   : > { %v2290_v47 = vpop.f32.mrf.mxu0 }
 0x28b   : > { %15018 = vst [vmem:[#allocation45_spill] sm:$0xff] %v11948_v51  ;;  %v11952_v30 = vadd.f32 %v2290_v47, %v15019_v50  ;;  %v10291_v47 = vld [vmem:[%s10850_s29 + $0xc8] sm:$0xff]   ;;  %v15027_v50 = vld [vmem:[#allocation52_spill] sm:$0xff] }
 0x28c   : > { %v2292_v32 = vpop.f32.mrf.mxu0 }
 0x28d   : > { %15020 = vst [vmem:[#allocation46_spill] sm:$0xff] %v11952_v30  ;;  %v11955_v7 = vadd.f32 %v2292_v32, %v15021_v42  ;;  %v15029_v42 = vld [vmem:[#allocation53_spill] sm:$0xff] }
 0x28e   : > { %v2296_v12 = vpop.f32.mrf.mxu0  ;;  %9418 = vmatmul.mubr.msk.bf16.gmra.mxu0 %vm890_vm0, %v10290_v55 }
 0x28f   : > { %15022 = vst [vmem:[#allocation47_spill] sm:$0xff] %v11955_v7  ;;  %v11959_v20 = vadd.f32 %v2296_v12, %v15023_v29  ;;  %3820 = vmatprep.mubr.bf16.mxu0 %v14818_v8  ;;  %v15031_v12 = vld [vmem:[#allocation54_spill] sm:$0xff] }
 0x290   : > { %v2298_v34 = vpop.f32.mrf.mxu0 }
 0x291   : > { %15024 = vst [vmem:[#allocation48_spill] sm:$0xff] %v11959_v20  ;;  %v11963_v51 = vadd.f32 %v2298_v34, %v15025_v31  ;;  %v15033_v31 = vld [vmem:[#allocation55_spill] sm:$0xff] }
 0x292   : > { %v2300_v58 = vpop.f32.mrf.mxu0 }
 0x293   : > { %15026 = vst [vmem:[#allocation49_spill] sm:$0xff] %v11963_v51  ;;  %v11967_v30 = vadd.f32 %v2300_v58, %v15027_v50  ;;  %v10292_v58 = vld [vmem:[%s10850_s29 + $0xd0] sm:$0xff]  }
 0x294   : > { %v2302_v32 = vpop.f32.mrf.mxu0  ;;  %v15035_v50 = vld [vmem:[#allocation56_spill] sm:$0xff] }
 0x295   : > { %15028 = vst [vmem:[#allocation50_spill] sm:$0xff] %v11967_v30  ;;  %v11970_v7 = vadd.f32 %v2302_v32, %v15029_v42  ;;  %v15037_v42 = vld [vmem:[#allocation57_spill] sm:$0xff] }
 0x296   : > { %v2306_v55 = vpop.f32.mrf.mxu0  ;;  %9419 = vmatmul.mubr.msk.bf16.gmra.mxu0 %vm890_vm0, %v10291_v47 }
 0x297   : > { %15030 = vst [vmem:[#allocation51_spill] sm:$0xff] %v11970_v7  ;;  %v11974_v29 = vadd.f32 %v2306_v55, %v15031_v12  ;;  %3830 = vmatprep.mubr.bf16.mxu0 %v14818_v8  ;;  %v15039_v55 = vld [vmem:[#allocation58_spill] sm:$0xff] }
 0x298   : > { %v2308_v34 = vpop.f32.mrf.mxu0 }
 0x299   : > { %15032 = vst [vmem:[#allocation52_spill] sm:$0xff] %v11974_v29  ;;  %v11978_v51 = vadd.f32 %v2308_v34, %v15033_v31  ;;  %v15041_v34 = vld [vmem:[#allocation59_spill] sm:$0xff] }
 0x29a   : > { %v2310_v20 = vpop.f32.mrf.mxu0 }
 0x29b   : > { %15034 = vst [vmem:[#allocation53_spill] sm:$0xff] %v11978_v51  ;;  %v11982_v30 = vadd.f32 %v2310_v20, %v15035_v50  ;;  %v10293_v20 = vld [vmem:[%s10850_s29 + $0xd8] sm:$0xff]   ;;  %v15043_v50 = vld [vmem:[#allocation60_spill] sm:$0xff] }
 0x29c   : > { %v2312_v32 = vpop.f32.mrf.mxu0 }
 0x29d   : > { %15036 = vst [vmem:[#allocation54_spill] sm:$0xff] %v11982_v30  ;;  %v11985_v7 = vadd.f32 %v2312_v32, %v15037_v42  ;;  %v4005_v32 = vlaneseq }
 0x29e   : > { %v2316_v47 = vpop.f32.mrf.mxu0  ;;  %9420 = vmatmul.mubr.msk.bf16.gmra.mxu0 %vm890_vm0, %v10292_v58 }
 0x29f   : > { %15038 = vst [vmem:[#allocation55_spill] sm:$0xff] %v11985_v7  ;;  %v11989_v12 = vadd.f32 %v2316_v47, %v15039_v55  ;;  %3840 = vmatprep.mubr.bf16.mxu0 %v14818_v8  ;;  %v15045_v7 = vld [vmem:[#allocation61_spill] sm:$0xff]  ;;  %v15047_v47 = vld [vmem:[#allocation62_spill] sm:$0xff] }
 0x2a0   : > { %v2318_v29 = vpop.f32.mrf.mxu0 }
 0x2a1   : > { %15040 = vst [vmem:[#allocation56_spill] sm:$0xff] %v11989_v12  ;;  %v11993_v31 = vadd.f32 %v2318_v29, %v15041_v34  ;;  %v12007_v29 = vshrl.u32 %v4005_v32, 7 }
 0x2a2   : > { %v2320_v51 = vpop.f32.mrf.mxu0 }
 0x2a3   : > { %15042 = vst [vmem:[#allocation57_spill] sm:$0xff] %v11993_v31  ;;  %v11997_v30 = vadd.f32 %v2320_v51, %v15043_v50  ;;  %15049 = vst [vmem:[#allocation61_spill] sm:$0xff] %v12007_v29  ;;  %v15050_v31 = vld [vmem:[#allocation63_spill] sm:$0xff]  ;;  %v10294_v50 = vld [vmem:[%s10850_s29 + $0xe0] sm:$0xff]  }
 0x2a4   : > { %v2322_v42 = vpop.f32.mrf.mxu0 }
 0x2a5   : > { %15044 = vst [vmem:[#allocation58_spill] sm:$0xff] %v11997_v30  ;;  %v12000_v3 = vadd.f32 %v2322_v42, %v15045_v7  ;;  %v15052_v30 = vld [vmem:[#allocation64_spill] sm:$0xff]  ;;  %v14797_v42 = vsub.s32 0, %v12007_v29 }
 0x2a6   : > { %v2326_v58 = vpop.f32.mrf.mxu0  ;;  %9421 = vmatmul.mubr.msk.bf16.gmra.mxu0 %vm890_vm0, %v10293_v20 }
 0x2a7   : > { %15046 = vst [vmem:[#allocation59_spill] sm:$0xff] %v12000_v3  ;;  %v12004_v55 = vadd.f32 %v2326_v58, %v15047_v47  ;;  %3850 = vmatprep.mubr.bf16.mxu0 %v14818_v8  ;;  %v4003_v58 = vld [vmem:[%s15054_s27] sm:$0x3]  ;;  %v15055_v47 = vld [vmem:[#allocation65_spill] sm:$0xff] }
 0x2a8   : > { %v2328_v34 = vpop.f32.mrf.mxu0 }
 0x2a9   : > { %15048 = vst [vmem:[#allocation60_spill] sm:$0xff] %v12004_v55  ;;  %v12010_v12 = vadd.f32 %v2328_v34, %v15050_v31  ;;  %v14798_v55 = vsub.s32 1, %v12007_v29 }
 0x2aa   : > { %v2330_v51 = vpop.f32.mrf.mxu0 }
 0x2ab   : > { %15051 = vst [vmem:[#allocation62_spill] sm:$0xff] %v12010_v12  ;;  %v12014_v7 = vadd.f32 %v2330_v51, %v15052_v30  ;;  %v12028_v30 = vrot.slane %v4003_v58, %v14797_v42 }
 0x2ac   : > { %v2332_v20 = vpop.f32.mrf.mxu0 }
 0x2ad   : > { %15053 = vst [vmem:[#allocation63_spill] sm:$0xff] %v12014_v7  ;;  %v12021_v32 = vadd.f32 %v2332_v20, %v15055_v47  ;;  %v12034_v20 = vrot.slane %v4003_v58, %v14798_v55 }
 0x2ae   : > { %v3612_v31 = vpop.f32.mrf.mxu0  ;;  %9422 = vmatmul.mubr.msk.bf16.gmra.mxu0 %vm890_vm0, %v10294_v50  ;;  %v3116_v50 = vadd.f32 %v11496_v14, %v11499_v10 }
 0x2af   : > { %15056 = vst [vmem:[#allocation64_spill] sm:$0xff] %v12021_v32  ;;  %v3891_v34 = vadd.f32 %v3612_v31, %v11489_v13  ;;  %3860 = vmatprep.mubr.bf16.mxu0 %v14818_v8  ;;  %v10295_v32 = vld [vmem:[%s10850_s29 + $0xe8] sm:$0xff]   ;;  %v15057_v31 = vld [vmem:[#allocation66_spill] sm:$0xff] }
 0x2b0   : > { %v3614_v51 = vpop.f32.mrf.mxu0 }
 0x2b1   : > { %v3892_v7 = vadd.f32 %v3614_v51, %v11494_v62  ;;  %v4015_v13 = vadd.f32 %v12028_v30, %v3891_v34 }
 0x2b2   : > { %v3616_v47 = vpop.f32.mrf.mxu0 }
 0x2b3   : > { %v3893_v12 = vadd.f32 %v3616_v47, %v15057_v31  ;;  %v4016_v3 = vadd.f32 %v12034_v20, %v3892_v7  ;;  %v4127_v58 = vmax.f32 %v4015_v13, 0.0 }
 0x2b4   : > { %v3618_v42 = vpop.f32.mrf.mxu0 }
 0x2b5   : > { %v4017_v60 = vadd.f32 %v12028_v30, %v3893_v12  ;;  %v3894_v62 = vadd.f32 %v3618_v42, %v3116_v50  ;;  %v4128_v34 = vmax.f32 %v4016_v3, 0.0  ;;  %v10296_v42 = vld [vmem:[%s10850_s29 + $0xf0] sm:$0xff]  }
 0x2b6   : > { %v3622_v51 = vpop.f32.mrf.mxu0  ;;  %9423 = vmatmul.mubr.msk.bf16.gmra.mxu0 %vm890_vm0, %v10295_v32  ;;  %v3120_v32 = vadd.f32 %v11516_v27, %v11519_v18 }
 0x2b7   : > { %v4129_v55 = vmax.f32 %v4017_v60, 0.0  ;;  %v4018_v29 = vadd.f32 %v12034_v20, %v3894_v62  ;;  %v3895_v14 = vadd.f32 %v3622_v51, %v11509_v1  ;;  %3870 = vmatprep.mubr.bf16.mxu0 %v14818_v8 }
 0x2b8   : > { %v3624_v10 = vpop.f32.mrf.mxu0 }
 0x2b9   : > { %v12047_v47 = vpack.c.bf16 %v4129_v55, %v4127_v58  ;;  %v4130_v7 = vmax.f32 %v4018_v29, 0.0  ;;  %v3896_v31 = vadd.f32 %v3624_v10, %v11514_v26  ;;  %v4019_v60 = vadd.f32 %v12028_v30, %v3895_v14 }
 0x2ba   : > { %v3626_v12 = vpop.f32.mrf.mxu0  ;;  %v3122_v26 = vadd.f32 %v11528_v2, %v11531_v37  ;;  %v3123_v58 = vadd.f32 %v11535_v36, %v11540_v40 }
 0x2bb   : > { %v3897_v50 = vadd.f32 %v3626_v12, %v11521_v41  ;;  %v12055_v13 = vpack.c.bf16 %v4130_v7, %v4128_v34  ;;  %v4020_v62 = vadd.f32 %v12034_v20, %v3896_v31  ;;  %v4131_v27 = vmax.f32 %v4019_v60, 0.0  ;;  %v10297_v31 = vld [vmem:[%s10850_s29 + $0xf8] sm:$0xff]  }
 0x2bc   : > { %v3628_v1 = vpop.f32.mrf.mxu0  ;;  %v3124_v12 = vadd.f32 %v11542_v46, %v11545_v52 }
 0x2bd   : > { %v4021_v3 = vadd.f32 %v12028_v30, %v3897_v50  ;;  %v3898_v55 = vadd.f32 %v3628_v1, %v3120_v32  ;;  %v4132_v10 = vmax.f32 %v4020_v62, 0.0  ;;  %v15058_v50 = vld [vmem:[#allocation67_spill] sm:$0xff] }
 0x2be   : > { %v3632_v29 = vpop.f32.mrf.mxu0  ;;  %9424 = vmatmul.mubr.msk.bf16.gmra.mxu0 %vm890_vm0, %v10296_v42  ;;  %v3125_v36 = vadd.f32 %v15058_v50, %v11552_v25 }
 0x2bf   : > { %v4133_v18 = vmax.f32 %v4021_v3, 0.0  ;;  %v4022_v51 = vadd.f32 %v12034_v20, %v3898_v55  ;;  %v3899_v41 = vadd.f32 %v3632_v29, %v11533_v49  ;;  %3880 = vmatprep.mubr.bf16.mxu0 %v14818_v8  ;;  %v15059_v3 = vld [vmem:[#allocation68_spill] sm:$0xff] }
 0x2c0   : > { %v3634_v14 = vpop.f32.mrf.mxu0  ;;  %v3126_v55 = vadd.f32 %v15059_v3, %v11558_v21  ;;  %v15061_v21 = vld [vmem:[#allocation70_spill] sm:$0xff] }
 0x2c1   : > { %v12067_v34 = vpack.c.bf16 %v4133_v18, %v4131_v27  ;;  %v4134_v7 = vmax.f32 %v4022_v51, 0.0  ;;  %v3900_v2 = vadd.f32 %v3634_v14, %v3122_v26  ;;  %v4023_v42 = vadd.f32 %v12028_v30, %v3899_v41  ;;  %v15060_v18 = vld [vmem:[#allocation69_spill] sm:$0xff] }
 0x2c2   : > { %v3636_v37 = vpop.f32.mrf.mxu0  ;;  %v3127_v51 = vadd.f32 %v15060_v18, %v11564_v57 }
 0x2c3   : > { %v3901_v32 = vadd.f32 %v3636_v37, %v3123_v58  ;;  %v12073_v49 = vpack.c.bf16 %v4134_v7, %v4132_v10  ;;  %v4024_v40 = vadd.f32 %v12034_v20, %v3900_v2  ;;  %v4135_v46 = vmax.f32 %v4023_v42, 0.0 }
 0x2c4   : > { %v3638_v60 = vpop.f32.mrf.mxu0  ;;  %v3128_v2 = vadd.f32 %v15061_v21, %v11569_v53 }
 0x2c5   : > { %v4025_v1 = vadd.f32 %v12028_v30, %v3901_v32  ;;  %v3902_v62 = vadd.f32 %v3638_v60, %v3124_v12  ;;  %v4136_v41 = vmax.f32 %v4024_v40, 0.0  ;;  %v15062_v32 = vld [vmem:[#allocation71_spill] sm:$0xff]  ;;  %v15063_v40 = vld [vmem:[#allocation72_spill] sm:$0xff] }
 0x2c6   : > { %v3642_v26 = vpop.f32.mrf.mxu0  ;;  %9425 = vmatmul.mubr.msk.bf16.gmra.mxu0 %vm890_vm0, %v10297_v31  ;;  %v3129_v60 = vadd.f32 %v15062_v32, %v11575_v56 }
 0x2c7   : > { %v4137_v52 = vmax.f32 %v4025_v1, 0.0  ;;  %v4026_v29 = vadd.f32 %v12034_v20, %v3902_v62  ;;  %v3903_v27 = vadd.f32 %v3642_v26, %v3125_v36  ;;  %v3130_v1 = vadd.f32 %v15063_v40, %v11581_v61  ;;  %v10300_v61 = vld [vmem:[%s15065_s23 + $0x4] ss:$16 sps:$4 sm:$0xff]  }
 0x2c8   : > { %v3644_v25 = vpop.f32.mrf.mxu0  ;;  %4692 = vmatprep.mubr.bf16.mxu1 %v10300_v61  ;;  %v15071_v61 = vld [vmem:[#allocation79_spill] sm:$0xff] }
 0x2c9   : > { %v12085_v58 = vpack.c.bf16 %v4137_v52, %v4135_v46  ;;  %v4138_v14 = vmax.f32 %v4026_v29, 0.0  ;;  %v3904_v10 = vadd.f32 %v3644_v25, %v3126_v55  ;;  %v4027_v37 = vadd.f32 %v12028_v30, %v3903_v27  ;;  %v15064_v46 = vld [vmem:[#allocation73_spill] sm:$0xff] }
 0x2ca   : > { %v3646_v7 = vpop.f32.mrf.mxu0  ;;  %v3131_v52 = vadd.f32 %v15064_v46, %v11587_v6 }
 0x2cb   : > { %v3905_v31 = vadd.f32 %v3646_v7, %v3127_v51  ;;  %v12090_v12 = vpack.c.bf16 %v4138_v14, %v4136_v41  ;;  %v4028_v57 = vadd.f32 %v12034_v20, %v3904_v10  ;;  %v4139_v3 = vmax.f32 %v4027_v37, 0.0  ;;  %v15066_v41 = vld [vmem:[#allocation74_spill] sm:$0xff] }
 0x2cc   : > { %v3648_v42 = vpop.f32.mrf.mxu0  ;;  %v3132_v14 = vadd.f32 %v15066_v41, %v11592_v4  ;;  %v3137_v41 = vadd.f32 %v15071_v61, %v11621_v28 }
 0x2cd   : > { %v4029_v50 = vadd.f32 %v12028_v30, %v3905_v31  ;;  %v3906_v36 = vadd.f32 %v3648_v42, %v3128_v2  ;;  %v4140_v27 = vmax.f32 %v4028_v57, 0.0  ;;  %v15067_v2 = vld [vmem:[#allocation75_spill] sm:$0xff] }
 0x2ce   : > { %v3652_v62 = vpop.f32.mrf.mxu0  ;;  %v3133_v37 = vadd.f32 %v15067_v2, %v11598_v9 }
 0x2cf   : > { %v4141_v53 = vmax.f32 %v4029_v50, 0.0  ;;  %v4030_v55 = vadd.f32 %v12034_v20, %v3906_v36  ;;  %v3907_v26 = vadd.f32 %v3652_v62, %v3129_v60  ;;  %v15068_v60 = vld [vmem:[#allocation76_spill] sm:$0xff]  ;;  %v15069_v62 = vld [vmem:[#allocation77_spill] sm:$0xff] }
 0x2d0   : > { %v3654_v29 = vpop.f32.mrf.mxu0  ;;  %v3134_v57 = vadd.f32 %v15068_v60, %v11604_v15 }
 0x2d1   : > { %v12101_v56 = vpack.c.bf16 %v4141_v53, %v4139_v3  ;;  %v4142_v18 = vmax.f32 %v4030_v55, 0.0  ;;  %v3908_v51 = vadd.f32 %v3654_v29, %v3130_v1  ;;  %v4031_v10 = vadd.f32 %v12028_v30, %v3907_v26  ;;  %v15070_v29 = vld [vmem:[#allocation78_spill] sm:$0xff] }
 0x2d2   : > { %v3656_v25 = vpop.f32.mrf.mxu0  ;;  %v3135_v3 = vadd.f32 %v15069_v62, %v11610_v0 }
 0x2d3   : > { %v3909_v7 = vadd.f32 %v3656_v25, %v3131_v52  ;;  %v12109_v21 = vpack.c.bf16 %v4142_v18, %v4140_v27  ;;  %v4032_v31 = vadd.f32 %v12034_v20, %v3908_v51  ;;  %v4143_v4 = vmax.f32 %v4031_v10, 0.0 }
 0x2d4   : > { %v3658_v6 = vpop.f32.mrf.mxu0  ;;  %v3136_v27 = vadd.f32 %v15070_v29, %v11615_v23 }
 0x2d5   : > { %v4033_v42 = vadd.f32 %v12028_v30, %v3909_v7  ;;  %v3910_v32 = vadd.f32 %v3658_v6, %v3132_v14  ;;  %v4144_v55 = vmax.f32 %v4032_v31, 0.0  ;;  %v15072_v7 = vld [vmem:[#allocation80_spill] sm:$0xff] }
 0x2d6   : > { %v3662_v50 = vpop.f32.mrf.mxu0  ;;  %v3138_v6 = vadd.f32 %v15072_v7, %v11627_v35  ;;  %v15080_v7 = vld [vmem:[#allocation87_spill] sm:$0xff] }
 0x2d7   : > { %v4145_v36 = vmax.f32 %v4033_v42, 0.0  ;;  %v4034_v40 = vadd.f32 %v12034_v20, %v3910_v32  ;;  %v3911_v1 = vadd.f32 %v3662_v50, %v3133_v37  ;;  %v15073_v32 = vld [vmem:[#allocation81_spill] sm:$0xff] }
 0x2d8   : > { %v3664_v53 = vpop.f32.mrf.mxu0  ;;  %v3139_v60 = vadd.f32 %v15073_v32, %v11633_v19 }
 0x2d9   : > { %v12120_v9 = vpack.c.bf16 %v4145_v36, %v4143_v4  ;;  %v4146_v26 = vmax.f32 %v4034_v40, 0.0  ;;  %v3912_v46 = vadd.f32 %v3664_v53, %v3134_v57  ;;  %v4035_v15 = vadd.f32 %v12028_v30, %v3911_v1  ;;  %v15074_v1 = vld [vmem:[#allocation82_spill] sm:$0xff] }
 0x2da   : > { %v3666_v52 = vpop.f32.mrf.mxu0  ;;  %v3140_v62 = vadd.f32 %v15074_v1, %v11638_v43 }
 0x2db   : > { %v3913_v18 = vadd.f32 %v3666_v52, %v3135_v3  ;;  %v12125_v51 = vpack.c.bf16 %v4146_v26, %v4144_v55  ;;  %v4036_v0 = vadd.f32 %v12034_v20, %v3912_v46  ;;  %v4147_v37 = vmax.f32 %v4035_v15, 0.0  ;;  %v15075_v26 = vld [vmem:[#allocation84_spill] sm:$0xff]  ;;  %v15076_v46 = vld [vmem:[#allocation83_spill] sm:$0xff]  ;;  %v15077_v15 = vld [vmem:[#allocation86_spill] sm:$0xff] }
 0x2dc   : > { %v3668_v25 = vpop.f32.mrf.mxu0  ;;  %v3141_v52 = vadd.f32 %v15076_v46, %v15075_v26 }
 0x2dd   : > { %v4037_v14 = vadd.f32 %v12028_v30, %v3913_v18  ;;  %v3914_v10 = vadd.f32 %v3668_v25, %v3136_v27  ;;  %v4148_v50 = vmax.f32 %v4036_v0, 0.0  ;;  %v15078_v18 = vld [vmem:[#allocation85_spill] sm:$0xff] }
 0x2de   : > { %v3672_v2 = vpop.f32.mrf.mxu0  ;;  %v3142_v25 = vadd.f32 %v15078_v18, %v15077_v15 }
 0x2df   : > { %v4149_v23 = vmax.f32 %v4037_v14, 0.0  ;;  %v4038_v31 = vadd.f32 %v12034_v20, %v3914_v10  ;;  %v3915_v42 = vadd.f32 %v3672_v2, %v3137_v41  ;;  %v15079_v10 = vld [vmem:[#allocation88_spill] sm:$0xff] }
 0x2e0   : > { %v3674_v57 = vpop.f32.mrf.mxu0 }
 0x2e1   : > { %v12136_v28 = vpack.c.bf16 %v4149_v23, %v4147_v37  ;;  %v4150_v4 = vmax.f32 %v4038_v31, 0.0  ;;  %v3916_v36 = vadd.f32 %v3674_v57, %v3138_v6  ;;  %v4039_v35 = vadd.f32 %v12028_v30, %v3915_v42  ;;  %v15082_v57 = vld [vmem:[#allocation89_spill] sm:$0xff] }
 0x2e2   : > { %v3676_v40 = vpop.f32.mrf.mxu0  ;;  %v3143_v6 = vadd.f32 %v15080_v7, %v15079_v10 }
 0x2e3   : > { %v3917_v3 = vadd.f32 %v3676_v40, %v3139_v60  ;;  %v12141_v53 = vpack.c.bf16 %v4150_v4, %v4148_v50  ;;  %v4040_v19 = vadd.f32 %v12034_v20, %v3916_v36  ;;  %v4151_v41 = vmax.f32 %v4039_v35, 0.0  ;;  %v15081_v60 = vld [vmem:[#allocation90_spill] sm:$0xff] }
 0x2e4   : > { %v3678_v55 = vpop.f32.mrf.mxu0  ;;  %v3144_v50 = vadd.f32 %v15082_v57, %v15081_v60 }
 0x2e5   : > { %v4041_v29 = vadd.f32 %v12028_v30, %v3917_v3  ;;  %v3918_v27 = vadd.f32 %v3678_v55, %v3140_v62  ;;  %v4152_v37 = vmax.f32 %v4040_v19, 0.0 }
 0x2e6   : > { %v3682_v61 = vpop.f32.mrf.mxu0 }
 0x2e7   : > { %v4153_v43 = vmax.f32 %v4041_v29, 0.0  ;;  %v4042_v0 = vadd.f32 %v12034_v20, %v3918_v27  ;;  %v3919_v14 = vadd.f32 %v3682_v61, %v3141_v52  ;;  %v12159_v29 = vpop.f32.mrf.mxu1 }
 0x2e8   : > { %v3684_v2 = vpop.f32.mrf.mxu0 }
 0x2e9   : > { %v4251_v23 = vpack.c.bf16 %v4153_v43, %v4151_v41  ;;  %v4154_v31 = vmax.f32 %v4042_v0, 0.0  ;;  %v3920_v42 = vadd.f32 %v3684_v2, %v3142_v25  ;;  %v4043_v4 = vadd.f32 %v12028_v30, %v3919_v14  ;;  %v15083_v14 = vld [vmem:[#allocation91_spill] sm:$0xff] }
 0x2ea   : > { %v3686_v32 = vpop.f32.mrf.mxu0  ;;  %v3148_v43 = vadd.f32 %v11673_v63, %v11676_v22 }
 0x2eb   : > { %v3921_v36 = vadd.f32 %v3686_v32, %v3143_v6  ;;  %v4252_v40 = vpack.c.bf16 %v4154_v31, %v4152_v37  ;;  %v4044_v62 = vadd.f32 %v12034_v20, %v3920_v42  ;;  %v4155_v26 = vmax.f32 %v4043_v4, 0.0  ;;  %v12166_v6 = vpop.f32.mrf.mxu1 }
 0x2ec   : > { %v3688_v1 = vpop.f32.mrf.mxu0 }
 0x2ed   : > { %v4045_v35 = vadd.f32 %v12028_v30, %v3921_v36  ;;  %v3922_v3 = vadd.f32 %v3688_v1, %v3144_v50  ;;  %v4156_v15 = vmax.f32 %v4044_v62, 0.0  ;;  %v12172_v60 = vpop.f32.mrf.mxu1  ;;  %v3152_v62 = vadd.f32 %v11690_v59, %v11693_v54 }
 0x2ee   : > { %v3692_v55 = vpop.f32.mrf.mxu0 }
 0x2ef   : > { %v4157_v46 = vmax.f32 %v4045_v35, 0.0  ;;  %v4046_v52 = vadd.f32 %v12034_v20, %v3922_v3  ;;  %v3923_v19 = vadd.f32 %v3692_v55, %v11667_v11  ;;  %v12185_v55 = vpop.f32.mrf.mxu1 }
 0x2f0   : > { %v3694_v27 = vpop.f32.mrf.mxu0 }
 0x2f1   : > { %v4253_v18 = vpack.c.bf16 %v4157_v46, %v4155_v26  ;;  %v4158_v25 = vmax.f32 %v4046_v52, 0.0  ;;  %v3924_v61 = vadd.f32 %v3694_v27, %v11671_v33  ;;  %v4047_v0 = vadd.f32 %v12028_v30, %v3923_v19  ;;  %v15084_v27 = vld [vmem:[#allocation93_spill] sm:$0xff] }
 0x2f2   : > { %v3696_v41 = vpop.f32.mrf.mxu0 }
 0x2f3   : > { %v3925_v10 = vadd.f32 %v3696_v41, %v15083_v14  ;;  %v4254_v7 = vpack.c.bf16 %v4158_v25, %v4156_v15  ;;  %v4048_v2 = vadd.f32 %v12034_v20, %v3924_v61  ;;  %v4159_v42 = vmax.f32 %v4047_v0, 0.0  ;;  %v15085_v15 = vld [vmem:[#allocation92_spill] sm:$0xff]  ;;  %v12199_v25 = vpop.f32.mrf.mxu1  ;;  %v15087_v0 = vld [vmem:[#allocation94_spill] sm:$0xff] }
 0x2f4   : > { %v3698_v11 = vpop.f32.mrf.mxu0 }
 0x2f5   : > { %v4049_v37 = vadd.f32 %v12028_v30, %v3925_v10  ;;  %v3926_v31 = vadd.f32 %v3698_v11, %v3148_v43  ;;  %4660 = vmatprep.subr.bf16.mxu1 %v4254_v7  ;;  %5370 = vmatprep.subr.bf16.mxu0 %v4254_v7  ;;  %v4160_v50 = vmax.f32 %v4048_v2, 0.0  ;;  %v15086_v43 = vld [vmem:[#allocation95_spill] sm:$0xff]  ;;  %v12212_v11 = vpop.f32.mrf.mxu1 }
 0x2f6   : > { %v3702_v33 = vpop.f32.mrf.mxu0  ;;  %4661 = vmatpush1.bf16.msra.mxu1 %v4253_v18  ;;  %5371 = vmatpush1.bf16.msra.mxu0 %v4253_v18  ;;  %v3155_v18 = vadd.f32 %v15085_v15, %v15084_v27  ;;  %v3156_v14 = vadd.f32 %v15087_v0, %v15086_v43  ;;  %v15098_v0 = vld [vmem:[#allocation3_spill] sm:$0xff] }
 0x2f7   : > { %v4161_v63 = vmax.f32 %v4049_v37, 0.0  ;;  %v4050_v22 = vadd.f32 %v12034_v20, %v3926_v31  ;;  %v3927_v32 = vadd.f32 %v3702_v33, %v11684_v5  ;;  %4662 = vmatprep.subr.bf16.mxu1 %v4252_v40  ;;  %5372 = vmatprep.subr.bf16.mxu0 %v4252_v40  ;;  %v15088_v37 = vld [vmem:[#allocation97_spill] sm:$0xff]  ;;  %v15089_v31 = vld [vmem:[#allocation96_spill] sm:$0xff] }
 0x2f8   : > { %v3704_v57 = vpop.f32.mrf.mxu0  ;;  %v3157_v33 = vadd.f32 %v15089_v31, %v15088_v37  ;;  %v15100_v31 = vld [vmem:[#allocation4_spill] sm:$0xff] }
 0x2f9   : > { %v12174_v4 = vpack.c.bf16 %v4161_v63, %v4159_v42  ;;  %v4162_v36 = vmax.f32 %v4050_v22, 0.0  ;;  %v3928_v1 = vadd.f32 %v3704_v57, %v11688_v16  ;;  %v4051_v3 = vadd.f32 %v12028_v30, %v3927_v32  ;;  %v15090_v22 = vld [vmem:[#allocation99_spill] sm:$0xff]  ;;  %v15091_v32 = vld [vmem:[#allocation98_spill] sm:$0xff] }
 0x2fa   : > { %v3706_v35 = vpop.f32.mrf.mxu0  ;;  %4663 = vmatpush1.bf16.msra.mxu1 %v4251_v23  ;;  %5373 = vmatpush1.bf16.msra.mxu0 %v4251_v23  ;;  %v3154_v23 = vadd.f32 %v11700_v24, %v11703_v38  ;;  %v3158_v57 = vadd.f32 %v15091_v32, %v15090_v22 }
 0x2fb   : > { %v3929_v5 = vadd.f32 %v3706_v35, %v11695_v48  ;;  %4664 = vmatprep.subr.bf16.mxu1 %v12141_v53  ;;  %5374 = vmatprep.subr.bf16.mxu0 %v12141_v53  ;;  %v12183_v40 = vpack.c.bf16 %v4162_v36, %v4160_v50  ;;  %v4052_v16 = vadd.f32 %v12034_v20, %v3928_v1  ;;  %v4163_v48 = vmax.f32 %v4051_v3, 0.0  ;;  %v15092_v35 = vld [vmem:[#allocation101_spill] sm:$0xff]  ;;  %v15093_v3 = vld [vmem:[#allocation100_spill] sm:$0xff] }
 0x2fc   : > { %v3708_v26 = vpop.f32.mrf.mxu0 }
 0x2fd   : > { %v4053_v59 = vadd.f32 %v12028_v30, %v3929_v5  ;;  %v3930_v54 = vadd.f32 %v3708_v26, %v3152_v62  ;;  %v4164_v38 = vmax.f32 %v4052_v16, 0.0  ;;  %v3159_v5 = vadd.f32 %v15093_v3, %v15092_v35  ;;  %v12227_v26 = vpop.f32.mrf.mxu1 }
 0x2fe   : > { %v3712_v46 = vpop.f32.mrf.mxu0  ;;  %4665 = vmatpush1.bf16.msra.mxu1 %v12136_v28  ;;  %5375 = vmatpush1.bf16.msra.mxu0 %v12136_v28 }
 0x2ff   : > { %v4165_v53 = vmax.f32 %v4053_v59, 0.0  ;;  %v4054_v52 = vadd.f32 %v12034_v20, %v3930_v54  ;;  %v3931_v19 = vadd.f32 %v3712_v46, %v11705_v44  ;;  %4666 = vmatprep.subr.bf16.mxu1 %v12125_v51  ;;  %5376 = vmatprep.subr.bf16.mxu0 %v12125_v51  ;;  %v15094_v46 = vld [vmem:[#allocation103_spill] sm:$0xff]  ;;  %v12240_v15 = vpop.f32.mrf.mxu1 }
 0x300   : > { %v3714_v24 = vpop.f32.mrf.mxu0 }
 0x301   : > { %v12201_v61 = vpack.c.bf16 %v4165_v53, %v4163_v48  ;;  %v4166_v28 = vmax.f32 %v4054_v52, 0.0  ;;  %v3932_v41 = vadd.f32 %v3714_v24, %v3154_v23  ;;  %v4055_v44 = vadd.f32 %v12028_v30, %v3931_v19  ;;  %v15095_v48 = vld [vmem:[#allocation102_spill] sm:$0xff] }
 0x302   : > { %v3716_v10 = vpop.f32.mrf.mxu0  ;;  %4667 = vmatpush1.bf16.msra.mxu1 %v12120_v9  ;;  %5377 = vmatpush1.bf16.msra.mxu0 %v12120_v9  ;;  %v3160_v53 = vadd.f32 %v15095_v48, %v15094_v46  ;;  %v15096_v24 = vld [vmem:[#allocation2_spill] sm:$0xff] }
 0x303   : > { %v3933_v51 = vadd.f32 %v3716_v10, %v3155_v18  ;;  %4668 = vmatprep.subr.bf16.mxu1 %v12109_v21  ;;  %5378 = vmatprep.subr.bf16.mxu0 %v12109_v21  ;;  %v12210_v7 = vpack.c.bf16 %v4166_v28, %v4164_v38  ;;  %v4056_v42 = vadd.f32 %v12034_v20, %v3932_v41  ;;  %v4167_v21 = vmax.f32 %v4055_v44, 0.0  ;;  %v15097_v38 = vld [vmem:[#allocation104_spill] sm:$0xff] }
 0x304   : > { %v3718_v2 = vpop.f32.mrf.mxu0  ;;  %v3161_v28 = vadd.f32 %v15097_v38, %v15096_v24 }
 0x305   : > { %v4057_v63 = vadd.f32 %v12028_v30, %v3933_v51  ;;  %v3934_v9 = vadd.f32 %v3718_v2, %v3156_v14  ;;  %v4168_v59 = vmax.f32 %v4056_v42, 0.0  ;;  %v15099_v14 = vld [vmem:[#allocation105_spill] sm:$0xff] }
 0x306   : > { %v3722_v50 = vpop.f32.mrf.mxu0  ;;  %4669 = vmatpush1.bf16.msra.mxu1 %v12101_v56  ;;  %5379 = vmatpush1.bf16.msra.mxu0 %v12101_v56  ;;  %v3162_v10 = vadd.f32 %v15099_v14, %v15098_v0 }
 0x307   : > { %v4169_v36 = vmax.f32 %v4057_v63, 0.0  ;;  %v4058_v1 = vadd.f32 %v12034_v20, %v3934_v9  ;;  %v3935_v62 = vadd.f32 %v3722_v50, %v3157_v33  ;;  %4670 = vmatprep.subr.bf16.mxu1 %v12090_v12  ;;  %5380 = vmatprep.subr.bf16.mxu0 %v12090_v12  ;;  %v15101_v33 = vld [vmem:[#allocation106_spill] sm:$0xff]  ;;  %v12255_v63 = vpop.f32.mrf.mxu1 }
 0x308   : > { %v3724_v16 = vpop.f32.mrf.mxu0  ;;  %v3163_v42 = vadd.f32 %v15101_v33, %v15100_v31 }
 0x309   : > { %v12229_v54 = vpack.c.bf16 %v4169_v36, %v4167_v21  ;;  %v4170_v23 = vmax.f32 %v4058_v1, 0.0  ;;  %v3936_v56 = vadd.f32 %v3724_v16, %v3158_v57  ;;  %v4059_v12 = vadd.f32 %v12028_v30, %v3935_v62  ;;  %v15102_v21 = vld [vmem:[#allocation5_spill] sm:$0xff]  ;;  %v15103_v36 = vld [vmem:[#allocation107_spill] sm:$0xff]  ;;  %v12266_v3 = vpop.f32.mrf.mxu1  ;;  %v15104_v16 = vld [vmem:[#allocation6_spill] sm:$0xff] }
 0x30a   : > { %v3726_v52 = vpop.f32.mrf.mxu0  ;;  %4671 = vmatpush1.bf16.msra.mxu1 %v12085_v58  ;;  %5381 = vmatpush1.bf16.msra.mxu0 %v12085_v58  ;;  %v3164_v1 = vadd.f32 %v15103_v36, %v15102_v21 }
 0x30b   : > { %v3937_v19 = vadd.f32 %v3726_v52, %v3159_v5  ;;  %4672 = vmatprep.subr.bf16.mxu1 %v12073_v49  ;;  %5382 = vmatprep.subr.bf16.mxu0 %v12073_v49  ;;  %v12238_v27 = vpack.c.bf16 %v4170_v23, %v4168_v59  ;;  %v4060_v41 = vadd.f32 %v12034_v20, %v3936_v56  ;;  %v4171_v49 = vmax.f32 %v4059_v12, 0.0  ;;  %v15105_v59 = vld [vmem:[#allocation108_spill] sm:$0xff] }
 0x30c   : > { %v3728_v18 = vpop.f32.mrf.mxu0  ;;  %v3165_v23 = vadd.f32 %v15105_v59, %v15104_v16 }
 0x30d   : > { %v4061_v43 = vadd.f32 %v12028_v30, %v3937_v19  ;;  %v3938_v58 = vadd.f32 %v3728_v18, %v3160_v53  ;;  %v4172_v22 = vmax.f32 %v4060_v41, 0.0  ;;  %v15107_v53 = vld [vmem:[#allocation109_spill] sm:$0xff]  ;;  %v15109_v41 = vld [vmem:[#allocation110_spill] sm:$0xff] }
 0x30e   : > { %v3732_v44 = vpop.f32.mrf.mxu0  ;;  %4673 = vmatpush1.bf16.msra.mxu1 %v12067_v34  ;;  %5383 = vmatpush1.bf16.msra.mxu0 %v12067_v34 }
 0x30f   : > { %v4173_v51 = vmax.f32 %v4061_v43, 0.0  ;;  %v4062_v2 = vadd.f32 %v12034_v20, %v3938_v58  ;;  %v3939_v37 = vadd.f32 %v3732_v44, %v3161_v28  ;;  %4674 = vmatprep.subr.bf16.mxu1 %v12055_v13  ;;  %5384 = vmatprep.subr.bf16.mxu0 %v12055_v13  ;;  %v15108_v28 = vld [vmem:[#allocation8_spill] sm:$0xff]  ;;  %v12277_v58 = vpop.f32.mrf.mxu1 }
 0x310   : > { %v3734_v9 = vpop.f32.mrf.mxu0  ;;  %v3167_v43 = vadd.f32 %v15109_v41, %v15108_v28 }
 0x311   : > { %v12257_v32 = vpack.c.bf16 %v4173_v51, %v4171_v49  ;;  %v4174_v57 = vmax.f32 %v4062_v2, 0.0  ;;  %v3940_v34 = vadd.f32 %v3734_v9, %v3162_v10  ;;  %v4063_v13 = vadd.f32 %v12028_v30, %v3939_v37  ;;  %v15110_v2 = vld [vmem:[#allocation9_spill] sm:$0xff]  ;;  %v15111_v37 = vld [vmem:[#allocation111_spill] sm:$0xff] }
 0x312   : > { %v3736_v50 = vpop.f32.mrf.mxu0  ;;  %4675 = vmatpush1.bf16.msra.mxu1 %v12047_v47  ;;  %5385 = vmatpush1.bf16.msra.mxu0 %v12047_v47  ;;  %v15106_v47 = vld [vmem:[#allocation7_spill] sm:$0xff]  ;;  %v3168_v31 = vadd.f32 %v15111_v37, %v15110_v2 }
 0x313   : > { %v3941_v62 = vadd.f32 %v3736_v50, %v3163_v42  ;;  %v12264_v35 = vpack.c.bf16 %v4174_v57, %v4172_v22  ;;  %v4064_v56 = vadd.f32 %v12034_v20, %v3940_v34  ;;  %v3166_v52 = vadd.f32 %v15107_v53, %v15106_v47  ;;  %v12286_v22 = vpop.f32.mrf.mxu1  ;;  %v15112_v34 = vld [vmem:[#allocation10_spill] sm:$0xff]  ;;  %v15113_v50 = vld [vmem:[#allocation112_spill] sm:$0xff] }
 0x314   : > { %v3738_v5 = vpop.f32.mrf.mxu0  ;;  %v4175_v19 = vmax.f32 %v4063_v13, 0.0  ;;  %v3169_v21 = vadd.f32 %v15113_v50, %v15112_v34  ;;  %v15116_v47 = vld [vmem:[#allocation12_spill] sm:$0xff]  ;;  %v15117_v53 = vld [vmem:[#allocation114_spill] sm:$0xff] }
 0x315   : > { %v4065_v46 = vadd.f32 %v12028_v30, %v3941_v62  ;;  %v3942_v48 = vadd.f32 %v3738_v5, %v3164_v1  ;;  %v4176_v14 = vmax.f32 %v4064_v56, 0.0  ;;  %v15114_v62 = vld [vmem:[#allocation11_spill] sm:$0xff]  ;;  %v15115_v5 = vld [vmem:[#allocation113_spill] sm:$0xff] }
 0x316   : > { %v3742_v12 = vpop.f32.mrf.mxu0  ;;  %v3170_v16 = vadd.f32 %v15115_v5, %v15114_v62 }
 0x317   : > { %v4177_v18 = vmax.f32 %v4065_v46, 0.0  ;;  %v4066_v24 = vadd.f32 %v12034_v20, %v3942_v48  ;;  %v3943_v38 = vadd.f32 %v3742_v12, %v3165_v23  ;;  %v12297_v12 = vpop.f32.mrf.mxu1 }
 0x318   : > { %v3744_v0 = vpop.f32.mrf.mxu0 }
 0x319   : > { %v12279_v10 = vpack.c.bf16 %v4177_v18, %v4175_v19  ;;  %v4178_v44 = vmax.f32 %v4066_v24, 0.0  ;;  %v3944_v49 = vadd.f32 %v3744_v0, %v3166_v52  ;;  %v4067_v33 = vadd.f32 %v12028_v30, %v3943_v38  ;;  %v15119_v0 = vld [vmem:[#allocation115_spill] sm:$0xff]  ;;  %v12306_v2 = vpop.f32.mrf.mxu1 }
 0x31a   : > { %v3746_v51 = vpop.f32.mrf.mxu0  ;;  %v3171_v52 = vadd.f32 %v15117_v53, %v15116_v47 }
 0x31b   : > { %v3945_v42 = vadd.f32 %v3746_v51, %v3167_v43  ;;  %v12284_v9 = vpack.c.bf16 %v4178_v44, %v4176_v14  ;;  %v4068_v36 = vadd.f32 %v12034_v20, %v3944_v49  ;;  %v4179_v23 = vmax.f32 %v4067_v33, 0.0  ;;  %v15118_v43 = vld [vmem:[#allocation13_spill] sm:$0xff]  ;;  %v15121_v33 = vld [vmem:[#allocation116_spill] sm:$0xff] }
 0x31c   : > { %v3748_v57 = vpop.f32.mrf.mxu0  ;;  %v3172_v14 = vadd.f32 %v15119_v0, %v15118_v43 }
 0x31d   : > { %v4069_v1 = vadd.f32 %v12028_v30, %v3945_v42  ;;  %v3946_v13 = vadd.f32 %v3748_v57, %v3168_v31  ;;  %v4180_v18 = vmax.f32 %v4068_v36, 0.0  ;;  %v15120_v31 = vld [vmem:[#allocation14_spill] sm:$0xff]  ;;  %v15123_v36 = vld [vmem:[#allocation117_spill] sm:$0xff] }
 0x31e   : > { %v3752_v59 = vpop.f32.mrf.mxu0  ;;  %v3173_v42 = vadd.f32 %v15121_v33, %v15120_v31 }
 0x31f   : > { %v4181_v56 = vmax.f32 %v4069_v1, 0.0  ;;  %v4070_v46 = vadd.f32 %v12034_v20, %v3946_v13  ;;  %v3947_v48 = vadd.f32 %v3752_v59, %v3169_v21  ;;  %v15122_v21 = vld [vmem:[#allocation15_spill] sm:$0xff] }
 0x320   : > { %v3754_v19 = vpop.f32.mrf.mxu0  ;;  %v3174_v1 = vadd.f32 %v15123_v36, %v15122_v21  ;;  %v15128_v36 = vld [vmem:[#allocation18_spill] sm:$0xff] }
 0x321   : > { %v12299_v24 = vpack.c.bf16 %v4181_v56, %v4179_v23  ;;  %v4182_v38 = vmax.f32 %v4070_v46, 0.0  ;;  %v3948_v28 = vadd.f32 %v3754_v19, %v3170_v16  ;;  %v4071_v44 = vadd.f32 %v12028_v30, %v3947_v48  ;;  %v15124_v23 = vld [vmem:[#allocation16_spill] sm:$0xff]  ;;  %v15125_v56 = vld [vmem:[#allocation118_spill] sm:$0xff]  ;;  %v12317_v48 = vpop.f32.mrf.mxu1 }
 0x322   : > { %v3756_v41 = vpop.f32.mrf.mxu0  ;;  %v3175_v46 = vadd.f32 %v15125_v56, %v15124_v23  ;;  %v15129_v23 = vld [vmem:[#allocation19_spill] sm:$0xff] }
 0x323   : > { %v3949_v49 = vadd.f32 %v3756_v41, %v3171_v52  ;;  %v12304_v51 = vpack.c.bf16 %v4182_v38, %v4180_v18  ;;  %v4072_v57 = vadd.f32 %v12034_v20, %v3948_v28  ;;  %v4183_v62 = vmax.f32 %v4071_v44, 0.0  ;;  %v15126_v28 = vld [vmem:[#allocation17_spill] sm:$0xff]  ;;  %v15127_v41 = vld [vmem:[#allocation119_spill] sm:$0xff] }
 0x324   : > { %v3758_v37 = vpop.f32.mrf.mxu0  ;;  %v3176_v43 = vadd.f32 %v15127_v41, %v15126_v28 }
 0x325   : > { %v4073_v34 = vadd.f32 %v12028_v30, %v3949_v49  ;;  %v3950_v50 = vadd.f32 %v3758_v37, %v3172_v14  ;;  %v4184_v53 = vmax.f32 %v4072_v57, 0.0  ;;  %v12322_v49 = vpop.f32.mrf.mxu1 }
 0x326   : > { %v3762_v13 = vpop.f32.mrf.mxu0 }
 0x327   : > { %v4185_v5 = vmax.f32 %v4073_v34, 0.0  ;;  %v4074_v16 = vadd.f32 %v12034_v20, %v3950_v50  ;;  %v3951_v59 = vadd.f32 %v3762_v13, %v3173_v42  ;;  %v12328_v13 = vpop.f32.mrf.mxu1 }
 0x328   : > { %v3764_v47 = vpop.f32.mrf.mxu0 }
 0x329   : > { %v4267_v52 = vpack.c.bf16 %v4185_v5, %v4183_v62  ;;  %v4186_v19 = vmax.f32 %v4074_v16, 0.0  ;;  %v3952_v18 = vadd.f32 %v3764_v47, %v3174_v1  ;;  %v4075_v0 = vadd.f32 %v12028_v30, %v3951_v59  ;;  %v15130_v47 = vld [vmem:[#allocation21_spill] sm:$0xff] }
 0x32a   : > { %v3766_v38 = vpop.f32.mrf.mxu0 }
 0x32b   : > { %v3953_v14 = vadd.f32 %v3766_v38, %v3175_v46  ;;  %v4268_v44 = vpack.c.bf16 %v4186_v19, %v4184_v53  ;;  %v4076_v31 = vadd.f32 %v12034_v20, %v3952_v18  ;;  %v4187_v34 = vmax.f32 %v4075_v0, 0.0  ;;  %v15131_v53 = vld [vmem:[#allocation20_spill] sm:$0xff] }
 0x32c   : > { %v3768_v37 = vpop.f32.mrf.mxu0  ;;  %v3180_v19 = vadd.f32 %v15131_v53, %v15130_v47  ;;  %v15132_v38 = vld [vmem:[#allocation120_spill] sm:$0xff] }
 0x32d   : > { %v4077_v33 = vadd.f32 %v12028_v30, %v3953_v14  ;;  %v3954_v42 = vadd.f32 %v3768_v37, %v3176_v43  ;;  %v4188_v5 = vmax.f32 %v4076_v31, 0.0  ;;  %v12335_v43 = vpop.f32.mrf.mxu1 }
 0x32e   : > { %v3772_v57 = vpop.f32.mrf.mxu0 }
 0x32f   : > { %v4189_v50 = vmax.f32 %v4077_v33, 0.0  ;;  %v4078_v21 = vadd.f32 %v12034_v20, %v3954_v42  ;;  %v3955_v1 = vadd.f32 %v3772_v57, %v15128_v36 }
 0x330   : > { %v3774_v62 = vpop.f32.mrf.mxu0 }
 0x331   : > { %v4269_v16 = vpack.c.bf16 %v4189_v50, %v4187_v34  ;;  %v4190_v59 = vmax.f32 %v4078_v21, 0.0  ;;  %v3956_v56 = vadd.f32 %v3774_v62, %v15129_v23  ;;  %v4079_v18 = vadd.f32 %v12028_v30, %v3955_v1  ;;  %v12341_v21 = vpop.f32.mrf.mxu1  ;;  %v15133_v23 = vld [vmem:[#allocation22_spill] sm:$0xff] }
 0x332   : > { %v3776_v46 = vpop.f32.mrf.mxu0 }
 0x333   : > { %v3957_v28 = vadd.f32 %v3776_v46, %v15132_v38  ;;  %v4270_v41 = vpack.c.bf16 %v4190_v59, %v4188_v5  ;;  %v4080_v14 = vadd.f32 %v12034_v20, %v3956_v56  ;;  %v4191_v42 = vmax.f32 %v4079_v18, 0.0  ;;  %v12354_v53 = vpop.f32.mrf.mxu1  ;;  %v15135_v38 = vld [vmem:[#allocation24_spill] sm:$0xff] }
 0x334   : > { %v3778_v0 = vpop.f32.mrf.mxu0 }
 0x335   : > { %v4081_v37 = vadd.f32 %v12028_v30, %v3957_v28  ;;  %v3958_v31 = vadd.f32 %v3778_v0, %v3180_v19  ;;  %4676 = vmatprep.subr.bf16.mxu1 %v4270_v41  ;;  %5386 = vmatprep.subr.bf16.mxu0 %v4270_v41  ;;  %v4192_v1 = vmax.f32 %v4080_v14, 0.0  ;;  %v15136_v14 = vld [vmem:[#allocation25_spill] sm:$0xff] }
 0x336   : > { %v3782_v33 = vpop.f32.mrf.mxu0  ;;  %4677 = vmatpush2.bf16.msra.mxu1 %v4269_v16  ;;  %5387 = vmatpush2.bf16.msra.mxu0 %v4269_v16  ;;  %v3184_v16 = vadd.f32 %v15133_v23, %v11863_v39 }
 0x337   : > { %v4193_v57 = vmax.f32 %v4081_v37, 0.0  ;;  %v4082_v34 = vadd.f32 %v12034_v20, %v3958_v31  ;;  %v3959_v50 = vadd.f32 %v3782_v33, %v11854_v17  ;;  %4678 = vmatprep.subr.bf16.mxu1 %v4268_v44  ;;  %5388 = vmatprep.subr.bf16.mxu0 %v4268_v44  ;;  %v15134_v17 = vld [vmem:[#allocation23_spill] sm:$0xff]  ;;  %v15137_v31 = vld [vmem:[#allocation26_spill] sm:$0xff] }
 0x338   : > { %v3784_v36 = vpop.f32.mrf.mxu0  ;;  %v3187_v33 = vadd.f32 %v12166_v6, %v15137_v31 }
 0x339   : > { %v12343_v62 = vpack.c.bf16 %v4193_v57, %v4191_v42  ;;  %v4194_v5 = vmax.f32 %v4082_v34, 0.0  ;;  %v3960_v59 = vadd.f32 %v3784_v36, %v11858_v45  ;;  %v4083_v46 = vadd.f32 %v12028_v30, %v3959_v50  ;;  %v12368_v42 = vpop.f32.mrf.mxu1  ;;  %v15138_v36 = vld [vmem:[#allocation27_spill] sm:$0xff] }
 0x33a   : > { %v3786_v56 = vpop.f32.mrf.mxu0  ;;  %4679 = vmatpush2.bf16.msra.mxu1 %v4267_v52  ;;  %5389 = vmatpush2.bf16.msra.mxu0 %v4267_v52  ;;  %v3186_v52 = vadd.f32 %v12159_v29, %v15135_v38 }
 0x33b   : > { %v3961_v47 = vadd.f32 %v3786_v56, %v15134_v17  ;;  %4680 = vmatprep.subr.bf16.mxu1 %v12304_v51  ;;  %5390 = vmatprep.subr.bf16.mxu0 %v12304_v51  ;;  %v12352_v44 = vpack.c.bf16 %v4194_v5, %v4192_v1  ;;  %v4084_v45 = vadd.f32 %v12034_v20, %v3960_v59  ;;  %v4195_v41 = vmax.f32 %v4083_v46, 0.0  ;;  %v12381_v23 = vpop.f32.mrf.mxu1  ;;  %v15139_v56 = vld [vmem:[#allocation28_spill] sm:$0xff] }
 0x33c   : > { %v3788_v19 = vpop.f32.mrf.mxu0  ;;  %v3188_v1 = vadd.f32 %v12172_v60, %v15138_v36  ;;  %v3189_v60 = vadd.f32 %v12185_v55, %v15139_v56  ;;  %v15141_v55 = vld [vmem:[#allocation30_spill] sm:$0xff] }
 0x33d   : > { %v4085_v39 = vadd.f32 %v12028_v30, %v3961_v47  ;;  %v3962_v18 = vadd.f32 %v3788_v19, %v3184_v16  ;;  %v4196_v57 = vmax.f32 %v4084_v45, 0.0  ;;  %v15140_v47 = vld [vmem:[#allocation29_spill] sm:$0xff] }
 0x33e   : > { %v3792_v28 = vpop.f32.mrf.mxu0  ;;  %4681 = vmatpush2.bf16.msra.mxu1 %v12299_v24  ;;  %5391 = vmatpush2.bf16.msra.mxu0 %v12299_v24  ;;  %v3190_v19 = vadd.f32 %v12199_v25, %v15140_v47 }
 0x33f   : > { %v4197_v51 = vmax.f32 %v4085_v39, 0.0  ;;  %v4086_v0 = vadd.f32 %v12034_v20, %v3962_v18  ;;  %v3963_v37 = vadd.f32 %v3792_v28, %v15136_v14  ;;  %4682 = vmatprep.subr.bf16.mxu1 %v12284_v9  ;;  %5392 = vmatprep.subr.bf16.mxu0 %v12284_v9  ;;  %v12396_v28 = vpop.f32.mrf.mxu1  ;;  %v15142_v14 = vld [vmem:[#allocation31_spill] sm:$0xff] }
 0x340   : > { %v3794_v29 = vpop.f32.mrf.mxu0 }
 0x341   : > { %v12370_v34 = vpack.c.bf16 %v4197_v51, %v4195_v41  ;;  %v4198_v24 = vmax.f32 %v4086_v0, 0.0  ;;  %v3964_v50 = vadd.f32 %v3794_v29, %v3186_v52  ;;  %v4087_v9 = vadd.f32 %v12028_v30, %v3963_v37  ;;  %v12409_v29 = vpop.f32.mrf.mxu1 }
 0x342   : > { %v3796_v5 = vpop.f32.mrf.mxu0  ;;  %4683 = vmatpush2.bf16.msra.mxu1 %v12279_v10  ;;  %5393 = vmatpush2.bf16.msra.mxu0 %v12279_v10  ;;  %v3191_v52 = vadd.f32 %v12212_v11, %v15141_v55  ;;  %v3192_v37 = vadd.f32 %v12227_v26, %v15142_v14 }
 0x343   : > { %v3965_v59 = vadd.f32 %v3796_v5, %v3187_v33  ;;  %4684 = vmatprep.subr.bf16.mxu1 %v12264_v35  ;;  %5394 = vmatprep.subr.bf16.mxu0 %v12264_v35  ;;  %v12379_v6 = vpack.c.bf16 %v4198_v24, %v4196_v57  ;;  %v4088_v46 = vadd.f32 %v12034_v20, %v3964_v50  ;;  %v4199_v35 = vmax.f32 %v4087_v9, 0.0  ;;  %v15143_v24 = vld [vmem:[#allocation32_spill] sm:$0xff] }
 0x344   : > { %v3798_v16 = vpop.f32.mrf.mxu0  ;;  %v3193_v26 = vadd.f32 %v12240_v15, %v15143_v24  ;;  %v15145_v15 = vld [vmem:[#allocation34_spill] sm:$0xff] }
 0x345   : > { %v4089_v17 = vadd.f32 %v12028_v30, %v3965_v59  ;;  %v3966_v10 = vadd.f32 %v3798_v16, %v3188_v1  ;;  %v4200_v41 = vmax.f32 %v4088_v46, 0.0  ;;  %v15144_v1 = vld [vmem:[#allocation33_spill] sm:$0xff]  ;;  %v12424_v46 = vpop.f32.mrf.mxu1  ;;  %v15149_v24 = vld [vmem:[#allocation38_spill] sm:$0xff] }
 0x346   : > { %v3802_v45 = vpop.f32.mrf.mxu0  ;;  %4685 = vmatpush2.bf16.msra.mxu1 %v12257_v32  ;;  %5395 = vmatpush2.bf16.msra.mxu0 %v12257_v32  ;;  %v3194_v5 = vadd.f32 %v12255_v63, %v15144_v1 }
 0x347   : > { %v4201_v39 = vmax.f32 %v4089_v17, 0.0  ;;  %v4090_v18 = vadd.f32 %v12034_v20, %v3966_v10  ;;  %v3967_v38 = vadd.f32 %v3802_v45, %v3189_v60  ;;  %4686 = vmatprep.subr.bf16.mxu1 %v12238_v27  ;;  %5396 = vmatprep.subr.bf16.mxu0 %v12238_v27  ;;  %v3195_v60 = vadd.f32 %v12266_v3, %v15145_v15  ;;  %v15146_v3 = vld [vmem:[#allocation35_spill] sm:$0xff]  ;;  %v12442_v55 = vpop.f32.mrf.mxu1 }
 0x348   : > { %v3804_v25 = vpop.f32.mrf.mxu0 }
 0x349   : > { %v12398_v51 = vpack.c.bf16 %v4201_v39, %v4199_v35  ;;  %v4202_v0 = vmax.f32 %v4090_v18, 0.0  ;;  %v3968_v32 = vadd.f32 %v3804_v25, %v3190_v19  ;;  %v4091_v27 = vadd.f32 %v12028_v30, %v3967_v38  ;;  %v10298_v19 = vld [vmem:[%s15065_s23] ss:$16 sps:$4 sm:$0xff]  }
 0x34a   : > { %v3806_v31 = vpop.f32.mrf.mxu0  ;;  %4687 = vmatpush2.bf16.msra.mxu1 %v12229_v54  ;;  %5397 = vmatpush2.bf16.msra.mxu0 %v12229_v54  ;;  %v3196_v35 = vadd.f32 %v12277_v58, %v15146_v3  ;;  %v15147_v25 = vld [vmem:[#allocation36_spill] sm:$0xff]  ;;  %v15148_v58 = vld [vmem:[#allocation37_spill] sm:$0xff] }
 0x34b   : > { %v3969_v33 = vadd.f32 %v3806_v31, %v3191_v52  ;;  %4688 = vmatprep.subr.bf16.mxu1 %v12210_v7  ;;  %5398 = vmatprep.subr.bf16.mxu0 %v12210_v7  ;;  %v12407_v11 = vpack.c.bf16 %v4202_v0, %v4200_v41  ;;  %v4092_v50 = vadd.f32 %v12034_v20, %v3968_v32  ;;  %v4203_v7 = vmax.f32 %v4091_v27, 0.0 }
 0x34c   : > { %v3808_v57 = vpop.f32.mrf.mxu0  ;;  %v3198_v14 = vadd.f32 %v12297_v12, %v15148_v58  ;;  %v10301_v12 = vld [vmem:[%s15065_s23 + $0x20] ss:$16 sps:$4 sm:$0xff]  }
 0x34d   : > { %v4093_v36 = vadd.f32 %v12028_v30, %v3969_v33  ;;  %v3970_v54 = vadd.f32 %v3808_v57, %v3192_v37  ;;  %v4204_v17 = vmax.f32 %v4092_v50, 0.0 }
 0x34e   : > { %v3812_v9 = vpop.f32.mrf.mxu0  ;;  %4689 = vmatpush2.bf16.msra.mxu1 %v12201_v61  ;;  %5399 = vmatpush2.bf16.msra.mxu0 %v12201_v61 }
 0x34f   : > { %v4205_v59 = vmax.f32 %v4093_v36, 0.0  ;;  %v4094_v16 = vadd.f32 %v12034_v20, %v3970_v54  ;;  %v3971_v56 = vadd.f32 %v3812_v9, %v3193_v26  ;;  %4690 = vmatprep.subr.bf16.mxu1 %v12183_v40  ;;  %5400 = vmatprep.subr.bf16.mxu0 %v12183_v40  ;;  %v10303_v40 = vld [vmem:[%s15065_s23 + $0x24] ss:$16 sps:$4 sm:$0xff]   ;;  %v3199_v26 = vadd.f32 %v12306_v2, %v15149_v24 }
 0x350   : > { %v3814_v63 = vpop.f32.mrf.mxu0 }
 0x351   : > { %v12426_v10 = vpack.c.bf16 %v4205_v59, %v4203_v7  ;;  %v4206_v47 = vmax.f32 %v4094_v16, 0.0  ;;  %v3972_v61 = vadd.f32 %v3814_v63, %v3194_v5  ;;  %v4095_v39 = vadd.f32 %v12028_v30, %v3971_v56  ;;  %v10306_v7 = vld [vmem:[%s15065_s23 + $0x44] ss:$16 sps:$4 sm:$0xff]   ;;  %v15150_v59 = vld [vmem:[#allocation39_spill] sm:$0xff] }
 0x352   : > { %v3816_v45 = vpop.f32.mrf.mxu0  ;;  %4691 = vmatpush2.bf16.msra.mxu1 %v12174_v4  ;;  %5401 = vmatpush2.bf16.msra.mxu0 %v12174_v4  ;;  %v3197_v4 = vadd.f32 %v12286_v22, %v15147_v25  ;;  %v12453_v22 = vpop.f32.mrf.mxu1  ;;  %v3200_v2 = vadd.f32 %v12317_v48, %v15150_v59  ;;  %v15153_v25 = vld [vmem:[#allocation42_spill] sm:$0xff] }
 0x353   : > { %v3973_v18 = vadd.f32 %v3816_v45, %v3195_v60  ;;  %v12439_v38 = vpack.c.bf16 %v4206_v47, %v4204_v17  ;;  %5931 = vmatprep.subr.bf16.mxu0 %v14818_v8  ;;  %v4096_v41 = vadd.f32 %v12034_v20, %v3972_v61  ;;  %v4207_v31 = vmax.f32 %v4095_v39, 0.0  ;;  %v15151_v17 = vld [vmem:[#allocation40_spill] sm:$0xff] }
 0x354   : > { %v3818_v52 = vpop.f32.mrf.mxu0  ;;  %v12468_v60 = vpop.f32.mrf.mxu1  ;;  %v3201_v47 = vadd.f32 %v12322_v49, %v15151_v17  ;;  %v15157_v17 = vld [vmem:[#allocation46_spill] sm:$0xff] }
 0x355   : > { %v4097_v0 = vadd.f32 %v12028_v30, %v3973_v18  ;;  %v3974_v32 = vadd.f32 %v3818_v52, %v3196_v35  ;;  %4693 = vmatmul.mubr.bf16.vlgmr.msra.gmra.mxu1 %v10298_v19  ;;  %v4208_v36 = vmax.f32 %v4096_v41, 0.0 }
 0x356   : > { %v3822_v37 = vpop.f32.mrf.mxu0  ;;  %4702 = vmatprep.mubr.bf16.mxu1 %v10303_v40  ;;  %v15152_v40 = vld [vmem:[#allocation41_spill] sm:$0xff]  ;;  %v12479_v49 = vpop.f32.mrf.mxu1 }
 0x357   : > { %v4209_v27 = vmax.f32 %v4097_v0, 0.0  ;;  %v4098_v33 = vadd.f32 %v12034_v20, %v3974_v32  ;;  %v3975_v57 = vadd.f32 %v3822_v37, %v3197_v4  ;;  %v3202_v48 = vadd.f32 %v12328_v13, %v15152_v40  ;;  %v10304_v13 = vld [vmem:[%s15065_s23 + $0x40] ss:$16 sps:$4 sm:$0xff]  }
 0x358   : > { %v3824_v50 = vpop.f32.mrf.mxu0  ;;  %v3203_v4 = vadd.f32 %v12335_v43, %v15153_v25 }
 0x359   : > { %v12455_v54 = vpack.c.bf16 %v4209_v27, %v4207_v31  ;;  %v4210_v1 = vmax.f32 %v4098_v33, 0.0  ;;  %v3976_v5 = vadd.f32 %v3824_v50, %v3198_v14  ;;  %v4099_v16 = vadd.f32 %v12028_v30, %v3975_v57  ;;  %v10309_v31 = vld [vmem:[%s15065_s23 + $0x64] ss:$16 sps:$4 sm:$0xff]   ;;  %v15154_v27 = vld [vmem:[#allocation43_spill] sm:$0xff] }
 0x35a   : > { %v3826_v9 = vpop.f32.mrf.mxu0  ;;  %v3204_v43 = vadd.f32 %v12341_v21, %v15154_v27 }
 0x35b   : > { %v3977_v56 = vadd.f32 %v3826_v9, %v3199_v26  ;;  %v12466_v15 = vpack.c.bf16 %v4210_v1, %v4208_v36  ;;  %v4100_v61 = vadd.f32 %v12034_v20, %v3976_v5  ;;  %v4211_v35 = vmax.f32 %v4099_v16, 0.0  ;;  %v12494_v26 = vpop.f32.mrf.mxu1  ;;  %v15155_v36 = vld [vmem:[#allocation44_spill] sm:$0xff] }
 0x35c   : > { %v3828_v63 = vpop.f32.mrf.mxu0  ;;  %v3205_v1 = vadd.f32 %v12354_v53, %v15155_v36  ;;  %v15161_v36 = vld [vmem:[#allocation50_spill] sm:$0xff] }
 0x35d   : > { %v4101_v19 = vadd.f32 %v12028_v30, %v3977_v56  ;;  %v3978_v45 = vadd.f32 %v3828_v63, %v3200_v2  ;;  %4703 = vmatmul.mubr.bf16.gmra.mxu1 %v10301_v12  ;;  %v4212_v0 = vmax.f32 %v4100_v61, 0.0  ;;  %v12505_v53 = vpop.f32.mrf.mxu1 }
 0x35e   : > { %v3832_v3 = vpop.f32.mrf.mxu0  ;;  %4712 = vmatprep.mubr.bf16.mxu1 %v10306_v7  ;;  %v15156_v7 = vld [vmem:[#allocation45_spill] sm:$0xff] }
 0x35f   : > { %v4213_v39 = vmax.f32 %v4101_v19, 0.0  ;;  %v4102_v18 = vadd.f32 %v12034_v20, %v3978_v45  ;;  %v3979_v52 = vadd.f32 %v3832_v3, %v3201_v47  ;;  %v3206_v21 = vadd.f32 %v12368_v42, %v15156_v7  ;;  %v10307_v42 = vld [vmem:[%s15065_s23 + $0x60] ss:$16 sps:$4 sm:$0xff]  }
 0x360   : > { %v3834_v41 = vpop.f32.mrf.mxu0  ;;  %v3207_v47 = vadd.f32 %v12381_v23, %v15157_v17 }
 0x361   : > { %v12481_v32 = vpack.c.bf16 %v4213_v39, %v4211_v35  ;;  %v4214_v58 = vmax.f32 %v4102_v18, 0.0  ;;  %v3980_v14 = vadd.f32 %v3834_v41, %v3202_v48  ;;  %v4103_v33 = vadd.f32 %v12028_v30, %v3979_v52  ;;  %v10312_v35 = vld [vmem:[%s15065_s23 + $0x84] ss:$16 sps:$4 sm:$0xff]   ;;  %v15158_v39 = vld [vmem:[#allocation47_spill] sm:$0xff] }
 0x362   : > { %v3836_v37 = vpop.f32.mrf.mxu0  ;;  %v3208_v23 = vadd.f32 %v12396_v28, %v15158_v39 }
 0x363   : > { %v3981_v57 = vadd.f32 %v3836_v37, %v3203_v4  ;;  %v12492_v24 = vpack.c.bf16 %v4214_v58, %v4212_v0  ;;  %v4104_v5 = vadd.f32 %v12034_v20, %v3980_v14  ;;  %v4215_v2 = vmax.f32 %v4103_v33, 0.0  ;;  %v12520_v4 = vpop.f32.mrf.mxu1  ;;  %v15159_v0 = vld [vmem:[#allocation48_spill] sm:$0xff] }
 0x364   : > { %v3838_v50 = vpop.f32.mrf.mxu0  ;;  %v3209_v58 = vadd.f32 %v12409_v29, %v15159_v0 }
 0x365   : > { %v4105_v12 = vadd.f32 %v12028_v30, %v3981_v57  ;;  %v3982_v9 = vadd.f32 %v3838_v50, %v3204_v43  ;;  %4713 = vmatmul.mubr.bf16.gmra.mxu1 %v10304_v13  ;;  %v4216_v19 = vmax.f32 %v4104_v5, 0.0  ;;  %v3096_v29 = vpop.f32.mrf.mxu1 }
 0x366   : > { %v3842_v59 = vpop.f32.mrf.mxu0  ;;  %4722 = vmatprep.mubr.bf16.mxu1 %v10309_v31  ;;  %v15160_v31 = vld [vmem:[#allocation49_spill] sm:$0xff] }
 0x367   : > { %v4217_v16 = vmax.f32 %v4105_v12, 0.0  ;;  %v4106_v56 = vadd.f32 %v12034_v20, %v3982_v9  ;;  %v3983_v63 = vadd.f32 %v3842_v59, %v3205_v1  ;;  %v3210_v28 = vadd.f32 %v12424_v46, %v15160_v31  ;;  %v10310_v46 = vld [vmem:[%s15065_s23 + $0x80] ss:$16 sps:$4 sm:$0xff]  }
 0x368   : > { %v3844_v61 = vpop.f32.mrf.mxu0  ;;  %v3211_v1 = vadd.f32 %v12442_v55, %v15161_v36 }
 0x369   : > { %v12507_v45 = vpack.c.bf16 %v4217_v16, %v4215_v2  ;;  %v4218_v40 = vmax.f32 %v4106_v56, 0.0  ;;  %v3984_v48 = vadd.f32 %v3844_v61, %v3206_v21  ;;  %v4107_v18 = vadd.f32 %v12028_v30, %v3983_v63  ;;  %v10315_v2 = vld [vmem:[%s15065_s23 + $0xa4] ss:$16 sps:$4 sm:$0xff]   ;;  %v15162_v16 = vld [vmem:[#allocation51_spill] sm:$0xff] }
 0x36a   : > { %v3846_v3 = vpop.f32.mrf.mxu0  ;;  %v3212_v56 = vadd.f32 %v12453_v22, %v15162_v16 }
 0x36b   : > { %v3985_v52 = vadd.f32 %v3846_v3, %v3207_v47  ;;  %v12518_v25 = vpack.c.bf16 %v4218_v40, %v4216_v19  ;;  %v4108_v14 = vadd.f32 %v12034_v20, %v3984_v48  ;;  %v4219_v43 = vmax.f32 %v4107_v18, 0.0  ;;  %v15163_v47 = vld [vmem:[#allocation52_spill] sm:$0xff]  ;;  %v3098_v19 = vpop.f32.mrf.mxu1 }
 0x36c   : > { %v3848_v41 = vpop.f32.mrf.mxu0  ;;  %v3213_v61 = vadd.f32 %v12468_v60, %v15163_v47 }
 0x36d   : > { %v4109_v13 = vadd.f32 %v12028_v30, %v3985_v52  ;;  %v3986_v37 = vadd.f32 %v3848_v41, %v3208_v23  ;;  %4723 = vmatmul.mubr.bf16.gmra.mxu1 %v10307_v42  ;;  %v4220_v12 = vmax.f32 %v4108_v14, 0.0  ;;  %v15165_v41 = vld [vmem:[#allocation54_spill] sm:$0xff] }
 0x36e   : > { %v3852_v27 = vpop.f32.mrf.mxu0  ;;  %4732 = vmatprep.mubr.bf16.mxu1 %v10312_v35  ;;  %v15164_v35 = vld [vmem:[#allocation53_spill] sm:$0xff]  ;;  %v3215_v0 = vadd.f32 %v12494_v26, %v15165_v41 }
 0x36f   : > { %v4221_v33 = vmax.f32 %v4109_v13, 0.0  ;;  %v4110_v57 = vadd.f32 %v12034_v20, %v3986_v37  ;;  %v3987_v50 = vadd.f32 %v3852_v27, %v3209_v58  ;;  %v3214_v22 = vadd.f32 %v12479_v49, %v15164_v35  ;;  %v3100_v58 = vpop.f32.mrf.mxu1 }
 0x370   : > { %v3854_v5 = vpop.f32.mrf.mxu0 }
 0x371   : > { %v12531_v9 = vpack.c.bf16 %v4221_v33, %v4219_v43  ;;  %v4222_v7 = vmax.f32 %v4110_v57, 0.0  ;;  %v3988_v21 = vadd.f32 %v3854_v5, %v3210_v28  ;;  %v4111_v55 = vadd.f32 %v12028_v30, %v3987_v50  ;;  %v10313_v28 = vld [vmem:[%s15065_s23 + $0xa0] ss:$16 sps:$4 sm:$0xff]   ;;  %v10318_v43 = vld [vmem:[%s15065_s23 + $0xc4] ss:$16 sps:$4 sm:$0xff]   ;;  %v15166_v33 = vld [vmem:[#allocation55_spill] sm:$0xff] }
 0x372   : > { %v3856_v59 = vpop.f32.mrf.mxu0  ;;  %v3216_v26 = vadd.f32 %v12505_v53, %v15166_v33 }
 0x373   : > { %v3989_v63 = vadd.f32 %v3856_v59, %v3211_v1  ;;  %v12542_v17 = vpack.c.bf16 %v4222_v7, %v4220_v12  ;;  %v4112_v48 = vadd.f32 %v12034_v20, %v3988_v21  ;;  %v4223_v23 = vmax.f32 %v4111_v55, 0.0  ;;  %v3104_v1 = vpop.f32.mrf.mxu1  ;;  %v15167_v12 = vld [vmem:[#allocation56_spill] sm:$0xff] }
 0x374   : > { %v3858_v40 = vpop.f32.mrf.mxu0  ;;  %v3217_v7 = vadd.f32 %v12520_v4, %v15167_v12  ;;  %v15169_v4 = vld [vmem:[#allocation58_spill] sm:$0xff] }
 0x375   : > { %v4113_v42 = vadd.f32 %v12028_v30, %v3989_v63  ;;  %v3990_v3 = vadd.f32 %v3858_v40, %v3212_v56  ;;  %4733 = vmatmul.mubr.bf16.gmra.mxu1 %v10310_v46  ;;  %4833 = vmatprep.subr.bf16.mxu1 %v12542_v17  ;;  %v4224_v13 = vmax.f32 %v4112_v48, 0.0  ;;  %v3106_v40 = vpop.f32.mrf.mxu1 }
 0x376   : > { %v3862_v39 = vpop.f32.mrf.mxu0  ;;  %4834 = vmatpush1.bf16.msra.mxu1 %v12531_v9  ;;  %4742 = vmatprep.mubr.bf16.mxu1 %v10315_v2  ;;  %v15168_v2 = vld [vmem:[#allocation57_spill] sm:$0xff] }
 0x377   : > { %v4225_v18 = vmax.f32 %v4113_v42, 0.0  ;;  %v4114_v60 = vadd.f32 %v12034_v20, %v3990_v3  ;;  %v3991_v52 = vadd.f32 %v3862_v39, %v3213_v61  ;;  %4835 = vmatprep.subr.bf16.mxu1 %v12518_v25  ;;  %v3218_v53 = vadd.f32 %v3096_v29, %v15168_v2 }
 0x378   : > { %v3864_v14 = vpop.f32.mrf.mxu0  ;;  %v3219_v61 = vadd.f32 %v3098_v19, %v15169_v4 }
 0x379   : > { %v12556_v37 = vpack.c.bf16 %v4225_v18, %v4223_v23  ;;  %v4226_v49 = vmax.f32 %v4114_v60, 0.0  ;;  %v3992_v31 = vadd.f32 %v3864_v14, %v3214_v22  ;;  %v4115_v57 = vadd.f32 %v12028_v30, %v3991_v52  ;;  %v10316_v22 = vld [vmem:[%s15065_s23 + $0xc0] ss:$16 sps:$4 sm:$0xff]   ;;  %v10321_v23 = vld [vmem:[%s15065_s23 + $0xe4] ss:$16 sps:$4 sm:$0xff]   ;;  %v15170_v18 = vld [vmem:[#allocation59_spill] sm:$0xff] }
 0x37a   : > { %v3866_v27 = vpop.f32.mrf.mxu0  ;;  %4836 = vmatpush1.bf16.msra.mxu1 %v12507_v45  ;;  %v3220_v19 = vadd.f32 %v3100_v58, %v15170_v18 }
 0x37b   : > { %v3993_v50 = vadd.f32 %v3866_v27, %v3215_v0  ;;  %4837 = vmatprep.subr.bf16.mxu1 %v12492_v24  ;;  %v12569_v36 = vpack.c.bf16 %v4226_v49, %v4224_v13  ;;  %v4116_v21 = vadd.f32 %v12034_v20, %v3992_v31  ;;  %v4227_v56 = vmax.f32 %v4115_v57, 0.0  ;;  %v3108_v0 = vpop.f32.mrf.mxu1  ;;  %v15171_v13 = vld [vmem:[#allocation60_spill] sm:$0xff] }
 0x37c   : > { %v3868_v5 = vpop.f32.mrf.mxu0  ;;  %v3221_v49 = vadd.f32 %v3104_v1, %v15171_v13  ;;  %v15173_v1 = vld [vmem:[#allocation63_spill] sm:$0xff]  ;;  %v10328_v13 = vld [vmem:[%s15065_s23 + $0x140] ss:$16 sps:$4 sm:$0xff]  }
 0x37d   : > { %v4117_v46 = vadd.f32 %v12028_v30, %v3993_v50  ;;  %v3994_v59 = vadd.f32 %v3868_v5, %v3216_v26  ;;  %4743 = vmatmul.mubr.bf16.gmra.mxu1 %v10313_v28  ;;  %v4228_v42 = vmax.f32 %v4116_v21, 0.0  ;;  %v3223_v12 = vadd.f32 %v3108_v0, %v15173_v1  ;;  %v10394_v1 = vld [vmem:[%s14776_s4 + $0x40] ss:$16 sps:$4 sm:$0xff]  }
 0x37e   : > { %v3872_v16 = vpop.f32.mrf.mxu0  ;;  %4838 = vmatpush1.bf16.msra.mxu1 %v12481_v32  ;;  %4752 = vmatprep.mubr.bf16.mxu1 %v10318_v43  ;;  %v15172_v43 = vld [vmem:[#allocation62_spill] sm:$0xff] }
 0x37f   : > { %v4229_v55 = vmax.f32 %v4117_v46, 0.0  ;;  %v4118_v63 = vadd.f32 %v12034_v20, %v3994_v59  ;;  %v3995_v47 = vadd.f32 %v3872_v16, %v3217_v7  ;;  %4839 = vmatprep.subr.bf16.mxu1 %v12466_v15  ;;  %v3222_v33 = vadd.f32 %v3106_v40, %v15172_v43  ;;  %v3110_v7 = vpop.f32.mrf.mxu1  ;;  %v10319_v16 = vld [vmem:[%s15065_s23 + $0xe0] ss:$16 sps:$4 sm:$0xff]  }
 0x380   : > { %v3874_v48 = vpop.f32.mrf.mxu0  ;;  %v10334_v43 = vld [vmem:[%s15065_s23 + $0x180] ss:$16 sps:$4 sm:$0xff]  }
 0x381   : > { %v12580_v3 = vpack.c.bf16 %v4229_v55, %v4227_v56  ;;  %v4230_v35 = vmax.f32 %v4118_v63, 0.0  ;;  %v3996_v29 = vadd.f32 %v3874_v48, %v3218_v53  ;;  %v4119_v60 = vadd.f32 %v12028_v30, %v3995_v47  ;;  %v10324_v55 = vld [vmem:[%s15065_s23 + $0x104] ss:$16 sps:$4 sm:$0xff]  }
 0x382   : > { %v3876_v39 = vpop.f32.mrf.mxu0  ;;  %4840 = vmatpush1.bf16.msra.mxu1 %v12455_v54  ;;  %v15174_v63 = vld [vmem:[#allocation64_spill] sm:$0xff] }
 0x383   : > { %v3997_v52 = vadd.f32 %v3876_v39, %v3219_v61  ;;  %4841 = vmatprep.subr.bf16.mxu1 %v12439_v38  ;;  %v12592_v41 = vpack.c.bf16 %v4230_v35, %v4228_v42  ;;  %v4120_v31 = vadd.f32 %v12034_v20, %v3996_v29  ;;  %v4231_v26 = vmax.f32 %v4119_v60, 0.0 }
 0x384   : > { %v3878_v14 = vpop.f32.mrf.mxu0  ;;  %v3224_v47 = vadd.f32 %v3110_v7, %v15174_v63  ;;  %v10343_v7 = vld [vmem:[%s15065_s23 + $0x2c] ss:$16 sps:$4 sm:$0xff]  }
 0x385   : > { %v4121_v28 = vadd.f32 %v12028_v30, %v3997_v52  ;;  %v3998_v27 = vadd.f32 %v3878_v14, %v3220_v19  ;;  %4753 = vmatmul.mubr.bf16.gmra.mxu1 %v10316_v22  ;;  %v4232_v46 = vmax.f32 %v4120_v31, 0.0  ;;  %v10322_v52 = vld [vmem:[%s15065_s23 + $0x100] ss:$16 sps:$4 sm:$0xff]   ;;  %v10330_v14 = vld [vmem:[%s15065_s23 + $0x144] ss:$16 sps:$4 sm:$0xff]  }
 0x386   : > { %v3882_v58 = vpop.f32.mrf.mxu0  ;;  %4842 = vmatpush1.bf16.msra.mxu1 %v12426_v10  ;;  %4762 = vmatprep.mubr.bf16.mxu1 %v10321_v23  ;;  %v10331_v31 = vld [vmem:[%s15065_s23 + $0x160] ss:$16 sps:$4 sm:$0xff]   ;;  %v10364_v63 = vld [vmem:[%s15065_s23 + $0x10c] ss:$16 sps:$4 sm:$0xff]  }
 0x387   : > { %v4233_v57 = vmax.f32 %v4121_v28, 0.0  ;;  %v4122_v50 = vadd.f32 %v12034_v20, %v3998_v27  ;;  %v3999_v5 = vadd.f32 %v3882_v58, %v3221_v49  ;;  %4843 = vmatprep.subr.bf16.mxu1 %v12407_v11  ;;  %v10333_v49 = vld [vmem:[%s15065_s23 + $0x164] ss:$16 sps:$4 sm:$0xff]  }
 0x388   : > { %v3884_v21 = vpop.f32.mrf.mxu0  ;;  %v10336_v28 = vld [vmem:[%s15065_s23 + $0x184] ss:$16 sps:$4 sm:$0xff]  }
 0x389   : > { %v12602_v59 = vpack.c.bf16 %v4233_v57, %v4231_v26  ;;  %v4234_v2 = vmax.f32 %v4122_v50, 0.0  ;;  %v4000_v53 = vadd.f32 %v3884_v21, %v3222_v33  ;;  %v4123_v4 = vadd.f32 %v12028_v30, %v3999_v5  ;;  %v10384_v27 = vld [vmem:[%s14776_s4 + $0x4] ss:$16 sps:$4 sm:$0xff]   ;;  %v10388_v26 = vld [vmem:[%s14776_s4 + $0x20] ss:$16 sps:$4 sm:$0xff]  }
 0x38a   : > { %v3886_v56 = vpop.f32.mrf.mxu0  ;;  %4844 = vmatpush1.bf16.msra.mxu1 %v12398_v51  ;;  %5402 = vmatprep.mubr.bf16.mxu0 %v10384_v27  ;;  %v10339_v33 = vld [vmem:[%s15065_s23 + $0x1a4] ss:$16 sps:$4 sm:$0xff]   ;;  %v10337_v57 = vld [vmem:[%s15065_s23 + $0x1a0] ss:$16 sps:$4 sm:$0xff]   ;;  %v10342_v50 = vld [vmem:[%s15065_s23 + $0xc] ss:$16 sps:$4 sm:$0xff]  }
 0x38b   : > { %v4001_v61 = vadd.f32 %v3886_v56, %v3223_v12  ;;  %4845 = vmatprep.subr.bf16.mxu1 %v12379_v6  ;;  %v12614_v40 = vpack.c.bf16 %v4234_v2, %v4232_v46  ;;  %v4124_v42 = vadd.f32 %v12034_v20, %v4000_v53  ;;  %v4235_v22 = vmax.f32 %v4123_v4, 0.0  ;;  %v10390_v58 = vld [vmem:[%s14776_s4 + $0x24] ss:$16 sps:$4 sm:$0xff]   ;;  %v10340_v12 = vld [vmem:[%s15065_s23 + $0x8] ss:$16 sps:$4 sm:$0xff]  }
 0x38c   : > { %v3888_v48 = vpop.f32.mrf.mxu0  ;;  %v10396_v5 = vld [vmem:[%s14776_s4 + $0x44] ss:$16 sps:$4 sm:$0xff]   ;;  %v10400_v46 = vld [vmem:[%s14776_s4 + $0x60] ss:$16 sps:$4 sm:$0xff]   ;;  %v10345_v2 = vld [vmem:[%s15065_s23 + $0x28] ss:$16 sps:$4 sm:$0xff]  }
 0x38d   : > { %v4125_v35 = vadd.f32 %v12028_v30, %v4001_v61  ;;  %v4002_v29 = vadd.f32 %v3888_v48, %v3224_v47  ;;  %4763 = vmatmul.mubr.bf16.gmra.mxu1 %v10319_v16  ;;  %v4236_v18 = vmax.f32 %v4124_v42, 0.0  ;;  %v10327_v30 = vld [vmem:[%s15065_s23 + $0x124] ss:$16 sps:$4 sm:$0xff]   ;;  %v10358_v16 = vld [vmem:[%s15065_s23 + $0xcc] ss:$16 sps:$4 sm:$0xff]  }
 0x38e   : > { %4846 = vmatpush1.bf16.msra.mxu1 %v12370_v34  ;;  %4772 = vmatprep.mubr.bf16.mxu1 %v10324_v55  ;;  %v10402_v21 = vld [vmem:[%s14776_s4 + $0x64] ss:$16 sps:$4 sm:$0xff]   ;;  %v10430_v55 = vld [vmem:[%s14776_s4 + $0x100] ss:$16 sps:$4 sm:$0xff]   ;;  %v10366_v61 = vld [vmem:[%s15065_s23 + $0x108] ss:$16 sps:$4 sm:$0xff]  }
 0x38f   : > { %v4237_v39 = vmax.f32 %v4125_v35, 0.0  ;;  %v4126_v23 = vadd.f32 %v12034_v20, %v4002_v29  ;;  %4847 = vmatprep.subr.bf16.mxu1 %v12352_v44  ;;  %v10325_v20 = vld [vmem:[%s15065_s23 + $0x120] ss:$16 sps:$4 sm:$0xff]   ;;  %v10408_v53 = vld [vmem:[%s14776_s4 + $0x84] ss:$16 sps:$4 sm:$0xff]  }
 0x390   : > { %v10432_v56 = vld [vmem:[%s14776_s4 + $0x104] ss:$16 sps:$4 sm:$0xff]   ;;  %v10442_v4 = vld [vmem:[%s14776_s4 + $0x140] ss:$16 sps:$4 sm:$0xff]   ;;  %v10369_v48 = vld [vmem:[%s15065_s23 + $0x128] ss:$16 sps:$4 sm:$0xff]  }
 0x391   : > { %v12621_v19 = vpack.c.bf16 %v4237_v39, %v4235_v22  ;;  %v4238_v60 = vmax.f32 %v4126_v23, 0.0  ;;  %v10444_v47 = vld [vmem:[%s14776_s4 + $0x144] ss:$16 sps:$4 sm:$0xff]   ;;  %v10370_v42 = vld [vmem:[%s15065_s23 + $0x14c] ss:$16 sps:$4 sm:$0xff]  }
 0x392   : > { %4848 = vmatpush1.bf16.msra.mxu1 %v12343_v62  ;;  %v10450_v35 = vld [vmem:[%s14776_s4 + $0x164] ss:$16 sps:$4 sm:$0xff]   ;;  %v10448_v29 = vld [vmem:[%s14776_s4 + $0x160] ss:$16 sps:$4 sm:$0xff]   ;;  %v10372_v22 = vld [vmem:[%s15065_s23 + $0x148] ss:$16 sps:$4 sm:$0xff]  }
 0x393   : > { %v12630_v0 = vpack.c.bf16 %v4238_v60, %v4236_v18  ;;  %v10373_v39 = vld [vmem:[%s15065_s23 + $0x16c] ss:$16 sps:$4 sm:$0xff]   ;;  %v10456_v23 = vld [vmem:[%s14776_s4 + $0x184] ss:$16 sps:$4 sm:$0xff]   ;;  %v10454_v18 = vld [vmem:[%s14776_s4 + $0x180] ss:$16 sps:$4 sm:$0xff]  }
 0x394   : > { %v10378_v27 = vld [vmem:[%s15065_s23 + $0x188] ss:$16 sps:$4 sm:$0xff]  }
 0x395   : > { %4773 = vmatmul.mubr.bf16.gmra.mxu1 %v10322_v52  ;;  %4857 = vmatprep.subr.bf16.mxu1 %v12630_v0 }
 0x396   : > { %4858 = vmatpush2.bf16.msra.mxu1 %v12621_v19  ;;  %4782 = vmatprep.mubr.bf16.mxu1 %v10327_v30  ;;  %v10375_v30 = vld [vmem:[%s15065_s23 + $0x168] ss:$16 sps:$4 sm:$0xff]  }
 0x397   : > { %4859 = vmatprep.subr.bf16.mxu1 %v12614_v40 }
 0x39a   : > { %4860 = vmatpush2.bf16.msra.mxu1 %v12602_v59 }
 0x39b   : > { %4861 = vmatprep.subr.bf16.mxu1 %v12592_v41 }
 0x39d   : > { %4783 = vmatmul.mubr.bf16.gmra.mxu1 %v10325_v20 }
 0x39e   : > { %4862 = vmatpush2.bf16.msra.mxu1 %v12580_v3  ;;  %4792 = vmatprep.mubr.bf16.mxu1 %v10330_v14  ;;  %v10462_v14 = vld [vmem:[%s14776_s4 + $0x1a4] ss:$16 sps:$4 sm:$0xff]  }
 0x39f   : > { %4863 = vmatprep.subr.bf16.mxu1 %v12569_v36 }
 0x3a2   : > { %4864 = vmatpush2.bf16.msra.mxu1 %v12556_v37 }
 0x3a3   : > { %5543 = vmatprep.subr.bf16.mxu1 %v12542_v17  ;;  %v10382_v17 = vld [vmem:[%s14776_s4] ss:$16 sps:$4 sm:$0xff]  }
 0x3a4   : > { %5403 = vmatmul.mubr.bf16.vlgmr.msra.gmra.mxu0 %v10382_v17  ;;  %v10379_v17 = vld [vmem:[%s15065_s23 + $0x1ac] ss:$16 sps:$4 sm:$0xff]  }
 0x3a5   : > { %4793 = vmatmul.mubr.bf16.gmra.mxu1 %v10328_v13  ;;  %5412 = vmatprep.mubr.bf16.mxu0 %v10390_v58  ;;  %v10460_v13 = vld [vmem:[%s14776_s4 + $0x1a0] ss:$16 sps:$4 sm:$0xff]  }
 0x3a6   : > { %4802 = vmatprep.mubr.bf16.mxu1 %v10333_v49 }
 0x3ac   : > { %5413 = vmatmul.mubr.bf16.gmra.mxu0 %v10388_v26 }
 0x3ad   : > { %4803 = vmatmul.mubr.bf16.gmra.mxu1 %v10331_v31  ;;  %5422 = vmatprep.mubr.bf16.mxu0 %v10396_v5 }
 0x3ae   : > { %4812 = vmatprep.mubr.bf16.mxu1 %v10336_v28 }
 0x3b4   : > { %5423 = vmatmul.mubr.bf16.gmra.mxu0 %v10394_v1 }
 0x3b5   : > { %4813 = vmatmul.mubr.bf16.gmra.mxu1 %v10334_v43  ;;  %5432 = vmatprep.mubr.bf16.mxu0 %v10402_v21  ;;  %v10385_v21 = vld [vmem:[%s14776_s4 + $0x8] ss:$16 sps:$4 sm:$0xff]  }
 0x3b6   : > { %4822 = vmatprep.mubr.bf16.mxu1 %v10339_v33 }
 0x3bc   : > { %5433 = vmatmul.mubr.bf16.gmra.mxu0 %v10400_v46  ;;  %v10391_v46 = vld [vmem:[%s14776_s4 + $0x2c] ss:$16 sps:$4 sm:$0xff]  }
 0x3bd   : > { %4823 = vmatmul.mubr.bf16.gmra.mxu1 %v10337_v57  ;;  %5442 = vmatprep.mubr.bf16.mxu0 %v10408_v53  ;;  %v10381_v57 = vld [vmem:[%s15065_s23 + $0x1a8] ss:$16 sps:$4 sm:$0xff]  }
 0x3be   : > { %9482 = vmatprep.mubr.msk.bf16.mxu1 %vm4617_vm1, %v10342_v50  ;;  %v10387_v50 = vld [vmem:[%s14776_s4 + $0xc] ss:$16 sps:$4 sm:$0xff]  }
 0x3c5   : > { %4866 = vmatmul.mubr.bf16.vlgmr.msra.gmra.mxu1 %v10340_v12 }
 0x3c6   : > { %5544 = vmatpush1.bf16.msra.mxu1 %v12531_v9  ;;  %9483 = vmatprep.mubr.msk.bf16.mxu1 %vm4617_vm1, %v10343_v7  ;;  %v10346_v9 = vld [vmem:[%s15065_s23 + $0x4c] ss:$16 sps:$4 sm:$0xff]  }
 0x3c7   : > { %5545 = vmatprep.subr.bf16.mxu1 %v12518_v25  ;;  %v10406_v25 = vld [vmem:[%s14776_s4 + $0x80] ss:$16 sps:$4 sm:$0xff]  }
 0x3c8   : > { %5443 = vmatmul.mubr.bf16.gmra.mxu0 %v10406_v25 }
 0x3ca   : > { %5546 = vmatpush1.bf16.msra.mxu1 %v12507_v45  ;;  %v10414_v45 = vld [vmem:[%s14776_s4 + $0xa4] ss:$16 sps:$4 sm:$0xff]  }
 0x3cb   : > { %5547 = vmatprep.subr.bf16.mxu1 %v12492_v24  ;;  %v10348_v24 = vld [vmem:[%s15065_s23 + $0x48] ss:$16 sps:$4 sm:$0xff]   ;;  %5452 = vmatprep.mubr.bf16.mxu0 %v10414_v45 }
 0x3cd   : > { %4876 = vmatmul.mubr.bf16.gmra.mxu1 %v10345_v2 }
 0x3ce   : > { %5548 = vmatpush1.bf16.msra.mxu1 %v12481_v32  ;;  %9484 = vmatprep.mubr.msk.bf16.mxu1 %vm4617_vm1, %v10346_v9  ;;  %v10349_v32 = vld [vmem:[%s15065_s23 + $0x6c] ss:$16 sps:$4 sm:$0xff]  }
 0x3cf   : > { %5549 = vmatprep.subr.bf16.mxu1 %v12466_v15  ;;  %v10412_v15 = vld [vmem:[%s14776_s4 + $0xa0] ss:$16 sps:$4 sm:$0xff]  }
 0x3d0   : > { %5453 = vmatmul.mubr.bf16.gmra.mxu0 %v10412_v15 }
 0x3d2   : > { %5550 = vmatpush1.bf16.msra.mxu1 %v12455_v54  ;;  %v10420_v54 = vld [vmem:[%s14776_s4 + $0xc4] ss:$16 sps:$4 sm:$0xff]  }
 0x3d3   : > { %5551 = vmatprep.subr.bf16.mxu1 %v12439_v38  ;;  %v10351_v38 = vld [vmem:[%s15065_s23 + $0x68] ss:$16 sps:$4 sm:$0xff]   ;;  %5462 = vmatprep.mubr.bf16.mxu0 %v10420_v54 }
 0x3d4   : > { %v10399_v54 = vld [vmem:[%s14776_s4 + $0x48] ss:$16 sps:$4 sm:$0xff]  }
 0x3d5   : > { %4886 = vmatmul.mubr.bf16.gmra.mxu1 %v10348_v24  ;;  %v10393_v24 = vld [vmem:[%s14776_s4 + $0x28] ss:$16 sps:$4 sm:$0xff]  }
 0x3d6   : > { %5552 = vmatpush1.bf16.msra.mxu1 %v12426_v10  ;;  %9485 = vmatprep.mubr.msk.bf16.mxu1 %vm4617_vm1, %v10349_v32  ;;  %v10352_v10 = vld [vmem:[%s15065_s23 + $0x8c] ss:$16 sps:$4 sm:$0xff]  }
 0x3d7   : > { %5553 = vmatprep.subr.bf16.mxu1 %v12407_v11  ;;  %v10418_v11 = vld [vmem:[%s14776_s4 + $0xc0] ss:$16 sps:$4 sm:$0xff]   ;;  %v10397_v32 = vld [vmem:[%s14776_s4 + $0x4c] ss:$16 sps:$4 sm:$0xff]  }
 0x3d8   : > { %5463 = vmatmul.mubr.bf16.gmra.mxu0 %v10418_v11  ;;  %v10403_v11 = vld [vmem:[%s14776_s4 + $0x6c] ss:$16 sps:$4 sm:$0xff]  }
 0x3da   : > { %5554 = vmatpush1.bf16.msra.mxu1 %v12398_v51  ;;  %v10426_v51 = vld [vmem:[%s14776_s4 + $0xe4] ss:$16 sps:$4 sm:$0xff]  }
 0x3db   : > { %5555 = vmatprep.subr.bf16.mxu1 %v12379_v6  ;;  %v10354_v6 = vld [vmem:[%s15065_s23 + $0x88] ss:$16 sps:$4 sm:$0xff]   ;;  %5472 = vmatprep.mubr.bf16.mxu0 %v10426_v51 }
 0x3dd   : > { %4896 = vmatmul.mubr.bf16.gmra.mxu1 %v10351_v38 }
 0x3de   : > { %5556 = vmatpush1.bf16.msra.mxu1 %v12370_v34  ;;  %9486 = vmatprep.mubr.msk.bf16.mxu1 %vm4617_vm1, %v10352_v10  ;;  %v10355_v34 = vld [vmem:[%s15065_s23 + $0xac] ss:$16 sps:$4 sm:$0xff]  }
 0x3df   : > { %5557 = vmatprep.subr.bf16.mxu1 %v12352_v44  ;;  %v10424_v44 = vld [vmem:[%s14776_s4 + $0xe0] ss:$16 sps:$4 sm:$0xff]  }
 0x3e0   : > { %5473 = vmatmul.mubr.bf16.gmra.mxu0 %v10424_v44 }
 0x3e1   : > { %5482 = vmatprep.mubr.bf16.mxu0 %v10432_v56 }
 0x3e2   : > { %5558 = vmatpush1.bf16.msra.mxu1 %v12343_v62  ;;  %v10357_v62 = vld [vmem:[%s15065_s23 + $0xa8] ss:$16 sps:$4 sm:$0xff]  }
 0x3e3   : > { %5567 = vmatprep.subr.bf16.mxu1 %v12630_v0  ;;  %v10376_v0 = vld [vmem:[%s15065_s23 + $0x18c] ss:$16 sps:$4 sm:$0xff]  }
 0x3e5   : > { %4906 = vmatmul.mubr.bf16.gmra.mxu1 %v10354_v6 }
 0x3e6   : > { %5568 = vmatpush2.bf16.msra.mxu1 %v12621_v19  ;;  %9487 = vmatprep.mubr.msk.bf16.mxu1 %vm4617_vm1, %v10355_v34 }
 0x3e7   : > { %5569 = vmatprep.subr.bf16.mxu1 %v12614_v40  ;;  %v10367_v40 = vld [vmem:[%s15065_s23 + $0x12c] ss:$16 sps:$4 sm:$0xff]  }
 0x3e8   : > { %5483 = vmatmul.mubr.bf16.gmra.mxu0 %v10430_v55 }
 0x3ea   : > { %5570 = vmatpush2.bf16.msra.mxu1 %v12602_v59  ;;  %v10438_v59 = vld [vmem:[%s14776_s4 + $0x124] ss:$16 sps:$4 sm:$0xff]  }
 0x3eb   : > { %5571 = vmatprep.subr.bf16.mxu1 %v12592_v41  ;;  %v10360_v41 = vld [vmem:[%s15065_s23 + $0xc8] ss:$16 sps:$4 sm:$0xff]   ;;  %5492 = vmatprep.mubr.bf16.mxu0 %v10438_v59 }
 0x3ec   : > { %v10411_v59 = vld [vmem:[%s14776_s4 + $0x88] ss:$16 sps:$4 sm:$0xff]  }
 0x3ed   : > { %4916 = vmatmul.mubr.bf16.gmra.mxu1 %v10357_v62  ;;  %v10405_v62 = vld [vmem:[%s14776_s4 + $0x68] ss:$16 sps:$4 sm:$0xff]  }
 0x3ee   : > { %5572 = vmatpush2.bf16.msra.mxu1 %v12580_v3  ;;  %9488 = vmatprep.mubr.msk.bf16.mxu1 %vm4617_vm1, %v10358_v16  ;;  %v10361_v3 = vld [vmem:[%s15065_s23 + $0xec] ss:$16 sps:$4 sm:$0xff]  }
 0x3ef   : > { %5573 = vmatprep.subr.bf16.mxu1 %v12569_v36  ;;  %v10436_v36 = vld [vmem:[%s14776_s4 + $0x120] ss:$16 sps:$4 sm:$0xff]   ;;  %v10409_v16 = vld [vmem:[%s14776_s4 + $0x8c] ss:$16 sps:$4 sm:$0xff]  }
 0x3f0   : > { %5493 = vmatmul.mubr.bf16.gmra.mxu0 %v10436_v36  ;;  %v10415_v36 = vld [vmem:[%s14776_s4 + $0xac] ss:$16 sps:$4 sm:$0xff]  }
 0x3f1   : > { %5502 = vmatprep.mubr.bf16.mxu0 %v10444_v47 }
 0x3f2   : > { %5574 = vmatpush2.bf16.msra.mxu1 %v12556_v37  ;;  %v10363_v37 = vld [vmem:[%s15065_s23 + $0xe8] ss:$16 sps:$4 sm:$0xff]  }
 0x3f3   : > { %6163 = vmatprep.subr.bf16.mxu1 %v14818_v8 }
 0x3f5   : > { %4926 = vmatmul.mubr.bf16.gmra.mxu1 %v10360_v41 }
 0x3f6   : > { %9489 = vmatprep.mubr.msk.bf16.mxu1 %vm4617_vm1, %v10361_v3 }
 0x3f8   : > { %5503 = vmatmul.mubr.bf16.gmra.mxu0 %v10442_v4  ;;  %v10466_v4 = vld [vmem:[%s14777_s5 + $0x38] sm:$0xff]  }
 0x3f9   : > { %5512 = vmatprep.mubr.bf16.mxu0 %v10450_v35  ;;  %5932 = vmatpush1.bf16.msra.mxu0 %v10466_v4 }
 0x3fa   : > { %5933 = vmatprep.subr.bf16.mxu0 %v14818_v8 }
 0x3fd   : > { %4936 = vmatmul.mubr.bf16.gmra.mxu1 %v10363_v37 }
 0x3fe   : > { %9490 = vmatprep.mubr.msk.bf16.mxu1 %vm4617_vm1, %v10364_v63 }
 0x400   : > { %5513 = vmatmul.mubr.bf16.gmra.mxu0 %v10448_v29  ;;  %v10468_v29 = vld [vmem:[%s14777_s5 + $0x30] sm:$0xff]  }
 0x401   : > { %5522 = vmatprep.mubr.bf16.mxu0 %v10456_v23  ;;  %5934 = vmatpush1.bf16.msra.mxu0 %v10468_v29  ;;  %v10435_v29 = vld [vmem:[%s14776_s4 + $0x108] ss:$16 sps:$4 sm:$0xff]  }
 0x402   : > { %5935 = vmatprep.subr.bf16.mxu0 %v14818_v8 }
 0x405   : > { %4946 = vmatmul.mubr.bf16.gmra.mxu1 %v10366_v61  ;;  %v10467_v61 = vld [vmem:[%s14778_s6 + $0x38] sm:$0xff]  }
 0x406   : > { %9491 = vmatprep.mubr.msk.bf16.mxu1 %vm4617_vm1, %v10367_v40 }
 0x408   : > { %5523 = vmatmul.mubr.bf16.gmra.mxu0 %v10454_v18  ;;  %v10470_v18 = vld [vmem:[%s14777_s5 + $0x28] sm:$0xff]  }
 0x409   : > { %5532 = vmatprep.mubr.bf16.mxu0 %v10462_v14  ;;  %v10423_v14 = vld [vmem:[%s14776_s4 + $0xc8] ss:$16 sps:$4 sm:$0xff]   ;;  %5936 = vmatpush1.bf16.msra.mxu0 %v10470_v18 }
 0x40a   : > { %5937 = vmatprep.subr.bf16.mxu0 %v14818_v8 }
 0x40d   : > { %4956 = vmatmul.mubr.bf16.gmra.mxu1 %v10369_v48  ;;  %v10417_v48 = vld [vmem:[%s14776_s4 + $0xa8] ss:$16 sps:$4 sm:$0xff]  }
 0x40e   : > { %9492 = vmatprep.mubr.msk.bf16.mxu1 %vm4617_vm1, %v10370_v42  ;;  %v10421_v42 = vld [vmem:[%s14776_s4 + $0xcc] ss:$16 sps:$4 sm:$0xff]  }
 0x410   : > { %5533 = vmatmul.mubr.bf16.gmra.mxu0 %v10460_v13  ;;  %v10427_v13 = vld [vmem:[%s14776_s4 + $0xec] ss:$16 sps:$4 sm:$0xff]  }
 0x415   : > { %v12850_v19 = vpop.f32.mrf.mxu1  ;;  %4966 = vmatmul.mubr.bf16.gmra.mxu1 %v10372_v22  ;;  %v10469_v22 = vld [vmem:[%s14778_s6 + $0x30] sm:$0xff]  }
 0x416   : > { %9493 = vmatprep.mubr.msk.bf16.mxu1 %vm4617_vm1, %v10373_v39 }
 0x417   : > { %v12853_v60 = vpop.f32.mrf.mxu1 }
 0x419   : > { %v12855_v52 = vpop.f32.mrf.mxu1 }
 0x41b   : > { %v12863_v20 = vpop.f32.mrf.mxu1 }
 0x41d   : > { %v12871_v49 = vpop.f32.mrf.mxu1  ;;  %4976 = vmatmul.mubr.bf16.gmra.mxu1 %v10375_v30  ;;  %v10471_v30 = vld [vmem:[%s14778_s6 + $0x28] sm:$0xff]  }
 0x41e   : > { %9494 = vmatprep.mubr.msk.bf16.mxu1 %vm4617_vm1, %v10376_v0 }
 0x41f   : > { %v12874_v31 = vpop.f32.mrf.mxu1 }
 0x421   : > { %v12876_v28 = vpop.f32.mrf.mxu1 }
 0x423   : > { %v12884_v43 = vpop.f32.mrf.mxu1 }
 0x425   : > { %v12886_v33 = vpop.f32.mrf.mxu1  ;;  %4986 = vmatmul.mubr.bf16.gmra.mxu1 %v10378_v27 }
 0x426   : > { %9495 = vmatprep.mubr.msk.bf16.mxu1 %vm4617_vm1, %v10379_v17  ;;  %v10472_v17 = vld [vmem:[%s14777_s5 + $0x20] sm:$0xff]  }
 0x427   : > { %v12889_v58 = vpop.f32.mrf.mxu1  ;;  %5938 = vmatpush1.bf16.msra.mxu0 %v10472_v17  ;;  %v10482_v17 = vld [vmem:[%s14777_s5 + $0x50] ss:$0 sps:$4 sm:$0xff]  }
 0x428   : > { %5939 = vmatprep.subr.bf16.mxu0 %v14818_v8 }
 0x429   : > { %v12891_v26 = vpop.f32.mrf.mxu1 }
 0x42b   : > { %v12899_v5 = vpop.f32.mrf.mxu1 }
 0x42d   : > { %v12901_v1 = vpop.f32.mrf.mxu1  ;;  %4996 = vmatmul.mubr.bf16.gmra.mxu1 %v10381_v57  ;;  %v10473_v57 = vld [vmem:[%s14778_s6 + $0x20] sm:$0xff]  }
 0x42e   : > { %9552 = vmatprep.mubr.msk.bf16.mxu1 %vm4617_vm1, %v10387_v50 }
 0x42f   : > { %v12904_v12 = vpop.f32.mrf.mxu1 }
 0x431   : > { %v12906_v7 = vpop.f32.mrf.mxu1 }
 0x433   : > { %v12914_v2 = vpop.f32.mrf.mxu1 }
 0x435   : > { %v12916_v9 = vpop.f32.mrf.mxu1  ;;  %5576 = vmatmul.mubr.bf16.vlgmr.msra.gmra.mxu1 %v10385_v21 }
 0x436   : > { %15175 = vst [vmem:[#allocation65_spill] sm:$0xff] %v12916_v9  ;;  %9553 = vmatprep.mubr.msk.bf16.mxu1 %vm4617_vm1, %v10391_v46  ;;  %6164 = vmatpush1.bf16.msra.mxu1 %v10467_v61  ;;  %v10474_v46 = vld [vmem:[%s14777_s5 + $0x18] sm:$0xff]   ;;  %v10478_v61 = vld [vmem:[%s14777_s5 + $0x8] sm:$0xff]  }
 0x437   : > { %v12919_v53 = vpop.f32.mrf.mxu1  ;;  %6165 = vmatprep.subr.bf16.mxu1 %v14818_v8  ;;  %5940 = vmatpush1.bf16.msra.mxu0 %v10474_v46 }
 0x438   : > { %15176 = vst [vmem:[#allocation66_spill] sm:$0xff] %v12919_v53  ;;  %5941 = vmatprep.subr.bf16.mxu0 %v14818_v8 }
 0x439   : > { %v12921_v25 = vpop.f32.mrf.mxu1 }
 0x43a   : > { %15177 = vst [vmem:[#allocation67_spill] sm:$0xff] %v12921_v25  ;;  %6166 = vmatpush1.bf16.msra.mxu1 %v10469_v22  ;;  %v10439_v22 = vld [vmem:[%s14776_s4 + $0x12c] ss:$16 sps:$4 sm:$0xff]  }
 0x43b   : > { %v12929_v45 = vpop.f32.mrf.mxu1  ;;  %6167 = vmatprep.subr.bf16.mxu1 %v14818_v8 }
 0x43c   : > { %15178 = vst [vmem:[#allocation68_spill] sm:$0xff] %v12929_v45 }
 0x43d   : > { %v12931_v15 = vpop.f32.mrf.mxu1  ;;  %5586 = vmatmul.mubr.bf16.gmra.mxu1 %v10393_v24  ;;  %v10475_v24 = vld [vmem:[%s14778_s6 + $0x18] sm:$0xff]  }
 0x43e   : > { %15179 = vst [vmem:[#allocation69_spill] sm:$0xff] %v12931_v15  ;;  %9554 = vmatprep.mubr.msk.bf16.mxu1 %vm4617_vm1, %v10397_v32  ;;  %6168 = vmatpush1.bf16.msra.mxu1 %v10471_v30  ;;  %v10480_v30 = vld [vmem:[%s14777_s5] sm:$0xff]  }
 0x43f   : > { %v12934_v38 = vpop.f32.mrf.mxu1  ;;  %6169 = vmatprep.subr.bf16.mxu1 %v14818_v8 }
 0x440   : > { %15180 = vst [vmem:[#allocation70_spill] sm:$0xff] %v12934_v38 }
 0x441   : > { %v12936_v10 = vpop.f32.mrf.mxu1 }
 0x442   : > { %15181 = vst [vmem:[#allocation71_spill] sm:$0xff] %v12936_v10  ;;  %6170 = vmatpush1.bf16.msra.mxu1 %v10473_v57  ;;  %v10483_v57 = vld [vmem:[%s14778_s6 + $0x50] ss:$0 sps:$4 sm:$0xff]  }
 0x443   : > { %v12944_v6 = vpop.f32.mrf.mxu1  ;;  %6171 = vmatprep.subr.bf16.mxu1 %v14818_v8 }
 0x444   : > { %15182 = vst [vmem:[#allocation72_spill] sm:$0xff] %v12944_v6 }
 0x445   : > { %v12946_v34 = vpop.f32.mrf.mxu1  ;;  %5596 = vmatmul.mubr.bf16.gmra.mxu1 %v10399_v54  ;;  %v10429_v54 = vld [vmem:[%s14776_s4 + $0xe8] ss:$16 sps:$4 sm:$0xff]  }
 0x446   : > { %15183 = vst [vmem:[#allocation73_spill] sm:$0xff] %v12946_v34  ;;  %9555 = vmatprep.mubr.msk.bf16.mxu1 %vm4617_vm1, %v10403_v11  ;;  %v10433_v11 = vld [vmem:[%s14776_s4 + $0x10c] ss:$16 sps:$4 sm:$0xff]   ;;  %6172 = vmatpush1.bf16.msra.mxu1 %v10475_v24  ;;  %v5929_v24 = vsel %vm5927_vm2, %v10482_v17, 0  ;;  %v10487_v17 = vld [vmem:[%s14778_s6 + $0x40] sm:$0xff]  }
 0x447   : > { %v12949_v51 = vpop.f32.mrf.mxu1  ;;  %6173 = vmatprep.subr.bf16.mxu1 %v14818_v8 }
 0x448   : > { %15184 = vst [vmem:[#allocation74_spill] sm:$0xff] %v12949_v51 }
 0x449   : > { %v12951_v44 = vpop.f32.mrf.mxu1 }
 0x44a   : > { %15185 = vst [vmem:[#allocation75_spill] sm:$0xff] %v12951_v44 }
 0x44b   : > { %v12959_v56 = vpop.f32.mrf.mxu1 }
 0x44c   : > { %15186 = vst [vmem:[#allocation76_spill] sm:$0xff] %v12959_v56 }
 0x44d   : > { %v12961_v55 = vpop.f32.mrf.mxu1  ;;  %5606 = vmatmul.mubr.bf16.gmra.mxu1 %v10405_v62 }
 0x44e   : > { %15187 = vst [vmem:[#allocation77_spill] sm:$0xff] %v12961_v55  ;;  %9556 = vmatprep.mubr.msk.bf16.mxu1 %vm4617_vm1, %v10409_v16  ;;  %v10476_v16 = vld [vmem:[%s14777_s5 + $0x10] sm:$0xff]  }
 0x44f   : > { %v12964_v41 = vpop.f32.mrf.mxu1  ;;  %5942 = vmatpush1.bf16.msra.mxu0 %v10476_v16  ;;  %v10441_v16 = vld [vmem:[%s14776_s4 + $0x128] ss:$16 sps:$4 sm:$0xff]  }
 0x450   : > { %15188 = vst [vmem:[#allocation78_spill] sm:$0xff] %v12964_v41  ;;  %5943 = vmatprep.subr.bf16.mxu0 %v14818_v8 }
 0x451   : > { %v12966_v3 = vpop.f32.mrf.mxu1 }
 0x452   : > { %15189 = vst [vmem:[#allocation79_spill] sm:$0xff] %v12966_v3 }
 0x453   : > { %v12974_v37 = vpop.f32.mrf.mxu1  ;;  %5944 = vmatpush1.bf16.msra.mxu0 %v10478_v61 }
 0x454   : > { %15190 = vst [vmem:[#allocation80_spill] sm:$0xff] %v12974_v37  ;;  %5945 = vmatprep.subr.bf16.mxu0 %v14818_v8 }
 0x455   : > { %v12976_v63 = vpop.f32.mrf.mxu1  ;;  %5616 = vmatmul.mubr.bf16.gmra.mxu1 %v10411_v59  ;;  %v10477_v59 = vld [vmem:[%s14778_s6 + $0x10] sm:$0xff]  }
 0x456   : > { %15191 = vst [vmem:[#allocation81_spill] sm:$0xff] %v12976_v63  ;;  %9557 = vmatprep.mubr.msk.bf16.mxu1 %vm4617_vm1, %v10415_v36  ;;  %6174 = vmatpush1.bf16.msra.mxu1 %v10477_v59  ;;  %v10445_v59 = vld [vmem:[%s14776_s4 + $0x14c] ss:$16 sps:$4 sm:$0xff]  }
 0x457   : > { %v12979_v47 = vpop.f32.mrf.mxu1  ;;  %6175 = vmatprep.subr.bf16.mxu1 %v14818_v8  ;;  %5946 = vmatpush1.bf16.msra.mxu0 %v10480_v30 }
 0x458   : > { %15192 = vst [vmem:[#allocation82_spill] sm:$0xff] %v12979_v47  ;;  %5957 = vmatprep.subr.bf16.mxu0 %v14818_v8 }
 0x459   : > { %v12987_v40 = vpop.f32.mrf.mxu1 }
 0x45a   : > { %15193 = vst [vmem:[#allocation84_spill] sm:$0xff] %v12987_v40 }
 0x45b   : > { %v12997_v35 = vpop.f32.mrf.mxu1  ;;  %5958 = vmatpush2.bf16.msra.mxu0 %v5929_v24  ;;  %v10447_v24 = vld [vmem:[%s14776_s4 + $0x148] ss:$16 sps:$4 sm:$0xff]  }
 0x45c   : > { %15194 = vst [vmem:[#allocation83_spill] sm:$0xff] %v12997_v35  ;;  %5959 = vmatprep.subr.bf16.mxu0 %v14818_v8 }
 0x45d   : > { %v13005_v39 = vpop.f32.mrf.mxu1  ;;  %5626 = vmatmul.mubr.bf16.gmra.mxu1 %v10417_v48  ;;  %v10479_v48 = vld [vmem:[%s14778_s6 + $0x8] sm:$0xff]  }
 0x45e   : > { %15195 = vst [vmem:[#allocation86_spill] sm:$0xff] %v13005_v39  ;;  %9558 = vmatprep.mubr.msk.bf16.mxu1 %vm4617_vm1, %v10421_v42  ;;  %6176 = vmatpush1.bf16.msra.mxu1 %v10479_v48  ;;  %v10484_v48 = vld [vmem:[%s14777_s5 + $0x48] sm:$0xff]  }
 0x45f   : > { %v13008_v23 = vpop.f32.mrf.mxu1  ;;  %6177 = vmatprep.subr.bf16.mxu1 %v14818_v8  ;;  %5960 = vmatpush2.bf16.msra.mxu0 %v10484_v48 }
 0x460   : > { %15196 = vst [vmem:[#allocation85_spill] sm:$0xff] %v13008_v23  ;;  %5961 = vmatprep.subr.bf16.mxu0 %v14818_v8 }
 0x461   : > { %v13018_v0 = vpop.f32.mrf.mxu1 }
 0x462   : > { %15197 = vst [vmem:[#allocation88_spill] sm:$0xff] %v13018_v0 }
 0x463   : > { %v13027_v27 = vpop.f32.mrf.mxu1 }
 0x464   : > { %15198 = vst [vmem:[#allocation87_spill] sm:$0xff] %v13027_v27 }
 0x465   : > { %v13036_v50 = vpop.f32.mrf.mxu1  ;;  %5636 = vmatmul.mubr.bf16.gmra.mxu1 %v10423_v14  ;;  %v10481_v14 = vld [vmem:[%s14778_s6] sm:$0xff]  }
 0x466   : > { %15199 = vst [vmem:[#allocation90_spill] sm:$0xff] %v13036_v50  ;;  %9559 = vmatprep.mubr.msk.bf16.mxu1 %vm4617_vm1, %v10427_v13  ;;  %6178 = vmatpush1.bf16.msra.mxu1 %v10481_v14  ;;  %v10486_v14 = vld [vmem:[%s14777_s5 + $0x40] sm:$0xff]  }
 0x467   : > { %v13039_v21 = vpop.f32.mrf.mxu1  ;;  %6189 = vmatprep.subr.bf16.mxu1 %v14818_v8  ;;  %5962 = vmatpush2.bf16.msra.mxu0 %v10486_v14  ;;  %v10453_v14 = vld [vmem:[%s14776_s4 + $0x168] ss:$16 sps:$4 sm:$0xff]  }
 0x468   : > { %15200 = vst [vmem:[#allocation89_spill] sm:$0xff] %v13039_v21 }
 0x469   : > { %v13049_v32 = vpop.f32.mrf.mxu1 }
 0x46a   : > { %15201 = vst [vmem:[#allocation91_spill] sm:$0xff] %v13049_v32 }
 0x46b   : > { %v13058_v62 = vpop.f32.mrf.mxu1 }
 0x46c   : > { %15202 = vst [vmem:[#allocation93_spill] sm:$0xff] %v13058_v62 }
 0x46d   : > { %v13067_v36 = vpop.f32.mrf.mxu1  ;;  %5646 = vmatmul.mubr.bf16.gmra.mxu1 %v10429_v54  ;;  %v6161_v54 = vsel %vm5927_vm2, %v10483_v57, 0 }
 0x46e   : > { %15203 = vst [vmem:[#allocation92_spill] sm:$0xff] %v13067_v36  ;;  %9560 = vmatprep.mubr.msk.bf16.mxu1 %vm4617_vm1, %v10433_v11  ;;  %6190 = vmatpush2.bf16.msra.mxu1 %v6161_v54  ;;  %v10451_v54 = vld [vmem:[%s14776_s4 + $0x16c] ss:$16 sps:$4 sm:$0xff]  }
 0x46f   : > { %v13070_v4 = vpop.f32.mrf.mxu1  ;;  %6191 = vmatprep.subr.bf16.mxu1 %v14818_v8 }
 0x470   : > { %15204 = vst [vmem:[#allocation95_spill] sm:$0xff] %v13070_v4 }
 0x471   : > { %v13080_v42 = vpop.f32.mrf.mxu1 }
 0x472   : > { %15205 = vst [vmem:[#allocation94_spill] sm:$0xff] %v13080_v42  ;;  %v10465_v42 = vld [vmem:[%s14776_s4 + $0x1a8] ss:$16 sps:$4 sm:$0xff]  }
 0x473   : > { %v13089_v18 = vpop.f32.mrf.mxu1 }
 0x474   : > { %15206 = vst [vmem:[#allocation97_spill] sm:$0xff] %v13089_v18 }
 0x475   : > { %v13098_v13 = vpop.f32.mrf.mxu1  ;;  %5656 = vmatmul.mubr.bf16.gmra.mxu1 %v10435_v29  ;;  %v10485_v29 = vld [vmem:[%s14778_s6 + $0x48] sm:$0xff]  }
 0x476   : > { %15207 = vst [vmem:[#allocation96_spill] sm:$0xff] %v13098_v13  ;;  %9561 = vmatprep.mubr.msk.bf16.mxu1 %vm4617_vm1, %v10439_v22  ;;  %6192 = vmatpush2.bf16.msra.mxu1 %v10485_v29  ;;  %v13157_v29 = vpop.f32.mrf.mxu0 }
 0x477   : > { %v13107_v46 = vpop.f32.mrf.mxu1  ;;  %6193 = vmatprep.subr.bf16.mxu1 %v14818_v8 }
 0x478   : > { %15208 = vst [vmem:[#allocation99_spill] sm:$0xff] %v13107_v46  ;;  %v10463_v46 = vld [vmem:[%s14776_s4 + $0x1ac] ss:$16 sps:$4 sm:$0xff]  }
 0x479   : > { %v13111_v11 = vpop.f32.mrf.mxu1 }
 0x47a   : > { %15209 = vst [vmem:[#allocation98_spill] sm:$0xff] %v13111_v11  ;;  %6194 = vmatpush2.bf16.msra.mxu1 %v10487_v17  ;;  %v10457_v17 = vld [vmem:[%s14776_s4 + $0x18c] ss:$16 sps:$4 sm:$0xff]  }
 0x47b   : > { %v13120_v61 = vpop.f32.mrf.mxu1 }
 0x47c   : > { %15210 = vst [vmem:[#allocation101_spill] sm:$0xff] %v13120_v61  ;;  %v10459_v61 = vld [vmem:[%s14776_s4 + $0x188] ss:$16 sps:$4 sm:$0xff]  }
 0x47d   : > { %v13129_v22 = vpop.f32.mrf.mxu1  ;;  %5666 = vmatmul.mubr.bf16.gmra.mxu1 %v10441_v16 }
 0x47e   : > { %15211 = vst [vmem:[#allocation100_spill] sm:$0xff] %v13129_v22  ;;  %9562 = vmatprep.mubr.msk.bf16.mxu1 %vm4617_vm1, %v10445_v59 }
 0x47f   : > { %v13132_v30 = vpop.f32.mrf.mxu1 }
 0x480   : > { %15212 = vst [vmem:[#allocation103_spill] sm:$0xff] %v13132_v30  ;;  %v13169_v30 = vpop.f32.mrf.mxu0 }
 0x481   : > { %v13142_v57 = vpop.f32.mrf.mxu1 }
 0x482   : > { %15213 = vst [vmem:[#allocation102_spill] sm:$0xff] %v13142_v57  ;;  %v13176_v57 = vpop.f32.mrf.mxu0 }
 0x483   : > { %v13150_v16 = vpop.f32.mrf.mxu1 }
 0x484   : > { %15214 = vst [vmem:[#allocation2_spill] sm:$0xff] %v13150_v16  ;;  %v13188_v13 = vpop.f32.mrf.mxu0 }
 0x485   : > { %v13152_v59 = vpop.f32.mrf.mxu1  ;;  %5676 = vmatmul.mubr.bf16.gmra.mxu1 %v10447_v24 }
 0x486   : > { %9563 = vmatprep.mubr.msk.bf16.mxu1 %vm4617_vm1, %v10451_v54  ;;  %v13195_v18 = vpop.f32.mrf.mxu0 }
 0x487   : > { %v13155_v48 = vpop.f32.mrf.mxu1 }
 0x488   : > { %v13204_v62 = vpop.f32.mrf.mxu0 }
 0x489   : > { %v13159_v8 = vpop.f32.mrf.mxu1 }
 0x48b   : > { %v13167_v16 = vpop.f32.mrf.mxu1 }
 0x48d   : > { %v13171_v24 = vpop.f32.mrf.mxu1  ;;  %5686 = vmatmul.mubr.bf16.gmra.mxu1 %v10453_v14 }
 0x48e   : > { %9564 = vmatprep.mubr.msk.bf16.mxu1 %vm4617_vm1, %v10457_v17 }
 0x48f   : > { %v13174_v54 = vpop.f32.mrf.mxu1 }
 0x491   : > { %v13178_v22 = vpop.f32.mrf.mxu1 }
 0x493   : > { %v13186_v11 = vpop.f32.mrf.mxu1 }
 0x495   : > { %v13190_v14 = vpop.f32.mrf.mxu1  ;;  %5696 = vmatmul.mubr.bf16.gmra.mxu1 %v10459_v61 }
 0x496   : > { %9565 = vmatprep.mubr.msk.bf16.mxu1 %vm4617_vm1, %v10463_v46  ;;  %v13210_v46 = vpop.f32.mrf.mxu0 }
 0x497   : > { %v13193_v17 = vpop.f32.mrf.mxu1 }
 0x498   : > { %v13216_v27 = vpop.f32.mrf.mxu0 }
 0x499   : > { %v13197_v4 = vpop.f32.mrf.mxu1 }
 0x49a   : > { %v13222_v39 = vpop.f32.mrf.mxu0 }
 0x49b   : > { %v13202_v36 = vpop.f32.mrf.mxu1 }
 0x49d   : > { %v13206_v21 = vpop.f32.mrf.mxu1  ;;  %5706 = vmatmul.mubr.bf16.gmra.mxu1 %v10465_v42  ;;  %v13228_v42 = vpop.f32.mrf.mxu0 }
 0x49f   : > { %v13208_v61 = vpop.f32.mrf.mxu1  ;;  %v13234_v37 = vpop.f32.mrf.mxu0 }
 0x4a1   : > { %v13212_v32 = vpop.f32.mrf.mxu1  ;;  %v13240_v55 = vpop.f32.mrf.mxu0 }
 0x4a3   : > { %v13214_v50 = vpop.f32.mrf.mxu1  ;;  %v13246_v44 = vpop.f32.mrf.mxu0 }
 0x4a5   : > { %v13218_v23 = vpop.f32.mrf.mxu1  ;;  %v13252_v38 = vpop.f32.mrf.mxu0 }
 0x4a6   : > { %15215 = vst [vmem:[#allocation104_spill] sm:$0xff] %v13218_v23 }
 0x4a7   : > { %v13220_v0 = vpop.f32.mrf.mxu1 }
 0x4a8   : > { %15216 = vst [vmem:[#allocation3_spill] sm:$0xff] %v13220_v0 }
 0x4a9   : > { %v13224_v35 = vpop.f32.mrf.mxu1 }
 0x4aa   : > { %15217 = vst [vmem:[#allocation105_spill] sm:$0xff] %v13224_v35 }
 0x4ab   : > { %v13226_v47 = vpop.f32.mrf.mxu1 }
 0x4ac   : > { %15218 = vst [vmem:[#allocation4_spill] sm:$0xff] %v13226_v47 }
 0x4ad   : > { %v13230_v40 = vpop.f32.mrf.mxu1 }
 0x4ae   : > { %15219 = vst [vmem:[#allocation106_spill] sm:$0xff] %v13230_v40 }
 0x4af   : > { %v13232_v63 = vpop.f32.mrf.mxu1 }
 0x4b0   : > { %15220 = vst [vmem:[#allocation5_spill] sm:$0xff] %v13232_v63 }
 0x4b1   : > { %v13236_v41 = vpop.f32.mrf.mxu1 }
 0x4b2   : > { %15221 = vst [vmem:[#allocation107_spill] sm:$0xff] %v13236_v41  ;;  %v13258_v41 = vpop.f32.mrf.mxu0 }
 0x4b3   : > { %v13238_v3 = vpop.f32.mrf.mxu1 }
 0x4b4   : > { %15222 = vst [vmem:[#allocation6_spill] sm:$0xff] %v13238_v3 }
 0x4b5   : > { %v13242_v56 = vpop.f32.mrf.mxu1 }
 0x4b6   : > { %15223 = vst [vmem:[#allocation108_spill] sm:$0xff] %v13242_v56  ;;  %v13264_v56 = vpop.f32.mrf.mxu0 }
 0x4b7   : > { %v13244_v51 = vpop.f32.mrf.mxu1 }
 0x4b8   : > { %15224 = vst [vmem:[#allocation7_spill] sm:$0xff] %v13244_v51 }
 0x4b9   : > { %v13248_v34 = vpop.f32.mrf.mxu1 }
 0x4ba   : > { %15225 = vst [vmem:[#allocation109_spill] sm:$0xff] %v13248_v34  ;;  %v13270_v34 = vpop.f32.mrf.mxu0 }
 0x4bb   : > { %v13250_v6 = vpop.f32.mrf.mxu1 }
 0x4bc   : > { %15226 = vst [vmem:[#allocation8_spill] sm:$0xff] %v13250_v6 }
 0x4bd   : > { %v13254_v63 = vpop.f32.mrf.mxu1 }
 0x4be   : > { %15227 = vst [vmem:[#allocation110_spill] sm:$0xff] %v13254_v63  ;;  %v13276_v63 = vpop.f32.mrf.mxu0 }
 0x4bf   : > { %v13256_v10 = vpop.f32.mrf.mxu1  ;;  %15235 = vst [vmem:[#allocation114_spill] sm:$0xff] %v13276_v63 }
 0x4c0   : > { %15228 = vst [vmem:[#allocation9_spill] sm:$0xff] %v13256_v10 }
 0x4c1   : > { %v13260_v3 = vpop.f32.mrf.mxu1 }
 0x4c2   : > { %15229 = vst [vmem:[#allocation111_spill] sm:$0xff] %v13260_v3  ;;  %v13282_v3 = vpop.f32.mrf.mxu0 }
 0x4c3   : > { %v13262_v40 = vpop.f32.mrf.mxu1  ;;  %15238 = vst [vmem:[#allocation14_spill] sm:$0xff] %v13282_v3 }
 0x4c4   : > { %15230 = vst [vmem:[#allocation10_spill] sm:$0xff] %v13262_v40 }
 0x4c5   : > { %v13266_v51 = vpop.f32.mrf.mxu1 }
 0x4c6   : > { %15231 = vst [vmem:[#allocation112_spill] sm:$0xff] %v13266_v51  ;;  %v13288_v51 = vpop.f32.mrf.mxu0 }
 0x4c7   : > { %v13268_v15 = vpop.f32.mrf.mxu1  ;;  %15241 = vst [vmem:[#allocation117_spill] sm:$0xff] %v13288_v51 }
 0x4c8   : > { %15232 = vst [vmem:[#allocation11_spill] sm:$0xff] %v13268_v15 }
 0x4c9   : > { %v13272_v6 = vpop.f32.mrf.mxu1 }
 0x4ca   : > { %15233 = vst [vmem:[#allocation113_spill] sm:$0xff] %v13272_v6  ;;  %v13294_v6 = vpop.f32.mrf.mxu0 }
 0x4cb   : > { %v13274_v47 = vpop.f32.mrf.mxu1  ;;  %15244 = vst [vmem:[#allocation17_spill] sm:$0xff] %v13294_v6 }
 0x4cc   : > { %15234 = vst [vmem:[#allocation12_spill] sm:$0xff] %v13274_v47 }
 0x4cd   : > { %v13278_v10 = vpop.f32.mrf.mxu1 }
 0x4ce   : > { %15236 = vst [vmem:[#allocation13_spill] sm:$0xff] %v13278_v10  ;;  %v13300_v10 = vpop.f32.mrf.mxu0 }
 0x4cf   : > { %v13280_v45 = vpop.f32.mrf.mxu1  ;;  %15247 = vst [vmem:[#allocation19_spill] sm:$0xff] %v13300_v10 }
 0x4d0   : > { %15237 = vst [vmem:[#allocation115_spill] sm:$0xff] %v13280_v45 }
 0x4d1   : > { %v13284_v40 = vpop.f32.mrf.mxu1 }
 0x4d2   : > { %15239 = vst [vmem:[#allocation116_spill] sm:$0xff] %v13284_v40  ;;  %v13306_v40 = vpop.f32.mrf.mxu0 }
 0x4d3   : > { %v13286_v0 = vpop.f32.mrf.mxu1  ;;  %15250 = vst [vmem:[#allocation120_spill] sm:$0xff] %v13306_v40 }
 0x4d4   : > { %15240 = vst [vmem:[#allocation15_spill] sm:$0xff] %v13286_v0 }
 0x4d5   : > { %v13290_v15 = vpop.f32.mrf.mxu1 }
 0x4d6   : > { %15242 = vst [vmem:[#allocation16_spill] sm:$0xff] %v13290_v15  ;;  %v13312_v15 = vpop.f32.mrf.mxu0 }
 0x4d7   : > { %v13292_v53 = vpop.f32.mrf.mxu1  ;;  %15253 = vst [vmem:[#allocation24_spill] sm:$0xff] %v13312_v15 }
 0x4d8   : > { %15243 = vst [vmem:[#allocation118_spill] sm:$0xff] %v13292_v53 }
 0x4d9   : > { %v13296_v47 = vpop.f32.mrf.mxu1 }
 0x4da   : > { %15245 = vst [vmem:[#allocation119_spill] sm:$0xff] %v13296_v47  ;;  %v13318_v47 = vpop.f32.mrf.mxu0 }
 0x4db   : > { %v13298_v63 = vpop.f32.mrf.mxu1  ;;  %15256 = vst [vmem:[#allocation27_spill] sm:$0xff] %v13318_v47 }
 0x4dc   : > { %15246 = vst [vmem:[#allocation18_spill] sm:$0xff] %v13298_v63 }
 0x4dd   : > { %v13302_v45 = vpop.f32.mrf.mxu1 }
 0x4de   : > { %15248 = vst [vmem:[#allocation21_spill] sm:$0xff] %v13302_v45  ;;  %v13324_v45 = vpop.f32.mrf.mxu0 }
 0x4df   : > { %v13304_v3 = vpop.f32.mrf.mxu1  ;;  %15259 = vst [vmem:[#allocation30_spill] sm:$0xff] %v13324_v45 }
 0x4e0   : > { %15249 = vst [vmem:[#allocation20_spill] sm:$0xff] %v13304_v3  ;;  %v6360_v3 = vld [vmem:[%s14779_s7 + $0x50] sm:$0x33] }
 0x4e1   : > { %v13308_v0 = vpop.f32.mrf.mxu1  ;;  %v9660_v9 = vcombine.low %v6360_v3, %v6360_v3 }
 0x4e2   : > { %15251 = vst [vmem:[#allocation22_spill] sm:$0xff] %v13308_v0 }
 0x4e3   : > { %v13310_v51 = vpop.f32.mrf.mxu1 }
 0x4e4   : > { %15252 = vst [vmem:[#allocation23_spill] sm:$0xff] %v13310_v51  ;;  %v9661_v51 = vcombine.high %v6360_v3, %v6360_v3  ;;  %v4882_v3 = vadd.f32 %v13178_v22, %v12876_v28 }
 0x4e5   : > { %v13314_v53 = vpop.f32.mrf.mxu1 }
 0x4e6   : > { %15254 = vst [vmem:[#allocation25_spill] sm:$0xff] %v13314_v53  ;;  %v9626_v53 = vld [vmem:[%s14779_s7 + $0xa8] sm:$0x33]  ;;  %9662 = vmatprep.subr.msk.bf16.mxu1 %vm6459_vm3, %v9661_v51  ;;  %v4868_v51 = vadd.f32 %v13152_v59, %v12850_v19 }
 0x4e7   : > { %v13316_v6 = vpop.f32.mrf.mxu1 }
 0x4e8   : > { %15255 = vst [vmem:[#allocation26_spill] sm:$0xff] %v13316_v6  ;;  %v9638_v6 = vcombine.high %v9626_v53, %v9626_v53 }
 0x4e9   : > { %v13320_v63 = vpop.f32.mrf.mxu1 }
 0x4ea   : > { %15257 = vst [vmem:[#allocation28_spill] sm:$0xff] %v13320_v63  ;;  %9639 = vmatprep.subr.msk.bf16.mxu0 %vm6459_vm3, %v9638_v6 }
 0x4eb   : > { %v13322_v10 = vpop.f32.mrf.mxu1 }
 0x4ec   : > { %15258 = vst [vmem:[#allocation29_spill] sm:$0xff] %v13322_v10  ;;  %v13337_v10 = vpop.f32.mrf.mxu0 }
 0x4ed   : > { %v13332_v0 = vpop.f32.mrf.mxu1  ;;  %15262 = vst [vmem:[#allocation33_spill] sm:$0xff] %v13337_v10 }
 0x4ee   : > { %15260 = vst [vmem:[#allocation31_spill] sm:$0xff] %v13332_v0  ;;  %v13344_v15 = vpop.f32.mrf.mxu0 }
 0x4ef   : > { %v13335_v63 = vpop.f32.mrf.mxu1  ;;  %15265 = vst [vmem:[#allocation36_spill] sm:$0xff] %v13344_v15 }
 0x4f0   : > { %15261 = vst [vmem:[#allocation32_spill] sm:$0xff] %v13335_v63  ;;  %v13346_v25 = vpop.f32.mrf.mxu0  ;;  %v4872_v63 = vadd.f32 %v13159_v8, %v12855_v52  ;;  %v9637_v8 = vcombine.low %v9626_v53, %v9626_v53  ;;  %v10492_v53 = vld [vmem:[%s14779_s7 + $0x44] ss:$8 sps:$4 sm:$0xff]  }
 0x4f1   : > { %v13340_v45 = vpop.f32.mrf.mxu1  ;;  %15266 = vst [vmem:[#allocation37_spill] sm:$0xff] %v13346_v25 }
 0x4f2   : > { %15263 = vst [vmem:[#allocation34_spill] sm:$0xff] %v13340_v45  ;;  %v13357_v10 = vpop.f32.mrf.mxu0 }
 0x4f3   : > { %v13342_v47 = vpop.f32.mrf.mxu1 }
 0x4f4   : > { %15264 = vst [vmem:[#allocation35_spill] sm:$0xff] %v13342_v47  ;;  %v4870_v47 = vadd.f32 %v13155_v48, %v12853_v60 }
 0x4f5   : > { %v5577_v40 = vpop.f32.mrf.mxu1 }
 0x4f6   : > { %v5578_v0 = vadd.f32 %v5577_v40, %v13157_v29  ;;  %v4874_v40 = vadd.f32 %v13167_v16, %v12863_v20  ;;  %v4878_v20 = vadd.f32 %v13171_v24, %v12871_v49  ;;  %v10490_v16 = vld [vmem:[%s14779_s7 + $0x40] ss:$8 sps:$4 sm:$0xff]  }
 0x4f7   : > { %v5579_v35 = vpop.f32.mrf.mxu1 }
 0x4f8   : > { %v5580_v6 = vadd.f32 %v5579_v35, %v13169_v30  ;;  %v5716_v29 = vmax.f32 %v4868_v51, %v5578_v0 }
 0x4f9   : > { %v5581_v23 = vpop.f32.mrf.mxu1 }
 0x4fa   : > { %v5582_v45 = vadd.f32 %v5581_v23, %v13176_v57  ;;  %v5717_v52 = vmax.f32 %v4870_v47, %v5580_v6  ;;  %v13362_v57 = vpop.f32.mrf.mxu0  ;;  %v4884_v47 = vadd.f32 %v13186_v11, %v12884_v43  ;;  %v10496_v11 = vld [vmem:[%s14779_s7 + $0x34] ss:$8 sps:$4 sm:$0xff]  }
 0x4fb   : > { %v5583_v15 = vpop.f32.mrf.mxu1 }
 0x4fc   : > { %v5718_v25 = vmax.f32 %v4872_v63, %v5582_v45  ;;  %v5584_v19 = vadd.f32 %v5583_v15, %v13188_v13  ;;  %v6658_v45 = vsel %vm6459_vm3, %v9660_v9, 0  ;;  %v10500_v15 = vld [vmem:[%s14779_s7 + $0x9c] ss:$8 sps:$4 sm:$0xff]   ;;  %v4880_v9 = vadd.f32 %v13174_v54, %v12874_v31  ;;  %v13385_v13 = vpop.f32.mrf.mxu0  ;;  %v10498_v31 = vld [vmem:[%s14779_s7 + $0x98] ss:$8 sps:$4 sm:$0xff]  }
 0x4fd   : > { %v5587_v59 = vpop.f32.mrf.mxu1 }
 0x4fe   : > { %v5772_v35 = vpack.c.bf16 %v5718_v25, %v5716_v29  ;;  %v5719_v30 = vmax.f32 %v4874_v40, %v5584_v19  ;;  %v5588_v48 = vadd.f32 %v5587_v59, %v13195_v18  ;;  %v6461_v25 = vsel %vm6459_vm3, %v9637_v8, 0  ;;  %v13397_v51 = vpop.f32.mrf.mxu0  ;;  %v10494_v29 = vld [vmem:[%s14779_s7 + $0x30] ss:$8 sps:$4 sm:$0xff]   ;;  %v10503_v8 = vld [vmem:[%s14779_s7 + $0x24] ss:$8 sps:$4 sm:$0xff]  }
 0x4ff   : > { %v5589_v23 = vpop.f32.mrf.mxu1  ;;  %v4888_v19 = vadd.f32 %v13190_v14, %v12886_v33  ;;  %v4890_v33 = vadd.f32 %v13193_v17, %v12889_v58 }
 0x500   : > { %v5773_v60 = vpack.c.bf16 %v5719_v30, %v5717_v52  ;;  %v5590_v63 = vadd.f32 %v5589_v23, %v13204_v62  ;;  %v5720_v28 = vmax.f32 %v4878_v20, %v5588_v48  ;;  %v4892_v52 = vadd.f32 %v13197_v4, %v12891_v26  ;;  %v13416_v30 = vpop.f32.mrf.mxu0 }
 0x501   : > { %v5591_v0 = vpop.f32.mrf.mxu1  ;;  %v4894_v23 = vadd.f32 %v13202_v36, %v12899_v5 }
 0x502   : > { %v5592_v49 = vadd.f32 %v5591_v0, %v13210_v46  ;;  %9577 = vmatprep.mubr.msk.bf16.mxu0 %vm5884_vm4, %v5773_v60  ;;  %9602 = vmatprep.mubr.msk.bf16.mxu1 %vm5884_vm4, %v5773_v60  ;;  %v5721_v24 = vmax.f32 %v4880_v9, %v5590_v63  ;;  %v13424_v0 = vpop.f32.mrf.mxu0 }
 0x503   : > { %v5593_v18 = vpop.f32.mrf.mxu1  ;;  %5964 = vmatmul.mubr.bf16.vlgmr.msra.gmra.mxu0 %v5772_v35  ;;  %6196 = vmatmul.mubr.bf16.vlgmr.msra.gmra.mxu1 %v5772_v35 }
 0x504   : > { %v5722_v22 = vmax.f32 %v4882_v3, %v5592_v49  ;;  %v5594_v62 = vadd.f32 %v5593_v18, %v13216_v27  ;;  %6668 = vmatpush1.bf16.msra.mxu1 %v6658_v45  ;;  %6471 = vmatpush1.bf16.msra.mxu0 %v6461_v25  ;;  %v4900_v3 = vadd.f32 %v13208_v61, %v12904_v12  ;;  %v13437_v63 = vpop.f32.mrf.mxu0 }
 0x505   : > { %v5597_v43 = vpop.f32.mrf.mxu1  ;;  %6669 = vmatprep.subr.bf16.mxu1 %v10492_v53  ;;  %6472 = vmatprep.subr.bf16.mxu0 %v10500_v15  ;;  %v4902_v53 = vadd.f32 %v13212_v32, %v12906_v7 }
 0x506   : > { %v5774_v54 = vpack.c.bf16 %v5722_v22, %v5720_v28  ;;  %v5723_v27 = vmax.f32 %v4884_v47, %v5594_v62  ;;  %v5598_v40 = vadd.f32 %v5597_v43, %v13222_v39  ;;  %v13442_v18 = vpop.f32.mrf.mxu0  ;;  %v15267_v28 = vld [vmem:[#allocation65_spill] sm:$0xff]  ;;  %v15268_v22 = vld [vmem:[#allocation104_spill] sm:$0xff]  ;;  %v15271_v43 = vld [vmem:[#allocation114_spill] sm:$0xff] }
 0x507   : > { %v5599_v46 = vpop.f32.mrf.mxu1  ;;  %v4908_v62 = vadd.f32 %v15268_v22, %v15267_v28 }
 0x508   : > { %v5775_v6 = vpack.c.bf16 %v5723_v27, %v5721_v24  ;;  %6670 = vmatpush1.bf16.msra.mxu1 %v10490_v16  ;;  %6473 = vmatpush1.bf16.msra.mxu0 %v10498_v31  ;;  %v5600_v39 = vadd.f32 %v5599_v46, %v13228_v42  ;;  %v5724_v26 = vmax.f32 %v4888_v19, %v5598_v40  ;;  %v15269_v31 = vld [vmem:[#allocation67_spill] sm:$0xff]  ;;  %v15275_v40 = vld [vmem:[#allocation68_spill] sm:$0xff] }
 0x509   : > { %v5601_v59 = vpop.f32.mrf.mxu1  ;;  %6671 = vmatprep.subr.bf16.mxu1 %v10496_v11  ;;  %v15274_v27 = vld [vmem:[#allocation3_spill] sm:$0xff] }
 0x50a   : > { %v5602_v35 = vadd.f32 %v5601_v59, %v13234_v37  ;;  %9578 = vmatprep.mubr.msk.bf16.mxu0 %vm5884_vm4, %v5775_v6  ;;  %9603 = vmatprep.mubr.msk.bf16.mxu1 %vm5884_vm4, %v5775_v6  ;;  %v10501_v37 = vld [vmem:[%s14779_s7 + $0x20] ss:$8 sps:$4 sm:$0xff]   ;;  %v5725_v58 = vmax.f32 %v4890_v33, %v5600_v39 }
 0x50b   : > { %v5603_v14 = vpop.f32.mrf.mxu1  ;;  %5972 = vmatmul.mubr.bf16.gmra.mxu0 %v5774_v54  ;;  %6204 = vmatmul.mubr.bf16.gmra.mxu1 %v5774_v54  ;;  %v15273_v54 = vld [vmem:[#allocation66_spill] sm:$0xff] }
 0x50c   : > { %v5726_v4 = vmax.f32 %v4892_v52, %v5602_v35  ;;  %v5604_v42 = vadd.f32 %v5603_v14, %v13240_v55  ;;  %6672 = vmatpush1.bf16.msra.mxu1 %v10494_v29  ;;  %v4898_v55 = vadd.f32 %v13206_v21, %v12901_v1  ;;  %v4904_v1 = vadd.f32 %v13214_v50, %v12914_v2  ;;  %v15270_v2 = vld [vmem:[#allocation105_spill] sm:$0xff]  ;;  %v15276_v29 = vld [vmem:[#allocation4_spill] sm:$0xff] }
 0x50d   : > { %v5607_v60 = vpop.f32.mrf.mxu1  ;;  %6673 = vmatprep.subr.bf16.mxu1 %v10503_v8  ;;  %v4912_v50 = vadd.f32 %v15270_v2, %v15269_v31  ;;  %v4910_v46 = vadd.f32 %v15274_v27, %v15273_v54  ;;  %v4914_v19 = vadd.f32 %v15276_v29, %v15275_v40  ;;  %v15277_v52 = vld [vmem:[#allocation117_spill] sm:$0xff]  ;;  %v15293_v27 = vld [vmem:[#allocation75_spill] sm:$0xff]  ;;  %v15295_v40 = vld [vmem:[#allocation30_spill] sm:$0xff] }
 0x50e   : > { %v5776_v17 = vpack.c.bf16 %v5726_v4, %v5724_v26  ;;  %v5727_v48 = vmax.f32 %v4894_v23, %v5604_v42  ;;  %v5608_v5 = vadd.f32 %v5607_v60, %v13246_v44 }
 0x50f   : > { %v5609_v20 = vpop.f32.mrf.mxu1 }
 0x510   : > { %v5777_v45 = vpack.c.bf16 %v5727_v48, %v5725_v58  ;;  %6674 = vmatpush1.bf16.msra.mxu1 %v10501_v37  ;;  %v5610_v25 = vadd.f32 %v5609_v20, %v13252_v38  ;;  %v5728_v7 = vmax.f32 %v4898_v55, %v5608_v5  ;;  %v15278_v37 = vld [vmem:[#allocation17_spill] sm:$0xff]  ;;  %v15282_v5 = vld [vmem:[#allocation107_spill] sm:$0xff] }
 0x511   : > { %v5611_v36 = vpop.f32.mrf.mxu1  ;;  %v15279_v58 = vld [vmem:[#allocation69_spill] sm:$0xff] }
 0x512   : > { %v5612_v15 = vadd.f32 %v5611_v36, %v13258_v41  ;;  %9579 = vmatprep.mubr.msk.bf16.mxu0 %vm5884_vm4, %v5777_v45  ;;  %9604 = vmatprep.mubr.msk.bf16.mxu1 %vm5884_vm4, %v5777_v45  ;;  %v5729_v32 = vmax.f32 %v4900_v3, %v5610_v25  ;;  %v15281_v45 = vld [vmem:[#allocation71_spill] sm:$0xff]  ;;  %v15284_v25 = vld [vmem:[#allocation120_spill] sm:$0xff]  ;;  %v15285_v3 = vld [vmem:[#allocation70_spill] sm:$0xff] }
 0x513   : > { %v5613_v44 = vpop.f32.mrf.mxu1  ;;  %5980 = vmatmul.mubr.bf16.gmra.mxu0 %v5776_v17  ;;  %6212 = vmatmul.mubr.bf16.gmra.mxu1 %v5776_v17  ;;  %v15280_v17 = vld [vmem:[#allocation106_spill] sm:$0xff]  ;;  %v4922_v55 = vadd.f32 %v15282_v5, %v15281_v45  ;;  %v15283_v36 = vld [vmem:[#allocation19_spill] sm:$0xff] }
 0x514   : > { %v5730_v21 = vmax.f32 %v4902_v53, %v5612_v15  ;;  %v5614_v38 = vadd.f32 %v5613_v44, %v13264_v56  ;;  %v15272_v56 = vld [vmem:[#allocation14_spill] sm:$0xff]  ;;  %v4918_v48 = vadd.f32 %v15280_v17, %v15279_v58  ;;  %v15286_v44 = vld [vmem:[#allocation5_spill] sm:$0xff] }
 0x515   : > { %v5617_v41 = vpop.f32.mrf.mxu1 }
 0x516   : > { %v5778_v49 = vpack.c.bf16 %v5730_v21, %v5728_v7  ;;  %v5731_v9 = vmax.f32 %v4904_v1, %v5614_v38  ;;  %v5618_v61 = vadd.f32 %v5617_v41, %v13270_v34  ;;  %v13455_v34 = vpop.f32.mrf.mxu0  ;;  %v4920_v1 = vadd.f32 %v15286_v44, %v15285_v3  ;;  %v15287_v38 = vld [vmem:[#allocation72_spill] sm:$0xff]  ;;  %v15288_v41 = vld [vmem:[#allocation6_spill] sm:$0xff] }
 0x517   : > { %v5619_v47 = vpop.f32.mrf.mxu1  ;;  %v15304_v3 = vld [vmem:[#allocation110_spill] sm:$0xff] }
 0x518   : > { %v5779_v12 = vpack.c.bf16 %v5731_v9, %v5729_v32  ;;  %v5620_v11 = vadd.f32 %v5619_v47, %v15271_v43  ;;  %v5732_v59 = vmax.f32 %v4908_v62, %v5618_v61  ;;  %v13460_v4 = vpop.f32.mrf.mxu0  ;;  %v4924_v32 = vadd.f32 %v15288_v41, %v15287_v38  ;;  %v15289_v47 = vld [vmem:[#allocation24_spill] sm:$0xff]  ;;  %v15306_v38 = vld [vmem:[#allocation111_spill] sm:$0xff] }
 0x519   : > { %v5621_v16 = vpop.f32.mrf.mxu1 }
 0x51a   : > { %v5622_v24 = vadd.f32 %v5621_v16, %v15272_v56  ;;  %9580 = vmatprep.mubr.msk.bf16.mxu0 %vm5884_vm4, %v5779_v12  ;;  %9605 = vmatprep.mubr.msk.bf16.mxu1 %vm5884_vm4, %v5779_v12  ;;  %v5733_v33 = vmax.f32 %v4910_v46, %v5620_v11  ;;  %v13473_v21 = vpop.f32.mrf.mxu0  ;;  %v15291_v11 = vld [vmem:[#allocation73_spill] sm:$0xff]  ;;  %v15292_v56 = vld [vmem:[#allocation108_spill] sm:$0xff] }
 0x51b   : > { %v5623_v6 = vpop.f32.mrf.mxu1  ;;  %5988 = vmatmul.mubr.bf16.gmra.mxu0 %v5778_v49  ;;  %6220 = vmatmul.mubr.bf16.gmra.mxu1 %v5778_v49  ;;  %v15294_v46 = vld [vmem:[#allocation109_spill] sm:$0xff] }
 0x51c   : > { %v5734_v8 = vmax.f32 %v4912_v50, %v5622_v24  ;;  %v5624_v39 = vadd.f32 %v5623_v6, %v15277_v52  ;;  %v13478_v31 = vpop.f32.mrf.mxu0  ;;  %v15290_v50 = vld [vmem:[#allocation27_spill] sm:$0xff]  ;;  %v4928_v24 = vadd.f32 %v15292_v56, %v15291_v11  ;;  %v4932_v6 = vadd.f32 %v15294_v46, %v15293_v27 }
 0x51d   : > { %v5627_v35 = vpop.f32.mrf.mxu1  ;;  %v15298_v52 = vld [vmem:[#allocation7_spill] sm:$0xff] }
 0x51e   : > { %v5780_v14 = vpack.c.bf16 %v5734_v8, %v5732_v59  ;;  %v5735_v23 = vmax.f32 %v4914_v19, %v5624_v39  ;;  %v5628_v60 = vadd.f32 %v5627_v35, %v15278_v37  ;;  %v15296_v19 = vld [vmem:[#allocation33_spill] sm:$0xff]  ;;  %v15297_v8 = vld [vmem:[#allocation74_spill] sm:$0xff] }
 0x51f   : > { %v5629_v26 = vpop.f32.mrf.mxu1  ;;  %v4930_v39 = vadd.f32 %v15298_v52, %v15297_v8  ;;  %v15313_v8 = vld [vmem:[#allocation84_spill] sm:$0xff]  ;;  %v15314_v52 = vld [vmem:[#allocation113_spill] sm:$0xff] }
 0x520   : > { %v5781_v42 = vpack.c.bf16 %v5735_v23, %v5733_v33  ;;  %v5630_v53 = vadd.f32 %v5629_v26, %v15283_v36  ;;  %v5736_v49 = vmax.f32 %v4918_v48, %v5628_v60  ;;  %v13491_v33 = vpop.f32.mrf.mxu0  ;;  %v15300_v23 = vld [vmem:[#allocation8_spill] sm:$0xff] }
 0x521   : > { %v5631_v20 = vpop.f32.mrf.mxu1  ;;  %v15301_v60 = vld [vmem:[#allocation36_spill] sm:$0xff] }
 0x522   : > { %v5632_v15 = vadd.f32 %v5631_v20, %v15284_v25  ;;  %9581 = vmatprep.mubr.msk.bf16.mxu0 %vm5884_vm4, %v5781_v42  ;;  %9606 = vmatprep.mubr.msk.bf16.mxu1 %vm5884_vm4, %v5781_v42  ;;  %v5737_v28 = vmax.f32 %v4920_v1, %v5630_v53  ;;  %v15302_v53 = vld [vmem:[#allocation37_spill] sm:$0xff] }
 0x523   : > { %v5633_v7 = vpop.f32.mrf.mxu1  ;;  %5996 = vmatmul.mubr.bf16.gmra.mxu0 %v5780_v14  ;;  %6228 = vmatmul.mubr.bf16.gmra.mxu1 %v5780_v14  ;;  %v15299_v14 = vld [vmem:[#allocation76_spill] sm:$0xff] }
 0x524   : > { %v5738_v9 = vmax.f32 %v4922_v55, %v5632_v15  ;;  %v5634_v12 = vadd.f32 %v5633_v7, %v15289_v47  ;;  %v4934_v26 = vadd.f32 %v15300_v23, %v15299_v14  ;;  %v13496_v55 = vpop.f32.mrf.mxu0  ;;  %v15303_v15 = vld [vmem:[#allocation77_spill] sm:$0xff]  ;;  %v15305_v7 = vld [vmem:[#allocation79_spill] sm:$0xff]  ;;  %v15315_v14 = vld [vmem:[#allocation82_spill] sm:$0xff] }
 0x525   : > { %v5637_v61 = vpop.f32.mrf.mxu1  ;;  %v4938_v44 = vadd.f32 %v15304_v3, %v15303_v15  ;;  %v4942_v41 = vadd.f32 %v15306_v38, %v15305_v7  ;;  %v15308_v47 = vld [vmem:[#allocation9_spill] sm:$0xff]  ;;  %v15316_v23 = vld [vmem:[#allocation11_spill] sm:$0xff]  ;;  %v15319_v15 = vld [vmem:[#allocation86_spill] sm:$0xff] }
 0x526   : > { %v5782_v22 = vpack.c.bf16 %v5738_v9, %v5736_v49  ;;  %v5739_v62 = vmax.f32 %v4924_v32, %v5634_v12  ;;  %v5638_v43 = vadd.f32 %v5637_v61, %v15290_v50  ;;  %v15307_v9 = vld [vmem:[#allocation78_spill] sm:$0xff]  ;;  %v15320_v3 = vld [vmem:[#allocation13_spill] sm:$0xff]  ;;  %v15321_v38 = vld [vmem:[#allocation88_spill] sm:$0xff] }
 0x527   : > { %v5639_v16 = vpop.f32.mrf.mxu1  ;;  %v4940_v12 = vadd.f32 %v15308_v47, %v15307_v9  ;;  %v15323_v9 = vld [vmem:[#allocation85_spill] sm:$0xff]  ;;  %v15324_v47 = vld [vmem:[#allocation115_spill] sm:$0xff] }
 0x528   : > { %v5783_v2 = vpack.c.bf16 %v5739_v62, %v5737_v28  ;;  %v5640_v29 = vadd.f32 %v5639_v16, %v15295_v40  ;;  %v5740_v42 = vmax.f32 %v4928_v24, %v5638_v43  ;;  %v13509_v28 = vpop.f32.mrf.mxu0  ;;  %v15310_v62 = vld [vmem:[#allocation10_spill] sm:$0xff]  ;;  %v15312_v40 = vld [vmem:[#allocation112_spill] sm:$0xff] }
 0x529   : > { %v5641_v54 = vpop.f32.mrf.mxu1 }
 0x52a   : > { %v5642_v59 = vadd.f32 %v5641_v54, %v15296_v19  ;;  %9582 = vmatprep.mubr.msk.bf16.mxu0 %vm5884_vm4, %v5783_v2  ;;  %9607 = vmatprep.mubr.msk.bf16.mxu1 %vm5884_vm4, %v5783_v2  ;;  %v5741_v48 = vmax.f32 %v4930_v39, %v5640_v29  ;;  %v13514_v43 = vpop.f32.mrf.mxu0  ;;  %v4952_v39 = vadd.f32 %v15314_v52, %v15313_v8  ;;  %v10513_v8 = vld [vmem:[%s14779_s7] ss:$8 sps:$4 sm:$0xff]  }
 0x52b   : > { %v5643_v35 = vpop.f32.mrf.mxu1  ;;  %6004 = vmatmul.mubr.bf16.gmra.mxu0 %v5782_v22  ;;  %6236 = vmatmul.mubr.bf16.gmra.mxu1 %v5782_v22  ;;  %v15309_v22 = vld [vmem:[#allocation80_spill] sm:$0xff]  ;;  %v15327_v52 = vld [vmem:[#allocation90_spill] sm:$0xff] }
 0x52c   : > { %v5742_v37 = vmax.f32 %v4932_v6, %v5642_v59  ;;  %v5644_v58 = vadd.f32 %v5643_v35, %v15301_v60  ;;  %v4944_v16 = vadd.f32 %v15310_v62, %v15309_v22  ;;  %v15311_v6 = vld [vmem:[#allocation81_spill] sm:$0xff]  ;;  %v13519_v59 = vpop.f32.mrf.mxu0  ;;  %v15325_v22 = vld [vmem:[#allocation87_spill] sm:$0xff] }
 0x52d   : > { %v5647_v17 = vpop.f32.mrf.mxu1  ;;  %v4948_v29 = vadd.f32 %v15312_v40, %v15311_v6  ;;  %v10515_v6 = vld [vmem:[%s14779_s7 + $0x4] ss:$8 sps:$4 sm:$0xff]  }
 0x52e   : > { %v5784_v20 = vpack.c.bf16 %v5742_v37, %v5740_v42  ;;  %v5743_v45 = vmax.f32 %v4934_v26, %v5644_v58  ;;  %v5648_v25 = vadd.f32 %v5647_v17, %v15302_v53  ;;  %v15317_v42 = vld [vmem:[#allocation83_spill] sm:$0xff]  ;;  %v15318_v37 = vld [vmem:[#allocation12_spill] sm:$0xff] }
 0x52f   : > { %v5649_v5 = vpop.f32.mrf.mxu1  ;;  %v4954_v60 = vadd.f32 %v15318_v37, %v15317_v42  ;;  %v15331_v37 = vld [vmem:[#allocation89_spill] sm:$0xff] }
 0x530   : > { %v5785_v36 = vpack.c.bf16 %v5743_v45, %v5741_v48  ;;  %v5650_v32 = vadd.f32 %v5649_v5, %v13357_v10  ;;  %v5744_v2 = vmax.f32 %v4938_v44, %v5648_v25  ;;  %v4958_v44 = vadd.f32 %v15320_v3, %v15319_v15 }
 0x531   : > { %v5651_v1 = vpop.f32.mrf.mxu1 }
 0x532   : > { %v5652_v49 = vadd.f32 %v5651_v1, %v13362_v57  ;;  %9583 = vmatprep.mubr.msk.bf16.mxu0 %vm5884_vm4, %v5785_v36  ;;  %9608 = vmatprep.mubr.msk.bf16.mxu1 %vm5884_vm4, %v5785_v36  ;;  %v5745_v11 = vmax.f32 %v4940_v12, %v5650_v32 }
 0x533   : > { %v5653_v61 = vpop.f32.mrf.mxu1  ;;  %6012 = vmatmul.mubr.bf16.gmra.mxu0 %v5784_v20  ;;  %6244 = vmatmul.mubr.bf16.gmra.mxu1 %v5784_v20  ;;  %v13532_v20 = vpop.f32.mrf.mxu0 }
 0x534   : > { %v5746_v50 = vmax.f32 %v4942_v41, %v5652_v49  ;;  %v5654_v10 = vadd.f32 %v5653_v61, %v13385_v13  ;;  %v15322_v41 = vld [vmem:[#allocation116_spill] sm:$0xff] }
 0x535   : > { %v5657_v57 = vpop.f32.mrf.mxu1  ;;  %v13537_v7 = vpop.f32.mrf.mxu0  ;;  %v4962_v32 = vadd.f32 %v15322_v41, %v15321_v38  ;;  %v10506_v61 = vld [vmem:[%s14779_s7 + $0x8c] ss:$8 sps:$4 sm:$0xff]   ;;  %v10521_v38 = vld [vmem:[%s14779_s7 + $0x5c] ss:$8 sps:$4 sm:$0xff]  }
 0x536   : > { %v5786_v56 = vpack.c.bf16 %v5746_v50, %v5744_v2  ;;  %v5747_v24 = vmax.f32 %v4944_v16, %v5654_v10  ;;  %v5658_v46 = vadd.f32 %v5657_v57, %v13397_v51  ;;  %v4950_v51 = vadd.f32 %v15316_v23, %v15315_v14  ;;  %v10504_v10 = vld [vmem:[%s14779_s7 + $0x88] ss:$8 sps:$4 sm:$0xff]   ;;  %6474 = vmatprep.subr.bf16.mxu0 %v10506_v61  ;;  %v15338_v61 = vld [vmem:[#allocation22_spill] sm:$0xff] }
 0x537   : > { %v5659_v54 = vpop.f32.mrf.mxu1  ;;  %v10507_v57 = vld [vmem:[%s14779_s7 + $0x10] ss:$8 sps:$4 sm:$0xff]   ;;  %6475 = vmatpush1.bf16.msra.mxu0 %v10504_v10  ;;  %v15329_v23 = vld [vmem:[#allocation91_spill] sm:$0xff] }
 0x538   : > { %v5787_v27 = vpack.c.bf16 %v5747_v24, %v5745_v11  ;;  %v5660_v13 = vadd.f32 %v5659_v54, %v13416_v30  ;;  %v5748_v58 = vmax.f32 %v4948_v29, %v5658_v46  ;;  %v15342_v10 = vld [vmem:[#allocation23_spill] sm:$0xff] }
 0x539   : > { %v5661_v19 = vpop.f32.mrf.mxu1 }
 0x53a   : > { %v5662_v35 = vadd.f32 %v5661_v19, %v13424_v0  ;;  %9584 = vmatprep.mubr.msk.bf16.mxu0 %vm5884_vm4, %v5787_v27  ;;  %9609 = vmatprep.mubr.msk.bf16.mxu1 %vm5884_vm4, %v5787_v27  ;;  %v5749_v0 = vmax.f32 %v4950_v51, %v5660_v13  ;;  %v10510_v19 = vld [vmem:[%s14779_s7 + $0x78] ss:$8 sps:$4 sm:$0xff]   ;;  %v15330_v51 = vld [vmem:[#allocation119_spill] sm:$0xff] }
 0x53b   : > { %v5663_v26 = vpop.f32.mrf.mxu1  ;;  %6020 = vmatmul.mubr.bf16.gmra.mxu0 %v5786_v56  ;;  %6252 = vmatmul.mubr.bf16.gmra.mxu1 %v5786_v56  ;;  %v13562_v56 = vpop.f32.mrf.mxu0 }
 0x53c   : > { %v5750_v17 = vmax.f32 %v4952_v39, %v5662_v35  ;;  %v5664_v48 = vadd.f32 %v5663_v26, %v13437_v63  ;;  %v15328_v39 = vld [vmem:[#allocation16_spill] sm:$0xff]  ;;  %v4972_v26 = vadd.f32 %v15330_v51, %v15329_v23 }
 0x53d   : > { %v5667_v30 = vpop.f32.mrf.mxu1  ;;  %v4968_v13 = vadd.f32 %v15328_v39, %v15327_v52  ;;  %v5526_v14 = vpop.f32.mrf.mxu0  ;;  %v15346_v23 = vld [vmem:[#allocation28_spill] sm:$0xff] }
 0x53e   : > { %v5788_v45 = vpack.c.bf16 %v5750_v17, %v5748_v58  ;;  %v5751_v5 = vmax.f32 %v4954_v60, %v5664_v48  ;;  %v5668_v25 = vadd.f32 %v5667_v30, %v13442_v18  ;;  %v4960_v18 = vadd.f32 %v15324_v47, %v15323_v9  ;;  %v15332_v60 = vld [vmem:[#allocation118_spill] sm:$0xff]  ;;  %v15333_v17 = vld [vmem:[#allocation93_spill] sm:$0xff] }
 0x53f   : > { %v5669_v36 = vpop.f32.mrf.mxu1  ;;  %v4970_v58 = vadd.f32 %v15332_v60, %v15331_v37  ;;  %v15334_v48 = vld [vmem:[#allocation18_spill] sm:$0xff] }
 0x540   : > { %v5789_v53 = vpack.c.bf16 %v5751_v5, %v5749_v0  ;;  %v5670_v63 = vadd.f32 %v5669_v36, %v13455_v34  ;;  %v10509_v34 = vld [vmem:[%s14779_s7 + $0x14] ss:$8 sps:$4 sm:$0xff]   ;;  %v5752_v16 = vmax.f32 %v4958_v44, %v5668_v25  ;;  %v4974_v30 = vadd.f32 %v15334_v48, %v15333_v17  ;;  %v10516_v36 = vld [vmem:[%s14779_s7 + $0x68] ss:$8 sps:$4 sm:$0xff]   ;;  %v5528_v25 = vpop.f32.mrf.mxu0 }
 0x541   : > { %v5671_v1 = vpop.f32.mrf.mxu1  ;;  %6675 = vmatprep.subr.bf16.mxu1 %v10509_v34 }
 0x542   : > { %v5672_v49 = vadd.f32 %v5671_v1, %v13460_v4  ;;  %9585 = vmatprep.mubr.msk.bf16.mxu0 %vm5884_vm4, %v5789_v53  ;;  %9610 = vmatprep.mubr.msk.bf16.mxu1 %vm5884_vm4, %v5789_v53  ;;  %v15326_v4 = vld [vmem:[#allocation15_spill] sm:$0xff]  ;;  %v5753_v24 = vmax.f32 %v4960_v18, %v5670_v63  ;;  %v15335_v63 = vld [vmem:[#allocation92_spill] sm:$0xff]  ;;  %v5530_v18 = vpop.f32.mrf.mxu0 }
 0x543   : > { %v5673_v12 = vpop.f32.mrf.mxu1  ;;  %6028 = vmatmul.mubr.bf16.gmra.mxu0 %v5788_v45  ;;  %6260 = vmatmul.mubr.bf16.gmra.mxu1 %v5788_v45  ;;  %v4964_v62 = vadd.f32 %v15326_v4, %v15325_v22  ;;  %v10518_v45 = vld [vmem:[%s14779_s7 + $0x6c] ss:$8 sps:$4 sm:$0xff]  }
 0x544   : > { %v5754_v2 = vmax.f32 %v4962_v32, %v5672_v49  ;;  %v5674_v50 = vadd.f32 %v5673_v12, %v13473_v21  ;;  %6676 = vmatpush1.bf16.msra.mxu1 %v10507_v57  ;;  %v10512_v21 = vld [vmem:[%s14779_s7 + $0x7c] ss:$8 sps:$4 sm:$0xff]   ;;  %v10519_v32 = vld [vmem:[%s14779_s7 + $0x58] ss:$8 sps:$4 sm:$0xff]  }
 0x545   : > { %v5677_v11 = vpop.f32.mrf.mxu1  ;;  %6476 = vmatprep.subr.bf16.mxu0 %v10512_v21  ;;  %6677 = vmatprep.subr.bf16.mxu1 %v10515_v6  ;;  %v15336_v49 = vld [vmem:[#allocation21_spill] sm:$0xff]  ;;  %v15337_v12 = vld [vmem:[#allocation94_spill] sm:$0xff] }
 0x546   : > { %v5790_v54 = vpack.c.bf16 %v5754_v2, %v5752_v16  ;;  %v5755_v27 = vmax.f32 %v4964_v62, %v5674_v50  ;;  %v5678_v29 = vadd.f32 %v5677_v11, %v13478_v31  ;;  %6477 = vmatpush1.bf16.msra.mxu0 %v10510_v19  ;;  %v4978_v9 = vadd.f32 %v15336_v49, %v15335_v63  ;;  %v15340_v62 = vld [vmem:[#allocation20_spill] sm:$0xff]  ;;  %v15341_v50 = vld [vmem:[#allocation97_spill] sm:$0xff] }
 0x547   : > { %v5679_v46 = vpop.f32.mrf.mxu1  ;;  %6478 = vmatprep.subr.bf16.mxu0 %v10518_v45  ;;  %v4982_v34 = vadd.f32 %v15338_v61, %v15337_v12  ;;  %v4984_v57 = vadd.f32 %v15342_v10, %v15341_v50  ;;  %v15343_v19 = vld [vmem:[#allocation96_spill] sm:$0xff]  ;;  %v15357_v61 = vld [vmem:[#allocation2_spill] sm:$0xff] }
 0x548   : > { %v5791_v40 = vpack.c.bf16 %v5755_v27, %v5753_v24  ;;  %v5680_v31 = vadd.f32 %v5679_v46, %v13491_v33  ;;  %v5756_v33 = vmax.f32 %v4968_v13, %v5678_v29  ;;  %6678 = vmatpush1.bf16.msra.mxu1 %v10513_v8  ;;  %v15344_v8 = vld [vmem:[#allocation25_spill] sm:$0xff] }
 0x549   : > { %v5681_v35 = vpop.f32.mrf.mxu1  ;;  %v4988_v52 = vadd.f32 %v15344_v8, %v15343_v19 }
 0x54a   : > { %v5682_v42 = vadd.f32 %v5681_v35, %v13496_v55  ;;  %9586 = vmatprep.mubr.msk.bf16.mxu0 %vm5884_vm4, %v5791_v40  ;;  %9611 = vmatprep.mubr.msk.bf16.mxu1 %vm5884_vm4, %v5791_v40  ;;  %v5757_v15 = vmax.f32 %v4970_v58, %v5680_v31  ;;  %v15345_v35 = vld [vmem:[#allocation98_spill] sm:$0xff]  ;;  %v15347_v31 = vld [vmem:[#allocation99_spill] sm:$0xff]  ;;  %v15350_v58 = vld [vmem:[#allocation29_spill] sm:$0xff] }
 0x54b   : > { %v5683_v0 = vpop.f32.mrf.mxu1  ;;  %6036 = vmatmul.mubr.bf16.gmra.mxu0 %v5790_v54  ;;  %6268 = vmatmul.mubr.bf16.gmra.mxu1 %v5790_v54  ;;  %v4992_v51 = vadd.f32 %v15346_v23, %v15345_v35  ;;  %v10526_v23 = vld [vmem:[%s14779_s7 + $0x14c] ss:$8 sps:$4 sm:$0xff]  }
 0x54c   : > { %v5758_v5 = vmax.f32 %v4972_v26, %v5682_v42  ;;  %v5684_v55 = vadd.f32 %v5683_v0, %v13509_v28  ;;  %6479 = vmatpush1.bf16.msra.mxu0 %v10516_v36  ;;  %v15348_v42 = vld [vmem:[#allocation26_spill] sm:$0xff] }
 0x54d   : > { %v5687_v53 = vpop.f32.mrf.mxu1  ;;  %6480 = vmatprep.subr.bf16.mxu0 %v10521_v38  ;;  %v4990_v37 = vadd.f32 %v15348_v42, %v15347_v31  ;;  %v10524_v42 = vld [vmem:[%s14779_s7 + $0x148] ss:$8 sps:$4 sm:$0xff]  }
 0x54e   : > { %v5792_v3 = vpack.c.bf16 %v5758_v5, %v5756_v33  ;;  %v5759_v44 = vmax.f32 %v4974_v30, %v5684_v55  ;;  %v5688_v28 = vadd.f32 %v5687_v53, %v13514_v43  ;;  %v15339_v43 = vld [vmem:[#allocation95_spill] sm:$0xff] }
 0x54f   : > { %v5689_v1 = vpop.f32.mrf.mxu1  ;;  %v4980_v16 = vadd.f32 %v15340_v62, %v15339_v43 }
 0x550   : > { %v5793_v41 = vpack.c.bf16 %v5759_v44, %v5757_v15  ;;  %v5690_v22 = vadd.f32 %v5689_v1, %v13519_v59  ;;  %v5760_v11 = vmax.f32 %v4978_v9, %v5688_v28  ;;  %6481 = vmatpush1.bf16.msra.mxu0 %v10519_v32  ;;  %v15351_v15 = vld [vmem:[#allocation100_spill] sm:$0xff]  ;;  %v15354_v28 = vld [vmem:[#allocation34_spill] sm:$0xff]  ;;  %v15355_v9 = vld [vmem:[#allocation103_spill] sm:$0xff] }
 0x551   : > { %v5691_v47 = vpop.f32.mrf.mxu1 }
 0x552   : > { %v5692_v4 = vadd.f32 %v5691_v47, %v13532_v20  ;;  %9587 = vmatprep.mubr.msk.bf16.mxu0 %vm5884_vm4, %v5793_v41  ;;  %9612 = vmatprep.mubr.msk.bf16.mxu1 %vm5884_vm4, %v5793_v41  ;;  %v5534_v20 = vpop.f32.mrf.mxu0  ;;  %v5761_v27 = vmax.f32 %v4980_v16, %v5690_v22  ;;  %v15353_v41 = vld [vmem:[#allocation102_spill] sm:$0xff]  ;;  %v15356_v47 = vld [vmem:[#allocation32_spill] sm:$0xff] }
 0x553   : > { %v5693_v2 = vpop.f32.mrf.mxu1  ;;  %6044 = vmatmul.mubr.bf16.gmra.mxu0 %v5792_v3  ;;  %6276 = vmatmul.mubr.bf16.gmra.mxu1 %v5792_v3  ;;  %v15352_v3 = vld [vmem:[#allocation31_spill] sm:$0xff]  ;;  %v5002_v32 = vadd.f32 %v15354_v28, %v15353_v41  ;;  %v10543_v28 = vld [vmem:[%s14779_s7 + $0x11c] ss:$8 sps:$4 sm:$0xff]  }
 0x554   : > { %v5762_v24 = vmax.f32 %v4982_v34, %v5692_v4  ;;  %v5694_v54 = vadd.f32 %v5693_v2, %v13537_v7  ;;  %v5536_v13 = vpop.f32.mrf.mxu0  ;;  %v4998_v44 = vadd.f32 %v15352_v3, %v15351_v15  ;;  %v15358_v34 = vld [vmem:[#allocation35_spill] sm:$0xff]  ;;  %v10532_v3 = vld [vmem:[%s14779_s7 + $0xf0] ss:$8 sps:$4 sm:$0xff]  }
 0x555   : > { %v5697_v59 = vpop.f32.mrf.mxu1  ;;  %v5004_v22 = vadd.f32 %v15358_v34, %v15357_v61  ;;  %v10540_v41 = vld [vmem:[%s14779_s7 + $0xe4] ss:$8 sps:$4 sm:$0xff]  }
 0x556   : > { %v5794_v46 = vpack.c.bf16 %v5762_v24, %v5760_v11  ;;  %v5763_v21 = vmax.f32 %v4984_v57, %v5694_v54  ;;  %v5698_v29 = vadd.f32 %v5697_v59, %v13562_v56  ;;  %v15349_v56 = vld [vmem:[#allocation101_spill] sm:$0xff]  ;;  %v5538_v33 = vpop.f32.mrf.mxu0  ;;  %v15359_v57 = vmov 0   ;;  %v9683_v54 = vld [vmem:[%s14779_s7 + $0x100] sm:$0x33] }
 0x557   : > { %v5699_v6 = vpop.f32.mrf.mxu1  ;;  %v4994_v17 = vadd.f32 %v15350_v58, %v15349_v56  ;;  %v9717_v11 = vld [vmem:[%s14779_s7 + $0x158] sm:$0x33]  ;;  %v9695_v59 = vcombine.high %v9683_v54, %v9683_v54  ;;  %v9694_v58 = vcombine.low %v9683_v54, %v9683_v54 }
 0x558   : > { %v5795_v40 = vpack.c.bf16 %v5763_v21, %v5761_v27  ;;  %v5700_v26 = vadd.f32 %v5699_v6, %v5526_v14  ;;  %v5764_v48 = vmax.f32 %v4988_v52, %v5698_v29  ;;  %v5540_v38 = vpop.f32.mrf.mxu0  ;;  %v9729_v24 = vcombine.high %v9717_v11, %v9717_v11 }
 0x559   : > { %v5701_v39 = vpop.f32.mrf.mxu1  ;;  %9696 = vmatprep.subr.msk.bf16.mxu0 %vm6459_vm3, %v9695_v59  ;;  %v9728_v6 = vcombine.low %v9717_v11, %v9717_v11  ;;  %v10552_v11 = vld [vmem:[%s14779_s7 + $0xc4] ss:$8 sps:$4 sm:$0xff]  }
 0x55a   : > { %v5702_v7 = vadd.f32 %v5701_v39, %v5528_v25  ;;  %9588 = vmatprep.mubr.msk.bf16.mxu0 %vm5884_vm4, %v5795_v40  ;;  %9613 = vmatprep.mubr.msk.bf16.mxu1 %vm5884_vm4, %v5795_v40  ;;  %v5765_v14 = vmax.f32 %v4990_v37, %v5700_v26  ;;  %v10530_v37 = vld [vmem:[%s14779_s7 + $0x13c] ss:$8 sps:$4 sm:$0xff]  }
 0x55b   : > { %v5703_v60 = vpop.f32.mrf.mxu1  ;;  %6052 = vmatmul.mubr.bf16.gmra.mxu0 %v5794_v46  ;;  %6284 = vmatmul.mubr.bf16.gmra.mxu1 %v5794_v46  ;;  %v7116_v35 = vsel %vm6459_vm3, %v9728_v6, 0 }
 0x55c   : > { %v5766_v30 = vmax.f32 %v4992_v51, %v5702_v7  ;;  %v5704_v0 = vadd.f32 %v5703_v60, %v5530_v18  ;;  %v5000_v18 = vadd.f32 %v15356_v47, %v15355_v9  ;;  %9730 = vmatprep.subr.msk.bf16.mxu1 %vm6459_vm3, %v9729_v24 }
 0x55d   : > { %v5707_v45 = vpop.f32.mrf.mxu1 }
 0x55e   : > { %v5796_v5 = vpack.c.bf16 %v5766_v30, %v5764_v48  ;;  %v5767_v55 = vmax.f32 %v4994_v17, %v5704_v0  ;;  %v5708_v25 = vadd.f32 %v5707_v45, %v5534_v20 }
 0x55f   : > { %v5709_v36 = vpop.f32.mrf.mxu1 }
 0x560   : > { %v5797_v53 = vpack.c.bf16 %v5767_v55, %v5765_v14  ;;  %v5710_v63 = vadd.f32 %v5709_v36, %v5536_v13  ;;  %v5768_v4 = vmax.f32 %v4998_v44, %v5708_v25  ;;  %v6867_v55 = vsel %vm6459_vm3, %v9694_v58, 0  ;;  %v10534_v36 = vld [vmem:[%s14779_s7 + $0xf4] ss:$8 sps:$4 sm:$0xff]   ;;  %v10535_v44 = vld [vmem:[%s14779_s7 + $0x128] ss:$8 sps:$4 sm:$0xff]  }
 0x561   : > { %v5711_v1 = vpop.f32.mrf.mxu1 }
 0x562   : > { %v5712_v49 = vadd.f32 %v5711_v1, %v5538_v33  ;;  %9589 = vmatprep.mubr.msk.bf16.mxu0 %vm5884_vm4, %v5797_v53  ;;  %9614 = vmatprep.mubr.msk.bf16.mxu1 %vm5884_vm4, %v5797_v53  ;;  %v5769_v16 = vmax.f32 %v5000_v18, %v5710_v63  ;;  %v10528_v33 = vld [vmem:[%s14779_s7 + $0x138] ss:$8 sps:$4 sm:$0xff]   ;;  %v10537_v53 = vld [vmem:[%s14779_s7 + $0x12c] ss:$8 sps:$4 sm:$0xff]  }
 0x563   : > { %v5713_v12 = vpop.f32.mrf.mxu1  ;;  %6060 = vmatmul.mubr.bf16.gmra.mxu0 %v5796_v5  ;;  %6292 = vmatmul.mubr.bf16.gmra.mxu1 %v5796_v5  ;;  %v10538_v18 = vld [vmem:[%s14779_s7 + $0xe0] ss:$8 sps:$4 sm:$0xff]  }
 0x564   : > { %v5770_v43 = vmax.f32 %v5002_v32, %v5712_v49  ;;  %v5714_v62 = vadd.f32 %v5713_v12, %v5540_v38  ;;  %v10541_v12 = vld [vmem:[%s14779_s7 + $0x118] ss:$8 sps:$4 sm:$0xff]  }
 0x566   : > { %v5798_v2 = vpack.c.bf16 %v5770_v43, %v5768_v4  ;;  %v5771_v50 = vmax.f32 %v5004_v22, %v5714_v62  ;;  %v10546_v22 = vld [vmem:[%s14779_s7 + $0xd4] ss:$8 sps:$4 sm:$0xff]  }
 0x567   : > { %v10549_v4 = vld [vmem:[%s14779_s7 + $0x10c] ss:$8 sps:$4 sm:$0xff]  }
 0x568   : > { %v5799_v10 = vpack.c.bf16 %v5771_v50, %v5769_v16  ;;  %v10544_v16 = vld [vmem:[%s14779_s7 + $0xd0] ss:$8 sps:$4 sm:$0xff]  }
 0x56a   : > { %9590 = vmatprep.mubr.msk.bf16.mxu0 %vm5884_vm4, %v5799_v10  ;;  %9615 = vmatprep.mubr.msk.bf16.mxu1 %vm5884_vm4, %v5799_v10 }
 0x56b   : > { %6068 = vmatmul.mubr.bf16.gmra.mxu0 %v5798_v2  ;;  %6300 = vmatmul.mubr.bf16.gmra.mxu1 %v5798_v2  ;;  %v10547_v2 = vld [vmem:[%s14779_s7 + $0x108] ss:$8 sps:$4 sm:$0xff]  }
 0x56c   : > { %6695 = vmatprep.mubr.bf16.mxu1 %v15359_v57  ;;  %6498 = vmatprep.mubr.bf16.mxu0 %v15359_v57 }
 0x5c3   : > { %v5965_v20 = vpop.f32.mrf.mxu0  ;;  %v6197_v27 = vpop.f32.mrf.mxu1 }
 0x5c4   : > { %v6308_v19 = vmax.f32 %v5965_v20, %v6197_v27 }
 0x5c5   : > { %v5967_v46 = vpop.f32.mrf.mxu0  ;;  %v6199_v21 = vpop.f32.mrf.mxu1 }
 0x5c6   : > { %v10550_v46 = vld [vmem:[%s14779_s7 + $0xc0] ss:$8 sps:$4 sm:$0xff]  }
 0x5c7   : > { %v5968_v40 = vpop.f32.mrf.mxu0  ;;  %v6200_v29 = vpop.f32.mrf.mxu1 }
 0x5c8   : > { %v6309_v8 = vmax.f32 %v5968_v40, %v6200_v29  ;;  %v10555_v40 = vld [vmem:[%s14779_s7 + $0xb4] ss:$8 sps:$4 sm:$0xff]  }
 0x5c9   : > { %v5970_v52 = vpop.f32.mrf.mxu0  ;;  %v6202_v39 = vpop.f32.mrf.mxu1  ;;  %v13731_v29 = vld [vmem:[%s14779_s7 + $0x1b0] sm:$0x33] }
 0x5ca   : > { %v6336_v13 = vpack.c.bf16 %v6309_v8, %v6308_v19  ;;  %v10553_v52 = vld [vmem:[%s14779_s7 + $0xb0] ss:$8 sps:$4 sm:$0xff]  }
 0x5cb   : > { %v5973_v51 = vpop.f32.mrf.mxu0  ;;  %v6205_v26 = vpop.f32.mrf.mxu1 }
 0x5cc   : > { %9663 = vmatmul.mubr.msk.bf16.vlgmr.msra.gmra.mxu1 %vm6428_vm5, %v6336_v13  ;;  %v6310_v17 = vmax.f32 %v5973_v51, %v6205_v26 }
 0x5cd   : > { %v5975_v7 = vpop.f32.mrf.mxu0  ;;  %v6207_v31 = vpop.f32.mrf.mxu1  ;;  %6705 = vmatprep.mubr.bf16.mxu1 %v15359_v57  ;;  %7126 = vmatpush1.bf16.msra.mxu1 %v7116_v35  ;;  %v9763_v35 = vcombine.high %v13731_v29, %v13731_v29 }
 0x5ce   : > { %7127 = vmatprep.subr.bf16.mxu1 %v10526_v23 }
 0x5cf   : > { %v5976_v60 = vpop.f32.mrf.mxu0  ;;  %v6208_v56 = vpop.f32.mrf.mxu1 }
 0x5d0   : > { %v6311_v48 = vmax.f32 %v5976_v60, %v6208_v56 }
 0x5d1   : > { %v5978_v30 = vpop.f32.mrf.mxu0  ;;  %v6210_v0 = vpop.f32.mrf.mxu1  ;;  %7128 = vmatpush1.bf16.msra.mxu1 %v10524_v42 }
 0x5d2   : > { %v6337_v45 = vpack.c.bf16 %v6311_v48, %v6310_v17  ;;  %7129 = vmatprep.subr.bf16.mxu1 %v10530_v37 }
 0x5d3   : > { %v5981_v14 = vpop.f32.mrf.mxu0  ;;  %v6213_v5 = vpop.f32.mrf.mxu1 }
 0x5d4   : > { %9640 = vmatmul.mubr.msk.bf16.vlgmr.msra.gmra.mxu0 %vm6428_vm5, %v6337_v45  ;;  %9664 = vmatmul.mubr.msk.bf16.gmra.mxu1 %vm6428_vm5, %v6337_v45  ;;  %v6312_v32 = vmax.f32 %v5981_v14, %v6213_v5 }
 0x5d5   : > { %v5983_v25 = vpop.f32.mrf.mxu0  ;;  %v6215_v15 = vpop.f32.mrf.mxu1  ;;  %6508 = vmatprep.mubr.bf16.mxu0 %v15359_v57  ;;  %6715 = vmatprep.mubr.bf16.mxu1 %v15359_v57 }
 0x5d6   : > { %6877 = vmatpush1.bf16.msra.mxu0 %v6867_v55  ;;  %7130 = vmatpush1.bf16.msra.mxu1 %v10528_v33 }
 0x5d7   : > { %v5984_v1 = vpop.f32.mrf.mxu0  ;;  %v6216_v38 = vpop.f32.mrf.mxu1  ;;  %6878 = vmatprep.subr.bf16.mxu0 %v10534_v36  ;;  %7131 = vmatprep.subr.bf16.mxu1 %v10537_v53 }
 0x5d8   : > { %v6313_v63 = vmax.f32 %v5984_v1, %v6216_v38 }
 0x5d9   : > { %v5986_v49 = vpop.f32.mrf.mxu0  ;;  %v6218_v9 = vpop.f32.mrf.mxu1 }
 0x5da   : > { %v13687_v47 = vpack.c.bf16 %v6313_v63, %v6312_v32  ;;  %6879 = vmatpush1.bf16.msra.mxu0 %v10532_v3  ;;  %7132 = vmatpush1.bf16.msra.mxu1 %v10535_v44 }
 0x5db   : > { %v5989_v61 = vpop.f32.mrf.mxu0  ;;  %v6221_v34 = vpop.f32.mrf.mxu1  ;;  %6880 = vmatprep.subr.bf16.mxu0 %v10540_v41  ;;  %7133 = vmatprep.subr.bf16.mxu1 %v10543_v28 }
 0x5dc   : > { %9641 = vmatmul.mubr.msk.bf16.gmra.mxu0 %vm6428_vm5, %v13687_v47  ;;  %9665 = vmatmul.mubr.msk.bf16.gmra.mxu1 %vm6428_vm5, %v13687_v47  ;;  %v6314_v24 = vmax.f32 %v5989_v61, %v6221_v34 }
 0x5dd   : > { %v5991_v43 = vpop.f32.mrf.mxu0  ;;  %v6223_v62 = vpop.f32.mrf.mxu1  ;;  %6518 = vmatprep.mubr.bf16.mxu0 %v15359_v57  ;;  %6725 = vmatprep.mubr.bf16.mxu1 %v15359_v57 }
 0x5de   : > { %6881 = vmatpush1.bf16.msra.mxu0 %v10538_v18  ;;  %7134 = vmatpush1.bf16.msra.mxu1 %v10541_v12 }
 0x5df   : > { %v5992_v50 = vpop.f32.mrf.mxu0  ;;  %v6224_v10 = vpop.f32.mrf.mxu1  ;;  %6882 = vmatprep.subr.bf16.mxu0 %v10546_v22  ;;  %7135 = vmatprep.subr.bf16.mxu1 %v10549_v4 }
 0x5e0   : > { %v6315_v54 = vmax.f32 %v5992_v50, %v6224_v10 }
 0x5e1   : > { %v5994_v59 = vpop.f32.mrf.mxu0  ;;  %v6226_v20 = vpop.f32.mrf.mxu1 }
 0x5e2   : > { %v13716_v27 = vpack.c.bf16 %v6315_v54, %v6314_v24  ;;  %6883 = vmatpush1.bf16.msra.mxu0 %v10544_v16  ;;  %7136 = vmatpush1.bf16.msra.mxu1 %v10547_v2 }
 0x5e3   : > { %v5997_v21 = vpop.f32.mrf.mxu0  ;;  %v6229_v6 = vpop.f32.mrf.mxu1  ;;  %6884 = vmatprep.subr.bf16.mxu0 %v10552_v11 }
 0x5e4   : > { %9642 = vmatmul.mubr.msk.bf16.gmra.mxu0 %vm6428_vm5, %v13716_v27  ;;  %9666 = vmatmul.mubr.msk.bf16.gmra.mxu1 %vm6428_vm5, %v13716_v27  ;;  %v6316_v23 = vmax.f32 %v5997_v21, %v6229_v6 }
 0x5e5   : > { %v5999_v19 = vpop.f32.mrf.mxu0  ;;  %v6231_v8 = vpop.f32.mrf.mxu1  ;;  %6528 = vmatprep.mubr.bf16.mxu0 %v15359_v57  ;;  %6735 = vmatprep.mubr.bf16.mxu1 %v15359_v57 }
 0x5e6   : > { %6885 = vmatpush1.bf16.msra.mxu0 %v10550_v46 }
 0x5e7   : > { %v6000_v39 = vpop.f32.mrf.mxu0  ;;  %v6232_v13 = vpop.f32.mrf.mxu1  ;;  %6886 = vmatprep.subr.bf16.mxu0 %v10555_v40 }
 0x5e8   : > { %v6317_v51 = vmax.f32 %v6000_v39, %v6232_v13 }
 0x5e9   : > { %v6002_v26 = vpop.f32.mrf.mxu0  ;;  %v6234_v7 = vpop.f32.mrf.mxu1 }
 0x5ea   : > { %v13740_v31 = vpack.c.bf16 %v6317_v51, %v6316_v23  ;;  %6887 = vmatpush1.bf16.msra.mxu0 %v10553_v52 }
 0x5eb   : > { %v6005_v42 = vpop.f32.mrf.mxu0  ;;  %v6237_v37 = vpop.f32.mrf.mxu1  ;;  %9764 = vmatprep.subr.msk.bf16.mxu0 %vm6459_vm3, %v9763_v35 }
 0x5ec   : > { %9643 = vmatmul.mubr.msk.bf16.gmra.mxu0 %vm6428_vm5, %v13740_v31  ;;  %9667 = vmatmul.mubr.msk.bf16.gmra.mxu1 %vm6428_vm5, %v13740_v31  ;;  %v6318_v48 = vmax.f32 %v6005_v42, %v6237_v37 }
 0x5ed   : > { %v6007_v60 = vpop.f32.mrf.mxu0  ;;  %v6239_v56 = vpop.f32.mrf.mxu1  ;;  %6538 = vmatprep.mubr.bf16.mxu0 %v15359_v57  ;;  %6745 = vmatprep.mubr.bf16.mxu1 %v15359_v57 }
 0x5ef   : > { %v6008_v58 = vpop.f32.mrf.mxu0  ;;  %v6240_v17 = vpop.f32.mrf.mxu1 }
 0x5f0   : > { %v6319_v30 = vmax.f32 %v6008_v58, %v6240_v17 }
 0x5f1   : > { %v6010_v0 = vpop.f32.mrf.mxu0  ;;  %v6242_v45 = vpop.f32.mrf.mxu1 }
 0x5f2   : > { %v13749_v33 = vpack.c.bf16 %v6319_v30, %v6318_v48 }
 0x5f3   : > { %v6013_v14 = vpop.f32.mrf.mxu0  ;;  %v6245_v5 = vpop.f32.mrf.mxu1 }
 0x5f4   : > { %9644 = vmatmul.mubr.msk.bf16.gmra.mxu0 %vm6428_vm5, %v13749_v33  ;;  %9668 = vmatmul.mubr.msk.bf16.gmra.mxu1 %vm6428_vm5, %v13749_v33  ;;  %v6320_v15 = vmax.f32 %v6013_v14, %v6245_v5 }
 0x5f5   : > { %v6015_v55 = vpop.f32.mrf.mxu0  ;;  %v6247_v36 = vpop.f32.mrf.mxu1  ;;  %6548 = vmatprep.mubr.bf16.mxu0 %v15359_v57  ;;  %6755 = vmatprep.mubr.bf16.mxu1 %v15359_v57 }
 0x5f6   : > { %v9762_v36 = vcombine.low %v13731_v29, %v13731_v29 }
 0x5f7   : > { %v6016_v53 = vpop.f32.mrf.mxu0  ;;  %v6248_v25 = vpop.f32.mrf.mxu1 }
 0x5f8   : > { %v6321_v3 = vmax.f32 %v6016_v53, %v6248_v25 }
 0x5f9   : > { %v6018_v44 = vpop.f32.mrf.mxu0  ;;  %v6250_v1 = vpop.f32.mrf.mxu1 }
 0x5fa   : > { %v13757_v38 = vpack.c.bf16 %v6321_v3, %v6320_v15  ;;  %v7365_v44 = vsel %vm6459_vm3, %v9762_v36, 0  ;;  %v10560_v1 = vld [vmem:[%s14779_s7 + $0x1a4] ss:$8 sps:$4 sm:$0xff]  }
 0x5fb   : > { %v6021_v41 = vpop.f32.mrf.mxu0  ;;  %v6253_v28 = vpop.f32.mrf.mxu1 }
 0x5fc   : > { %9645 = vmatmul.mubr.msk.bf16.gmra.mxu0 %vm6428_vm5, %v13757_v38  ;;  %9669 = vmatmul.mubr.msk.bf16.gmra.mxu1 %vm6428_vm5, %v13757_v38  ;;  %v6322_v18 = vmax.f32 %v6021_v41, %v6253_v28  ;;  %v10558_v28 = vld [vmem:[%s14779_s7 + $0x1a0] ss:$8 sps:$4 sm:$0xff]  }
 0x5fd   : > { %v6023_v32 = vpop.f32.mrf.mxu0  ;;  %v6255_v63 = vpop.f32.mrf.mxu1  ;;  %6558 = vmatprep.mubr.bf16.mxu0 %v15359_v57  ;;  %6765 = vmatprep.mubr.bf16.mxu1 %v15359_v57 }
 0x5ff   : > { %v6024_v49 = vpop.f32.mrf.mxu0  ;;  %v6256_v9 = vpop.f32.mrf.mxu1 }
 0x600   : > { %v6323_v12 = vmax.f32 %v6024_v49, %v6256_v9 }
 0x601   : > { %v6026_v61 = vpop.f32.mrf.mxu0  ;;  %v6258_v34 = vpop.f32.mrf.mxu1 }
 0x602   : > { %v13765_v22 = vpack.c.bf16 %v6323_v12, %v6322_v18  ;;  %v10561_v18 = vld [vmem:[%s14779_s7 + $0x190] ss:$8 sps:$4 sm:$0xff]   ;;  %v10566_v34 = vld [vmem:[%s14779_s7 + $0x184] ss:$8 sps:$4 sm:$0xff]  }
 0x603   : > { %v6029_v4 = vpop.f32.mrf.mxu0  ;;  %v6261_v43 = vpop.f32.mrf.mxu1 }
 0x604   : > { %9646 = vmatmul.mubr.msk.bf16.gmra.mxu0 %vm6428_vm5, %v13765_v22  ;;  %9670 = vmatmul.mubr.msk.bf16.gmra.mxu1 %vm6428_vm5, %v13765_v22  ;;  %v6324_v10 = vmax.f32 %v6029_v4, %v6261_v43 }
 0x605   : > { %v6031_v62 = vpop.f32.mrf.mxu0  ;;  %v6263_v16 = vpop.f32.mrf.mxu1  ;;  %6568 = vmatprep.mubr.bf16.mxu0 %v15359_v57  ;;  %6775 = vmatprep.mubr.bf16.mxu1 %v15359_v57 }
 0x606   : > { %v10564_v16 = vld [vmem:[%s14779_s7 + $0x180] ss:$8 sps:$4 sm:$0xff]  }
 0x607   : > { %v6032_v2 = vpop.f32.mrf.mxu0  ;;  %v6264_v50 = vpop.f32.mrf.mxu1 }
 0x608   : > { %v6325_v11 = vmax.f32 %v6032_v2, %v6264_v50 }
 0x609   : > { %v6034_v24 = vpop.f32.mrf.mxu0  ;;  %v6266_v54 = vpop.f32.mrf.mxu1 }
 0x60a   : > { %v13773_v59 = vpack.c.bf16 %v6325_v11, %v6324_v10 }
 0x60b   : > { %v6037_v20 = vpop.f32.mrf.mxu0  ;;  %v6269_v46 = vpop.f32.mrf.mxu1 }
 0x60c   : > { %9647 = vmatmul.mubr.msk.bf16.gmra.mxu0 %vm6428_vm5, %v13773_v59  ;;  %9671 = vmatmul.mubr.msk.bf16.gmra.mxu1 %vm6428_vm5, %v13773_v59  ;;  %v6326_v8 = vmax.f32 %v6037_v20, %v6269_v46  ;;  %v10567_v20 = vld [vmem:[%s14779_s7 + $0x170] ss:$8 sps:$4 sm:$0xff]   ;;  %v10572_v46 = vld [vmem:[%s14779_s7 + $0x164] ss:$8 sps:$4 sm:$0xff]  }
 0x60d   : > { %v6039_v21 = vpop.f32.mrf.mxu0  ;;  %v6271_v6 = vpop.f32.mrf.mxu1  ;;  %6578 = vmatprep.mubr.bf16.mxu0 %v15359_v57  ;;  %6785 = vmatprep.mubr.bf16.mxu1 %v15359_v57 }
 0x60e   : > { %v10570_v21 = vld [vmem:[%s14779_s7 + $0x160] ss:$8 sps:$4 sm:$0xff]  }
 0x60f   : > { %v6040_v40 = vpop.f32.mrf.mxu0  ;;  %v6272_v19 = vpop.f32.mrf.mxu1 }
 0x610   : > { %v6327_v52 = vmax.f32 %v6040_v40, %v6272_v19 }
 0x611   : > { %v6042_v39 = vpop.f32.mrf.mxu0  ;;  %v6274_v13 = vpop.f32.mrf.mxu1 }
 0x612   : > { %v13781_v35 = vpack.c.bf16 %v6327_v52, %v6326_v8 }
 0x613   : > { %v6045_v23 = vpop.f32.mrf.mxu0  ;;  %v6277_v51 = vpop.f32.mrf.mxu1 }
 0x614   : > { %9648 = vmatmul.mubr.msk.bf16.gmra.mxu0 %vm6428_vm5, %v13781_v35  ;;  %9672 = vmatmul.mubr.msk.bf16.gmra.mxu1 %vm6428_vm5, %v13781_v35  ;;  %v6328_v60 = vmax.f32 %v6045_v23, %v6277_v51 }
 0x615   : > { %v6047_v26 = vpop.f32.mrf.mxu0  ;;  %v6279_v7 = vpop.f32.mrf.mxu1  ;;  %6588 = vmatprep.mubr.bf16.mxu0 %v15359_v57  ;;  %7153 = vmatprep.mubr.bf16.mxu1 %v15359_v57 }
 0x617   : > { %v6048_v42 = vpop.f32.mrf.mxu0  ;;  %v6280_v37 = vpop.f32.mrf.mxu1 }
 0x618   : > { %v6329_v56 = vmax.f32 %v6048_v42, %v6280_v37 }
 0x619   : > { %v6050_v58 = vpop.f32.mrf.mxu0  ;;  %v6282_v17 = vpop.f32.mrf.mxu1 }
 0x61a   : > { %v13789_v48 = vpack.c.bf16 %v6329_v56, %v6328_v60 }
 0x61b   : > { %v13791_v30 = vpop.f32.mrf.mxu0  ;;  %v13793_v0 = vpop.f32.mrf.mxu1 }
 0x61c   : > { %9649 = vmatmul.mubr.msk.bf16.gmra.mxu0 %vm6428_vm5, %v13789_v48  ;;  %9731 = vmatmul.mubr.msk.bf16.vlgmr.msra.gmra.mxu1 %vm6428_vm5, %v13716_v27  ;;  %v6330_v40 = vmax.f32 %v13791_v30, %v13793_v0 }
 0x61d   : > { %v6055_v45 = vpop.f32.mrf.mxu0  ;;  %v6287_v14 = vpop.f32.mrf.mxu1  ;;  %6904 = vmatprep.mubr.bf16.mxu0 %v15359_v57  ;;  %7163 = vmatprep.mubr.bf16.mxu1 %v15359_v57 }
 0x61f   : > { %v13801_v5 = vpop.f32.mrf.mxu0  ;;  %v13803_v55 = vpop.f32.mrf.mxu1 }
 0x620   : > { %v6331_v6 = vmax.f32 %v13801_v5, %v13803_v55 }
 0x621   : > { %v6058_v53 = vpop.f32.mrf.mxu0  ;;  %v6290_v25 = vpop.f32.mrf.mxu1 }
 0x622   : > { %v13895_v19 = vpack.c.bf16 %v6331_v6, %v6330_v40 }
 0x623   : > { %v13807_v15 = vpop.f32.mrf.mxu0  ;;  %v13809_v3 = vpop.f32.mrf.mxu1 }
 0x624   : > { %9697 = vmatmul.mubr.msk.bf16.vlgmr.msra.gmra.mxu0 %vm6428_vm5, %v13687_v47  ;;  %9732 = vmatmul.mubr.msk.bf16.gmra.mxu1 %vm6428_vm5, %v13740_v31  ;;  %v10563_v47 = vld [vmem:[%s14779_s7 + $0x194] ss:$8 sps:$4 sm:$0xff]   ;;  %v6332_v52 = vmax.f32 %v13807_v15, %v13809_v3 }
 0x625   : > { %v6063_v41 = vpop.f32.mrf.mxu0  ;;  %v6295_v29 = vpop.f32.mrf.mxu1  ;;  %6914 = vmatprep.mubr.bf16.mxu0 %v15359_v57  ;;  %7173 = vmatprep.mubr.bf16.mxu1 %v15359_v57 }
 0x626   : > { %7375 = vmatpush1.bf16.msra.mxu0 %v7365_v44 }
 0x627   : > { %v13824_v32 = vpop.f32.mrf.mxu0  ;;  %v13826_v63 = vpop.f32.mrf.mxu1  ;;  %7376 = vmatprep.subr.bf16.mxu0 %v10560_v1 }
 0x628   : > { %v6333_v8 = vmax.f32 %v13824_v32, %v13826_v63 }
 0x629   : > { %v6066_v49 = vpop.f32.mrf.mxu0  ;;  %v6298_v9 = vpop.f32.mrf.mxu1 }
 0x62a   : > { %7377 = vmatpush1.bf16.msra.mxu0 %v10558_v28  ;;  %v13907_v39 = vpack.c.bf16 %v6333_v8, %v6332_v52 }
 0x62b   : > { %v6069_v12 = vpop.f32.mrf.mxu0  ;;  %v6301_v61 = vpop.f32.mrf.mxu1  ;;  %7378 = vmatprep.subr.bf16.mxu0 %v10563_v47 }
 0x62c   : > { %v6334_v4 = vmax.f32 %v6069_v12, %v6301_v61  ;;  %9698 = vmatmul.mubr.msk.bf16.gmra.mxu0 %vm6428_vm5, %v13716_v27  ;;  %9733 = vmatmul.mubr.msk.bf16.gmra.mxu1 %vm6428_vm5, %v13749_v33  ;;  %v10569_v27 = vld [vmem:[%s14779_s7 + $0x174] ss:$8 sps:$4 sm:$0xff]  }
 0x62d   : > { %v6071_v43 = vpop.f32.mrf.mxu0  ;;  %v6303_v62 = vpop.f32.mrf.mxu1  ;;  %6924 = vmatprep.mubr.bf16.mxu0 %v15359_v57  ;;  %7183 = vmatprep.mubr.bf16.mxu1 %v15359_v57 }
 0x62e   : > { %7379 = vmatpush1.bf16.msra.mxu0 %v10561_v18 }
 0x62f   : > { %v6072_v2 = vpop.f32.mrf.mxu0  ;;  %v6304_v50 = vpop.f32.mrf.mxu1  ;;  %7380 = vmatprep.subr.bf16.mxu0 %v10566_v34 }
 0x630   : > { %v6335_v10 = vmax.f32 %v6072_v2, %v6304_v50 }
 0x631   : > { %v6074_v11 = vpop.f32.mrf.mxu0  ;;  %v6306_v24 = vpop.f32.mrf.mxu1 }
 0x632   : > { %v13849_v54 = vpack.c.bf16 %v6335_v10, %v6334_v4  ;;  %7381 = vmatpush1.bf16.msra.mxu0 %v10564_v16 }
 0x633   : > { %7382 = vmatprep.subr.bf16.mxu0 %v10569_v27 }
 0x634   : > { %9699 = vmatmul.mubr.msk.bf16.gmra.mxu0 %vm6428_vm5, %v13740_v31  ;;  %9734 = vmatmul.mubr.msk.bf16.gmra.mxu1 %vm6428_vm5, %v13757_v38 }
 0x635   : > { %6934 = vmatprep.mubr.bf16.mxu0 %v15359_v57  ;;  %7193 = vmatprep.mubr.bf16.mxu1 %v15359_v57 }
 0x636   : > { %7383 = vmatpush1.bf16.msra.mxu0 %v10567_v20 }
 0x637   : > { %7384 = vmatprep.subr.bf16.mxu0 %v10572_v46 }
 0x63a   : > { %7385 = vmatpush1.bf16.msra.mxu0 %v10570_v21 }
 0x63b   : > { %8087 = vmatprep.subr.bf16.mxu0 %v15359_v57 }
 0x63c   : > { %9700 = vmatmul.mubr.msk.bf16.gmra.mxu0 %vm6428_vm5, %v13749_v33  ;;  %9735 = vmatmul.mubr.msk.bf16.gmra.mxu1 %vm6428_vm5, %v13765_v22 }
 0x63d   : > { %6944 = vmatprep.mubr.bf16.mxu0 %v15359_v57  ;;  %7203 = vmatprep.mubr.bf16.mxu1 %v15359_v57 }
 0x644   : > { %9701 = vmatmul.mubr.msk.bf16.gmra.mxu0 %vm6428_vm5, %v13757_v38  ;;  %9736 = vmatmul.mubr.msk.bf16.gmra.mxu1 %vm6428_vm5, %v13773_v59 }
 0x645   : > { %6954 = vmatprep.mubr.bf16.mxu0 %v15359_v57  ;;  %7213 = vmatprep.mubr.bf16.mxu1 %v15359_v57 }
 0x64c   : > { %9702 = vmatmul.mubr.msk.bf16.gmra.mxu0 %vm6428_vm5, %v13765_v22  ;;  %9737 = vmatmul.mubr.msk.bf16.gmra.mxu1 %vm6428_vm5, %v13781_v35 }
 0x64d   : > { %6964 = vmatprep.mubr.bf16.mxu0 %v15359_v57  ;;  %7223 = vmatprep.mubr.bf16.mxu1 %v15359_v57 }
 0x654   : > { %9703 = vmatmul.mubr.msk.bf16.gmra.mxu0 %vm6428_vm5, %v13773_v59  ;;  %9738 = vmatmul.mubr.msk.bf16.gmra.mxu1 %vm6428_vm5, %v13789_v48 }
 0x655   : > { %6974 = vmatprep.mubr.bf16.mxu0 %v15359_v57  ;;  %7233 = vmatprep.mubr.bf16.mxu1 %v15359_v57 }
 0x65c   : > { %9704 = vmatmul.mubr.msk.bf16.gmra.mxu0 %vm6428_vm5, %v13781_v35  ;;  %9739 = vmatmul.mubr.msk.bf16.gmra.mxu1 %vm6428_vm5, %v13895_v19 }
 0x65d   : > { %6984 = vmatprep.mubr.bf16.mxu0 %v15359_v57  ;;  %7243 = vmatprep.mubr.bf16.mxu1 %v15359_v57 }
 0x664   : > { %9705 = vmatmul.mubr.msk.bf16.gmra.mxu0 %vm6428_vm5, %v13789_v48  ;;  %9740 = vmatmul.mubr.msk.bf16.gmra.mxu1 %vm6428_vm5, %v13907_v39 }
 0x665   : > { %6994 = vmatprep.mubr.bf16.mxu0 %v15359_v57 }
 0x66c   : > { %9706 = vmatmul.mubr.msk.bf16.gmra.mxu0 %vm6428_vm5, %v13895_v19 }
 0x66d   : > { %7402 = vmatprep.mubr.bf16.mxu0 %v15359_v57 }
 0x674   : > { %9765 = vmatmul.mubr.msk.bf16.vlgmr.msra.gmra.mxu0 %vm6428_vm5, %v13740_v31 }
 0x675   : > { %7412 = vmatprep.mubr.bf16.mxu0 %v15359_v57 }
 0x67c   : > { %9766 = vmatmul.mubr.msk.bf16.gmra.mxu0 %vm6428_vm5, %v13749_v33 }
 0x67d   : > { %7422 = vmatprep.mubr.bf16.mxu0 %v15359_v57 }
 0x684   : > { %9767 = vmatmul.mubr.msk.bf16.gmra.mxu0 %vm6428_vm5, %v13757_v38 }
 0x685   : > { %7432 = vmatprep.mubr.bf16.mxu0 %v15359_v57 }
 0x68c   : > { %v6697_v13 = vpop.f32.mrf.mxu1  ;;  %9768 = vmatmul.mubr.msk.bf16.gmra.mxu0 %vm6428_vm5, %v13765_v22 }
 0x68d   : > { %7442 = vmatprep.mubr.bf16.mxu0 %v15359_v57 }
 0x68e   : > { %v6699_v23 = vpop.f32.mrf.mxu1 }
 0x690   : > { %v6701_v31 = vpop.f32.mrf.mxu1 }
 0x692   : > { %v13929_v51 = vpop.f32.mrf.mxu1 }
 0x694   : > { %v6500_v26 = vpop.f32.mrf.mxu0  ;;  %v6707_v7 = vpop.f32.mrf.mxu1  ;;  %9769 = vmatmul.mubr.msk.bf16.gmra.mxu0 %vm6428_vm5, %v13773_v59 }
 0x695   : > { %v13933_v33 = vadd.f32 %v6697_v13, %v6500_v26  ;;  %7452 = vmatprep.mubr.bf16.mxu0 %v15359_v57 }
 0x696   : > { %v6502_v38 = vpop.f32.mrf.mxu0  ;;  %v6709_v42 = vpop.f32.mrf.mxu1 }
 0x697   : > { %v13936_v37 = vadd.f32 %v6699_v23, %v6502_v38 }
 0x698   : > { %v6504_v22 = vpop.f32.mrf.mxu0  ;;  %v6711_v60 = vpop.f32.mrf.mxu1 }
 0x699   : > { %v13938_v56 = vadd.f32 %v6701_v31, %v6504_v22 }
 0x69a   : > { %v13940_v58 = vpop.f32.mrf.mxu0  ;;  %v13942_v17 = vpop.f32.mrf.mxu1 }
 0x69c   : > { %v6510_v30 = vpop.f32.mrf.mxu0  ;;  %v6717_v0 = vpop.f32.mrf.mxu1  ;;  %9770 = vmatmul.mubr.msk.bf16.gmra.mxu0 %vm6428_vm5, %v13781_v35 }
 0x69d   : > { %v13946_v59 = vadd.f32 %v6707_v7, %v6510_v30  ;;  %7462 = vmatprep.mubr.bf16.mxu0 %v15359_v57 }
 0x69e   : > { %v6512_v45 = vpop.f32.mrf.mxu0  ;;  %v6719_v14 = vpop.f32.mrf.mxu1 }
 0x69f   : > { %v13949_v5 = vadd.f32 %v6709_v42, %v6512_v45 }
 0x6a0   : > { %v6514_v55 = vpop.f32.mrf.mxu0  ;;  %v6721_v36 = vpop.f32.mrf.mxu1 }
 0x6a1   : > { %v13951_v53 = vadd.f32 %v6711_v60, %v6514_v55 }
 0x6a2   : > { %v13953_v25 = vpop.f32.mrf.mxu0  ;;  %v13955_v15 = vpop.f32.mrf.mxu1 }
 0x6a4   : > { %v6520_v3 = vpop.f32.mrf.mxu0  ;;  %v6727_v44 = vpop.f32.mrf.mxu1  ;;  %9771 = vmatmul.mubr.msk.bf16.gmra.mxu0 %vm6428_vm5, %v13789_v48 }
 0x6a5   : > { %v13959_v35 = vadd.f32 %v6717_v0, %v6520_v3  ;;  %7472 = vmatprep.mubr.bf16.mxu0 %v15359_v57 }
 0x6a6   : > { %v6522_v1 = vpop.f32.mrf.mxu0  ;;  %v6729_v41 = vpop.f32.mrf.mxu1 }
 0x6a7   : > { %v13962_v29 = vadd.f32 %v6719_v14, %v6522_v1 }
 0x6a8   : > { %v6524_v28 = vpop.f32.mrf.mxu0  ;;  %v6731_v32 = vpop.f32.mrf.mxu1 }
 0x6a9   : > { %v13964_v63 = vadd.f32 %v6721_v36, %v6524_v28 }
 0x6aa   : > { %v13966_v47 = vpop.f32.mrf.mxu0  ;;  %v13968_v49 = vpop.f32.mrf.mxu1 }
 0x6ac   : > { %v6530_v9 = vpop.f32.mrf.mxu0  ;;  %v6737_v18 = vpop.f32.mrf.mxu1  ;;  %9772 = vmatmul.mubr.msk.bf16.gmra.mxu0 %vm6428_vm5, %v13895_v19 }
 0x6ad   : > { %v13972_v48 = vadd.f32 %v6727_v44, %v6530_v9  ;;  %7482 = vmatprep.mubr.bf16.mxu0 %v15359_v57 }
 0x6ae   : > { %v6532_v12 = vpop.f32.mrf.mxu0  ;;  %v6739_v61 = vpop.f32.mrf.mxu1 }
 0x6af   : > { %v13975_v34 = vadd.f32 %v6729_v41, %v6532_v12 }
 0x6b0   : > { %v6534_v4 = vpop.f32.mrf.mxu0  ;;  %v6741_v43 = vpop.f32.mrf.mxu1 }
 0x6b1   : > { %v13977_v62 = vadd.f32 %v6731_v32, %v6534_v4 }
 0x6b2   : > { %v13979_v16 = vpop.f32.mrf.mxu0  ;;  %v13981_v2 = vpop.f32.mrf.mxu1 }
 0x6b4   : > { %v6540_v50 = vpop.f32.mrf.mxu0  ;;  %v6747_v27 = vpop.f32.mrf.mxu1  ;;  %9773 = vmatmul.mubr.msk.bf16.gmra.mxu0 %vm6428_vm5, %v13907_v39 }
 0x6b5   : > { %v13985_v10 = vadd.f32 %v6737_v18, %v6540_v50  ;;  %7492 = vmatprep.mubr.bf16.mxu0 %v15359_v57 }
 0x6b6   : > { %v6542_v11 = vpop.f32.mrf.mxu0  ;;  %v6749_v24 = vpop.f32.mrf.mxu1 }
 0x6b7   : > { %v13988_v20 = vadd.f32 %v6739_v61, %v6542_v11 }
 0x6b8   : > { %v6544_v46 = vpop.f32.mrf.mxu0  ;;  %v6751_v21 = vpop.f32.mrf.mxu1 }
 0x6b9   : > { %v13990_v6 = vadd.f32 %v6741_v43, %v6544_v46 }
 0x6ba   : > { %v13992_v40 = vpop.f32.mrf.mxu0  ;;  %v13994_v19 = vpop.f32.mrf.mxu1 }
 0x6bc   : > { %v6550_v8 = vpop.f32.mrf.mxu0  ;;  %v6757_v52 = vpop.f32.mrf.mxu1  ;;  %9774 = vmatmul.mubr.msk.bf16.gmra.mxu0 %vm6428_vm5, %v13849_v54 }
 0x6bd   : > { %v13998_v39 = vadd.f32 %v6747_v27, %v6550_v8 }
 0x6be   : > { %v6552_v13 = vpop.f32.mrf.mxu0  ;;  %v6759_v23 = vpop.f32.mrf.mxu1 }
 0x6bf   : > { %v14000_v31 = vadd.f32 %v6749_v24, %v6552_v13 }
 0x6c0   : > { %v6554_v26 = vpop.f32.mrf.mxu0  ;;  %v6761_v7 = vpop.f32.mrf.mxu1 }
 0x6c1   : > { %v14002_v38 = vadd.f32 %v6751_v21, %v6554_v26 }
 0x6c2   : > { %v14004_v42 = vpop.f32.mrf.mxu0  ;;  %v14006_v22 = vpop.f32.mrf.mxu1 }
 0x6c4   : > { %v6560_v60 = vpop.f32.mrf.mxu0  ;;  %v6767_v30 = vpop.f32.mrf.mxu1 }
 0x6c5   : > { %v14008_v0 = vadd.f32 %v6757_v52, %v6560_v60 }
 0x6c6   : > { %v6562_v45 = vpop.f32.mrf.mxu0  ;;  %v6769_v54 = vpop.f32.mrf.mxu1 }
 0x6c7   : > { %v14010_v14 = vadd.f32 %v6759_v23, %v6562_v45 }
 0x6c8   : > { %v6564_v55 = vpop.f32.mrf.mxu0  ;;  %v6771_v36 = vpop.f32.mrf.mxu1 }
 0x6c9   : > { %v14012_v3 = vadd.f32 %v6761_v7, %v6564_v55 }
 0x6ca   : > { %v14014_v44 = vpop.f32.mrf.mxu0  ;;  %v14016_v1 = vpop.f32.mrf.mxu1 }
 0x6cb   : > { %15360 = vst [vmem:[#allocation38_spill] sm:$0xff] %v14016_v1 }
 0x6cc   : > { %v6570_v41 = vpop.f32.mrf.mxu0  ;;  %v6777_v28 = vpop.f32.mrf.mxu1 }
 0x6cd   : > { %v14018_v32 = vadd.f32 %v6767_v30, %v6570_v41 }
 0x6ce   : > { %v6572_v9 = vpop.f32.mrf.mxu0  ;;  %v6779_v18 = vpop.f32.mrf.mxu1 }
 0x6cf   : > { %v14020_v12 = vadd.f32 %v6769_v54, %v6572_v9 }
 0x6d0   : > { %v6574_v61 = vpop.f32.mrf.mxu0  ;;  %v6781_v4 = vpop.f32.mrf.mxu1 }
 0x6d1   : > { %v14022_v43 = vadd.f32 %v6771_v36, %v6574_v61 }
 0x6d2   : > { %v14024_v50 = vpop.f32.mrf.mxu0  ;;  %v14026_v27 = vpop.f32.mrf.mxu1 }
 0x6d3   : > { %15361 = vst [vmem:[#allocation39_spill] sm:$0xff] %v14024_v50  ;;  %15362 = vst [vmem:[#allocation40_spill] sm:$0xff] %v14026_v27 }
 0x6d4   : > { %v6580_v11 = vpop.f32.mrf.mxu0  ;;  %v6787_v24 = vpop.f32.mrf.mxu1 }
 0x6d5   : > { %v14028_v46 = vadd.f32 %v6777_v28, %v6580_v11 }
 0x6d6   : > { %v6582_v21 = vpop.f32.mrf.mxu0  ;;  %v6789_v8 = vpop.f32.mrf.mxu1 }
 0x6d7   : > { %v14030_v52 = vadd.f32 %v6779_v18, %v6582_v21 }
 0x6d8   : > { %v6584_v13 = vpop.f32.mrf.mxu0  ;;  %v6791_v23 = vpop.f32.mrf.mxu1 }
 0x6d9   : > { %v14032_v26 = vadd.f32 %v6781_v4, %v6584_v13 }
 0x6da   : > { %v14034_v7 = vpop.f32.mrf.mxu0  ;;  %v14036_v60 = vpop.f32.mrf.mxu1 }
 0x6db   : > { %15363 = vst [vmem:[#allocation41_spill] sm:$0xff] %v14034_v7  ;;  %15364 = vst [vmem:[#allocation42_spill] sm:$0xff] %v14036_v60 }
 0x6dc   : > { %v6590_v30 = vpop.f32.mrf.mxu0  ;;  %v7155_v45 = vpop.f32.mrf.mxu1 }
 0x6dd   : > { %v14038_v54 = vadd.f32 %v6787_v24, %v6590_v30 }
 0x6de   : > { %v6592_v55 = vpop.f32.mrf.mxu0  ;;  %v7157_v36 = vpop.f32.mrf.mxu1 }
 0x6df   : > { %v14040_v41 = vadd.f32 %v6789_v8, %v6592_v55  ;;  %v6704_v8 = vadd.f32 %v13929_v51, %v13940_v58 }
 0x6e0   : > { %v6594_v28 = vpop.f32.mrf.mxu0  ;;  %v7159_v9 = vpop.f32.mrf.mxu1 }
 0x6e1   : > { %v14042_v18 = vadd.f32 %v6791_v23, %v6594_v28 }
 0x6e2   : > { %v14044_v61 = vpop.f32.mrf.mxu0  ;;  %v7161_v4 = vpop.f32.mrf.mxu1 }
 0x6e3   : > { %15365 = vst [vmem:[#allocation43_spill] sm:$0xff] %v14044_v61 }
 0x6e4   : > { %v6906_v11 = vpop.f32.mrf.mxu0  ;;  %v7165_v13 = vpop.f32.mrf.mxu1 }
 0x6e5   : > { %v7005_v21 = vadd.f32 %v6906_v11, %v13933_v33 }
 0x6e6   : > { %v6908_v57 = vpop.f32.mrf.mxu0  ;;  %v7167_v28 = vpop.f32.mrf.mxu1 }
 0x6e7   : > { %v7006_v60 = vadd.f32 %v6908_v57, %v13936_v37  ;;  %v14048_v24 = vadd.f32 %v7155_v45, %v7005_v21 }
 0x6e8   : > { %v6910_v30 = vpop.f32.mrf.mxu0  ;;  %v7169_v57 = vpop.f32.mrf.mxu1 }
 0x6e9   : > { %v7007_v55 = vadd.f32 %v6910_v30, %v13938_v56  ;;  %v14053_v23 = vadd.f32 %v7157_v36, %v7006_v60  ;;  %v6714_v56 = vadd.f32 %v13942_v17, %v13953_v25 }
 0x6ea   : > { %v6912_v61 = vpop.f32.mrf.mxu0  ;;  %v7171_v36 = vpop.f32.mrf.mxu1 }
 0x6eb   : > { %v7008_v27 = vadd.f32 %v6912_v61, %v6704_v8  ;;  %v14055_v7 = vadd.f32 %v7159_v9, %v7007_v55 }
 0x6ec   : > { %v6916_v33 = vpop.f32.mrf.mxu0 }
 0x6ed   : > { %v7009_v11 = vadd.f32 %v6916_v33, %v13946_v59  ;;  %v14058_v1 = vadd.f32 %v7161_v4, %v7008_v27 }
 0x6ee   : > { %v6918_v37 = vpop.f32.mrf.mxu0 }
 0x6ef   : > { %v7010_v45 = vadd.f32 %v6918_v37, %v13949_v5  ;;  %v14061_v21 = vadd.f32 %v7165_v13, %v7009_v11  ;;  %v7175_v5 = vpop.f32.mrf.mxu1 }
 0x6f0   : > { %v6920_v51 = vpop.f32.mrf.mxu0 }
 0x6f1   : > { %v7011_v58 = vadd.f32 %v6920_v51, %v13951_v53  ;;  %v14066_v60 = vadd.f32 %v7167_v28, %v7010_v45 }
 0x6f2   : > { %v6922_v9 = vpop.f32.mrf.mxu0 }
 0x6f3   : > { %v7012_v61 = vadd.f32 %v6922_v9, %v6714_v56  ;;  %v14068_v59 = vadd.f32 %v7169_v57, %v7011_v58 }
 0x6f4   : > { %v6926_v27 = vpop.f32.mrf.mxu0 }
 0x6f5   : > { %v7013_v4 = vadd.f32 %v6926_v27, %v13959_v35  ;;  %v14071_v30 = vadd.f32 %v7171_v36, %v7012_v61 }
 0x6f6   : > { %v6928_v13 = vpop.f32.mrf.mxu0 }
 0x6f7   : > { %v14074_v8 = vadd.f32 %v6928_v13, %v13962_v29  ;;  %v14076_v17 = vadd.f32 %v7175_v5, %v7013_v4 }
 0x6f8   : > { %v6930_v53 = vpop.f32.mrf.mxu0 }
 0x6f9   : > { %v14079_v25 = vadd.f32 %v6930_v53, %v13964_v63 }
 0x6fa   : > { %v14081_v55 = vpop.f32.mrf.mxu0 }
 0x6fc   : > { %v6936_v28 = vpop.f32.mrf.mxu0 }
 0x6fd   : > { %v14084_v33 = vadd.f32 %v6936_v28, %v13972_v48  ;;  %v14100_v48 = vpop.f32.mrf.mxu1 }
 0x6fe   : > { %v6938_v35 = vpop.f32.mrf.mxu0 }
 0x6ff   : > { %v14087_v11 = vadd.f32 %v6938_v35, %v13975_v34 }
 0x700   : > { %v6940_v57 = vpop.f32.mrf.mxu0 }
 0x701   : > { %v14090_v29 = vadd.f32 %v6940_v57, %v13977_v62  ;;  %v14107_v62 = vpop.f32.mrf.mxu1 }
 0x702   : > { %v14092_v37 = vpop.f32.mrf.mxu0 }
 0x704   : > { %v6946_v45 = vpop.f32.mrf.mxu0 }
 0x705   : > { %v14095_v63 = vadd.f32 %v6946_v45, %v13985_v10 }
 0x706   : > { %v6948_v51 = vpop.f32.mrf.mxu0 }
 0x707   : > { %v14098_v56 = vadd.f32 %v6948_v51, %v13988_v20  ;;  %v14115_v20 = vpop.f32.mrf.mxu1 }
 0x708   : > { %v6950_v58 = vpop.f32.mrf.mxu0 }
 0x709   : > { %v14103_v34 = vadd.f32 %v6950_v58, %v13990_v6  ;;  %v14122_v13 = vpop.f32.mrf.mxu1 }
 0x70a   : > { %v14105_v36 = vpop.f32.mrf.mxu0 }
 0x70c   : > { %v6956_v9 = vpop.f32.mrf.mxu0 }
 0x70d   : > { %v14110_v61 = vadd.f32 %v6956_v9, %v13998_v39 }
 0x70e   : > { %v6958_v10 = vpop.f32.mrf.mxu0 }
 0x70f   : > { %v14113_v27 = vadd.f32 %v6958_v10, %v14000_v31  ;;  %v14130_v31 = vpop.f32.mrf.mxu1 }
 0x710   : > { %v6960_v4 = vpop.f32.mrf.mxu0 }
 0x711   : > { %v14118_v5 = vadd.f32 %v6960_v4, %v14002_v38  ;;  %v14137_v51 = vpop.f32.mrf.mxu1 }
 0x712   : > { %v14120_v6 = vpop.f32.mrf.mxu0 }
 0x714   : > { %v6966_v53 = vpop.f32.mrf.mxu0 }
 0x715   : > { %v14125_v28 = vadd.f32 %v6966_v53, %v14008_v0 }
 0x716   : > { %v6968_v39 = vpop.f32.mrf.mxu0 }
 0x717   : > { %15366 = vst [vmem:[#allocation44_spill] sm:$0xff] %v14125_v28  ;;  %v14128_v35 = vadd.f32 %v6968_v39, %v14010_v14  ;;  %v14145_v14 = vpop.f32.mrf.mxu1 }
 0x718   : > { %v6970_v57 = vpop.f32.mrf.mxu0 }
 0x719   : > { %15367 = vst [vmem:[#allocation45_spill] sm:$0xff] %v14128_v35  ;;  %v14133_v45 = vadd.f32 %v6970_v57, %v14012_v3  ;;  %v10575_v3 = vld [vmem:[%s14781_s9 + $0x4] ss:$8 sps:$4 sm:$0xff]  }
 0x71a   : > { %v14135_v38 = vpop.f32.mrf.mxu0  ;;  %9785 = vmatprep.mubr.msk.bf16.mxu1 %vm7710_vm6, %v10575_v3 }
 0x71b   : > { %15368 = vst [vmem:[#allocation46_spill] sm:$0xff] %v14133_v45  ;;  %15369 = vst [vmem:[#allocation47_spill] sm:$0xff] %v14135_v38 }
 0x71c   : > { %v6976_v58 = vpop.f32.mrf.mxu0 }
 0x71d   : > { %v14140_v9 = vadd.f32 %v6976_v58, %v14018_v32  ;;  %v14156_v32 = vpop.f32.mrf.mxu1 }
 0x71e   : > { %v6978_v0 = vpop.f32.mrf.mxu0 }
 0x71f   : > { %15370 = vst [vmem:[#allocation48_spill] sm:$0xff] %v14140_v9  ;;  %v14143_v10 = vadd.f32 %v6978_v0, %v14020_v12 }
 0x720   : > { %v6980_v4 = vpop.f32.mrf.mxu0 }
 0x721   : > { %15371 = vst [vmem:[#allocation49_spill] sm:$0xff] %v14143_v10  ;;  %v14148_v53 = vadd.f32 %v6980_v4, %v14022_v43  ;;  %v14164_v43 = vpop.f32.mrf.mxu1 }
 0x722   : > { %v14153_v39 = vpop.f32.mrf.mxu0 }
 0x723   : > { %15372 = vst [vmem:[#allocation50_spill] sm:$0xff] %v14148_v53  ;;  %15373 = vst [vmem:[#allocation51_spill] sm:$0xff] %v14153_v39  ;;  %v14171_v39 = vpop.f32.mrf.mxu1 }
 0x724   : > { %v6986_v57 = vpop.f32.mrf.mxu0 }
 0x725   : > { %v14159_v12 = vadd.f32 %v6986_v57, %v14028_v46 }
 0x726   : > { %v6988_v58 = vpop.f32.mrf.mxu0 }
 0x727   : > { %15374 = vst [vmem:[#allocation52_spill] sm:$0xff] %v14159_v12  ;;  %v14162_v0 = vadd.f32 %v6988_v58, %v14030_v52  ;;  %v14179_v52 = vpop.f32.mrf.mxu1 }
 0x728   : > { %v6990_v4 = vpop.f32.mrf.mxu0 }
 0x729   : > { %15375 = vst [vmem:[#allocation53_spill] sm:$0xff] %v14162_v0  ;;  %v14167_v53 = vadd.f32 %v6990_v4, %v14032_v26  ;;  %v7543_v4 = vld [vmem:[%s14780_s8] sm:$0x3] }
 0x72a   : > { %v14169_v10 = vpop.f32.mrf.mxu0 }
 0x72b   : > { %15376 = vst [vmem:[#allocation54_spill] sm:$0xff] %v14167_v53  ;;  %15377 = vst [vmem:[#allocation55_spill] sm:$0xff] %v14169_v10  ;;  %v14189_v53 = vpop.f32.mrf.mxu1 }
 0x72c   : > { %v6996_v3 = vpop.f32.mrf.mxu0 }
 0x72d   : > { %v14174_v9 = vadd.f32 %v6996_v3, %v14038_v54 }
 0x72e   : > { %v6998_v46 = vpop.f32.mrf.mxu0 }
 0x72f   : > { %15378 = vst [vmem:[#allocation56_spill] sm:$0xff] %v14174_v9  ;;  %v14177_v57 = vadd.f32 %v6998_v46, %v14040_v41  ;;  %v15382_v9 = vld [vmem:[#allocation61_spill] sm:$0xff] }
 0x730   : > { %v7000_v58 = vpop.f32.mrf.mxu0  ;;  %v15383_v41 = vsub.s32 0, %v15382_v9 }
 0x731   : > { %15379 = vst [vmem:[#allocation57_spill] sm:$0xff] %v14177_v57  ;;  %v14182_v0 = vadd.f32 %v7000_v58, %v14042_v18  ;;  %v15384_v18 = vsub.s32 1, %v15382_v9 }
 0x732   : > { %v14184_v26 = vpop.f32.mrf.mxu0  ;;  %v14194_v46 = vrot.slane %v7543_v4, %v15383_v41 }
 0x733   : > { %15380 = vst [vmem:[#allocation58_spill] sm:$0xff] %v14182_v0  ;;  %15381 = vst [vmem:[#allocation59_spill] sm:$0xff] %v14184_v26  ;;  %v14199_v58 = vrot.slane %v7543_v4, %v15384_v18  ;;  %v14201_v0 = vpop.f32.mrf.mxu1 }
 0x734   : > { %v7404_v54 = vpop.f32.mrf.mxu0 }
 0x735   : > { %v7503_v3 = vadd.f32 %v7404_v54, %v14048_v24  ;;  %v14208_v35 = vpop.f32.mrf.mxu1 }
 0x736   : > { %v7406_v57 = vpop.f32.mrf.mxu0 }
 0x737   : > { %v7504_v10 = vadd.f32 %v7406_v57, %v14053_v23  ;;  %v7555_v12 = vadd.f32 %v14194_v46, %v7503_v3 }
 0x738   : > { %v7408_v26 = vpop.f32.mrf.mxu0 }
 0x739   : > { %v7505_v50 = vadd.f32 %v7408_v26, %v14055_v7  ;;  %v7556_v24 = vadd.f32 %v14199_v58, %v7504_v10  ;;  %v7595_v9 = vmax.f32 %v7555_v12, 0.0  ;;  %v14215_v26 = vpop.f32.mrf.mxu1 }
 0x73a   : > { %v7410_v45 = vpop.f32.mrf.mxu0 }
 0x73b   : > { %v7557_v54 = vadd.f32 %v14194_v46, %v7505_v50  ;;  %v7506_v41 = vadd.f32 %v7410_v45, %v14058_v1  ;;  %v7596_v3 = vmax.f32 %v7556_v24, 0.0 }
 0x73c   : > { %v7414_v23 = vpop.f32.mrf.mxu0 }
 0x73d   : > { %v7597_v57 = vmax.f32 %v7557_v54, 0.0  ;;  %v7558_v4 = vadd.f32 %v14199_v58, %v7506_v41  ;;  %v7507_v18 = vadd.f32 %v7414_v23, %v14061_v21  ;;  %v6724_v54 = vadd.f32 %v13955_v15, %v13966_v47 }
 0x73e   : > { %v7416_v38 = vpop.f32.mrf.mxu0 }
 0x73f   : > { %v14212_v28 = vpack.c.bf16 %v7597_v57, %v7595_v9  ;;  %v7598_v7 = vmax.f32 %v7558_v4, 0.0  ;;  %v7508_v10 = vadd.f32 %v7416_v38, %v14066_v60  ;;  %v7559_v1 = vadd.f32 %v14194_v46, %v7507_v18  ;;  %v14227_v38 = vpop.f32.mrf.mxu1 }
 0x740   : > { %v7418_v50 = vpop.f32.mrf.mxu0  ;;  %v7016_v60 = vadd.f32 %v14081_v55, %v6724_v54 }
 0x741   : > { %v7509_v45 = vadd.f32 %v7418_v50, %v14068_v59  ;;  %v14219_v12 = vpack.c.bf16 %v7598_v7, %v7596_v3  ;;  %v7560_v24 = vadd.f32 %v14199_v58, %v7508_v10  ;;  %v7263_v59 = vadd.f32 %v14100_v48, %v14074_v8  ;;  %v14237_v50 = vpop.f32.mrf.mxu1 }
 0x742   : > { %v7420_v21 = vpop.f32.mrf.mxu0  ;;  %v7599_v57 = vmax.f32 %v7559_v1, 0.0  ;;  %v7264_v3 = vadd.f32 %v14107_v62, %v14079_v25  ;;  %v7265_v1 = vadd.f32 %v14115_v20, %v7016_v60  ;;  %v7267_v20 = vadd.f32 %v14130_v31, %v14087_v11 }
 0x743   : > { %v7561_v41 = vadd.f32 %v14194_v46, %v7509_v45  ;;  %v7510_v23 = vadd.f32 %v7420_v21, %v14071_v30  ;;  %v7600_v7 = vmax.f32 %v7560_v24, 0.0 }
 0x744   : > { %v7424_v9 = vpop.f32.mrf.mxu0 }
 0x745   : > { %v7601_v4 = vmax.f32 %v7561_v41, 0.0  ;;  %v7562_v18 = vadd.f32 %v14199_v58, %v7510_v23  ;;  %v7511_v15 = vadd.f32 %v7424_v9, %v14076_v17  ;;  %v6734_v17 = vadd.f32 %v13968_v49, %v13979_v16  ;;  %v14250_v9 = vpop.f32.mrf.mxu1 }
 0x746   : > { %v7426_v47 = vpop.f32.mrf.mxu0  ;;  %v7266_v41 = vadd.f32 %v14122_v13, %v14084_v33 }
 0x747   : > { %v14235_v30 = vpack.c.bf16 %v7601_v4, %v7599_v57  ;;  %v7602_v55 = vmax.f32 %v7562_v18, 0.0  ;;  %v7512_v10 = vadd.f32 %v7426_v47, %v7263_v59  ;;  %v7563_v8 = vadd.f32 %v14194_v46, %v7511_v15  ;;  %v14259_v13 = vpop.f32.mrf.mxu1 }
 0x748   : > { %v7428_v45 = vpop.f32.mrf.mxu0  ;;  %v7020_v23 = vadd.f32 %v14092_v37, %v6734_v17  ;;  %v7268_v18 = vadd.f32 %v14137_v51, %v14090_v29 }
 0x749   : > { %v7513_v48 = vadd.f32 %v7428_v45, %v7264_v3  ;;  %v14241_v54 = vpack.c.bf16 %v7602_v55, %v7600_v7  ;;  %v7564_v25 = vadd.f32 %v14199_v58, %v7512_v10  ;;  %v7603_v60 = vmax.f32 %v7563_v8, 0.0  ;;  %v14272_v17 = vpop.f32.mrf.mxu1 }
 0x74a   : > { %v7430_v21 = vpop.f32.mrf.mxu0  ;;  %v7269_v31 = vadd.f32 %v14145_v14, %v7020_v23  ;;  %v6744_v10 = vadd.f32 %v13981_v2, %v13992_v40  ;;  %v7271_v14 = vadd.f32 %v14164_v43, %v14098_v56 }
 0x74b   : > { %v7565_v62 = vadd.f32 %v14194_v46, %v7513_v48  ;;  %v7514_v24 = vadd.f32 %v7430_v21, %v7265_v1  ;;  %v7604_v15 = vmax.f32 %v7564_v25, 0.0  ;;  %v7270_v48 = vadd.f32 %v14156_v32, %v14095_v63  ;;  %v14281_v32 = vpop.f32.mrf.mxu1 }
 0x74c   : > { %v7434_v59 = vpop.f32.mrf.mxu0  ;;  %v7024_v1 = vadd.f32 %v14105_v36, %v6744_v10 }
 0x74d   : > { %v7605_v57 = vmax.f32 %v7565_v62, 0.0  ;;  %v7566_v49 = vadd.f32 %v14199_v58, %v7514_v24  ;;  %v7515_v16 = vadd.f32 %v7434_v59, %v7266_v41  ;;  %v7272_v41 = vadd.f32 %v14171_v39, %v14103_v34 }
 0x74e   : > { %v7436_v4 = vpop.f32.mrf.mxu0  ;;  %v7273_v43 = vadd.f32 %v14179_v52, %v7024_v1  ;;  %v7275_v52 = vadd.f32 %v14201_v0, %v14113_v27 }
 0x74f   : > { %v14257_v47 = vpack.c.bf16 %v7605_v57, %v7603_v60  ;;  %v7606_v33 = vmax.f32 %v7566_v49, 0.0  ;;  %v7516_v37 = vadd.f32 %v7436_v4, %v7267_v20  ;;  %v7567_v7 = vadd.f32 %v14194_v46, %v7515_v16 }
 0x750   : > { %v7438_v3 = vpop.f32.mrf.mxu0  ;;  %v6754_v49 = vadd.f32 %v13994_v19, %v14004_v42 }
 0x751   : > { %v7517_v11 = vadd.f32 %v7438_v3, %v7268_v18  ;;  %v14263_v55 = vpack.c.bf16 %v7606_v33, %v7604_v15  ;;  %v7568_v29 = vadd.f32 %v14199_v58, %v7516_v37  ;;  %v7607_v25 = vmax.f32 %v7567_v7, 0.0  ;;  %v7229_v33 = vpop.f32.mrf.mxu1 }
 0x752   : > { %v7440_v45 = vpop.f32.mrf.mxu0  ;;  %v7274_v18 = vadd.f32 %v14189_v53, %v14110_v61  ;;  %v7028_v15 = vadd.f32 %v14120_v6, %v6754_v49 }
 0x753   : > { %v7569_v51 = vadd.f32 %v14194_v46, %v7517_v11  ;;  %v7518_v8 = vadd.f32 %v7440_v45, %v7269_v31  ;;  %v7608_v23 = vmax.f32 %v7568_v29, 0.0  ;;  %v7276_v31 = vadd.f32 %v14208_v35, %v14118_v5  ;;  %v7231_v6 = vpop.f32.mrf.mxu1 }
 0x754   : > { %v7444_v21 = vpop.f32.mrf.mxu0  ;;  %v7277_v27 = vadd.f32 %v14215_v26, %v7028_v15  ;;  %v15389_v15 = vld [vmem:[#allocation39_spill] sm:$0xff] }
 0x755   : > { %v7609_v62 = vmax.f32 %v7569_v51, 0.0  ;;  %v7570_v2 = vadd.f32 %v14199_v58, %v7518_v8  ;;  %v7519_v40 = vadd.f32 %v7444_v21, %v7270_v48  ;;  %v6764_v48 = vadd.f32 %v14006_v22, %v14014_v44 }
 0x756   : > { %v7446_v24 = vpop.f32.mrf.mxu0 }
 0x757   : > { %v14279_v59 = vpack.c.bf16 %v7609_v62, %v7607_v25  ;;  %v7610_v63 = vmax.f32 %v7570_v2, 0.0  ;;  %v7520_v36 = vadd.f32 %v7446_v24, %v7271_v14  ;;  %v7571_v60 = vadd.f32 %v14194_v46, %v7519_v40  ;;  %v15385_v14 = vld [vmem:[#allocation44_spill] sm:$0xff]  ;;  %v15386_v62 = vld [vmem:[#allocation47_spill] sm:$0xff]  ;;  %v7235_v40 = vpop.f32.mrf.mxu1 }
 0x758   : > { %v7448_v20 = vpop.f32.mrf.mxu0  ;;  %v7278_v25 = vadd.f32 %v14227_v38, %v15385_v14  ;;  %v7032_v2 = vadd.f32 %v15386_v62, %v6764_v48 }
 0x759   : > { %v7521_v56 = vadd.f32 %v7448_v20, %v7272_v41  ;;  %v14285_v57 = vpack.c.bf16 %v7610_v63, %v7608_v23  ;;  %v7572_v34 = vadd.f32 %v14199_v58, %v7520_v36  ;;  %v7611_v3 = vmax.f32 %v7571_v60, 0.0  ;;  %v15387_v41 = vld [vmem:[#allocation45_spill] sm:$0xff]  ;;  %v15388_v20 = vld [vmem:[#allocation46_spill] sm:$0xff] }
 0x75a   : > { %v7450_v16 = vpop.f32.mrf.mxu0  ;;  %v7279_v26 = vadd.f32 %v14237_v50, %v15387_v41  ;;  %v7280_v60 = vadd.f32 %v14250_v9, %v15388_v20  ;;  %v7281_v50 = vadd.f32 %v14259_v13, %v7032_v2 }
 0x75b   : > { %v7573_v39 = vadd.f32 %v14194_v46, %v7521_v56  ;;  %v7522_v4 = vadd.f32 %v7450_v16, %v7273_v43  ;;  %v7612_v10 = vmax.f32 %v7572_v34, 0.0  ;;  %v7237_v16 = vpop.f32.mrf.mxu1 }
 0x75c   : > { %v7454_v37 = vpop.f32.mrf.mxu0 }
 0x75d   : > { %v7613_v7 = vmax.f32 %v7573_v39, 0.0  ;;  %v7574_v19 = vadd.f32 %v14199_v58, %v7522_v4  ;;  %v7523_v42 = vadd.f32 %v7454_v37, %v7274_v18  ;;  %v15390_v37 = vld [vmem:[#allocation38_spill] sm:$0xff] }
 0x75e   : > { %v7456_v11 = vpop.f32.mrf.mxu0 }
 0x75f   : > { %v14299_v45 = vpack.c.bf16 %v7613_v7, %v7611_v3  ;;  %v7614_v61 = vmax.f32 %v7574_v19, 0.0  ;;  %v7524_v53 = vadd.f32 %v7456_v11, %v7275_v52  ;;  %v7575_v51 = vadd.f32 %v14194_v46, %v7523_v42  ;;  %v15391_v42 = vld [vmem:[#allocation48_spill] sm:$0xff] }
 0x760   : > { %v7458_v29 = vpop.f32.mrf.mxu0  ;;  %v6774_v52 = vadd.f32 %v15390_v37, %v15389_v15  ;;  %v7282_v11 = vadd.f32 %v14272_v17, %v15391_v42 }
 0x761   : > { %v7525_v8 = vadd.f32 %v7458_v29, %v7276_v31  ;;  %v14303_v0 = vpack.c.bf16 %v7614_v61, %v7612_v10  ;;  %v7576_v5 = vadd.f32 %v14199_v58, %v7524_v53  ;;  %v7615_v23 = vmax.f32 %v7575_v51, 0.0  ;;  %v7239_v31 = vpop.f32.mrf.mxu1  ;;  %v15392_v10 = vld [vmem:[#allocation51_spill] sm:$0xff]  ;;  %v15393_v29 = vld [vmem:[#allocation49_spill] sm:$0xff] }
 0x762   : > { %v7460_v1 = vpop.f32.mrf.mxu0  ;;  %v7036_v61 = vadd.f32 %v15392_v10, %v6774_v52  ;;  %v7283_v13 = vadd.f32 %v14281_v32, %v15393_v29 }
 0x763   : > { %v7577_v35 = vadd.f32 %v14194_v46, %v7525_v8  ;;  %v7526_v21 = vadd.f32 %v7460_v1, %v7277_v27  ;;  %v7616_v56 = vmax.f32 %v7576_v5, 0.0  ;;  %v15394_v5 = vld [vmem:[#allocation50_spill] sm:$0xff]  ;;  %v7241_v62 = vpop.f32.mrf.mxu1 }
 0x764   : > { %v7464_v24 = vpop.f32.mrf.mxu0 }
 0x765   : > { %v7617_v63 = vmax.f32 %v7577_v35, 0.0  ;;  %v7578_v22 = vadd.f32 %v14199_v58, %v7526_v21  ;;  %v7527_v44 = vadd.f32 %v7464_v24, %v7278_v25  ;;  %v7284_v35 = vadd.f32 %v7229_v33, %v15394_v5 }
 0x766   : > { %v7466_v36 = vpop.f32.mrf.mxu0 }
 0x767   : > { %v14317_v43 = vpack.c.bf16 %v7617_v63, %v7615_v23  ;;  %v7618_v38 = vmax.f32 %v7578_v22, 0.0  ;;  %v7528_v49 = vadd.f32 %v7466_v36, %v7279_v26  ;;  %v7579_v39 = vadd.f32 %v14194_v46, %v7527_v44  ;;  %v15395_v23 = vld [vmem:[#allocation41_spill] sm:$0xff]  ;;  %v15396_v63 = vld [vmem:[#allocation40_spill] sm:$0xff] }
 0x768   : > { %v7468_v34 = vpop.f32.mrf.mxu0  ;;  %v7285_v26 = vadd.f32 %v7231_v6, %v7036_v61  ;;  %v6784_v22 = vadd.f32 %v15396_v63, %v15395_v23 }
 0x769   : > { %v7529_v4 = vadd.f32 %v7468_v34, %v7280_v60  ;;  %v14321_v18 = vpack.c.bf16 %v7618_v38, %v7616_v56  ;;  %v7580_v9 = vadd.f32 %v14199_v58, %v7528_v49  ;;  %v7619_v51 = vmax.f32 %v7579_v39, 0.0  ;;  %v15397_v60 = vld [vmem:[#allocation52_spill] sm:$0xff]  ;;  %v7245_v38 = vpop.f32.mrf.mxu1  ;;  %v15398_v49 = vld [vmem:[#allocation55_spill] sm:$0xff] }
 0x76a   : > { %v7470_v3 = vpop.f32.mrf.mxu0  ;;  %v7286_v56 = vadd.f32 %v7235_v40, %v15397_v60  ;;  %v7040_v34 = vadd.f32 %v15398_v49, %v6784_v22 }
 0x76b   : > { %v7581_v7 = vadd.f32 %v14194_v46, %v7529_v4  ;;  %v7530_v19 = vadd.f32 %v7470_v3, %v7281_v50  ;;  %v7620_v21 = vmax.f32 %v7580_v9, 0.0  ;;  %v15399_v4 = vld [vmem:[#allocation53_spill] sm:$0xff]  ;;  %v15400_v9 = vld [vmem:[#allocation54_spill] sm:$0xff]  ;;  %v7247_v40 = vpop.f32.mrf.mxu1 }
 0x76c   : > { %v7474_v53 = vpop.f32.mrf.mxu0  ;;  %v7287_v50 = vadd.f32 %v7237_v16, %v15399_v4 }
 0x76d   : > { %v7621_v8 = vmax.f32 %v7581_v7, 0.0  ;;  %v7582_v27 = vadd.f32 %v14199_v58, %v7530_v19  ;;  %v7531_v48 = vadd.f32 %v7474_v53, %v7282_v11  ;;  %v7288_v7 = vadd.f32 %v7239_v31, %v15400_v9 }
 0x76e   : > { %v7476_v1 = vpop.f32.mrf.mxu0 }
 0x76f   : > { %v14334_v14 = vpack.c.bf16 %v7621_v8, %v7619_v51  ;;  %v7622_v25 = vmax.f32 %v7582_v27, 0.0  ;;  %v7532_v17 = vadd.f32 %v7476_v1, %v7283_v13  ;;  %v7583_v24 = vadd.f32 %v14194_v46, %v7531_v48  ;;  %v15401_v51 = vld [vmem:[#allocation43_spill] sm:$0xff]  ;;  %v15402_v8 = vld [vmem:[#allocation42_spill] sm:$0xff] }
 0x770   : > { %v7478_v2 = vpop.f32.mrf.mxu0  ;;  %v7289_v13 = vadd.f32 %v7241_v62, %v7040_v34  ;;  %v6794_v27 = vadd.f32 %v15402_v8, %v15401_v51  ;;  %v15405_v62 = vld [vmem:[#allocation57_spill] sm:$0xff]  ;;  %v10605_v8 = vld [vmem:[%s14783_s11 + $0x30] sm:$0xff]  }
 0x771   : > { %v7533_v41 = vadd.f32 %v7478_v2, %v7284_v35  ;;  %v14337_v32 = vpack.c.bf16 %v7622_v25, %v7620_v21  ;;  %v7584_v36 = vadd.f32 %v14199_v58, %v7532_v17  ;;  %v7623_v6 = vmax.f32 %v7583_v24, 0.0  ;;  %v15403_v35 = vld [vmem:[#allocation56_spill] sm:$0xff]  ;;  %v7249_v25 = vpop.f32.mrf.mxu1  ;;  %v15404_v17 = vld [vmem:[#allocation59_spill] sm:$0xff]  ;;  %v10604_v51 = vld [vmem:[%s14784_s12 + $0x38] sm:$0xff]  }
 0x772   : > { %v7480_v44 = vpop.f32.mrf.mxu0  ;;  %v7290_v21 = vadd.f32 %v7245_v38, %v15403_v35  ;;  %v7044_v2 = vadd.f32 %v15404_v17, %v6794_v27  ;;  %v10606_v27 = vld [vmem:[%s14784_s12 + $0x30] sm:$0xff]   ;;  %v10611_v35 = vld [vmem:[%s14783_s11 + $0x18] sm:$0xff]  }
 0x773   : > { %v7585_v33 = vadd.f32 %v14194_v46, %v7533_v41  ;;  %v7534_v20 = vadd.f32 %v7480_v44, %v7285_v26  ;;  %v7624_v19 = vmax.f32 %v7584_v36, 0.0  ;;  %v7291_v41 = vadd.f32 %v7247_v40, %v15405_v62  ;;  %v15406_v36 = vld [vmem:[#allocation58_spill] sm:$0xff]  ;;  %v7251_v49 = vpop.f32.mrf.mxu1  ;;  %v10614_v17 = vld [vmem:[%s14784_s12 + $0x10] sm:$0xff]  }
 0x774   : > { %v7484_v39 = vpop.f32.mrf.mxu0  ;;  %v10617_v62 = vld [vmem:[%s14783_s11] sm:$0xff]  }
 0x775   : > { %v7625_v15 = vmax.f32 %v7585_v33, 0.0  ;;  %v7586_v37 = vadd.f32 %v14199_v58, %v7534_v20  ;;  %v7535_v52 = vadd.f32 %v7484_v39, %v7286_v56  ;;  %v7292_v33 = vadd.f32 %v7249_v25, %v15406_v36  ;;  %v10613_v25 = vld [vmem:[%s14783_s11 + $0x10] sm:$0xff]  }
 0x776   : > { %v7486_v3 = vpop.f32.mrf.mxu0 }
 0x777   : > { %v14348_v42 = vpack.c.bf16 %v7625_v15, %v7623_v6  ;;  %v7626_v11 = vmax.f32 %v7586_v37, 0.0  ;;  %v7536_v10 = vadd.f32 %v7486_v3, %v7287_v50  ;;  %v7587_v53 = vadd.f32 %v14194_v46, %v7535_v52 }
 0x778   : > { %v7488_v61 = vpop.f32.mrf.mxu0  ;;  %v7293_v50 = vadd.f32 %v7251_v49, %v7044_v2  ;;  %v10615_v2 = vld [vmem:[%s14783_s11 + $0x8] sm:$0xff]  }
 0x779   : > { %v7537_v29 = vadd.f32 %v7488_v61, %v7288_v7  ;;  %v7650_v16 = vpack.c.bf16 %v7626_v11, %v7624_v19  ;;  %v7588_v1 = vadd.f32 %v14199_v58, %v7536_v10  ;;  %v7627_v26 = vmax.f32 %v7587_v53, 0.0  ;;  %v10578_v53 = vld [vmem:[%s14781_s9 + $0x10] ss:$8 sps:$4 sm:$0xff]  }
 0x77a   : > { %v7490_v48 = vpop.f32.mrf.mxu0 }
 0x77b   : > { %v7589_v31 = vadd.f32 %v14194_v46, %v7537_v29  ;;  %v7538_v5 = vadd.f32 %v7490_v48, %v7289_v13  ;;  %7726 = vmatprep.subr.bf16.mxu1 %v7650_v16  ;;  %v7628_v20 = vmax.f32 %v7588_v1, 0.0  ;;  %v10579_v29 = vld [vmem:[%s14781_s9 + $0x24] ss:$8 sps:$4 sm:$0xff]   ;;  %v10602_v13 = vld [vmem:[%s14782_s10 + $0x40] ss:$8 sps:$4 sm:$0xff]  }
 0x77c   : > { %v7494_v24 = vpop.f32.mrf.mxu0  ;;  %7727 = vmatpush1.bf16.msra.mxu1 %v14348_v42  ;;  %v10607_v48 = vld [vmem:[%s14783_s11 + $0x28] sm:$0xff]  }
 0x77d   : > { %v7629_v23 = vmax.f32 %v7589_v31, 0.0  ;;  %v7590_v63 = vadd.f32 %v14199_v58, %v7538_v5  ;;  %v7539_v22 = vadd.f32 %v7494_v24, %v7290_v21  ;;  %7728 = vmatprep.subr.bf16.mxu1 %v14337_v32  ;;  %v10608_v1 = vld [vmem:[%s14784_s12 + $0x28] sm:$0xff]   ;;  %v10609_v31 = vld [vmem:[%s14783_s11 + $0x20] sm:$0xff]   ;;  %v10612_v21 = vld [vmem:[%s14784_s12 + $0x18] sm:$0xff]  }
 0x77e   : > { %v7496_v44 = vpop.f32.mrf.mxu0  ;;  %v10610_v5 = vld [vmem:[%s14784_s12 + $0x20] sm:$0xff]   ;;  %v10616_v24 = vld [vmem:[%s14784_s12 + $0x8] sm:$0xff]  }
 0x77f   : > { %v14362_v60 = vpack.c.bf16 %v7629_v23, %v7627_v26  ;;  %v7630_v56 = vmax.f32 %v7590_v63, 0.0  ;;  %v7540_v38 = vadd.f32 %v7496_v44, %v7291_v41  ;;  %v7591_v39 = vadd.f32 %v14194_v46, %v7539_v22  ;;  %v10618_v41 = vld [vmem:[%s14784_s12] sm:$0xff]   ;;  %v10619_v26 = vld [vmem:[%s14783_s11 + $0x48] sm:$0xff]  }
 0x780   : > { %v7498_v34 = vpop.f32.mrf.mxu0  ;;  %7729 = vmatpush1.bf16.msra.mxu1 %v14334_v14  ;;  %v10620_v23 = vld [vmem:[%s14784_s12 + $0x48] sm:$0xff]   ;;  %v10621_v63 = vld [vmem:[%s14783_s11 + $0x40] sm:$0xff]   ;;  %v10673_v44 = vmov 0.0  }
 0x781   : > { %v7541_v4 = vadd.f32 %v7498_v34, %v7292_v33  ;;  %7730 = vmatprep.subr.bf16.mxu1 %v14321_v18  ;;  %v14367_v6 = vpack.c.bf16 %v7630_v56, %v7628_v20  ;;  %v7592_v37 = vadd.f32 %v14199_v58, %v7540_v38  ;;  %v7631_v9 = vmax.f32 %v7591_v39, 0.0  ;;  %v10622_v22 = vld [vmem:[%s14784_s12 + $0x40] sm:$0xff]  }
 0x782   : > { %v7500_v15 = vpop.f32.mrf.mxu0 }
 0x783   : > { %v7593_v52 = vadd.f32 %v14194_v46, %v7541_v4  ;;  %v7542_v3 = vadd.f32 %v7500_v15, %v7293_v50  ;;  %v7632_v11 = vmax.f32 %v7592_v37, 0.0  ;;  %v10573_v46 = vld [vmem:[%s14781_s9] ss:$8 sps:$4 sm:$0xff]  }
 0x784   : > { %7731 = vmatpush1.bf16.msra.mxu1 %v14317_v43 }
 0x785   : > { %v7633_v7 = vmax.f32 %v7593_v52, 0.0  ;;  %v7594_v19 = vadd.f32 %v14199_v58, %v7542_v3  ;;  %7732 = vmatprep.subr.bf16.mxu1 %v14303_v0  ;;  %v10576_v58 = vld [vmem:[%s14781_s9 + $0x14] ss:$8 sps:$4 sm:$0xff]  }
 0x787   : > { %v7653_v10 = vpack.c.bf16 %v7633_v7, %v7631_v9  ;;  %v7634_v40 = vmax.f32 %v7594_v19, 0.0 }
 0x788   : > { %7733 = vmatpush1.bf16.msra.mxu1 %v14299_v45 }
 0x789   : > { %7734 = vmatprep.subr.bf16.mxu1 %v14285_v57  ;;  %v7654_v61 = vpack.c.bf16 %v7634_v40, %v7632_v11 }
 0x78c   : > { %7735 = vmatpush1.bf16.msra.mxu1 %v14279_v59 }
 0x78d   : > { %7736 = vmatprep.subr.bf16.mxu1 %v14263_v55 }
 0x790   : > { %7737 = vmatpush1.bf16.msra.mxu1 %v14257_v47 }
 0x791   : > { %7738 = vmatprep.subr.bf16.mxu1 %v14241_v54 }
 0x794   : > { %7739 = vmatpush1.bf16.msra.mxu1 %v14235_v30 }
 0x795   : > { %7740 = vmatprep.subr.bf16.mxu1 %v14219_v12 }
 0x798   : > { %7741 = vmatpush1.bf16.msra.mxu1 %v14212_v28 }
 0x799   : > { %7754 = vmatprep.subr.bf16.mxu1 %v7654_v61 }
 0x79c   : > { %7755 = vmatpush2.bf16.msra.mxu1 %v7653_v10 }
 0x79d   : > { %7756 = vmatprep.subr.bf16.mxu1 %v14367_v6 }
 0x7a0   : > { %7757 = vmatpush2.bf16.msra.mxu1 %v14362_v60 }
 0x7a1   : > { %7879 = vmatprep.subr.bf16.mxu1 %v7650_v16  ;;  %v10603_v16 = vld [vmem:[%s14783_s11 + $0x38] sm:$0xff]  }
 0x7a2   : > { %8088 = vmatpush1.bf16.msra.mxu0 %v10603_v16 }
 0x7a3   : > { %7759 = vmatmul.mubr.bf16.vlgmr.msra.gmra.mxu1 %v10573_v46 }
 0x7a4   : > { %7880 = vmatpush1.bf16.msra.mxu1 %v14348_v42  ;;  %9786 = vmatprep.mubr.msk.bf16.mxu1 %vm7710_vm6, %v10576_v58  ;;  %v10600_v42 = vld [vmem:[%s14782_s10 + $0x44] ss:$8 sps:$4 sm:$0xff]  }
 0x7a5   : > { %7881 = vmatprep.subr.bf16.mxu1 %v14337_v32  ;;  %v10581_v32 = vld [vmem:[%s14781_s9 + $0x20] ss:$8 sps:$4 sm:$0xff]  }
 0x7a8   : > { %7882 = vmatpush1.bf16.msra.mxu1 %v14334_v14  ;;  %v10582_v14 = vld [vmem:[%s14781_s9 + $0x34] ss:$8 sps:$4 sm:$0xff]  }
 0x7a9   : > { %7883 = vmatprep.subr.bf16.mxu1 %v14321_v18  ;;  %v10599_v18 = vld [vmem:[%s14782_s10 + $0x30] ss:$8 sps:$4 sm:$0xff]  }
 0x7ab   : > { %7769 = vmatmul.mubr.bf16.gmra.mxu1 %v10578_v53 }
 0x7ac   : > { %7884 = vmatpush1.bf16.msra.mxu1 %v14317_v43  ;;  %9787 = vmatprep.mubr.msk.bf16.mxu1 %vm7710_vm6, %v10579_v29  ;;  %v10597_v43 = vld [vmem:[%s14782_s10 + $0x34] ss:$8 sps:$4 sm:$0xff]  }
 0x7ad   : > { %7885 = vmatprep.subr.bf16.mxu1 %v14303_v0  ;;  %v10584_v0 = vld [vmem:[%s14781_s9 + $0x30] ss:$8 sps:$4 sm:$0xff]  }
 0x7b0   : > { %7886 = vmatpush1.bf16.msra.mxu1 %v14299_v45  ;;  %v10585_v45 = vld [vmem:[%s14781_s9 + $0x44] ss:$8 sps:$4 sm:$0xff]  }
 0x7b1   : > { %7887 = vmatprep.subr.bf16.mxu1 %v14285_v57  ;;  %v10596_v57 = vld [vmem:[%s14782_s10 + $0x20] ss:$8 sps:$4 sm:$0xff]  }
 0x7b3   : > { %7779 = vmatmul.mubr.bf16.gmra.mxu1 %v10581_v32 }
 0x7b4   : > { %7888 = vmatpush1.bf16.msra.mxu1 %v14279_v59  ;;  %9788 = vmatprep.mubr.msk.bf16.mxu1 %vm7710_vm6, %v10582_v14  ;;  %v10594_v59 = vld [vmem:[%s14782_s10 + $0x24] ss:$8 sps:$4 sm:$0xff]  }
 0x7b5   : > { %7889 = vmatprep.subr.bf16.mxu1 %v14263_v55  ;;  %v10587_v55 = vld [vmem:[%s14781_s9 + $0x40] ss:$8 sps:$4 sm:$0xff]  }
 0x7b8   : > { %7890 = vmatpush1.bf16.msra.mxu1 %v14257_v47  ;;  %v10590_v47 = vld [vmem:[%s14782_s10 + $0x4] ss:$8 sps:$4 sm:$0xff]  }
 0x7b9   : > { %7891 = vmatprep.subr.bf16.mxu1 %v14241_v54  ;;  %v10593_v54 = vld [vmem:[%s14782_s10 + $0x10] ss:$8 sps:$4 sm:$0xff]  }
 0x7bb   : > { %7789 = vmatmul.mubr.bf16.gmra.mxu1 %v10584_v0 }
 0x7bc   : > { %7892 = vmatpush1.bf16.msra.mxu1 %v14235_v30  ;;  %9789 = vmatprep.mubr.msk.bf16.mxu1 %vm7710_vm6, %v10585_v45  ;;  %v15407_v30 = vmov 0   ;;  %v10623_v45 = vld [vmem:[%s14785_s13 + $0x48] sm:$0xff]  }
 0x7bd   : > { %7893 = vmatprep.subr.bf16.mxu1 %v14219_v12  ;;  %v10588_v12 = vld [vmem:[%s14782_s10] ss:$8 sps:$4 sm:$0xff]   ;;  %8089 = vmatprep.subr.bf16.mxu0 %v15407_v30 }
 0x7be   : > { %8090 = vmatpush1.bf16.msra.mxu0 %v10605_v8 }
 0x7bf   : > { %8091 = vmatprep.subr.bf16.mxu0 %v15407_v30 }
 0x7c0   : > { %7894 = vmatpush1.bf16.msra.mxu1 %v14212_v28  ;;  %v10591_v28 = vld [vmem:[%s14782_s10 + $0x14] ss:$8 sps:$4 sm:$0xff]  }
 0x7c1   : > { %7907 = vmatprep.subr.bf16.mxu1 %v7654_v61 }
 0x7c2   : > { %8092 = vmatpush1.bf16.msra.mxu0 %v10607_v48 }
 0x7c3   : > { %7799 = vmatmul.mubr.bf16.gmra.mxu1 %v10587_v55  ;;  %8093 = vmatprep.subr.bf16.mxu0 %v15407_v30 }
 0x7c4   : > { %7908 = vmatpush2.bf16.msra.mxu1 %v7653_v10  ;;  %9800 = vmatprep.mubr.msk.bf16.mxu1 %vm7710_vm6, %v10590_v47 }
 0x7c5   : > { %7909 = vmatprep.subr.bf16.mxu1 %v14367_v6 }
 0x7c6   : > { %8094 = vmatpush1.bf16.msra.mxu0 %v10609_v31 }
 0x7c7   : > { %8095 = vmatprep.subr.bf16.mxu0 %v15407_v30 }
 0x7c8   : > { %7910 = vmatpush2.bf16.msra.mxu1 %v14362_v60 }
 0x7c9   : > { %8240 = vmatprep.subr.bf16.mxu1 %v15407_v30 }
 0x7ca   : > { %8096 = vmatpush1.bf16.msra.mxu0 %v10611_v35 }
 0x7cb   : > { %7912 = vmatmul.mubr.bf16.vlgmr.msra.gmra.mxu1 %v10588_v12  ;;  %8097 = vmatprep.subr.bf16.mxu0 %v15407_v30 }
 0x7cc   : > { %9801 = vmatprep.mubr.msk.bf16.mxu1 %vm7710_vm6, %v10591_v28  ;;  %8241 = vmatpush1.bf16.msra.mxu1 %v10604_v51 }
 0x7cd   : > { %8242 = vmatprep.subr.bf16.mxu1 %v15407_v30 }
 0x7ce   : > { %8098 = vmatpush1.bf16.msra.mxu0 %v10613_v25 }
 0x7cf   : > { %8099 = vmatprep.subr.bf16.mxu0 %v15407_v30 }
 0x7d0   : > { %8243 = vmatpush1.bf16.msra.mxu1 %v10606_v27 }
 0x7d1   : > { %8244 = vmatprep.subr.bf16.mxu1 %v15407_v30 }
 0x7d2   : > { %8100 = vmatpush1.bf16.msra.mxu0 %v10615_v2 }
 0x7d3   : > { %7922 = vmatmul.mubr.bf16.gmra.mxu1 %v10593_v54  ;;  %8101 = vmatprep.subr.bf16.mxu0 %v15407_v30 }
 0x7d4   : > { %9802 = vmatprep.mubr.msk.bf16.mxu1 %vm7710_vm6, %v10594_v59  ;;  %8245 = vmatpush1.bf16.msra.mxu1 %v10608_v1 }
 0x7d5   : > { %8246 = vmatprep.subr.bf16.mxu1 %v15407_v30 }
 0x7d6   : > { %8102 = vmatpush1.bf16.msra.mxu0 %v10617_v62 }
 0x7d7   : > { %8115 = vmatprep.subr.bf16.mxu0 %v15407_v30 }
 0x7d8   : > { %8247 = vmatpush1.bf16.msra.mxu1 %v10610_v5 }
 0x7d9   : > { %8248 = vmatprep.subr.bf16.mxu1 %v15407_v30 }
 0x7da   : > { %8116 = vmatpush2.bf16.msra.mxu0 %v10619_v26 }
 0x7db   : > { %7932 = vmatmul.mubr.bf16.gmra.mxu1 %v10596_v57  ;;  %8117 = vmatprep.subr.bf16.mxu0 %v15407_v30 }
 0x7dc   : > { %9803 = vmatprep.mubr.msk.bf16.mxu1 %vm7710_vm6, %v10597_v43  ;;  %8249 = vmatpush1.bf16.msra.mxu1 %v10612_v21 }
 0x7dd   : > { %8250 = vmatprep.subr.bf16.mxu1 %v15407_v30 }
 0x7de   : > { %8118 = vmatpush2.bf16.msra.mxu0 %v10621_v63 }
 0x7df   : > { %9974 = vmatprep.subr.bf16.mxu0 %v10673_v44 }
 0x7e0   : > { %8251 = vmatpush1.bf16.msra.mxu1 %v10614_v17 }
 0x7e1   : > { %8252 = vmatprep.subr.bf16.mxu1 %v15407_v30 }
 0x7e3   : > { %7942 = vmatmul.mubr.bf16.gmra.mxu1 %v10599_v18 }
 0x7e4   : > { %9804 = vmatprep.mubr.msk.bf16.mxu1 %vm7710_vm6, %v10600_v42  ;;  %8253 = vmatpush1.bf16.msra.mxu1 %v10616_v24 }
 0x7e5   : > { %8254 = vmatprep.subr.bf16.mxu1 %v15407_v30 }
 0x7e8   : > { %8255 = vmatpush1.bf16.msra.mxu1 %v10618_v41 }
 0x7e9   : > { %8268 = vmatprep.subr.bf16.mxu1 %v15407_v30 }
 0x7eb   : > { %7952 = vmatmul.mubr.bf16.gmra.mxu1 %v10602_v13 }
 0x7ec   : > { %8269 = vmatpush2.bf16.msra.mxu1 %v10620_v23 }
 0x7ed   : > { %8270 = vmatprep.subr.bf16.mxu1 %v15407_v30 }
 0x7f0   : > { %8271 = vmatpush2.bf16.msra.mxu1 %v10622_v22 }
 0x7f1   : > { %9988 = vmatprep.subr.bf16.mxu1 %v10673_v44 }
 0x863   : > { %v7760_v36 = vpop.f32.mrf.mxu1 }
 0x865   : > { %v7762_v33 = vpop.f32.mrf.mxu1 }
 0x867   : > { %v7764_v20 = vpop.f32.mrf.mxu1 }
 0x869   : > { %v7766_v60 = vpop.f32.mrf.mxu1 }
 0x86b   : > { %v7770_v56 = vpop.f32.mrf.mxu1 }
 0x86d   : > { %v7772_v38 = vpop.f32.mrf.mxu1 }
 0x86f   : > { %v7774_v49 = vpop.f32.mrf.mxu1 }
 0x871   : > { %v7776_v34 = vpop.f32.mrf.mxu1 }
 0x873   : > { %v7780_v39 = vpop.f32.mrf.mxu1 }
 0x875   : > { %v7782_v4 = vpop.f32.mrf.mxu1 }
 0x877   : > { %v7784_v50 = vpop.f32.mrf.mxu1 }
 0x879   : > { %v7786_v6 = vpop.f32.mrf.mxu1 }
 0x87b   : > { %v14549_v15 = vpop.f32.mrf.mxu1 }
 0x87d   : > { %v7792_v37 = vpop.f32.mrf.mxu1 }
 0x87f   : > { %v7794_v52 = vpop.f32.mrf.mxu1 }
 0x881   : > { %v7796_v3 = vpop.f32.mrf.mxu1 }
 0x883   : > { %v14551_v9 = vpop.f32.mrf.mxu1 }
 0x885   : > { %v14553_v7 = vpop.f32.mrf.mxu1 }
 0x887   : > { %v14555_v19 = vpop.f32.mrf.mxu1 }
 0x889   : > { %v14557_v11 = vpop.f32.mrf.mxu1 }
 0x88b   : > { %v7913_v10 = vpop.f32.mrf.mxu1 }
 0x88c   : > { %v7962_v32 = vmax.f32 %v7760_v36, %v7913_v10 }
 0x88d   : > { %v7915_v40 = vpop.f32.mrf.mxu1 }
 0x88e   : > { %v7963_v53 = vmax.f32 %v7762_v33, %v7915_v40 }
 0x88f   : > { %v7917_v61 = vpop.f32.mrf.mxu1 }
 0x890   : > { %v7964_v46 = vmax.f32 %v7764_v20, %v7917_v61 }
 0x891   : > { %v7919_v58 = vpop.f32.mrf.mxu1 }
 0x892   : > { %v7965_v29 = vmax.f32 %v7766_v60, %v7919_v58  ;;  %v7982_v55 = vpack.c.bf16 %v7964_v46, %v7962_v32  ;;  %v10638_v32 = vld [vmem:[%s14785_s13 + $0x98] sm:$0xff]  }
 0x893   : > { %v7923_v14 = vpop.f32.mrf.mxu1 }
 0x894   : > { %v7983_v0 = vpack.c.bf16 %v7965_v29, %v7963_v53  ;;  %v7966_v57 = vmax.f32 %v7770_v56, %v7923_v14 }
 0x895   : > { %v7925_v47 = vpop.f32.mrf.mxu1 }
 0x896   : > { %9815 = vmatprep.mubr.msk.bf16.mxu0 %vm7710_vm6, %v7983_v0  ;;  %9830 = vmatprep.mubr.msk.bf16.mxu1 %vm7710_vm6, %v7983_v0  ;;  %v7967_v54 = vmax.f32 %v7772_v38, %v7925_v47 }
 0x897   : > { %v7927_v12 = vpop.f32.mrf.mxu1  ;;  %8120 = vmatmul.mubr.bf16.vlgmr.msra.gmra.mxu0 %v7982_v55  ;;  %8273 = vmatmul.mubr.bf16.vlgmr.msra.gmra.mxu1 %v7982_v55 }
 0x898   : > { %9975 = vmatpush3.bf16.msra.mxu0 %v10623_v45  ;;  %v7968_v28 = vmax.f32 %v7774_v49, %v7927_v12  ;;  %v10640_v12 = vld [vmem:[%s14785_s13 + $0x90] sm:$0xff]  }
 0x899   : > { %v7929_v30 = vpop.f32.mrf.mxu1  ;;  %9976 = vmatprep.subr.bf16.mxu0 %v10673_v44 }
 0x89a   : > { %v7969_v59 = vmax.f32 %v7776_v34, %v7929_v30  ;;  %v7984_v42 = vpack.c.bf16 %v7968_v28, %v7966_v57  ;;  %v10629_v57 = vld [vmem:[%s14785_s13 + $0x70] sm:$0xff]  }
 0x89b   : > { %v7933_v43 = vpop.f32.mrf.mxu1 }
 0x89c   : > { %v7985_v18 = vpack.c.bf16 %v7969_v59, %v7967_v54  ;;  %v7970_v1 = vmax.f32 %v7780_v39, %v7933_v43  ;;  %v10628_v39 = vld [vmem:[%s14785_s13 + $0x20] sm:$0xff]  }
 0x89d   : > { %v7935_v13 = vpop.f32.mrf.mxu1  ;;  %9989 = vmatpush3.bf16.msra.mxu1 %v10628_v39 }
 0x89e   : > { %9816 = vmatprep.mubr.msk.bf16.mxu0 %vm7710_vm6, %v7985_v18  ;;  %9831 = vmatprep.mubr.msk.bf16.mxu1 %vm7710_vm6, %v7985_v18  ;;  %v7971_v27 = vmax.f32 %v7782_v4, %v7935_v13  ;;  %v10630_v4 = vld [vmem:[%s14785_s13 + $0x18] sm:$0xff]   ;;  %v10642_v13 = vld [vmem:[%s14785_s13 + $0x88] sm:$0xff]  }
 0x89f   : > { %8128 = vmatmul.mubr.bf16.gmra.mxu0 %v7984_v42  ;;  %8281 = vmatmul.mubr.bf16.gmra.mxu1 %v7984_v42  ;;  %v7937_v16 = vpop.f32.mrf.mxu1 }
 0x8a0   : > { %v7972_v51 = vmax.f32 %v7784_v50, %v7937_v16  ;;  %9990 = vmatprep.subr.bf16.mxu1 %v10673_v44  ;;  %v10632_v50 = vld [vmem:[%s14785_s13 + $0x10] sm:$0xff]  }
 0x8a1   : > { %v7939_v8 = vpop.f32.mrf.mxu1  ;;  %9991 = vmatpush3.bf16.msra.mxu1 %v10630_v4 }
 0x8a2   : > { %v7973_v48 = vmax.f32 %v7786_v6, %v7939_v8  ;;  %v7986_v35 = vpack.c.bf16 %v7972_v51, %v7970_v1  ;;  %9992 = vmatprep.subr.bf16.mxu1 %v10673_v44  ;;  %v10624_v6 = vld [vmem:[%s14785_s13 + $0x40] sm:$0xff]   ;;  %v10631_v8 = vld [vmem:[%s14785_s13 + $0x68] sm:$0xff]  }
 0x8a3   : > { %v7943_v31 = vpop.f32.mrf.mxu1  ;;  %9977 = vmatpush3.bf16.msra.mxu0 %v10624_v6  ;;  %v10644_v1 = vld [vmem:[%s14785_s13 + $0x80] sm:$0xff]  }
 0x8a4   : > { %v7987_v5 = vpack.c.bf16 %v7973_v48, %v7971_v27  ;;  %v7974_v41 = vmax.f32 %v14549_v15, %v7943_v31  ;;  %v10634_v15 = vld [vmem:[%s14785_s13 + $0x8] sm:$0xff]   ;;  %9978 = vmatprep.subr.bf16.mxu0 %v10673_v44 }
 0x8a5   : > { %v7945_v21 = vpop.f32.mrf.mxu1  ;;  %9993 = vmatpush3.bf16.msra.mxu1 %v10632_v50  ;;  %v10639_v50 = vld [vmem:[%s14785_s13 + $0xc0] sm:$0xff]  }
 0x8a6   : > { %9817 = vmatprep.mubr.msk.bf16.mxu0 %vm7710_vm6, %v7987_v5  ;;  %9832 = vmatprep.mubr.msk.bf16.mxu1 %vm7710_vm6, %v7987_v5  ;;  %v7975_v24 = vmax.f32 %v7792_v37, %v7945_v21  ;;  %v10625_v37 = vld [vmem:[%s14785_s13 + $0x38] sm:$0xff]  }
 0x8a7   : > { %8136 = vmatmul.mubr.bf16.gmra.mxu0 %v7986_v35  ;;  %8289 = vmatmul.mubr.bf16.gmra.mxu1 %v7986_v35  ;;  %v7947_v25 = vpop.f32.mrf.mxu1  ;;  %v10633_v35 = vld [vmem:[%s14785_s13 + $0x60] sm:$0xff]  }
 0x8a8   : > { %v7976_v17 = vmax.f32 %v7794_v52, %v7947_v25  ;;  %9994 = vmatprep.subr.bf16.mxu1 %v10673_v44  ;;  %v10636_v52 = vld [vmem:[%s14785_s13] sm:$0xff]   ;;  %9979 = vmatpush3.bf16.msra.mxu0 %v10625_v37 }
 0x8a9   : > { %v7949_v2 = vpop.f32.mrf.mxu1  ;;  %9995 = vmatpush3.bf16.msra.mxu1 %v10634_v15  ;;  %9980 = vmatprep.subr.bf16.mxu0 %v10673_v44 }
 0x8aa   : > { %v7977_v62 = vmax.f32 %v7796_v3, %v7949_v2  ;;  %v7988_v63 = vpack.c.bf16 %v7976_v17, %v7974_v41  ;;  %9996 = vmatprep.subr.bf16.mxu1 %v10673_v44  ;;  %v10626_v3 = vld [vmem:[%s14785_s13 + $0x30] sm:$0xff]   ;;  %v10646_v17 = vld [vmem:[%s14785_s13 + $0x78] sm:$0xff]  }
 0x8ab   : > { %v7953_v26 = vpop.f32.mrf.mxu1 }
 0x8ac   : > { %v7989_v23 = vpack.c.bf16 %v7977_v62, %v7975_v24  ;;  %v7978_v38 = vmax.f32 %v14551_v9, %v7953_v26  ;;  %9981 = vmatpush3.bf16.msra.mxu0 %v10626_v3  ;;  %v10627_v9 = vld [vmem:[%s14785_s13 + $0x28] sm:$0xff]   ;;  %v10635_v62 = vld [vmem:[%s14785_s13 + $0x58] sm:$0xff]  }
 0x8ad   : > { %v7955_v22 = vpop.f32.mrf.mxu1  ;;  %9997 = vmatpush3.bf16.msra.mxu1 %v10636_v52  ;;  %9982 = vmatprep.subr.bf16.mxu0 %v10673_v44 }
 0x8ae   : > { %9818 = vmatprep.mubr.msk.bf16.mxu0 %vm7710_vm6, %v7989_v23  ;;  %9833 = vmatprep.mubr.msk.bf16.mxu1 %vm7710_vm6, %v7989_v23  ;;  %v7979_v60 = vmax.f32 %v14553_v7, %v7955_v22 }
 0x8af   : > { %v7957_v36 = vpop.f32.mrf.mxu1  ;;  %8144 = vmatmul.mubr.bf16.gmra.mxu0 %v7988_v63  ;;  %8297 = vmatmul.mubr.bf16.gmra.mxu1 %v7988_v63 }
 0x8b0   : > { %v7980_v33 = vmax.f32 %v14555_v19, %v7957_v36  ;;  %10016 = vmatprep.subr.bf16.mxu1 %v10673_v44  ;;  %9983 = vmatpush3.bf16.msra.mxu0 %v10627_v9  ;;  %v10641_v9 = vld [vmem:[%s14785_s13 + $0xb8] sm:$0xff]  }
 0x8b1   : > { %v7959_v20 = vpop.f32.mrf.mxu1  ;;  %10002 = vmatprep.subr.bf16.mxu0 %v10673_v44 }
 0x8b2   : > { %v7981_v56 = vmax.f32 %v14557_v11, %v7959_v20  ;;  %v7990_v34 = vpack.c.bf16 %v7980_v33, %v7978_v38  ;;  %v10637_v33 = vld [vmem:[%s14785_s13 + $0x50] sm:$0xff]  }
 0x8b4   : > { %v7991_v49 = vpack.c.bf16 %v7981_v56, %v7979_v60  ;;  %v10648_v56 = vld [vmem:[%s14787_s15 + $0x38] sm:$0xff]  }
 0x8b6   : > { %9819 = vmatprep.mubr.msk.bf16.mxu0 %vm7710_vm6, %v7991_v49  ;;  %9834 = vmatprep.mubr.msk.bf16.mxu1 %vm7710_vm6, %v7991_v49 }
 0x8b7   : > { %8152 = vmatmul.mubr.bf16.gmra.mxu0 %v7990_v34  ;;  %8305 = vmatmul.mubr.bf16.gmra.mxu1 %v7990_v34 }
 0x8b8   : > { %9984 = vmatprep.mubr.msk.bf16.mxu0 %vm10674_vm7, %v10673_v44  ;;  %9998 = vmatprep.mubr.msk.bf16.mxu1 %vm10674_vm7, %v10673_v44 }
 0x957   : > { %v8121_v7 = vpop.f32.mrf.mxu0  ;;  %v8274_v19 = vpop.f32.mrf.mxu1 }
 0x958   : > { %v8313_v46 = vmax.f32 %v8121_v7, %v8274_v19 }
 0x959   : > { %v8123_v11 = vpop.f32.mrf.mxu0  ;;  %v8276_v10 = vpop.f32.mrf.mxu1 }
 0x95a   : > { %v10643_v11 = vld [vmem:[%s14785_s13 + $0xb0] sm:$0xff]   ;;  %v10645_v10 = vld [vmem:[%s14785_s13 + $0xa8] sm:$0xff]  }
 0x95b   : > { %v8124_v40 = vpop.f32.mrf.mxu0  ;;  %v8277_v61 = vpop.f32.mrf.mxu1 }
 0x95c   : > { %v8314_v58 = vmax.f32 %v8124_v40, %v8277_v61  ;;  %v10647_v40 = vld [vmem:[%s14785_s13 + $0xa0] sm:$0xff]  }
 0x95d   : > { %v8126_v53 = vpop.f32.mrf.mxu0  ;;  %v8279_v29 = vpop.f32.mrf.mxu1 }
 0x95e   : > { %v8323_v14 = vpack.c.bf16 %v8314_v58, %v8313_v46  ;;  %v10649_v53 = vld [vmem:[%s14787_s15 + $0x30] sm:$0xff]   ;;  %v10650_v29 = vld [vmem:[%s14787_s15 + $0x28] sm:$0xff]  }
 0x95f   : > { %v8129_v0 = vpop.f32.mrf.mxu0  ;;  %v8282_v45 = vpop.f32.mrf.mxu1 }
 0x960   : > { %9999 = vmatmul.mubr.msk.bf16.vlgmr.msra.gmra.mxu1 %vm8379_vm8, %v8323_v14  ;;  %v8315_v54 = vmax.f32 %v8129_v0, %v8282_v45  ;;  %v10652_v14 = vld [vmem:[%s14787_s15 + $0x18] sm:$0xff]   ;;  %v10653_v0 = vld [vmem:[%s14787_s15 + $0x10] sm:$0xff]   ;;  %v10654_v45 = vld [vmem:[%s14787_s15 + $0x8] sm:$0xff]  }
 0x961   : > { %v8131_v55 = vpop.f32.mrf.mxu0  ;;  %v8284_v47 = vpop.f32.mrf.mxu1  ;;  %10017 = vmatpush3.bf16.msra.mxu1 %v10638_v32  ;;  %10026 = vmatprep.mubr.msk.bf16.mxu1 %vm10674_vm7, %v10673_v44  ;;  %v10651_v32 = vld [vmem:[%s14787_s15 + $0x20] sm:$0xff]  }
 0x962   : > { %10018 = vmatprep.subr.bf16.mxu1 %v10673_v44  ;;  %v10655_v55 = vld [vmem:[%s14787_s15] sm:$0xff]   ;;  %v10656_v47 = vld [vmem:[%s14789_s17 + $0x38] sm:$0xff]  }
 0x963   : > { %v8132_v28 = vpop.f32.mrf.mxu0  ;;  %v8285_v30 = vpop.f32.mrf.mxu1 }
 0x964   : > { %v8316_v59 = vmax.f32 %v8132_v28, %v8285_v30  ;;  %v10658_v28 = vld [vmem:[%s14789_s17 + $0x28] sm:$0xff]   ;;  %v10659_v30 = vld [vmem:[%s14789_s17 + $0x20] sm:$0xff]  }
 0x965   : > { %v8134_v43 = vpop.f32.mrf.mxu0  ;;  %v8287_v18 = vpop.f32.mrf.mxu1  ;;  %10019 = vmatpush3.bf16.msra.mxu1 %v10640_v12  ;;  %v10657_v12 = vld [vmem:[%s14789_s17 + $0x30] sm:$0xff]  }
 0x966   : > { %v8324_v42 = vpack.c.bf16 %v8316_v59, %v8315_v54  ;;  %10020 = vmatprep.subr.bf16.mxu1 %v10673_v44  ;;  %v10660_v54 = vld [vmem:[%s14789_s17 + $0x18] sm:$0xff]  }
 0x967   : > { %v8137_v16 = vpop.f32.mrf.mxu0  ;;  %v8290_v51 = vpop.f32.mrf.mxu1 }
 0x968   : > { %9985 = vmatmul.mubr.msk.bf16.vlgmr.msra.gmra.mxu0 %vm8379_vm8, %v8324_v42  ;;  %v8317_v4 = vmax.f32 %v8137_v16, %v8290_v51 }
 0x969   : > { %10003 = vmatpush3.bf16.msra.mxu0 %v10629_v57  ;;  %v8139_v27 = vpop.f32.mrf.mxu0  ;;  %v8292_v48 = vpop.f32.mrf.mxu1  ;;  %10012 = vmatprep.mubr.msk.bf16.mxu0 %vm10674_vm7, %v10673_v44 }
 0x96a   : > { %10004 = vmatprep.subr.bf16.mxu0 %v10673_v44  ;;  %10021 = vmatpush3.bf16.msra.mxu1 %v10642_v13 }
 0x96b   : > { %v8140_v31 = vpop.f32.mrf.mxu0  ;;  %v8293_v5 = vpop.f32.mrf.mxu1  ;;  %10022 = vmatprep.subr.bf16.mxu1 %v10673_v44 }
 0x96c   : > { %v8318_v38 = vmax.f32 %v8140_v31, %v8293_v5 }
 0x96d   : > { %10005 = vmatpush3.bf16.msra.mxu0 %v10631_v8  ;;  %v8142_v21 = vpop.f32.mrf.mxu0  ;;  %v8295_v25 = vpop.f32.mrf.mxu1 }
 0x96e   : > { %10006 = vmatprep.subr.bf16.mxu0 %v10673_v44  ;;  %10023 = vmatpush3.bf16.msra.mxu1 %v10644_v1  ;;  %v8325_v37 = vpack.c.bf16 %v8318_v38, %v8317_v4  ;;  %v10662_v4 = vld [vmem:[%s14789_s17 + $0x8] sm:$0xff]  }
 0x96f   : > { %v8145_v2 = vpop.f32.mrf.mxu0  ;;  %v8298_v24 = vpop.f32.mrf.mxu1  ;;  %10024 = vmatprep.subr.bf16.mxu1 %v10673_v44 }
 0x970   : > { %v8319_v22 = vmax.f32 %v8145_v2, %v8298_v24 }
 0x971   : > { %10007 = vmatpush3.bf16.msra.mxu0 %v10633_v35  ;;  %v8147_v41 = vpop.f32.mrf.mxu0  ;;  %v8300_v26 = vpop.f32.mrf.mxu1 }
 0x972   : > { %10008 = vmatprep.subr.bf16.mxu0 %v10673_v44  ;;  %10025 = vmatpush3.bf16.msra.mxu1 %v10646_v17 }
 0x973   : > { %v8148_v23 = vpop.f32.mrf.mxu0  ;;  %v8301_v63 = vpop.f32.mrf.mxu1  ;;  %10044 = vmatprep.subr.bf16.mxu1 %v10673_v44 }
 0x974   : > { %v8320_v36 = vmax.f32 %v8148_v23, %v8301_v63  ;;  %v9905_v23 = vld [vmem:[%s14786_s14] ss:$0 sm:$0xff] }
 0x975   : > { %10009 = vmatpush3.bf16.msra.mxu0 %v10635_v62  ;;  %v8150_v20 = vpop.f32.mrf.mxu0  ;;  %v8303_v60 = vpop.f32.mrf.mxu1 }
 0x976   : > { %10010 = vmatprep.subr.bf16.mxu0 %v10673_v44  ;;  %v8326_v49 = vpack.c.bf16 %v8320_v36, %v8319_v22 }
 0x977   : > { %v8153_v34 = vpop.f32.mrf.mxu0  ;;  %v8306_v39 = vpop.f32.mrf.mxu1 }
 0x978   : > { %10027 = vmatmul.mubr.msk.bf16.vlgmr.msra.gmra.mxu1 %vm8379_vm8, %v8326_v49  ;;  %v8321_v46 = vmax.f32 %v8153_v34, %v8306_v39  ;;  %v10661_v39 = vld [vmem:[%s14789_s17 + $0x10] sm:$0xff]  }
 0x979   : > { %10011 = vmatpush3.bf16.msra.mxu0 %v10637_v33  ;;  %v8155_v6 = vpop.f32.mrf.mxu0  ;;  %v8308_v15 = vpop.f32.mrf.mxu1  ;;  %10045 = vmatpush3.bf16.msra.mxu1 %v10648_v56 }
 0x97a   : > { %10030 = vmatprep.subr.bf16.mxu0 %v10673_v44  ;;  %10046 = vmatprep.subr.bf16.mxu1 %v10673_v44  ;;  %v9906_v6 = vld [vmem:[%s14788_s16] ss:$0 sm:$0xff] }
 0x97b   : > { %v8156_v52 = vpop.f32.mrf.mxu0  ;;  %v8309_v3 = vpop.f32.mrf.mxu1  ;;  %10060 = vmatprep.mubr.msk.bf16.mxu1 %vm10674_vm7, %v10673_v44 }
 0x97c   : > { %10013 = vmatmul.mubr.msk.bf16.vlgmr.msra.gmra.mxu0 %vm8379_vm8, %v8325_v37  ;;  %v8322_v61 = vmax.f32 %v8156_v52, %v8309_v3 }
 0x97d   : > { %10031 = vmatpush3.bf16.msra.mxu0 %v10639_v50  ;;  %10040 = vmatprep.mubr.msk.bf16.mxu0 %vm10674_vm7, %v10673_v44  ;;  %v8158_v7 = vpop.f32.mrf.mxu0  ;;  %v8311_v19 = vpop.f32.mrf.mxu1  ;;  %v10663_v50 = vld [vmem:[%s14789_s17] sm:$0xff]  }
 0x97e   : > { %10032 = vmatprep.subr.bf16.mxu0 %v10673_v44  ;;  %v8327_v58 = vpack.c.bf16 %v8322_v61, %v8321_v46  ;;  %10047 = vmatpush3.bf16.msra.mxu1 %v10649_v53 }
 0x97f   : > { %10048 = vmatprep.subr.bf16.mxu1 %v10673_v44 }
 0x981   : > { %10033 = vmatpush3.bf16.msra.mxu0 %v10641_v9 }
 0x982   : > { %10034 = vmatprep.subr.bf16.mxu0 %v10673_v44  ;;  %10049 = vmatpush3.bf16.msra.mxu1 %v10650_v29 }
 0x983   : > { %10050 = vmatprep.subr.bf16.mxu1 %v10673_v44 }
 0x985   : > { %10035 = vmatpush3.bf16.msra.mxu0 %v10643_v11 }
 0x986   : > { %10036 = vmatprep.subr.bf16.mxu0 %v10673_v44  ;;  %10051 = vmatpush3.bf16.msra.mxu1 %v10651_v32 }
 0x987   : > { %10052 = vmatprep.subr.bf16.mxu1 %v10673_v44 }
 0x989   : > { %10037 = vmatpush3.bf16.msra.mxu0 %v10645_v10 }
 0x98a   : > { %10038 = vmatprep.subr.bf16.mxu0 %v10673_v44  ;;  %10053 = vmatpush3.bf16.msra.mxu1 %v10652_v14 }
 0x98b   : > { %10054 = vmatprep.subr.bf16.mxu1 %v10673_v44 }
 0x98d   : > { %10039 = vmatpush3.bf16.msra.mxu0 %v10647_v40 }
 0x98e   : > { %10064 = vmatprep.subr.bf16.mxu0 %v10673_v44  ;;  %10055 = vmatpush3.bf16.msra.mxu1 %v10653_v0 }
 0x98f   : > { %10056 = vmatprep.subr.bf16.mxu1 %v10673_v44 }
 0x990   : > { %10041 = vmatmul.mubr.msk.bf16.vlgmr.msra.gmra.mxu0 %vm8379_vm8, %v8327_v58 }
 0x991   : > { %10080 = vmatprep.mubr.msk.bf16.mxu0 %vm10674_vm7, %v10673_v44  ;;  %10065 = vmatpush3.bf16.msra.mxu0 %v10656_v47 }
 0x992   : > { %10057 = vmatpush3.bf16.msra.mxu1 %v10654_v45  ;;  %10066 = vmatprep.subr.bf16.mxu0 %v10673_v44 }
 0x993   : > { %10058 = vmatprep.subr.bf16.mxu1 %v10673_v44 }
 0x995   : > { %10067 = vmatpush3.bf16.msra.mxu0 %v10657_v12 }
 0x996   : > { %10059 = vmatpush3.bf16.msra.mxu1 %v10655_v55  ;;  %10068 = vmatprep.subr.bf16.mxu0 %v10673_v44 }
 0x999   : > { %10069 = vmatpush3.bf16.msra.mxu0 %v10658_v28 }
 0x99a   : > { %10070 = vmatprep.subr.bf16.mxu0 %v10673_v44 }
 0x99d   : > { %10071 = vmatpush3.bf16.msra.mxu0 %v10659_v30 }
 0x99e   : > { %10072 = vmatprep.subr.bf16.mxu0 %v10673_v44 }
 0x9a1   : > { %10073 = vmatpush3.bf16.msra.mxu0 %v10660_v54 }
 0x9a2   : > { %10074 = vmatprep.subr.bf16.mxu0 %v10673_v44 }
 0x9a5   : > { %10075 = vmatpush3.bf16.msra.mxu0 %v10661_v39 }
 0x9a6   : > { %10076 = vmatprep.subr.bf16.mxu0 %v10673_v44 }
 0x9a9   : > { %10077 = vmatpush3.bf16.msra.mxu0 %v10662_v4 }
 0x9aa   : > { %10078 = vmatprep.subr.bf16.mxu0 %v10673_v44  ;;  %v9915_v44 = vld [vmem:[%s14790_s18] ss:$0 sm:$0xff] }
 0x9ad   : > { %10079 = vmatpush3.bf16.msra.mxu0 %v10663_v50 }
 0xa20   : > { %v8491_v59 = vpop.f32.mrf.mxu1 }
 0xa22   : > { %v10000_v57 = vpop.f32.mrf.mxu1 }
 0xa24   : > { %v8494_v43 = vpop.f32.mrf.mxu1 }
 0xa26   : > { %v10001_v18 = vpop.f32.mrf.mxu1 }
 0xa28   : > { %v8417_v42 = vpop.f32.mrf.mxu0 }
 0xa29   : > { %v8492_v25 = vadd.f32 %v8491_v59, %v8417_v42 }
 0xa2a   : > { %v9986_v13 = vpop.f32.mrf.mxu0 }
 0xa2c   : > { %v8420_v16 = vpop.f32.mrf.mxu0 }
 0xa2d   : > { %v8495_v2 = vadd.f32 %v8494_v43, %v8420_v16 }
 0xa2e   : > { %v9987_v51 = vpop.f32.mrf.mxu0 }
 0xa38   : > { %v8663_v8 = vpop.f32.mrf.mxu1 }
 0xa3a   : > { %v10028_v27 = vpop.f32.mrf.mxu1 }
 0xa3c   : > { %v8576_v48 = vpop.f32.mrf.mxu0  ;;  %v8666_v1 = vpop.f32.mrf.mxu1 }
 0xa3d   : > { %v8583_v17 = vadd.f32 %v8576_v48, %v8492_v25 }
 0xa3e   : > { %v10014_v31 = vpop.f32.mrf.mxu0  ;;  %v10029_v5 = vpop.f32.mrf.mxu1 }
 0xa3f   : > { %v8670_v62 = vadd.f32 %v8663_v8, %v8583_v17 }
 0xa40   : > { %v8579_v35 = vpop.f32.mrf.mxu0 }
 0xa41   : > { %v8584_v24 = vadd.f32 %v8579_v35, %v8495_v2 }
 0xa42   : > { %v10015_v21 = vpop.f32.mrf.mxu0 }
 0xa43   : > { %v8671_v22 = vadd.f32 %v8666_v1, %v8584_v24 }
 0xa50   : > { %v8750_v41 = vpop.f32.mrf.mxu0 }
 0xa51   : > { %v8757_v26 = vadd.f32 %v8750_v41, %v8670_v62 }
 0xa52   : > { %v10042_v63 = vpop.f32.mrf.mxu0 }
 0xa53   : > { %v8766_v33 = vadd.f32 %v9905_v23, %v8757_v26 }
 0xa54   : > { %v8753_v36 = vpop.f32.mrf.mxu0 }
 0xa55   : > { %v8758_v20 = vadd.f32 %v8753_v36, %v8671_v22  ;;  %v8768_v38 = vmax.f32 %v8766_v33, 0.0 }
 0xa56   : > { %v10043_v60 = vpop.f32.mrf.mxu0 }
 0xa57   : > { %v8767_v56 = vadd.f32 %v9905_v23, %v8758_v20 }
 0xa59   : > { %v8769_v49 = vmax.f32 %v8767_v56, 0.0 }
 0xa5b   : > { %v8770_v34 = vpack.c.bf16 %v8769_v49, %v8768_v38 }
 0xa5d   : > { %10061 = vmatmul.mubr.bf16.vlgmr.msra.gmra.mxu1 %v8770_v34 }
 0xb1d   : > { %v8876_v15 = vpop.f32.mrf.mxu1 }
 0xb1e   : > { %v8877_v52 = vadd.f32 %v9906_v6, %v8876_v15 }
 0xb1f   : > { %v10062_v37 = vpop.f32.mrf.mxu1 }
 0xb20   : > { %v8883_v19 = vmax.f32 %v8877_v52, 0.0 }
 0xb21   : > { %v8879_v3 = vpop.f32.mrf.mxu1 }
 0xb22   : > { %v8880_v9 = vadd.f32 %v9906_v6, %v8879_v3 }
 0xb23   : > { %v10063_v7 = vpop.f32.mrf.mxu1 }
 0xb24   : > { %v8884_v11 = vmax.f32 %v8880_v9, 0.0 }
 0xb26   : > { %v8885_v10 = vpack.c.bf16 %v8884_v11, %v8883_v19 }
 0xb28   : > { %10081 = vmatmul.mubr.bf16.vlgmr.msra.gmra.mxu0 %v8885_v10 }
 0xbe8   : > { %v8991_v40 = vpop.f32.mrf.mxu0 }
 0xbe9   : > { %v8992_v61 = vadd.f32 %v9915_v44, %v8991_v40 }
 0xbea   : > { %v10082_v46 = vpop.f32.mrf.mxu0 }
 0xbeb   : > { %8998 = vst [vmem:[%s604_s28] sm:$0xff] %v8992_v61 }
 0xbec   : > { %v8994_v58 = vpop.f32.mrf.mxu0 }
 0xbed   : > { %v8995_v53 = vadd.f32 %v9915_v44, %v8994_v58 }
 0xbee   : > { %v10083_v29 = vpop.f32.mrf.mxu0 }
 0xbef   : > { %8999 = vst [vmem:[%s604_s28 + $0x8] sm:$0xff] %v8995_v53 }
 0xbf0 PF: > { %s29_s0 = sadd.s32 1, %s10670_s0  }
 0xbf1   : > { %p26_p5 = scmp.ge.s32.totalorder %s29_s0, 4  }
 0xbf3   :  { %28 = sbr.rel (!%p26_p5) target bundleno = 5 (0x5), region = 138 }

</bundles_post_ra>
